<compile_context>
chip_gen: v5e
topology: v5e:2x2
jax: 0.10.0
libtpu: 0.0.40
codegen_flags: <defaults>
</compile_context>

<pallas_src>
import functools
import math

import jax
import jax.numpy as jnp
from jax.experimental import pallas as pl
from jax.experimental.pallas import tpu as pltpu

_EPS = 1e-5  # nn.InstanceNorm1d default eps


def _instance_norm(h, gamma, beta):
    """h: (Bt, N, E). Normalize over the sequence axis per (batch, channel).

    One-pass stats + folded scale/shift: the (Bt,N,E) tensor only pays one
    multiply-add; var = E[h^2] - E[h]^2 (f32, clamped at 0).
    """
    mean = jnp.mean(h, axis=1, keepdims=True)                      # (Bt,1,E)
    mean_sq = jnp.mean(h * h, axis=1, keepdims=True)               # (Bt,1,E)
    var = jnp.maximum(mean_sq - mean * mean, 0.0)
    scale = gamma * jax.lax.rsqrt(var + _EPS)                      # (Bt,1,E)
    shift = beta - mean * scale                                    # (Bt,1,E)
    return h * scale + shift


def _ffn_kernel(x_ref, xold_ref, w1_ref, b1_ref, w2_ref, b2_ref,
                g1_ref, be1_ref, g2_ref, be2_ref, out_ref, *, bf16_inner):
    bt, n, e = x_ref.shape

    # Residual add + instance norm 1 (f32).
    h = x_ref[...] + xold_ref[...]                                 # (Bt,N,E)
    hn = _instance_norm(h, g1_ref[...], be1_ref[...])              # (Bt,N,E)

    # FeedForward: relu(hn @ W1 + b1) @ W2 + b2.
    # bf16 matmul operands, f32 MXU accumulation.
    hn2d = hn.reshape(bt * n, e).astype(jnp.bfloat16)              # layout-preserving
    z = jnp.dot(hn2d, w1_ref[...], preferred_element_type=jnp.float32)
    if bf16_inner:
        # bf16 bias + ReLU (halves the live footprint of z; v6e/v7x).
        z = jnp.maximum(z.astype(jnp.bfloat16) + b1_ref[...].astype(jnp.bfloat16), 0.0)
    else:
        # f32 bias + ReLU (preferred on v5e: no native bf16 VALU).
        z = jnp.maximum(z + b1_ref[...], 0.0).astype(jnp.bfloat16)
    y = jnp.dot(z, w2_ref[...], preferred_element_type=jnp.float32)
    y = (y + b2_ref[...]).reshape(bt, n, e)                        # (Bt,N,E) f32

    # Residual add + instance norm 2, lane-dense store.
    out = _instance_norm(hn + y, g2_ref[...], be2_ref[...])
    out_ref[...] = out.astype(out_ref.dtype)


def prepare_params(params):
    """Cast/reshape params ONCE outside the hot path (hoists the f32->bf16
    weight converts out of every forward call)."""
    W1, b1, W2, b2, g1, be1, g2, be2 = params
    E, F = W1.shape
    return (W1.astype(jnp.bfloat16),
            b1.reshape(1, F).astype(jnp.float32),
            W2.astype(jnp.bfloat16),
            b2.reshape(1, E).astype(jnp.float32),
            g1.reshape(1, 1, E).astype(jnp.float32),
            be1.reshape(1, 1, E).astype(jnp.float32),
            g2.reshape(1, 1, E).astype(jnp.float32),
            be2.reshape(1, 1, E).astype(jnp.float32))


def transformer_ffn(x, x_old, prepared_params, *, block_batch=None, bf16_inner=True):
    """x, x_old: (B, N, E) -> (B, N, E). prepared_params = prepare_params(raw)."""
    w1_b, b1_r, w2_b, b2_r, g1_r, be1_r, g2_r, be2_r = prepared_params
    B, N, E = x.shape
    F = w1_b.shape[1]

    # bt heuristic: ~128 MXU rows per step, but keep >= 4 grid steps when the
    # batch allows so both v7x TensorCores get >= 2 pipelined steps each
    # (DMA of step i+1 / writeback of i-1 overlap with compute of i).
    bt = block_batch
    if bt is None:
        bt = max(1, 128 // max(N, 1))
        bt = min(bt, max(1, B // 4))
        while B % bt:
            bt -= 1
    assert B % bt == 0, "batch must be divisible by the batch block"
    grid = (B // bt,)

    kernel = functools.partial(_ffn_kernel, bf16_inner=bf16_inner)
    cparams = pltpu.CompilerParams(
        dimension_semantics=("parallel",),
        vmem_limit_bytes=64 * 1024 * 1024,
    )

    def _call(single_buffer_weights):
        def const_spec(shape):
            idx = lambda i, _nd=len(shape): (0,) * _nd
            if single_buffer_weights:
                # Resident params: constant index_map + single buffer (no need
                # for the default 2x buffering of weights that never change).
                return pl.BlockSpec(shape, idx, pipeline_mode=pl.Buffered(1))
            return pl.BlockSpec(shape, idx)

        return pl.pallas_call(
            kernel,
            out_shape=jax.ShapeDtypeStruct((B, N, E), x.dtype),
            grid=grid,
            in_specs=[
                pl.BlockSpec((bt, N, E), lambda i: (i, 0, 0)),   # x
                pl.BlockSpec((bt, N, E), lambda i: (i, 0, 0)),   # x_old
                const_spec((E, F)),                              # W1 (resident)
                const_spec((1, F)),                              # b1
                const_spec((F, E)),                              # W2 (resident)
                const_spec((1, E)),                              # b2
                const_spec((1, 1, E)),                           # gamma1
                const_spec((1, 1, E)),                           # beta1
                const_spec((1, 1, E)),                           # gamma2
                const_spec((1, 1, E)),                           # beta2
            ],
            out_specs=pl.BlockSpec((bt, N, E), lambda i: (i, 0, 0)),
            compiler_params=cparams,
        )(x, x_old, w1_b, b1_r, w2_b, b2_r, g1_r, be1_r, g2_r, be2_r)

    if hasattr(pl, "Buffered"):
        try:
            return _call(True)
        except Exception:
            # pipeline_mode=pl.Buffered(1) not supported by this jax/mosaic
            # build; fall back to default double-buffered resident params.
            pass
    return _call(False)


def reference_transformer_ffn(x, x_old, params):
    """Plain-JAX f32 reference mirroring the PyTorch forward."""
    W1, b1, W2, b2, g1, be1, g2, be2 = params

    def inorm(h, g, b):
        mean = jnp.mean(h, axis=1, keepdims=True)
        var = jnp.mean((h - mean) ** 2, axis=1, keepdims=True)
        return (h - mean) / jnp.sqrt(var + _EPS) * g + b

    h = inorm(x_old + x, g1, be1)
    z = jax.nn.relu(
        jnp.einsum('bne,ef->bnf', h, W1, precision=jax.lax.Precision.HIGHEST) + b1)
    y = jnp.einsum('bnf,fe->bne', z, W2, precision=jax.lax.Precision.HIGHEST) + b2
    return inorm(h + y, g2, be2)


def init_params(key, embed_dim, hidden):
    """nn.Linear-style init; instance-norm affine params perturbed from (1, 0)."""
    ks = jax.random.split(key, 8)
    bd1 = 1.0 / math.sqrt(embed_dim)
    bd2 = 1.0 / math.sqrt(hidden)
    W1 = jax.random.uniform(ks[0], (embed_dim, hidden), jnp.float32, -bd1, bd1)
    b1 = jax.random.uniform(ks[1], (hidden,), jnp.float32, -bd1, bd1)
    W2 = jax.random.uniform(ks[2], (hidden, embed_dim), jnp.float32, -bd2, bd2)
    b2 = jax.random.uniform(ks[3], (embed_dim,), jnp.float32, -bd2, bd2)
    g1 = 1.0 + 0.1 * jax.random.normal(ks[4], (embed_dim,), jnp.float32)
    be1 = 0.1 * jax.random.normal(ks[5], (embed_dim,), jnp.float32)
    g2 = 1.0 + 0.1 * jax.random.normal(ks[6], (embed_dim,), jnp.float32)
    be2 = 0.1 * jax.random.normal(ks[7], (embed_dim,), jnp.float32)
    return (W1, b1, W2, b2, g1, be1, g2, be2)


if __name__ == "__main__":
    B, N = 8, 64                      # bt=2 -> 128 MXU rows/step, grid=(4,)
    embed_dim, ff_hidden = 256, 512   # module defaults; lane-dense (multiples of 128)

    key = jax.random.PRNGKey(0)
    kx, kxo, kp = jax.random.split(key, 3)
    x = jax.random.normal(kx, (B, N, embed_dim), jnp.float32)
    x_old = jax.random.normal(kxo, (B, N, embed_dim), jnp.float32)
    params = init_params(kp, embed_dim, ff_hidden)

    prepared = jax.block_until_ready(prepare_params(params))  # one-time cast, off the hot path

    out = transformer_ffn(x, x_old, prepared)
    out = jax.block_until_ready(out)

    ref = reference_transformer_ffn(x, x_old, params)
    assert out.shape == (B, N, embed_dim)
    # Tolerance loosened: kernel matmuls + inner bias/ReLU use bf16 operands
    # (f32 accumulation) and the norms use one-pass statistics.
    max_err = float(jnp.max(jnp.abs(out - ref)))
    assert jnp.allclose(out, ref, rtol=5e-2, atol=5e-2), \
        f"mismatch vs reference (max abs err {max_err})"

    print("KERNEL_OK")
</pallas_src>

<mosaic_0001>
module attributes {stable_mosaic.version = 11 : i64} {
  func.func @_ffn_kernel(%arg0: i32, %arg1: memref<2x64x256xf32, #tpu.memory_space<vmem>>, %arg2: memref<2x64x256xf32, #tpu.memory_space<vmem>>, %arg3: memref<256x512xbf16, #tpu.memory_space<vmem>>, %arg4: memref<1x512xf32, #tpu.memory_space<vmem>>, %arg5: memref<512x256xbf16, #tpu.memory_space<vmem>>, %arg6: memref<1x256xf32, #tpu.memory_space<vmem>>, %arg7: memref<1x1x256xf32, #tpu.memory_space<vmem>>, %arg8: memref<1x1x256xf32, #tpu.memory_space<vmem>>, %arg9: memref<1x1x256xf32, #tpu.memory_space<vmem>>, %arg10: memref<1x1x256xf32, #tpu.memory_space<vmem>>, %arg11: memref<2x64x256xf32, #tpu.memory_space<vmem>>) attributes {dimension_semantics = [#tpu.dimension_semantics<parallel>], iteration_bounds = array<i64: 4>, scalar_prefetch = 0 : i64, scratch_operands = 0 : i64, tpu.core_type = #tpu.core_type<tc>, window_params = [{transform_indices = @transform_0, window_bounds = array<i64: 2, 64, 256>}, {transform_indices = @transform_1, window_bounds = array<i64: 2, 64, 256>}, {pipeline_mode = #tpu.pipeline_mode<synchronous>, transform_indices = @transform_2, window_bounds = array<i64: 256, 512>}, {pipeline_mode = #tpu.pipeline_mode<synchronous>, transform_indices = @transform_3, window_bounds = array<i64: 1, 512>}, {pipeline_mode = #tpu.pipeline_mode<synchronous>, transform_indices = @transform_4, window_bounds = array<i64: 512, 256>}, {pipeline_mode = #tpu.pipeline_mode<synchronous>, transform_indices = @transform_5, window_bounds = array<i64: 1, 256>}, {pipeline_mode = #tpu.pipeline_mode<synchronous>, transform_indices = @transform_6, window_bounds = array<i64: 1, 1, 256>}, {pipeline_mode = #tpu.pipeline_mode<synchronous>, transform_indices = @transform_7, window_bounds = array<i64: 1, 1, 256>}, {pipeline_mode = #tpu.pipeline_mode<synchronous>, transform_indices = @transform_8, window_bounds = array<i64: 1, 1, 256>}, {pipeline_mode = #tpu.pipeline_mode<synchronous>, transform_indices = @transform_9, window_bounds = array<i64: 1, 1, 256>}, {transform_indices = @transform_10, window_bounds = array<i64: 2, 64, 256>}]} {
    %c0 = arith.constant 0 : index
    %c0_0 = arith.constant 0 : index
    %c0_1 = arith.constant 0 : index
    %0 = vector.load %arg1[%c0, %c0_0, %c0_1] : memref<2x64x256xf32, #tpu.memory_space<vmem>>, vector<2x64x256xf32>
    %c0_2 = arith.constant 0 : index
    %c0_3 = arith.constant 0 : index
    %c0_4 = arith.constant 0 : index
    %1 = vector.load %arg2[%c0_2, %c0_3, %c0_4] : memref<2x64x256xf32, #tpu.memory_space<vmem>>, vector<2x64x256xf32>
    %2 = arith.addf %0, %1 : vector<2x64x256xf32>
    %c0_5 = arith.constant 0 : index
    %c0_6 = arith.constant 0 : index
    %c0_7 = arith.constant 0 : index
    %3 = vector.load %arg7[%c0_5, %c0_6, %c0_7] : memref<1x1x256xf32, #tpu.memory_space<vmem>>, vector<1x1x256xf32>
    %c0_8 = arith.constant 0 : index
    %c0_9 = arith.constant 0 : index
    %c0_10 = arith.constant 0 : index
    %4 = vector.load %arg8[%c0_8, %c0_9, %c0_10] : memref<1x1x256xf32, #tpu.memory_space<vmem>>, vector<1x1x256xf32>
    %cst = arith.constant dense<0.000000e+00> : vector<2x256xf32>
    %5 = vector.multi_reduction <add>, %2, %cst [1] : vector<2x64x256xf32> to vector<2x256xf32>
    %6 = vector.shape_cast %5 : vector<2x256xf32> to vector<2x1x256xf32>
    %cst_11 = arith.constant 6.400000e+01 : f32
    %7 = vector.broadcast %cst_11 : f32 to vector<2x1x256xf32>
    %8 = arith.divf %6, %7 : vector<2x1x256xf32>
    %9 = arith.mulf %2, %2 : vector<2x64x256xf32>
    %cst_12 = arith.constant dense<0.000000e+00> : vector<2x256xf32>
    %10 = vector.multi_reduction <add>, %9, %cst_12 [1] : vector<2x64x256xf32> to vector<2x256xf32>
    %11 = vector.shape_cast %10 : vector<2x256xf32> to vector<2x1x256xf32>
    %cst_13 = arith.constant 6.400000e+01 : f32
    %12 = vector.broadcast %cst_13 : f32 to vector<2x1x256xf32>
    %13 = arith.divf %11, %12 : vector<2x1x256xf32>
    %14 = arith.mulf %8, %8 : vector<2x1x256xf32>
    %15 = arith.subf %13, %14 : vector<2x1x256xf32>
    %cst_14 = arith.constant 0.000000e+00 : f32
    %16 = vector.broadcast %cst_14 : f32 to vector<2x1x256xf32>
    %17 = arith.maximumf %15, %16 : vector<2x1x256xf32>
    %cst_15 = arith.constant 9.99999974E-6 : f32
    %18 = vector.broadcast %cst_15 : f32 to vector<2x1x256xf32>
    %19 = arith.addf %17, %18 : vector<2x1x256xf32>
    %20 = math.rsqrt %19 : vector<2x1x256xf32>
    %21 = vector.broadcast %3 : vector<1x1x256xf32> to vector<2x1x256xf32>
    %22 = arith.mulf %21, %20 : vector<2x1x256xf32>
    %23 = arith.mulf %8, %22 : vector<2x1x256xf32>
    %24 = vector.broadcast %4 : vector<1x1x256xf32> to vector<2x1x256xf32>
    %25 = arith.subf %24, %23 : vector<2x1x256xf32>
    %26 = vector.broadcast %22 : vector<2x1x256xf32> to vector<2x64x256xf32>
    %27 = arith.mulf %2, %26 : vector<2x64x256xf32>
    %28 = vector.broadcast %25 : vector<2x1x256xf32> to vector<2x64x256xf32>
    %29 = arith.addf %27, %28 : vector<2x64x256xf32>
    %30 = vector.shape_cast %29 : vector<2x64x256xf32> to vector<128x256xf32>
    %31 = arith.truncf %30 : vector<128x256xf32> to vector<128x256xbf16>
    %c0_16 = arith.constant 0 : index
    %c0_17 = arith.constant 0 : index
    %32 = vector.load %arg3[%c0_16, %c0_17] : memref<256x512xbf16, #tpu.memory_space<vmem>>, vector<256x512xbf16>
    %cst_18 = arith.constant dense<0.000000e+00> : vector<128x512xf32>
    %33 = tpu.matmul %31, %32, %cst_18 {dimension_numbers = #tpu.dot_dimension_numbers<[1], [0], [0], [1], [0, 0, 1, 1], [], []>} : vector<128x256xbf16>, vector<256x512xbf16>, vector<128x512xf32> -> vector<128x512xf32>
    %34 = arith.truncf %33 : vector<128x512xf32> to vector<128x512xbf16>
    %c0_19 = arith.constant 0 : index
    %c0_20 = arith.constant 0 : index
    %35 = vector.load %arg4[%c0_19, %c0_20] : memref<1x512xf32, #tpu.memory_space<vmem>>, vector<1x512xf32>
    %36 = arith.truncf %35 : vector<1x512xf32> to vector<1x512xbf16>
    %37 = vector.broadcast %36 : vector<1x512xbf16> to vector<128x512xbf16>
    %38 = arith.addf %34, %37 : vector<128x512xbf16>
    %cst_21 = arith.constant 0.000000e+00 : bf16
    %39 = vector.broadcast %cst_21 : bf16 to vector<128x512xbf16>
    %40 = arith.maximumf %38, %39 : vector<128x512xbf16>
    %c0_22 = arith.constant 0 : index
    %c0_23 = arith.constant 0 : index
    %41 = vector.load %arg5[%c0_22, %c0_23] : memref<512x256xbf16, #tpu.memory_space<vmem>>, vector<512x256xbf16>
    %cst_24 = arith.constant dense<0.000000e+00> : vector<128x256xf32>
    %42 = tpu.matmul %40, %41, %cst_24 {dimension_numbers = #tpu.dot_dimension_numbers<[1], [0], [0], [1], [0, 0, 1, 1], [], []>} : vector<128x512xbf16>, vector<512x256xbf16>, vector<128x256xf32> -> vector<128x256xf32>
    %c0_25 = arith.constant 0 : index
    %c0_26 = arith.constant 0 : index
    %43 = vector.load %arg6[%c0_25, %c0_26] : memref<1x256xf32, #tpu.memory_space<vmem>>, vector<1x256xf32>
    %44 = vector.broadcast %43 : vector<1x256xf32> to vector<128x256xf32>
    %45 = arith.addf %42, %44 : vector<128x256xf32>
    %46 = vector.shape_cast %45 : vector<128x256xf32> to vector<2x64x256xf32>
    %47 = arith.addf %29, %46 : vector<2x64x256xf32>
    %c0_27 = arith.constant 0 : index
    %c0_28 = arith.constant 0 : index
    %c0_29 = arith.constant 0 : index
    %48 = vector.load %arg9[%c0_27, %c0_28, %c0_29] : memref<1x1x256xf32, #tpu.memory_space<vmem>>, vector<1x1x256xf32>
    %c0_30 = arith.constant 0 : index
    %c0_31 = arith.constant 0 : index
    %c0_32 = arith.constant 0 : index
    %49 = vector.load %arg10[%c0_30, %c0_31, %c0_32] : memref<1x1x256xf32, #tpu.memory_space<vmem>>, vector<1x1x256xf32>
    %cst_33 = arith.constant dense<0.000000e+00> : vector<2x256xf32>
    %50 = vector.multi_reduction <add>, %47, %cst_33 [1] : vector<2x64x256xf32> to vector<2x256xf32>
    %51 = vector.shape_cast %50 : vector<2x256xf32> to vector<2x1x256xf32>
    %cst_34 = arith.constant 6.400000e+01 : f32
    %52 = vector.broadcast %cst_34 : f32 to vector<2x1x256xf32>
    %53 = arith.divf %51, %52 : vector<2x1x256xf32>
    %54 = arith.mulf %47, %47 : vector<2x64x256xf32>
    %cst_35 = arith.constant dense<0.000000e+00> : vector<2x256xf32>
    %55 = vector.multi_reduction <add>, %54, %cst_35 [1] : vector<2x64x256xf32> to vector<2x256xf32>
    %56 = vector.shape_cast %55 : vector<2x256xf32> to vector<2x1x256xf32>
    %cst_36 = arith.constant 6.400000e+01 : f32
    %57 = vector.broadcast %cst_36 : f32 to vector<2x1x256xf32>
    %58 = arith.divf %56, %57 : vector<2x1x256xf32>
    %59 = arith.mulf %53, %53 : vector<2x1x256xf32>
    %60 = arith.subf %58, %59 : vector<2x1x256xf32>
    %cst_37 = arith.constant 0.000000e+00 : f32
    %61 = vector.broadcast %cst_37 : f32 to vector<2x1x256xf32>
    %62 = arith.maximumf %60, %61 : vector<2x1x256xf32>
    %cst_38 = arith.constant 9.99999974E-6 : f32
    %63 = vector.broadcast %cst_38 : f32 to vector<2x1x256xf32>
    %64 = arith.addf %62, %63 : vector<2x1x256xf32>
    %65 = math.rsqrt %64 : vector<2x1x256xf32>
    %66 = vector.broadcast %48 : vector<1x1x256xf32> to vector<2x1x256xf32>
    %67 = arith.mulf %66, %65 : vector<2x1x256xf32>
    %68 = arith.mulf %53, %67 : vector<2x1x256xf32>
    %69 = vector.broadcast %49 : vector<1x1x256xf32> to vector<2x1x256xf32>
    %70 = arith.subf %69, %68 : vector<2x1x256xf32>
    %71 = vector.broadcast %67 : vector<2x1x256xf32> to vector<2x64x256xf32>
    %72 = arith.mulf %47, %71 : vector<2x64x256xf32>
    %73 = vector.broadcast %70 : vector<2x1x256xf32> to vector<2x64x256xf32>
    %74 = arith.addf %72, %73 : vector<2x64x256xf32>
    %c0_39 = arith.constant 0 : index
    %c0_40 = arith.constant 0 : index
    %c0_41 = arith.constant 0 : index
    %75 = vector.load %arg11[%c0_39, %c0_40, %c0_41] : memref<2x64x256xf32, #tpu.memory_space<vmem>>, vector<2x64x256xf32>
    tpu.vector_store %arg11[%c0_39, %c0_40, %c0_41], %74 {strides = array<i32>} : memref<2x64x256xf32, #tpu.memory_space<vmem>>, vector<2x64x256xf32>,
    return
  }
  func.func @transform_0(%arg0: i32) -> (i32, i32, i32) {
    %c0_i32 = arith.constant 0 : i32
    %c0_i32_0 = arith.constant 0 : i32
    %c0_i32_1 = arith.constant 0 : i32
    return %arg0, %c0_i32, %c0_i32_0 : i32, i32, i32
  }
  func.func @transform_1(%arg0: i32) -> (i32, i32, i32) {
    %c0_i32 = arith.constant 0 : i32
    %c0_i32_0 = arith.constant 0 : i32
    %c0_i32_1 = arith.constant 0 : i32
    return %arg0, %c0_i32, %c0_i32_0 : i32, i32, i32
  }
  func.func @transform_2(%arg0: i32) -> (i32, i32) {
    %c0_i32 = arith.constant 0 : i32
    %c0_i32_0 = arith.constant 0 : i32
    %c0_i32_1 = arith.constant 0 : i32
    return %c0_i32, %c0_i32_0 : i32, i32
  }
  func.func @transform_3(%arg0: i32) -> (i32, i32) {
    %c0_i32 = arith.constant 0 : i32
    %c0_i32_0 = arith.constant 0 : i32
    %c0_i32_1 = arith.constant 0 : i32
    return %c0_i32, %c0_i32_0 : i32, i32
  }
  func.func @transform_4(%arg0: i32) -> (i32, i32) {
    %c0_i32 = arith.constant 0 : i32
    %c0_i32_0 = arith.constant 0 : i32
    %c0_i32_1 = arith.constant 0 : i32
    return %c0_i32, %c0_i32_0 : i32, i32
  }
  func.func @transform_5(%arg0: i32) -> (i32, i32) {
    %c0_i32 = arith.constant 0 : i32
    %c0_i32_0 = arith.constant 0 : i32
    %c0_i32_1 = arith.constant 0 : i32
    return %c0_i32, %c0_i32_0 : i32, i32
  }
  func.func @transform_6(%arg0: i32) -> (i32, i32, i32) {
    %c0_i32 = arith.constant 0 : i32
    %c0_i32_0 = arith.constant 0 : i32
    %c0_i32_1 = arith.constant 0 : i32
    %c0_i32_2 = arith.constant 0 : i32
    return %c0_i32, %c0_i32_0, %c0_i32_1 : i32, i32, i32
  }
  func.func @transform_7(%arg0: i32) -> (i32, i32, i32) {
    %c0_i32 = arith.constant 0 : i32
    %c0_i32_0 = arith.constant 0 : i32
    %c0_i32_1 = arith.constant 0 : i32
    %c0_i32_2 = arith.constant 0 : i32
    return %c0_i32, %c0_i32_0, %c0_i32_1 : i32, i32, i32
  }
  func.func @transform_8(%arg0: i32) -> (i32, i32, i32) {
    %c0_i32 = arith.constant 0 : i32
    %c0_i32_0 = arith.constant 0 : i32
    %c0_i32_1 = arith.constant 0 : i32
    %c0_i32_2 = arith.constant 0 : i32
    return %c0_i32, %c0_i32_0, %c0_i32_1 : i32, i32, i32
  }
  func.func @transform_9(%arg0: i32) -> (i32, i32, i32) {
    %c0_i32 = arith.constant 0 : i32
    %c0_i32_0 = arith.constant 0 : i32
    %c0_i32_1 = arith.constant 0 : i32
    %c0_i32_2 = arith.constant 0 : i32
    return %c0_i32, %c0_i32_0, %c0_i32_1 : i32, i32, i32
  }
  func.func @transform_10(%arg0: i32) -> (i32, i32, i32) {
    %c0_i32 = arith.constant 0 : i32
    %c0_i32_0 = arith.constant 0 : i32
    %c0_i32_1 = arith.constant 0 : i32
    return %arg0, %c0_i32, %c0_i32_0 : i32, i32, i32
  }
}

module attributes {stable_mosaic.version = 11 : i64} {
  func.func @_ffn_kernel(%arg0: i32, %arg1: memref<2x64x256xf32, #tpu.memory_space<vmem>>, %arg2: memref<2x64x256xf32, #tpu.memory_space<vmem>>, %arg3: memref<256x512xbf16, #tpu.memory_space<vmem>>, %arg4: memref<1x512xf32, #tpu.memory_space<vmem>>, %arg5: memref<512x256xbf16, #tpu.memory_space<vmem>>, %arg6: memref<1x256xf32, #tpu.memory_space<vmem>>, %arg7: memref<1x1x256xf32, #tpu.memory_space<vmem>>, %arg8: memref<1x1x256xf32, #tpu.memory_space<vmem>>, %arg9: memref<1x1x256xf32, #tpu.memory_space<vmem>>, %arg10: memref<1x1x256xf32, #tpu.memory_space<vmem>>, %arg11: memref<2x64x256xf32, #tpu.memory_space<vmem>>) attributes {dimension_semantics = [#tpu.dimension_semantics<parallel>], iteration_bounds = array<i64: 4>, scalar_prefetch = 0 : i64, scratch_operands = 0 : i64, tpu.core_type = #tpu.core_type<tc>, window_params = [{transform_indices = @transform_0, window_bounds = array<i64: 2, 64, 256>}, {transform_indices = @transform_1, window_bounds = array<i64: 2, 64, 256>}, {pipeline_mode = #tpu.pipeline_mode<synchronous>, transform_indices = @transform_2, window_bounds = array<i64: 256, 512>}, {pipeline_mode = #tpu.pipeline_mode<synchronous>, transform_indices = @transform_3, window_bounds = array<i64: 1, 512>}, {pipeline_mode = #tpu.pipeline_mode<synchronous>, transform_indices = @transform_4, window_bounds = array<i64: 512, 256>}, {pipeline_mode = #tpu.pipeline_mode<synchronous>, transform_indices = @transform_5, window_bounds = array<i64: 1, 256>}, {pipeline_mode = #tpu.pipeline_mode<synchronous>, transform_indices = @transform_6, window_bounds = array<i64: 1, 1, 256>}, {pipeline_mode = #tpu.pipeline_mode<synchronous>, transform_indices = @transform_7, window_bounds = array<i64: 1, 1, 256>}, {pipeline_mode = #tpu.pipeline_mode<synchronous>, transform_indices = @transform_8, window_bounds = array<i64: 1, 1, 256>}, {pipeline_mode = #tpu.pipeline_mode<synchronous>, transform_indices = @transform_9, window_bounds = array<i64: 1, 1, 256>}, {transform_indices = @transform_10, window_bounds = array<i64: 2, 64, 256>}]} {
    %c0 = arith.constant 0 : index
    %c0_0 = arith.constant 0 : index
    %c0_1 = arith.constant 0 : index
    %0 = vector.load %arg1[%c0, %c0_0, %c0_1] : memref<2x64x256xf32, #tpu.memory_space<vmem>>, vector<2x64x256xf32>
    %c0_2 = arith.constant 0 : index
    %c0_3 = arith.constant 0 : index
    %c0_4 = arith.constant 0 : index
    %1 = vector.load %arg2[%c0_2, %c0_3, %c0_4] : memref<2x64x256xf32, #tpu.memory_space<vmem>>, vector<2x64x256xf32>
    %2 = arith.addf %0, %1 : vector<2x64x256xf32>
    %c0_5 = arith.constant 0 : index
    %c0_6 = arith.constant 0 : index
    %c0_7 = arith.constant 0 : index
    %3 = vector.load %arg7[%c0_5, %c0_6, %c0_7] : memref<1x1x256xf32, #tpu.memory_space<vmem>>, vector<1x1x256xf32>
    %c0_8 = arith.constant 0 : index
    %c0_9 = arith.constant 0 : index
    %c0_10 = arith.constant 0 : index
    %4 = vector.load %arg8[%c0_8, %c0_9, %c0_10] : memref<1x1x256xf32, #tpu.memory_space<vmem>>, vector<1x1x256xf32>
    %cst = arith.constant dense<0.000000e+00> : vector<2x256xf32>
    %5 = vector.multi_reduction <add>, %2, %cst [1] : vector<2x64x256xf32> to vector<2x256xf32>
    %6 = vector.shape_cast %5 : vector<2x256xf32> to vector<2x1x256xf32>
    %cst_11 = arith.constant 6.400000e+01 : f32
    %7 = vector.broadcast %cst_11 : f32 to vector<2x1x256xf32>
    %8 = arith.divf %6, %7 : vector<2x1x256xf32>
    %9 = arith.mulf %2, %2 : vector<2x64x256xf32>
    %cst_12 = arith.constant dense<0.000000e+00> : vector<2x256xf32>
    %10 = vector.multi_reduction <add>, %9, %cst_12 [1] : vector<2x64x256xf32> to vector<2x256xf32>
    %11 = vector.shape_cast %10 : vector<2x256xf32> to vector<2x1x256xf32>
    %cst_13 = arith.constant 6.400000e+01 : f32
    %12 = vector.broadcast %cst_13 : f32 to vector<2x1x256xf32>
    %13 = arith.divf %11, %12 : vector<2x1x256xf32>
    %14 = arith.mulf %8, %8 : vector<2x1x256xf32>
    %15 = arith.subf %13, %14 : vector<2x1x256xf32>
    %cst_14 = arith.constant 0.000000e+00 : f32
    %16 = vector.broadcast %cst_14 : f32 to vector<2x1x256xf32>
    %17 = arith.maximumf %15, %16 : vector<2x1x256xf32>
    %cst_15 = arith.constant 9.99999974E-6 : f32
    %18 = vector.broadcast %cst_15 : f32 to vector<2x1x256xf32>
    %19 = arith.addf %17, %18 : vector<2x1x256xf32>
    %20 = math.rsqrt %19 : vector<2x1x256xf32>
    %21 = vector.broadcast %3 : vector<1x1x256xf32> to vector<2x1x256xf32>
    %22 = arith.mulf %21, %20 : vector<2x1x256xf32>
    %23 = arith.mulf %8, %22 : vector<2x1x256xf32>
    %24 = vector.broadcast %4 : vector<1x1x256xf32> to vector<2x1x256xf32>
    %25 = arith.subf %24, %23 : vector<2x1x256xf32>
    %26 = vector.broadcast %22 : vector<2x1x256xf32> to vector<2x64x256xf32>
    %27 = arith.mulf %2, %26 : vector<2x64x256xf32>
    %28 = vector.broadcast %25 : vector<2x1x256xf32> to vector<2x64x256xf32>
    %29 = arith.addf %27, %28 : vector<2x64x256xf32>
    %30 = vector.shape_cast %29 : vector<2x64x256xf32> to vector<128x256xf32>
    %31 = arith.truncf %30 : vector<128x256xf32> to vector<128x256xbf16>
    %c0_16 = arith.constant 0 : index
    %c0_17 = arith.constant 0 : index
    %32 = vector.load %arg3[%c0_16, %c0_17] : memref<256x512xbf16, #tpu.memory_space<vmem>>, vector<256x512xbf16>
    %cst_18 = arith.constant dense<0.000000e+00> : vector<128x512xf32>
    %33 = tpu.matmul %31, %32, %cst_18 {dimension_numbers = #tpu.dot_dimension_numbers<[1], [0], [0], [1], [0, 0, 1, 1], [], []>} : vector<128x256xbf16>, vector<256x512xbf16>, vector<128x512xf32> -> vector<128x512xf32>
    %34 = arith.truncf %33 : vector<128x512xf32> to vector<128x512xbf16>
    %c0_19 = arith.constant 0 : index
    %c0_20 = arith.constant 0 : index
    %35 = vector.load %arg4[%c0_19, %c0_20] : memref<1x512xf32, #tpu.memory_space<vmem>>, vector<1x512xf32>
    %36 = arith.truncf %35 : vector<1x512xf32> to vector<1x512xbf16>
    %37 = vector.broadcast %36 : vector<1x512xbf16> to vector<128x512xbf16>
    %38 = arith.addf %34, %37 : vector<128x512xbf16>
    %cst_21 = arith.constant 0.000000e+00 : bf16
    %39 = vector.broadcast %cst_21 : bf16 to vector<128x512xbf16>
    %40 = arith.maximumf %38, %39 : vector<128x512xbf16>
    %c0_22 = arith.constant 0 : index
    %c0_23 = arith.constant 0 : index
    %41 = vector.load %arg5[%c0_22, %c0_23] : memref<512x256xbf16, #tpu.memory_space<vmem>>, vector<512x256xbf16>
    %cst_24 = arith.constant dense<0.000000e+00> : vector<128x256xf32>
    %42 = tpu.matmul %40, %41, %cst_24 {dimension_numbers = #tpu.dot_dimension_numbers<[1], [0], [0], [1], [0, 0, 1, 1], [], []>} : vector<128x512xbf16>, vector<512x256xbf16>, vector<128x256xf32> -> vector<128x256xf32>
    %c0_25 = arith.constant 0 : index
    %c0_26 = arith.constant 0 : index
    %43 = vector.load %arg6[%c0_25, %c0_26] : memref<1x256xf32, #tpu.memory_space<vmem>>, vector<1x256xf32>
    %44 = vector.broadcast %43 : vector<1x256xf32> to vector<128x256xf32>
    %45 = arith.addf %42, %44 : vector<128x256xf32>
    %46 = vector.shape_cast %45 : vector<128x256xf32> to vector<2x64x256xf32>
    %47 = arith.addf %29, %46 : vector<2x64x256xf32>
    %c0_27 = arith.constant 0 : index
    %c0_28 = arith.constant 0 : index
    %c0_29 = arith.constant 0 : index
    %48 = vector.load %arg9[%c0_27, %c0_28, %c0_29] : memref<1x1x256xf32, #tpu.memory_space<vmem>>, vector<1x1x256xf32>
    %c0_30 = arith.constant 0 : index
    %c0_31 = arith.constant 0 : index
    %c0_32 = arith.constant 0 : index
    %49 = vector.load %arg10[%c0_30, %c0_31, %c0_32] : memref<1x1x256xf32, #tpu.memory_space<vmem>>, vector<1x1x256xf32>
    %cst_33 = arith.constant dense<0.000000e+00> : vector<2x256xf32>
    %50 = vector.multi_reduction <add>, %47, %cst_33 [1] : vector<2x64x256xf32> to vector<2x256xf32>
    %51 = vector.shape_cast %50 : vector<2x256xf32> to vector<2x1x256xf32>
    %cst_34 = arith.constant 6.400000e+01 : f32
    %52 = vector.broadcast %cst_34 : f32 to vector<2x1x256xf32>
    %53 = arith.divf %51, %52 : vector<2x1x256xf32>
    %54 = arith.mulf %47, %47 : vector<2x64x256xf32>
    %cst_35 = arith.constant dense<0.000000e+00> : vector<2x256xf32>
    %55 = vector.multi_reduction <add>, %54, %cst_35 [1] : vector<2x64x256xf32> to vector<2x256xf32>
    %56 = vector.shape_cast %55 : vector<2x256xf32> to vector<2x1x256xf32>
    %cst_36 = arith.constant 6.400000e+01 : f32
    %57 = vector.broadcast %cst_36 : f32 to vector<2x1x256xf32>
    %58 = arith.divf %56, %57 : vector<2x1x256xf32>
    %59 = arith.mulf %53, %53 : vector<2x1x256xf32>
    %60 = arith.subf %58, %59 : vector<2x1x256xf32>
    %cst_37 = arith.constant 0.000000e+00 : f32
    %61 = vector.broadcast %cst_37 : f32 to vector<2x1x256xf32>
    %62 = arith.maximumf %60, %61 : vector<2x1x256xf32>
    %cst_38 = arith.constant 9.99999974E-6 : f32
    %63 = vector.broadcast %cst_38 : f32 to vector<2x1x256xf32>
    %64 = arith.addf %62, %63 : vector<2x1x256xf32>
    %65 = math.rsqrt %64 : vector<2x1x256xf32>
    %66 = vector.broadcast %48 : vector<1x1x256xf32> to vector<2x1x256xf32>
    %67 = arith.mulf %66, %65 : vector<2x1x256xf32>
    %68 = arith.mulf %53, %67 : vector<2x1x256xf32>
    %69 = vector.broadcast %49 : vector<1x1x256xf32> to vector<2x1x256xf32>
    %70 = arith.subf %69, %68 : vector<2x1x256xf32>
    %71 = vector.broadcast %67 : vector<2x1x256xf32> to vector<2x64x256xf32>
    %72 = arith.mulf %47, %71 : vector<2x64x256xf32>
    %73 = vector.broadcast %70 : vector<2x1x256xf32> to vector<2x64x256xf32>
    %74 = arith.addf %72, %73 : vector<2x64x256xf32>
    %c0_39 = arith.constant 0 : index
    %c0_40 = arith.constant 0 : index
    %c0_41 = arith.constant 0 : index
    %75 = vector.load %arg11[%c0_39, %c0_40, %c0_41] : memref<2x64x256xf32, #tpu.memory_space<vmem>>, vector<2x64x256xf32>
    tpu.vector_store %arg11[%c0_39, %c0_40, %c0_41], %74 {strides = array<i32>} : memref<2x64x256xf32, #tpu.memory_space<vmem>>, vector<2x64x256xf32>,
    return
  }
  func.func @transform_0(%arg0: i32) -> (i32, i32, i32) {
    %c0_i32 = arith.constant 0 : i32
    %c0_i32_0 = arith.constant 0 : i32
    %c0_i32_1 = arith.constant 0 : i32
    return %arg0, %c0_i32, %c0_i32_0 : i32, i32, i32
  }
  func.func @transform_1(%arg0: i32) -> (i32, i32, i32) {
    %c0_i32 = arith.constant 0 : i32
    %c0_i32_0 = arith.constant 0 : i32
    %c0_i32_1 = arith.constant 0 : i32
    return %arg0, %c0_i32, %c0_i32_0 : i32, i32, i32
  }
  func.func @transform_2(%arg0: i32) -> (i32, i32) {
    %c0_i32 = arith.constant 0 : i32
    %c0_i32_0 = arith.constant 0 : i32
    %c0_i32_1 = arith.constant 0 : i32
    return %c0_i32, %c0_i32_0 : i32, i32
  }
  func.func @transform_3(%arg0: i32) -> (i32, i32) {
    %c0_i32 = arith.constant 0 : i32
    %c0_i32_0 = arith.constant 0 : i32
    %c0_i32_1 = arith.constant 0 : i32
    return %c0_i32, %c0_i32_0 : i32, i32
  }
  func.func @transform_4(%arg0: i32) -> (i32, i32) {
    %c0_i32 = arith.constant 0 : i32
    %c0_i32_0 = arith.constant 0 : i32
    %c0_i32_1 = arith.constant 0 : i32
    return %c0_i32, %c0_i32_0 : i32, i32
  }
  func.func @transform_5(%arg0: i32) -> (i32, i32) {
    %c0_i32 = arith.constant 0 : i32
    %c0_i32_0 = arith.constant 0 : i32
    %c0_i32_1 = arith.constant 0 : i32
    return %c0_i32, %c0_i32_0 : i32, i32
  }
  func.func @transform_6(%arg0: i32) -> (i32, i32, i32) {
    %c0_i32 = arith.constant 0 : i32
    %c0_i32_0 = arith.constant 0 : i32
    %c0_i32_1 = arith.constant 0 : i32
    %c0_i32_2 = arith.constant 0 : i32
    return %c0_i32, %c0_i32_0, %c0_i32_1 : i32, i32, i32
  }
  func.func @transform_7(%arg0: i32) -> (i32, i32, i32) {
    %c0_i32 = arith.constant 0 : i32
    %c0_i32_0 = arith.constant 0 : i32
    %c0_i32_1 = arith.constant 0 : i32
    %c0_i32_2 = arith.constant 0 : i32
    return %c0_i32, %c0_i32_0, %c0_i32_1 : i32, i32, i32
  }
  func.func @transform_8(%arg0: i32) -> (i32, i32, i32) {
    %c0_i32 = arith.constant 0 : i32
    %c0_i32_0 = arith.constant 0 : i32
    %c0_i32_1 = arith.constant 0 : i32
    %c0_i32_2 = arith.constant 0 : i32
    return %c0_i32, %c0_i32_0, %c0_i32_1 : i32, i32, i32
  }
  func.func @transform_9(%arg0: i32) -> (i32, i32, i32) {
    %c0_i32 = arith.constant 0 : i32
    %c0_i32_0 = arith.constant 0 : i32
    %c0_i32_1 = arith.constant 0 : i32
    %c0_i32_2 = arith.constant 0 : i32
    return %c0_i32, %c0_i32_0, %c0_i32_1 : i32, i32, i32
  }
  func.func @transform_10(%arg0: i32) -> (i32, i32, i32) {
    %c0_i32 = arith.constant 0 : i32
    %c0_i32_0 = arith.constant 0 : i32
    %c0_i32_1 = arith.constant 0 : i32
    return %arg0, %c0_i32, %c0_i32_0 : i32, i32, i32
  }
}

</mosaic_0001>

<bundles_post_ra>
// kernel: tpu_custom_call.1
= control target key start
LH: loop header
LB: loop body
LE: loop exit
PB: predicated region body
PF: predicated region fallthrough
CT: control target
= control target key end

     0   :  { %s6073_s0 = inlined_call_operand.hbm [shape: f32[8,64,256], index: 0, kind: input, shape index: {}]   ;;  %s6074_s1 = inlined_call_operand.hbm [shape: f32[8,64,256], index: 1, kind: input, shape index: {}]   ;;  %s6075_s2 = inlined_call_operand.hbm [shape: bf16[256,512], index: 2, kind: input, shape index: {}]   ;;  %s6076_s3 = inlined_call_operand.hbm [shape: f32[1,512], index: 3, kind: input, shape index: {}]   ;;  %s6077_s4 = inlined_call_operand.hbm [shape: bf16[512,256], index: 4, kind: input, shape index: {}]   ;;  %s6078_s5 = inlined_call_operand.vmem [shape: f32[1,256], index: 5, kind: input, shape index: {}]   ;;  %s6079_s6 = inlined_call_operand.vmem [shape: f32[1,1,256], index: 6, kind: input, shape index: {}]   ;;  %s6080_s7 = inlined_call_operand.vmem [shape: f32[1,1,256], index: 7, kind: input, shape index: {}]   ;;  %s6081_s8 = inlined_call_operand.hbm [shape: f32[1,1,256], index: 8, kind: input, shape index: {}]   ;;  %s6082_s9 = inlined_call_operand.vmem [shape: f32[1,1,256], index: 9, kind: input, shape index: {}]   ;;  %s6083_s10 = inlined_call_operand.hbm [shape: f32[8,64,256], index: 10, kind: output, shape index: {}]  }
   0x1   :  { %6122 = sst [smem:[#allocation46_spill]] %s6073_s0 }
   0x2   :  { %6123 = sst [smem:[#allocation47_spill]] %s6075_s2 }
   0x3   :  { %6124 = sst [smem:[#allocation48_spill]] %s6076_s3 }
   0x4   :  { %6125 = sst [smem:[#allocation49_spill]] %s6077_s4 }
   0x5   :  { %6126 = sst [smem:[#allocation50_spill]] %s6081_s8 }
   0x6   :  { %15 = vsyncpa [#allocation3], 0 }
   0x7   :  { %17 = vsyncpa [#allocation3 + $0x1], 0 }
   0x8   :  { %18 = vsyncpa [#allocation6], 0 }
   0x9   :  { %20 = vsyncpa [#allocation6 + $0x1], 0 }
   0xa   :  { %21 = vsyncpa [#allocation9], 0 }
   0xb   :  { %22 = vsyncpa [#allocation12], 0 }
   0xc   :  { %23 = vsyncpa [#allocation4], 0 }
   0xd   :  { %25 = vsyncpa [#allocation4 + $0x1], 0  ;;  %s4526_s13 = smov 0   ;;  %s4528_s14 = smov 0  }
   0xe   :  { %s4530_s15 = smov 0   ;;  %s4532_s16 = smov 0  }
   0xf LB: > { %6127 = sst [smem:[#allocation20_spill]] %s4454_s15  ;;  %s4547_s17 = sadd.s32 4294967295, %s4458_s16   ;;  %s4458_s16 = sphi %s4532_s16, %s6209_s16   ;;  %s4454_s15 = sphi %s4530_s15, %s6211_s15   ;;  %s4450_s14 = sphi %s4528_s14, %s6213_s14   ;;  %s4446_s13 = sphi %s4526_s13, %s6212_s13  }
  0x10   : > { %s3404_s18 = sadd.s32 4294967294, %s4458_s16   ;;  %p51_p0 = scmp.ne.s32.totalorder %s4450_s14, %s4446_s13 }
  0x11   : > { %p52_p1 = scmp.eq.s32.totalorder %s4547_s17, 0  ;;  %p269_p2 = scmp.eq.s32.totalorder %s4547_s17, 3 }
  0x12   : > { %p275_p3 = scmp.eq.s32.totalorder %s3404_s18, 3  ;;  %p3405_p5 = scmp.ge.s32.totalorder %s4458_s16, 1 }
  0x13   : > { %p4556_p4 = por %p52_p1, %p51_p0  ;;  %p282_p7 = scmp.lt.s32.totalorder %s4458_s16, 5 }
  0x14   : > { %p4561_p6 = por %p275_p3, %p51_p0  ;;  %s6131_s2 = sld [smem:[#allocation47_spill]] }
  0x15   : > { %p4569_p8 = pnand %p3405_p5, %p282_p7  ;;  %s4460_s25 = smov [#allocation7]  }
  0x16   : > { %s6129_s20 = scalar_select %p4561_p6, 1, 0 }
  0x17   : > { %p4101_p9 = pneg %p4569_p8  ;;  %s295_s26 = sshll.u32 %s4460_s25, 4  ;;  %s296_s26 = int_to_ptr.vmem [resolvable:$true] %s295_s26 }
  0x18   : > { %6130 = sst [smem:[#allocation21_spill]] %s6129_s20  ;;  %s6084_s11 = smov 256  }
  0x19   : > { %p4577_p10 = pnand %p4101_p9, %p52_p1  ;;  %s6134_s3 = sld [smem:[#allocation48_spill]] }
  0x1a   : > { %s293_s23 = sshll.u32 %s6131_s2, 4  ;;  %s6086_s12 = smov 16   ;;  %s294_s23 = int_to_ptr.hbm [resolvable:$true] %s293_s23 }
  0x1b   : > { %4104 = dma.hbm_to_vmem [thread:$0]  (!%p4577_p10), %s294_s23, 8192, %s296_s26, [#allocation6], %s6084_s11, %s6084_s11, %s6086_s12  }
  0x1c   : > { %s4463_s18 = smov [#allocation8]   ;;  %s6135_s4 = sld [smem:[#allocation49_spill]] }
  0x1d   : > { %s310_s21 = sshll.u32 %s4463_s18, 4  ;;  %s4464_s28 = smov [#allocation10]   ;;  %s311_s21 = int_to_ptr.vmem [resolvable:$true] %s310_s21 }
  0x1e   : > { %s321_s29 = sshll.u32 %s4464_s28, 4  ;;  %s6136_s8 = sld [smem:[#allocation50_spill]]  ;;  %s322_s29 = int_to_ptr.vmem [resolvable:$true] %s321_s29 }
  0x1f   : > { %s308_s30 = sshll.u32 %s6134_s3, 4  ;;  %s4465_s22 = smov 128   ;;  %s309_s30 = int_to_ptr.hbm [resolvable:$true] %s308_s30 }
  0x20   : > { %4107 = dma.hbm_to_vmem [thread:$0]  (!%p4577_p10), %s309_s30, 64, %s311_s21, [#allocation9]  }
  0x21   : > { %s4466_s25 = smov 8   ;;  %s4467_s30 = smov [#allocation11]  }
  0x22   : > { %s319_s2 = sshll.u32 %s6135_s4, 4  ;;  %s345_s21 = sshll.u32 %s4467_s30, 4  ;;  %s320_s2 = int_to_ptr.hbm [resolvable:$true] %s319_s2  ;;  %s346_s21 = int_to_ptr.vmem [resolvable:$true] %s345_s21 }
  0x23   : > { %4110 = dma.hbm_to_vmem [thread:$0]  (!%p4577_p10), %s320_s2, 8192, %s322_s29, [#allocation9], %s4465_s22, %s4465_s22, %s4466_s25  }
  0x24   : > { %s343_s18 = sshll.u32 %s6136_s8, 4  ;;  %s4602_s28 = sadd.s32 1, %s4458_s16   ;;  %s344_s18 = int_to_ptr.hbm [resolvable:$true] %s343_s18 }
  0x25   : > { %4113 = dma.hbm_to_vmem [thread:$0]  (!%p4577_p10), %s344_s18, 32, %s346_s21, [#allocation12]  }
  0x26   : > { %6137 = sst [smem:[#allocation22_spill]] %s4602_s28  ;;  %s38_s23 = sadd.s32 1, %s4454_s15 }
  0x27   : > { %s35_s26 = ssub.s32 %s4458_s16, %s4602_s28  ;;  %p45_p11 = scmp.ne.s32.totalorder %s4454_s15, %s4450_s14 }
  0x28   : > { %p36_p12 = scmp.eq.s32.totalorder %s35_s26, 0  ;;  %p46_p13 = scmp.eq.s32.totalorder %s4458_s16, 0 }
  0x29   : > { %p4612_p0 = por %p269_p2, %p45_p11  ;;  %p4129_p3 = scmp.lt.s32.totalorder %s4458_s16, 4 }
  0x2a   : > { %s4618_s2 = scalar_select %p36_p12, %s4454_s15, %s38_s23  }
  0x2b   : > { %p47_p5 = por %p46_p13, %p45_p11  ;;  %s359_s29 = sand.u32 1, %s4454_s15  }
  0x2c   : > { %6139 = sst [smem:[#allocation23_spill]] %s4618_s2  ;;  %s4621_s27 = sshll.u32 %s359_s29, 8 }
  0x2d   : > { %s3946_s18 = sshll.u32 %s4458_s16, 8  ;;  %s6140_s0 = sld [smem:[#allocation46_spill]] }
  0x2e   : > { %s363_s21 = scalar_lea.vmem [#allocation2], %s4621_s27  ;;  %p4628_p2 = pnand %p4129_p3, %p47_p5 }
  0x2f   : > { %s372_s26 = sshll.u32 %s363_s21, 4  ;;  %s392_s8 = scalar_lea.hbm %s6074_s1, %s3946_s18  ;;  %s373_s26 = int_to_ptr.vmem [resolvable:$true] %s372_s26 }
  0x30   : > { %s393_s2 = sshll.u32 %s392_s8, 4  ;;  %s360_s15 = scalar_lea.sflag [#allocation3], %s359_s29  ;;  %s394_s2 = int_to_ptr.hbm [resolvable:$true] %s393_s2 }
  0x31   : > { %p4320_p9 = pneg %p4628_p2 }
  0x33   : > { %s369_s30 = scalar_lea.hbm %s6140_s0, %s3946_s18  ;;  %s4323_s21 = scalar_lea.hbm %s6140_s0, 1024 }
  0x34   : > { %s370_s12 = sshll.u32 %s369_s30, 4  ;;  %s371_s12 = int_to_ptr.hbm [resolvable:$true] %s370_s12 }
  0x35   : > { %s4316_s28 = sshra.s32 %s371_s12, 4  ;;  %s4317_s28 = int_to_ptr.hbm [resolvable:$true] %s4316_s28 }
  0x36   : > { %s4318_s22 = scalar_lea.hbm %s4317_s28, 256  ;;  %p4324_p12 = scmp.lt.s32.totalorder %s4317_s28, %s6140_s0 }
  0x37   : > { %p4319_p7 = scmp.ne.s32.totalorder %s4317_s28, %s4318_s22  ;;  %p4325_p13 = scmp.lt.s32.totalorder %s4323_s21, %s4318_s22 }
  0x39   : > { %p4321_p10 = pnand %p4320_p9, %p4319_p7  ;;  %p4326_p3 = por %p4325_p13, %p4324_p12 }
  0x3b   : > { %p4322_p11 = pneg %p4321_p10 }
  0x3d   : > { %p4327_p5 = pnand %p4326_p3, %p4322_p11 }
  0x3f   : > { %4330 = shalt.err (!%p4327_p5)
}
  0x40   : > { %s6142_s8 = smov 16   ;;  %s6143_s29 = smov 256  }
  0x41   : > { %4117 = dma.hbm_to_vmem [thread:$0]  (!%p4628_p2), %s371_s12, 4096, %s373_s26, %s360_s15, %s6143_s29, %s6143_s29, %s6142_s8  }
  0x42   : > { %s386_s18 = scalar_lea.vmem [#allocation5], %s4621_s27  ;;  %s382_s30 = sand.u32 1, %s4458_s16  }
  0x43   : > { %s395_s25 = sshll.u32 %s386_s18, 4  ;;  %s383_s4 = scalar_lea.sflag [#allocation6], %s382_s30  ;;  %s396_s25 = int_to_ptr.vmem [resolvable:$true] %s395_s25 }
  0x44   : > { %s4346_s28 = sshra.s32 %s394_s2, 4  ;;  %s4353_s0 = scalar_lea.hbm %s6074_s1, 1024  ;;  %s4347_s28 = int_to_ptr.hbm [resolvable:$true] %s4346_s28 }
  0x45   : > { %s4348_s22 = scalar_lea.hbm %s4347_s28, 256  ;;  %p4354_p12 = scmp.lt.s32.totalorder %s4347_s28, %s6074_s1 }
  0x46   : > { %p4349_p7 = scmp.ne.s32.totalorder %s4347_s28, %s4348_s22  ;;  %p4355_p13 = scmp.lt.s32.totalorder %s4353_s0, %s4348_s22 }
  0x48   : > { %p4351_p10 = pnand %p4349_p7, %p4320_p9  ;;  %p4356_p3 = por %p4355_p13, %p4354_p12 }
  0x4a   : > { %p4352_p11 = pneg %p4351_p10 }
  0x4c   : > { %p4357_p5 = pnand %p4356_p3, %p4352_p11 }
  0x4e   : > { %4360 = shalt.err (!%p4357_p5)
}
  0x4f   : > { %4120 = dma.hbm_to_vmem [thread:$0]  (!%p4628_p2), %s394_s2, 4096, %s396_s25, %s383_s4, %s6143_s29, %s6143_s29, %s6142_s8  }
  0x50   : > { %407 = sbr.rel (%p4569_p8) target bundleno = 951 (0x3b7), region = 60 }
  0x55   : > { %s4670_s12 = sand.u32 1, %s4450_s14  }
  0x56   : > { %s4673_s20 = sshll.u32 %s4670_s12, 8  ;;  %s410_s0 = scalar_lea.sflag [#allocation3], %s4670_s12 }
  0x57   : > { %s4677_s27 = scalar_lea.vmem [#allocation2], %s4673_s20 }
  0x58   : > { %4421 = dma.done.wait (%p4556_p4), %s410_s0, 4096  }
  0x59   : > { %4423 = vsyncadd (%p4556_p4), %s410_s0, 4294963200  ;;  %s419_s3 = sand.u32 1, %s4547_s17   ;;  %s4685_s2 = scalar_lea.vmem [#allocation5], %s4673_s20 }
  0x5a   : > { %s420_s24 = scalar_lea.sflag [#allocation6], %s419_s3 }
  0x5b   : > { %4425 = dma.done.wait (%p4556_p4), %s420_s24, 4096  }
  0x5c   : > { %4427 = vsyncadd (%p4556_p4), %s420_s24, 4294963200 }
  0x5d   : > { %4429 = dma.done.wait (%p52_p1), [#allocation6], 8192  }
  0x5e   : > { %4431 = vsyncadd (%p52_p1), [#allocation6], 4294959104 }
  0x5f   : > { %4433 = dma.done.wait (%p52_p1), [#allocation9], 8256  }
  0x60   : > { %4435 = vsyncadd (%p52_p1), [#allocation9], 4294959040 }
  0x61   : > { %4437 = dma.done.wait (%p52_p1), [#allocation12], 32  }
  0x62   : > { %4439 = vsyncadd (%p52_p1), [#allocation12], 4294967264  ;;  %v3541_v0 = vld [vmem:[#allocation7 + $0xe0] sm:$0xf]  ;;  %v3979_v1 = vld [vmem:[#allocation7 + $0xec] sm:$0xf0] }
  0x63   : > { %v3669_v2 = vld [vmem:[#allocation7 + $0x1e0] sm:$0xf]  ;;  %v3542_v3 = vor.u32 %v3979_v1, %v3541_v0  ;;  %v4011_v4 = vld [vmem:[#allocation7 + $0x1ec] sm:$0xf0]  ;;  %v3977_v5 = vld [vmem:[#allocation7 + $0xe4] sm:$0xf] }
  0x64   : > { %v3543_v6 = vld [vmem:[#allocation7 + $0xf0] sm:$0xf0]  ;;  %v3670_v7 = vor.u32 %v4011_v4, %v3669_v2  ;;  %v4009_v9 = vld [vmem:[#allocation7 + $0x1e4] sm:$0xf]  ;;  %v3525_v11 = vld [vmem:[#allocation7 + $0xc0] sm:$0xf] }
  0x65   : > { %v3546_v8 = vor.u32 %v3977_v5, %v3543_v6  ;;  %v3671_v10 = vld [vmem:[#allocation7 + $0x1f0] sm:$0xf0]  ;;  %1307 = vmatpush.bf16.msra.mxu0 %v3542_v3  ;;  %v3975_v13 = vld [vmem:[#allocation7 + $0xcc] sm:$0xf0]  ;;  %v3653_v14 = vld [vmem:[#allocation7 + $0x1c0] sm:$0xf] }
  0x66   : > { %v3674_v12 = vor.u32 %v4009_v9, %v3671_v10  ;;  %v4007_v15 = vld [vmem:[#allocation7 + $0x1cc] sm:$0xf0]  ;;  %1356 = vmatpush.bf16.msra.mxu1 %v3670_v7  ;;  %v3526_v16 = vor.u32 %v3975_v13, %v3525_v11  ;;  %v3973_v18 = vld [vmem:[#allocation7 + $0xc4] sm:$0xf]  ;;  %v3527_v19 = vld [vmem:[#allocation7 + $0xd0] sm:$0xf0] }
  0x67   : > { %1405 = vmatpush.bf16.msra.mxu2 %v3546_v8  ;;  %v3654_v17 = vor.u32 %v4007_v15, %v3653_v14  ;;  %v4005_v20 = vld [vmem:[#allocation7 + $0x1c4] sm:$0xf]  ;;  %v3530_v21 = vor.u32 %v3973_v18, %v3527_v19  ;;  %v3655_v22 = vld [vmem:[#allocation7 + $0x1d0] sm:$0xf0]  ;;  %v3509_v23 = vld [vmem:[#allocation7 + $0xa0] sm:$0xf] }
  0x68   : > { %1454 = vmatpush.bf16.msra.mxu3 %v3674_v12  ;;  %v3971_v24 = vld [vmem:[#allocation7 + $0xac] sm:$0xf0]  ;;  %v3658_v25 = vor.u32 %v4005_v20, %v3655_v22  ;;  %v3637_v26 = vld [vmem:[#allocation7 + $0x1a0] sm:$0xf]  ;;  %v3969_v28 = vld [vmem:[#allocation7 + $0xa4] sm:$0xf] }
  0x69   : > { %v4003_v27 = vld [vmem:[#allocation7 + $0x1ac] sm:$0xf0]  ;;  %1308 = vmatpush.bf16.msra.mxu0 %v3526_v16  ;;  %v3510_v29 = vor.u32 %v3971_v24, %v3509_v23  ;;  %v3511_v30 = vld [vmem:[#allocation7 + $0xb0] sm:$0xf0]  ;;  %v4001_v31 = vld [vmem:[#allocation7 + $0x1a4] sm:$0xf] }
  0x6a   : > { %v3639_v32 = vld [vmem:[#allocation7 + $0x1b0] sm:$0xf0]  ;;  %1357 = vmatpush.bf16.msra.mxu1 %v3654_v17  ;;  %v3638_v33 = vor.u32 %v4003_v27, %v3637_v26  ;;  %v3514_v34 = vor.u32 %v3969_v28, %v3511_v30  ;;  %v3493_v35 = vld [vmem:[#allocation7 + $0x80] sm:$0xf]  ;;  %v3967_v36 = vld [vmem:[#allocation7 + $0x8c] sm:$0xf0] }
  0x6b   : > { %1406 = vmatpush.bf16.msra.mxu2 %v3530_v21  ;;  %v3621_v37 = vld [vmem:[#allocation7 + $0x180] sm:$0xf]  ;;  %v3642_v38 = vor.u32 %v4001_v31, %v3639_v32  ;;  %v3999_v39 = vld [vmem:[#allocation7 + $0x18c] sm:$0xf0]  ;;  %v3965_v40 = vld [vmem:[#allocation7 + $0x84] sm:$0xf]  ;;  %v3494_v44 = vor.u32 %v3967_v36, %v3493_v35 }
  0x6c   : > { %1455 = vmatpush.bf16.msra.mxu3 %v3658_v25  ;;  %v3495_v41 = vld [vmem:[#allocation7 + $0x90] sm:$0xf0]  ;;  %v3997_v42 = vld [vmem:[#allocation7 + $0x184] sm:$0xf]  ;;  %v3622_v45 = vor.u32 %v3999_v39, %v3621_v37  ;;  %v3477_v47 = vld [vmem:[#allocation7 + $0x60] sm:$0xf] }
  0x6d   : > { %v3623_v43 = vld [vmem:[#allocation7 + $0x190] sm:$0xf0]  ;;  %1309 = vmatpush.bf16.msra.mxu0 %v3510_v29  ;;  %v3498_v46 = vor.u32 %v3965_v40, %v3495_v41  ;;  %v3963_v48 = vld [vmem:[#allocation7 + $0x6c] sm:$0xf0]  ;;  %v3605_v49 = vld [vmem:[#allocation7 + $0x160] sm:$0xf] }
  0x6e   : > { %1358 = vmatpush.bf16.msra.mxu1 %v3638_v33  ;;  %v3626_v50 = vor.u32 %v3997_v42, %v3623_v43  ;;  %v3995_v51 = vld [vmem:[#allocation7 + $0x16c] sm:$0xf0]  ;;  %v3961_v52 = vld [vmem:[#allocation7 + $0x64] sm:$0xf]  ;;  %v3479_v53 = vld [vmem:[#allocation7 + $0x70] sm:$0xf0]  ;;  %v3478_v56 = vor.u32 %v3963_v48, %v3477_v47 }
  0x6f   : > { %1407 = vmatpush.bf16.msra.mxu2 %v3514_v34  ;;  %v3993_v54 = vld [vmem:[#allocation7 + $0x164] sm:$0xf]  ;;  %v3607_v55 = vld [vmem:[#allocation7 + $0x170] sm:$0xf0]  ;;  %v3606_v57 = vor.u32 %v3995_v51, %v3605_v49  ;;  %v3482_v58 = vor.u32 %v3961_v52, %v3479_v53  ;;  %v3461_v59 = vld [vmem:[#allocation7 + $0x40] sm:$0xf] }
  0x70   : > { %1456 = vmatpush.bf16.msra.mxu3 %v3642_v38  ;;  %v3959_v60 = vld [vmem:[#allocation7 + $0x4c] sm:$0xf0]  ;;  %v3589_v61 = vld [vmem:[#allocation7 + $0x140] sm:$0xf]  ;;  %v3610_v62 = vor.u32 %v3993_v54, %v3607_v55  ;;  %v3957_v0 = vld [vmem:[#allocation7 + $0x44] sm:$0xf] }
  0x71   : > { %1310 = vmatpush.bf16.msra.mxu0 %v3494_v44  ;;  %v3991_v63 = vld [vmem:[#allocation7 + $0x14c] sm:$0xf0]  ;;  %v3463_v1 = vld [vmem:[#allocation7 + $0x50] sm:$0xf0]  ;;  %v3989_v2 = vld [vmem:[#allocation7 + $0x144] sm:$0xf]  ;;  %v3462_v4 = vor.u32 %v3959_v60, %v3461_v59 }
  0x72   : > { %1359 = vmatpush.bf16.msra.mxu1 %v3622_v45  ;;  %v3591_v3 = vld [vmem:[#allocation7 + $0x150] sm:$0xf0]  ;;  %v3445_v5 = vld [vmem:[#allocation7 + $0x20] sm:$0xf]  ;;  %v3955_v6 = vld [vmem:[#allocation7 + $0x2c] sm:$0xf0]  ;;  %v3590_v7 = vor.u32 %v3991_v63, %v3589_v61  ;;  %v3466_v8 = vor.u32 %v3957_v0, %v3463_v1 }
  0x73   : > { %1408 = vmatpush.bf16.msra.mxu2 %v3498_v46  ;;  %v3573_v9 = vld [vmem:[#allocation7 + $0x120] sm:$0xf]  ;;  %v3987_v10 = vld [vmem:[#allocation7 + $0x12c] sm:$0xf0]  ;;  %v3953_v11 = vld [vmem:[#allocation7 + $0x24] sm:$0xf]  ;;  %v3594_v12 = vor.u32 %v3989_v2, %v3591_v3  ;;  %v3446_v19 = vor.u32 %v3955_v6, %v3445_v5 }
  0x74   : > { %1457 = vmatpush.bf16.msra.mxu3 %v3626_v50  ;;  %v3447_v13 = vld [vmem:[#allocation7 + $0x30] sm:$0xf0]  ;;  %v3985_v14 = vld [vmem:[#allocation7 + $0x124] sm:$0xf]  ;;  %v3429_v16 = vld [vmem:[#allocation7] sm:$0xf]  ;;  %v3574_v23 = vor.u32 %v3987_v10, %v3573_v9 }
  0x75   : > { %1311 = vmatpush.bf16.msra.mxu0 %v3478_v56  ;;  %v3575_v15 = vld [vmem:[#allocation7 + $0x130] sm:$0xf0]  ;;  %v3951_v17 = vld [vmem:[#allocation7 + $0xc] sm:$0xf0]  ;;  %v3557_v18 = vld [vmem:[#allocation7 + $0x100] sm:$0xf]  ;;  %v3450_v24 = vor.u32 %v3953_v11, %v3447_v13 }
  0x76   : > { %1360 = vmatpush.bf16.msra.mxu1 %v3606_v57  ;;  %v3983_v20 = vld [vmem:[#allocation7 + $0x10c] sm:$0xf0]  ;;  %v3949_v21 = vld [vmem:[#allocation7 + $0x4] sm:$0xf]  ;;  %v3431_v22 = vld [vmem:[#allocation7 + $0x10] sm:$0xf0]  ;;  %v3578_v30 = vor.u32 %v3985_v14, %v3575_v15  ;;  %v3430_v37 = vor.u32 %v3951_v17, %v3429_v16 }
  0x77   : > { %1409 = vmatpush.bf16.msra.mxu2 %v3482_v58  ;;  %v3981_v25 = vld [vmem:[#allocation7 + $0x104] sm:$0xf]  ;;  %v3559_v26 = vld [vmem:[#allocation7 + $0x110] sm:$0xf0]  ;;  %v490_v28 = vld [vmem:[%s4677_s27 + $0x8] sm:$0xff]  ;;  %v3558_v38 = vor.u32 %v3983_v20, %v3557_v18  ;;  %v3434_v39 = vor.u32 %v3949_v21, %v3431_v22  ;;  %v4468_v2 = vmov 64.0  }
  0x78   : > { %1458 = vmatpush.bf16.msra.mxu3 %v3610_v62  ;;  %v489_v27 = vld [vmem:[%s4677_s27] sm:$0xff]  ;;  %v491_v29 = vld [vmem:[%s4677_s27 + $0x10] sm:$0xff]  ;;  %v492_v31 = vld [vmem:[%s4677_s27 + $0x18] sm:$0xff]  ;;  %v3562_v50 = vor.u32 %v3981_v25, %v3559_v26  ;;  %4178 = vrcp.f32 %v4468_v2  ;;  %vm800_vm7 = vcmask 1040384   ;;  %s5935_s28 = scalar_lea.vmem [#allocation13], %s4673_s20  ;;  %s4078_s22 = sshll.u32 %s4547_s17, 8 }
  0x79   : > { %1312 = vmatpush.bf16.msra.mxu0 %v3462_v4  ;;  %v493_v32 = vld [vmem:[%s4677_s27 + $0x20] sm:$0xff]  ;;  %v494_v33 = vld [vmem:[%s4677_s27 + $0x28] sm:$0xff]  ;;  %v495_v34 = vld [vmem:[%s4677_s27 + $0x30] sm:$0xff]  ;;  %s3266_s17 = scalar_lea.hbm %s6083_s10, %s4078_s22  ;;  %s3267_s15 = sshll.u32 %s5935_s28, 4  ;;  %s3268_s15 = int_to_ptr.vmem [resolvable:$true] %s3267_s15 }
  0x7a   : > { %1361 = vmatpush.bf16.msra.mxu1 %v3590_v7  ;;  %v496_v35 = vld [vmem:[%s4677_s27 + $0x38] sm:$0xff]  ;;  %v521_v36 = vld [vmem:[%s4685_s2] sm:$0xff]  ;;  %v522_v40 = vld [vmem:[%s4685_s2 + $0x8] sm:$0xff]  ;;  %s3269_s20 = sshll.u32 %s3266_s17, 4  ;;  %s3254_s0 = scalar_lea.sflag [#allocation4], %s4670_s12  ;;  %s3270_s20 = int_to_ptr.hbm [resolvable:$true] %s3269_s20 }
  0x7b   : > { %1410 = vmatpush.bf16.msra.mxu2 %v3466_v8  ;;  %v523_v41 = vld [vmem:[%s4685_s2 + $0x10] sm:$0xff]  ;;  %v524_v42 = vld [vmem:[%s4685_s2 + $0x18] sm:$0xff]  ;;  %v4715_v43 = vadd.f32 %v521_v36, %v489_v27  ;;  %v525_v44 = vld [vmem:[%s4685_s2 + $0x20] sm:$0xff]  ;;  %v4720_v47 = vadd.f32 %v522_v40, %v490_v28  ;;  %s4396_s19 = scalar_lea.hbm %s6083_s10, 1024 }
  0x7c   : > { %1459 = vmatpush.bf16.msra.mxu3 %v3594_v12  ;;  %v526_v45 = vld [vmem:[%s4685_s2 + $0x28] sm:$0xff]  ;;  %v527_v46 = vld [vmem:[%s4685_s2 + $0x30] sm:$0xff]  ;;  %v4722_v48 = vadd.f32 %v523_v41, %v491_v29  ;;  %v4724_v49 = vadd.f32 %v524_v42, %v492_v31  ;;  %v497_v51 = vld [vmem:[%s4677_s27 + $0x40] sm:$0xff]  ;;  %v4728_v53 = vadd.f32 %v525_v44, %v493_v32 }
  0x7d   : > { %1313 = vmatpush.bf16.msra.mxu0 %v3446_v19  ;;  %v528_v52 = vld [vmem:[%s4685_s2 + $0x38] sm:$0xff]  ;;  %v4730_v54 = vadd.f32 %v526_v45, %v494_v33  ;;  %v498_v55 = vld [vmem:[%s4677_s27 + $0x48] sm:$0xff]  ;;  %v529_v56 = vld [vmem:[%s4685_s2 + $0x40] sm:$0xff]  ;;  %v4738_v60 = vadd.f32 %v527_v46, %v495_v34  ;;  %v650_v19 = vmul.f32 %v4715_v43, %v4715_v43  ;;  %v651_v20 = vmul.f32 %v4720_v47, %v4720_v47 }
  0x7e   : > { %1362 = vmatpush.bf16.msra.mxu1 %v3574_v23  ;;  %v530_v57 = vld [vmem:[%s4685_s2 + $0x48] sm:$0xff]  ;;  %v587_v58 = vadd.f32 %v4722_v48, %v4715_v43  ;;  %v499_v59 = vld [vmem:[%s4677_s27 + $0x50] sm:$0xff]  ;;  %v4740_v61 = vadd.f32 %v528_v52, %v496_v35  ;;  %v600_v62 = vadd.f32 %v4724_v49, %v4720_v47  ;;  %v500_v63 = vld [vmem:[%s4677_s27 + $0x58] sm:$0xff]  ;;  %v4748_v4 = vadd.f32 %v529_v56, %v497_v51  ;;  %v4179_v27 = vpop.eup %4178 }
  0x7f   : > { %1411 = vmatpush.bf16.msra.mxu2 %v3450_v24  ;;  %v531_v0 = vld [vmem:[%s4685_s2 + $0x50] sm:$0xff]  ;;  %v532_v1 = vld [vmem:[%s4685_s2 + $0x58] sm:$0xff]  ;;  %v501_v3 = vld [vmem:[%s4677_s27 + $0x60] sm:$0xff]  ;;  %v4750_v5 = vadd.f32 %v530_v57, %v498_v55  ;;  %v652_v21 = vmul.f32 %v4722_v48, %v4722_v48  ;;  %v653_v22 = vmul.f32 %v4724_v49, %v4724_v49  ;;  %v654_v28 = vmul.f32 %v4728_v53, %v4728_v53 }
  0x80   : > { %1460 = vmatpush.bf16.msra.mxu3 %v3578_v30  ;;  %v588_v6 = vadd.f32 %v587_v58, %v4728_v53  ;;  %v601_v7 = vadd.f32 %v600_v62, %v4730_v54  ;;  %v502_v8 = vld [vmem:[%s4677_s27 + $0x68] sm:$0xff]  ;;  %v533_v9 = vld [vmem:[%s4685_s2 + $0x60] sm:$0xff]  ;;  %v503_v11 = vld [vmem:[%s4677_s27 + $0x70] sm:$0xff]  ;;  %v4758_v12 = vadd.f32 %v531_v0, %v499_v59  ;;  %v4760_v13 = vadd.f32 %v532_v1, %v500_v63 }
  0x81   : > { %1314 = vmatpush.bf16.msra.mxu0 %v3430_v37  ;;  %v534_v10 = vld [vmem:[%s4685_s2 + $0x68] sm:$0xff]  ;;  %v504_v16 = vld [vmem:[%s4677_s27 + $0x78] sm:$0xff]  ;;  %v535_v17 = vld [vmem:[%s4685_s2 + $0x70] sm:$0xff]  ;;  %v4775_v23 = vadd.f32 %v533_v9, %v501_v3  ;;  %v655_v29 = vmul.f32 %v4730_v54, %v4730_v54  ;;  %v656_v34 = vmul.f32 %v4738_v60, %v4738_v60  ;;  %v657_v35 = vmul.f32 %v4740_v61, %v4740_v61 }
  0x82   : > { %1363 = vmatpush.bf16.msra.mxu1 %v3558_v38  ;;  %v589_v14 = vadd.f32 %v588_v6, %v4738_v60  ;;  %v602_v15 = vadd.f32 %v601_v7, %v4740_v61  ;;  %v536_v18 = vld [vmem:[%s4685_s2 + $0x78] sm:$0xff]  ;;  %v4777_v24 = vadd.f32 %v534_v10, %v502_v8  ;;  %v4785_v30 = vadd.f32 %v535_v17, %v503_v11 }
  0x83   : > { %1412 = vmatpush.bf16.msra.mxu2 %v3434_v39  ;;  %v4787_v31 = vadd.f32 %v536_v18, %v504_v16  ;;  %v682_v36 = vadd.f32 %v652_v21, %v650_v19  ;;  %v695_v37 = vadd.f32 %v653_v22, %v651_v20  ;;  %v640_v40 = vmul.f32 64.0, %v4179_v27 }
  0x84   : > { %1461 = vmatpush.bf16.msra.mxu3 %v3562_v50  ;;  %v590_v25 = vadd.f32 %v589_v14, %v4748_v4  ;;  %v603_v26 = vadd.f32 %v602_v15, %v4750_v5  ;;  %v658_v41 = vmul.f32 %v4748_v4, %v4748_v4  ;;  %v659_v42 = vmul.f32 %v4750_v5, %v4750_v5 }
  0x85   : > { %v683_v44 = vadd.f32 %v682_v36, %v654_v28  ;;  %v696_v45 = vadd.f32 %v695_v37, %v655_v29  ;;  %v660_v51 = vmul.f32 %v4758_v12, %v4758_v12  ;;  %v661_v52 = vmul.f32 %v4760_v13, %v4760_v13 }
  0x86   : > { %v591_v32 = vadd.f32 %v590_v25, %v4758_v12  ;;  %v604_v33 = vadd.f32 %v603_v26, %v4760_v13  ;;  %v641_v59 = vsub.f32 1.0, %v640_v40  ;;  %v662_v62 = vmul.f32 %v4775_v23, %v4775_v23 }
  0x87   : > { %v684_v55 = vadd.f32 %v683_v44, %v656_v34  ;;  %v697_v56 = vadd.f32 %v696_v45, %v657_v35  ;;  %v663_v63 = vmul.f32 %v4777_v24, %v4777_v24  ;;  %v664_v6 = vmul.f32 %v4785_v30, %v4785_v30 }
  0x88   : > { %v592_v38 = vadd.f32 %v591_v32, %v4775_v23  ;;  %v605_v39 = vadd.f32 %v604_v33, %v4777_v24  ;;  %v665_v7 = vmul.f32 %v4787_v31, %v4787_v31  ;;  %v642_v14 = vmul.f32 %v4179_v27, %v641_v59  ;;  %v538_v59 = vld [vmem:[%s4685_s2 + $0x88] sm:$0xff] }
  0x89   : > { %v685_v0 = vadd.f32 %v684_v55, %v658_v41  ;;  %v698_v1 = vadd.f32 %v697_v56, %v659_v42  ;;  %vm644_vm0 = vweird.f32 %v4179_v27 }
  0x8a   : > { %v593_v46 = vadd.f32 %v592_v38, %v4785_v30  ;;  %v606_v50 = vadd.f32 %v605_v39, %v4787_v31  ;;  %v643_v25 = vadd.f32 %v4179_v27, %v642_v14  ;;  %v509_v14 = vld [vmem:[%s4677_s27 + $0xa0] sm:$0xff] }
  0x8b   : > { %v686_v8 = vadd.f32 %v685_v0, %v660_v51  ;;  %v699_v9 = vadd.f32 %v698_v1, %v661_v52  ;;  %v540_v0 = vld [vmem:[%s4685_s2 + $0x98] sm:$0xff] }
  0x8c   : > { %v594_v57 = vrot.slane %v593_v46, 4  ;;  %v607_v58 = vrot.slane %v606_v50, 4  ;;  %v4815_v35 = vsel %vm644_vm0, %v4179_v27, %v643_v25  ;;  %v511_v25 = vld [vmem:[%s4677_s27 + $0xb0] sm:$0xff] }
  0x8d   : > { %v687_v15 = vadd.f32 %v686_v8, %v662_v62  ;;  %v700_v16 = vadd.f32 %v699_v9, %v663_v63  ;;  %6144 = vst [vmem:[#allocation24_spill] sm:$0xff] %v4815_v35 }
  0x8e   : > { %v595_v2 = vadd.f32 %v594_v57, %v593_v46  ;;  %v608_v3 = vadd.f32 %v607_v58, %v606_v50  ;;  %v506_v57 = vld [vmem:[%s4677_s27 + $0x88] sm:$0xff]  ;;  %v508_v58 = vld [vmem:[%s4677_s27 + $0x98] sm:$0xff] }
  0x8f   : > { %v688_v19 = vadd.f32 %v687_v15, %v664_v6  ;;  %v701_v20 = vadd.f32 %v700_v16, %v665_v7  ;;  %v4833_v1 = vadd.f32 %v538_v59, %v506_v57  ;;  %v510_v6 = vld [vmem:[%s4677_s27 + $0xa8] sm:$0xff]  ;;  %v4838_v7 = vadd.f32 %v540_v0, %v508_v58  ;;  %v512_v15 = vld [vmem:[%s4677_s27 + $0xb8] sm:$0xff]  ;;  %v541_v16 = vld [vmem:[%s4685_s2 + $0xa0] sm:$0xff] }
  0x90   : > { %v596_v10 = vrot.slane %v595_v2, 2  ;;  %v609_v11 = vrot.slane %v608_v3, 2  ;;  %v515_v58 = vld [vmem:[%s4677_s27 + $0xd0] sm:$0xff]  ;;  %v518_v59 = vld [vmem:[%s4677_s27 + $0xe8] sm:$0xff] }
  0x91   : > { %v689_v26 = vrot.slane %v688_v19, 4  ;;  %v702_v28 = vrot.slane %v701_v20, 4 }
  0x92   : > { %v597_v17 = vadd.f32 %v596_v10, %v595_v2  ;;  %v610_v18 = vadd.f32 %v609_v11, %v608_v3  ;;  %v505_v2 = vld [vmem:[%s4677_s27 + $0x80] sm:$0xff]  ;;  %v507_v3 = vld [vmem:[%s4677_s27 + $0x90] sm:$0xff] }
  0x93   : > { %v690_v33 = vadd.f32 %v689_v26, %v688_v19  ;;  %v703_v34 = vadd.f32 %v702_v28, %v701_v20  ;;  %v537_v10 = vld [vmem:[%s4685_s2 + $0x80] sm:$0xff]  ;;  %v539_v11 = vld [vmem:[%s4685_s2 + $0x90] sm:$0xff]  ;;  %v626_v19 = vadd.f32 %v4838_v7, %v4833_v1  ;;  %v542_v20 = vld [vmem:[%s4685_s2 + $0xa8] sm:$0xff] }
  0x94   : > { %v598_v21 = vrot.slane %v597_v17, 1  ;;  %v611_v22 = vrot.slane %v610_v18, 1  ;;  %v514_v26 = vld [vmem:[%s4677_s27 + $0xc8] sm:$0xff]  ;;  %v543_v28 = vld [vmem:[%s4685_s2 + $0xb0] sm:$0xff] }
  0x95   : > { %v691_v36 = vrot.slane %v690_v33, 2  ;;  %v704_v37 = vrot.slane %v703_v34, 2 }
  0x96   : > { %v599_v29 = vadd.f32 %v598_v21, %v597_v17  ;;  %v612_v32 = vadd.f32 %v611_v22, %v610_v18  ;;  %v4849_v17 = vadd.f32 %v537_v10, %v505_v2  ;;  %v4851_v18 = vadd.f32 %v539_v11, %v507_v3  ;;  %v544_v21 = vld [vmem:[%s4685_s2 + $0xb8] sm:$0xff] }
  0x97   : > { %v692_v40 = vadd.f32 %v691_v36, %v690_v33  ;;  %v705_v41 = vadd.f32 %v704_v37, %v703_v34  ;;  %v4858_v22 = vadd.f32 %v541_v16, %v509_v14  ;;  %v546_v34 = vld [vmem:[%s4685_s2 + $0xc8] sm:$0xff]  ;;  %v4871_v36 = vadd.f32 %v543_v28, %v511_v25 }
  0x98   : > { %v4818_v38 = vmul.f32 %v4815_v35, %v599_v29  ;;  %v4821_v39 = vmul.f32 %v4815_v35, %v612_v32  ;;  %v4864_v29 = vadd.f32 %v542_v20, %v510_v6  ;;  %v4866_v32 = vadd.f32 %v544_v21, %v512_v15  ;;  %v550_v6 = vld [vmem:[%s4685_s2 + $0xe8] sm:$0xff]  ;;  %v517_v20 = vld [vmem:[%s4677_s27 + $0xe0] sm:$0xff] }
  0x99   : > { %v693_v42 = vrot.slane %v692_v40, 1  ;;  %v706_v44 = vrot.slane %v705_v41, 1  ;;  %v613_v33 = vadd.f32 %v4851_v18, %v4849_v17  ;;  %v666_v37 = vmul.f32 %v4849_v17, %v4849_v17  ;;  %v549_v21 = vld [vmem:[%s4685_s2 + $0xe0] sm:$0xff] }
  0x9a   : > { %v738_v46 = vmul.f32 %v4818_v38, %v4818_v38  ;;  %v739_v50 = vmul.f32 %v4821_v39, %v4821_v39  ;;  %6145 = vst [vmem:[#allocation25_spill] sm:$0xff] %v4866_v32  ;;  %v671_v2 = vmul.f32 %v4864_v29, %v4864_v29  ;;  %v672_v14 = vmul.f32 %v4871_v36, %v4871_v36 }
  0x9b   : > { %v694_v45 = vadd.f32 %v693_v42, %v692_v40  ;;  %v707_v27 = vadd.f32 %v706_v44, %v705_v41  ;;  %v667_v40 = vmul.f32 %v4833_v1, %v4833_v1  ;;  %v668_v41 = vmul.f32 %v4851_v18, %v4851_v18  ;;  %v513_v42 = vld [vmem:[%s4677_s27 + $0xc0] sm:$0xff]  ;;  %v516_v44 = vld [vmem:[%s4677_s27 + $0xd8] sm:$0xff] }
  0x9c   : > { %v673_v15 = vmul.f32 %v4866_v32, %v4866_v32 }
  0x9d   : > { %v734_v51 = vmul.f32 %v694_v45, %v4815_v35  ;;  %v735_v52 = vmul.f32 %v707_v27, %v4815_v35  ;;  %v545_v45 = vld [vmem:[%s4685_s2 + $0xc0] sm:$0xff]  ;;  %v614_v27 = vadd.f32 %v613_v33, %v4858_v22  ;;  %v708_v57 = vadd.f32 %v668_v41, %v666_v37  ;;  %v3551_v37 = vld [vmem:[#allocation7 + $0xf8] sm:$0xf0] }
  0x9e   : > { %v4924_v41 = vadd.f32 %v549_v21, %v517_v20 }
  0x9f   : > { %v742_v55 = vsub.f32 %v734_v51, %v738_v46  ;;  %v743_v56 = vsub.f32 %v735_v52, %v739_v50  ;;  %v627_v46 = vadd.f32 %v626_v19, %v4864_v29  ;;  %v669_v50 = vmul.f32 %v4838_v7, %v4838_v7  ;;  %v548_v52 = vld [vmem:[%s4685_s2 + $0xd8] sm:$0xff] }
  0xa0   : > { %v670_v51 = vmul.f32 %v4858_v22, %v4858_v22  ;;  %v4907_v11 = vadd.f32 %v548_v52, %v516_v44  ;;  %v3679_v52 = vld [vmem:[#allocation7 + $0x1f8] sm:$0xf0] }
  0xa1   : > { %v746_v62 = vmax.f32 %v742_v55, 0.0  ;;  %v747_v63 = vmax.f32 %v743_v56, 0.0  ;;  %v4890_v55 = vadd.f32 %v545_v45, %v513_v42  ;;  %v4892_v56 = vadd.f32 %v546_v34, %v514_v26  ;;  %v3978_v34 = vld [vmem:[#allocation7 + $0xec] sm:$0xf] }
  0xa2   : > { %v628_v0 = vadd.f32 %v627_v46, %v4866_v32  ;;  %v709_v28 = vadd.f32 %v708_v57, %v670_v51  ;;  %v4926_v42 = vadd.f32 %v550_v6, %v518_v59  ;;  %v4010_v46 = vld [vmem:[#allocation7 + $0x1ec] sm:$0xf]  ;;  %v721_v57 = vadd.f32 %v669_v50, %v667_v40  ;;  %v3549_v59 = vld [vmem:[#allocation7 + $0xe8] sm:$0xf]  ;;  %v3980_v6 = vld [vmem:[#allocation7 + $0xf4] sm:$0xf0] }
  0xa3   : > { %v4840_v8 = vadd.f32 1e-05, %v746_v62  ;;  %v4842_v9 = vadd.f32 1e-05, %v747_v63  ;;  %6146 = vst [vmem:[#allocation26_spill] sm:$0xff] %v4890_v55  ;;  %v547_v62 = vld [vmem:[%s4685_s2 + $0xd0] sm:$0xff]  ;;  %v615_v63 = vadd.f32 %v614_v27, %v4871_v36  ;;  %v674_v26 = vmul.f32 %v4890_v55, %v4890_v55 }
  0xa4   : > { %v4905_v10 = vadd.f32 %v547_v62, %v515_v58  ;;  %v629_v44 = vadd.f32 %v628_v0, %v4892_v56  ;;  %v3554_v27 = vor.u32 %v3978_v34, %v3551_v37  ;;  %v520_v58 = vld [vmem:[%s4677_s27 + $0xf8] sm:$0xff]  ;;  %v3677_v0 = vld [vmem:[#allocation7 + $0x1e8] sm:$0xf]  ;;  %v3550_v21 = vor.u32 %v3980_v6, %v3549_v59  ;;  %v519_v37 = vld [vmem:[%s4677_s27 + $0xf0] sm:$0xff]  ;;  %s4390_s27 = sshra.s32 %s3270_s20, 4  ;;  %s4391_s27 = int_to_ptr.hbm [resolvable:$true] %s4390_s27 }
  0xa5   : > { %4180 = vrsqrt.f32 %v4840_v8  ;;  %vm760_vm1 = vweird.f32 %v4840_v8  ;;  %vm770_vm2 = vweird.f32 %v4842_v9  ;;  %v616_v25 = vadd.f32 %v615_v63, %v4890_v55  ;;  %v4012_v34 = vld [vmem:[#allocation7 + $0x1f4] sm:$0xf0]  ;;  %s4392_s3 = scalar_lea.hbm %s4391_s27, 256  ;;  %p4397_p2 = scmp.lt.s32.totalorder %s4391_s27, %s6083_s10 }
  0xa6   : > { %4182 = vrsqrt.f32 %v4842_v9  ;;  %v3682_v63 = vor.u32 %v4010_v46, %v3679_v52  ;;  %1601 = vmatpush.bf16.msrb.mxu2 %v3554_v27  ;;  %v552_v46 = vld [vmem:[%s4685_s2 + $0xf8] sm:$0xff]  ;;  %1503 = vmatpush.bf16.msrb.mxu0 %v3550_v21  ;;  %v710_v27 = vadd.f32 %v709_v28, %v672_v14  ;;  %v722_v59 = vadd.f32 %v721_v57, %v671_v2  ;;  %p4393_p1 = scmp.ne.s32.totalorder %s4391_s27, %s4392_s3  ;;  %p4398_p9 = scmp.lt.s32.totalorder %s4396_s19, %s4392_s3 }
  0xa7   : > { %v617_v51 = vadd.f32 %v616_v25, %v4905_v10  ;;  %v551_v25 = vld [vmem:[%s4685_s2 + $0xf0] sm:$0xff]  ;;  %v678_v28 = vmul.f32 %v4924_v41, %v4924_v41 }
  0xa8   : > { %1650 = vmatpush.bf16.msrb.mxu3 %v3682_v63  ;;  %v4940_v52 = vadd.f32 %v551_v25, %v519_v37  ;;  %v723_v2 = vadd.f32 %v722_v59, %v673_v15  ;;  %v4984_v15 = vld [vmem:[%s6079_s6] sm:$0x3]  ;;  %p4394_p4 = pnand %p4393_p1, %p4612_p0  ;;  %p4399_p7 = por %p4398_p9, %p4397_p2 }
  0xa9   : > { %v618_v40 = vadd.f32 %v617_v51, %v4924_v41 }
  0xaa   : > { %p4395_p8 = pneg %p4394_p4 }
  0xab   : > { %v4902_v3 = vpop.eup %4180  ;;  %v619_v63 = vadd.f32 %v618_v40, %v4940_v52 }
  0xac   : > { %v4913_v16 = vpop.eup %4182  ;;  %v755_v19 = vmul.f32 %v4902_v3, %v4840_v8  ;;  %vm761_vm3 = vweird.f32 %v4902_v3  ;;  %v3974_v8 = vld [vmem:[#allocation7 + $0xcc] sm:$0xf]  ;;  %p4400_p10 = pnand %p4399_p7, %p4395_p8 }
  0xad   : > { %v765_v33 = vmul.f32 %v4913_v16, %v4842_v9  ;;  %vm771_vm4 = vweird.f32 %v4913_v16  ;;  %vm4951_vm5 = vmor %vm760_vm1, %vm761_vm3  ;;  %v680_v9 = vmul.f32 %v4940_v52, %v4940_v52 }
  0xae   : > { %v756_v45 = vmul.f32 %v4902_v3, %v755_v19  ;;  %v630_v19 = vadd.f32 %v629_v44, %v4907_v11  ;;  %v4943_v44 = vadd.f32 %v552_v46, %v520_v58  ;;  %v675_v58 = vmul.f32 %v4892_v56, %v4892_v56  ;;  %vm4963_vm6 = vmor %vm770_vm2, %vm771_vm4 }
  0xaf   : > { %v766_v62 = vmul.f32 %v4913_v16, %v765_v33  ;;  %v3678_v33 = vor.u32 %v4012_v34, %v3677_v0  ;;  %v711_v0 = vadd.f32 %v710_v27, %v674_v26 }
  0xb0   : > { %v757_v20 = vmul.f32 0.5, %v756_v45  ;;  %v631_v55 = vadd.f32 %v630_v19, %v4926_v42  ;;  %v676_v45 = vmul.f32 %v4905_v10, %v4905_v10  ;;  %v724_v37 = vadd.f32 %v723_v2, %v675_v58 }
  0xb1   : > { %v767_v50 = vmul.f32 0.5, %v766_v62  ;;  %1552 = vmatpush.bf16.msrb.mxu1 %v3678_v33 }
  0xb2   : > { %v758_v32 = vsub.f32 1.5, %v757_v20  ;;  %v632_v14 = vadd.f32 %v631_v55, %v4943_v44  ;;  %v620_v20 = vrot.slane %v619_v63, 4  ;;  %v712_v21 = vadd.f32 %v711_v0, %v676_v45  ;;  %v4006_v0 = vld [vmem:[#allocation7 + $0x1cc] sm:$0xf] }
  0xb3   : > { %v768_v62 = vsub.f32 1.5, %v767_v50  ;;  %v679_v50 = vmul.f32 %v4926_v42, %v4926_v42 }
  0xb4   : > { %v759_v6 = vmul.f32 %v4902_v3, %v758_v32  ;;  %v677_v32 = vmul.f32 %v4907_v11, %v4907_v11  ;;  %v633_v57 = vrot.slane %v632_v14, 4  ;;  %v621_v34 = vadd.f32 %v620_v20, %v619_v63  ;;  %v3533_v20 = vld [vmem:[#allocation7 + $0xc8] sm:$0xf] }
  0xb5   : > { %v769_v19 = vmul.f32 %v4913_v16, %v768_v62  ;;  %v713_v33 = vadd.f32 %v712_v21, %v678_v28  ;;  %v681_v62 = vmul.f32 %v4943_v44, %v4943_v44  ;;  %v4008_v21 = vld [vmem:[#allocation7 + $0x1d4] sm:$0xf0] }
  0xb6   : > { %v763_v55 = vsel %vm4951_vm5, %v4902_v3, %v759_v6  ;;  %v634_v40 = vadd.f32 %v633_v57, %v632_v14  ;;  %v725_v46 = vadd.f32 %v724_v37, %v677_v32  ;;  %v3535_v14 = vld [vmem:[#allocation7 + $0xd8] sm:$0xf0]  ;;  %v3976_v57 = vld [vmem:[#allocation7 + $0xd4] sm:$0xf0] }
  0xb7   : > { %v773_v26 = vsel %vm4963_vm6, %v4913_v16, %v769_v19  ;;  %v714_v45 = vadd.f32 %v713_v33, %v680_v9  ;;  %v622_v16 = vrot.slane %v621_v34, 2  ;;  %v3538_v28 = vor.u32 %v3974_v8, %v3535_v14  ;;  %v3663_v19 = vld [vmem:[#allocation7 + $0x1d8] sm:$0xf0]  ;;  %v3661_v9 = vld [vmem:[#allocation7 + $0x1c8] sm:$0xf] }
  0xb8   : > { %v798_v25 = vrot.slane %v773_v26, 7  ;;  %v635_v51 = vrot.slane %v634_v40, 2  ;;  %v726_v58 = vadd.f32 %v725_v46, %v679_v50  ;;  %v3666_v33 = vor.u32 %v4006_v0, %v3663_v19 }
  0xb9   : > { %v715_v63 = vrot.slane %v714_v45, 4  ;;  %1602 = vmatpush.bf16.msrb.mxu2 %v3538_v28 }
  0xba   : > { %v801_v3 = vsel %vm800_vm7, %v763_v55, %v798_v25  ;;  %v623_v55 = vadd.f32 %v622_v16, %v621_v34  ;;  %v727_v37 = vadd.f32 %v726_v58, %v681_v62  ;;  %v5003_v25 = vld [vmem:[%s6080_s7] sm:$0x3]  ;;  %v636_v46 = vadd.f32 %v635_v51, %v634_v40  ;;  %1651 = vmatpush.bf16.msrb.mxu3 %v3666_v33 }
  0xbb   : > { %v805_v27 = vmul.f32 %v801_v3, %v4984_v15  ;;  %v716_v26 = vadd.f32 %v715_v63, %v714_v45  ;;  %v3534_v3 = vor.u32 %v3976_v57, %v3533_v20 }
  0xbc   : > { %v624_v45 = vrot.slane %v623_v55, 1  ;;  %v637_v51 = vrot.slane %v636_v46, 1 }
  0xbd   : > { %v4992_v59 = vperm.slane %v805_v27, 0  ;;  %v4994_v6 = vperm.slane %v805_v27, 1  ;;  %v717_v16 = vrot.slane %v716_v26, 2  ;;  %1504 = vmatpush.bf16.msrb.mxu0 %v3534_v3  ;;  %v3517_v3 = vld [vmem:[#allocation7 + $0xa8] sm:$0xf] }
  0xbe   : > { %v638_v20 = vadd.f32 %v637_v51, %v636_v46 }
  0xbf   : > { %v817_v32 = vmul.f32 %v4992_v59, %v4818_v38  ;;  %v818_v2 = vmul.f32 %v4994_v6, %v4821_v39  ;;  %v833_v38 = vmul.f32 %v4992_v59, %v4715_v43  ;;  %v3662_v39 = vor.u32 %v4008_v21, %v3661_v9 }
  0xc0   : > { %v835_v34 = vmul.f32 %v4992_v59, %v4722_v48  ;;  %v834_v63 = vmul.f32 %v4994_v6, %v4720_v47  ;;  %v836_v40 = vmul.f32 %v4994_v6, %v4724_v49  ;;  %v728_v43 = vrot.slane %v727_v37, 4 }
  0xc1   : > { %v825_v50 = vrot.slane %v818_v2, 7  ;;  %1553 = vmatpush.bf16.msrb.mxu1 %v3662_v39  ;;  %v625_v48 = vadd.f32 %v624_v45, %v623_v55  ;;  %v718_v14 = vadd.f32 %v717_v16, %v716_v26  ;;  %v837_v55 = vmul.f32 %v4992_v59, %v4728_v53  ;;  %v3970_v26 = vld [vmem:[#allocation7 + $0xac] sm:$0xf]  ;;  %v3972_v39 = vld [vmem:[#allocation7 + $0xb4] sm:$0xf0] }
  0xc2   : > { %v729_v28 = vadd.f32 %v728_v43, %v727_v37  ;;  %v3519_v37 = vld [vmem:[#allocation7 + $0xb8] sm:$0xf0]  ;;  %v5049_v33 = vmul.f32 %v4815_v35, %v638_v20  ;;  %v839_v16 = vmul.f32 %v4992_v59, %v4738_v60  ;;  %v838_v53 = vmul.f32 %v4994_v6, %v4730_v54  ;;  %v4004_v43 = vld [vmem:[#allocation7 + $0x1b4] sm:$0xf0] }
  0xc3   : > { %v827_v27 = vsel %vm800_vm7, %v817_v32, %v825_v50  ;;  %v5040_v57 = vmul.f32 %v4815_v35, %v625_v48  ;;  %v719_v9 = vrot.slane %v718_v14, 1  ;;  %v4002_v50 = vld [vmem:[#allocation7 + $0x1ac] sm:$0xf]  ;;  %v3522_v46 = vor.u32 %v3970_v26, %v3519_v37 }
  0xc4   : > { %v831_v62 = vsub.f32 %v5003_v25, %v827_v27  ;;  %v730_v21 = vrot.slane %v729_v28, 2  ;;  %v840_v51 = vmul.f32 %v4994_v6, %v4740_v61  ;;  %v741_v60 = vmul.f32 %v5049_v33, %v5049_v33 }
  0xc5   : > { %v720_v27 = vadd.f32 %v719_v9, %v718_v14  ;;  %v740_v45 = vmul.f32 %v5040_v57, %v5040_v57  ;;  %1603 = vmatpush.bf16.msrb.mxu2 %v3522_v46 }
  0xc6   : > { %v5015_v58 = vperm.slane %v831_v62, 0  ;;  %v5017_v8 = vperm.slane %v831_v62, 1 }
  0xc8   : > { %v5020_v0 = vadd.f32 %v5015_v58, %v833_v38  ;;  %v5023_v19 = vadd.f32 %v5015_v58, %v835_v34  ;;  %v5026_v47 = vadd.f32 %v5017_v8, %v834_v63  ;;  %v5029_v49 = vadd.f32 %v5017_v8, %v836_v40  ;;  %v3647_v38 = vld [vmem:[#allocation7 + $0x1b8] sm:$0xf0]  ;;  %v3645_v40 = vld [vmem:[#allocation7 + $0x1a8] sm:$0xf] }
  0xc9   : > { %v731_v34 = vadd.f32 %v730_v21, %v729_v28  ;;  %v3650_v62 = vor.u32 %v4002_v50, %v3647_v38  ;;  %v3518_v63 = vor.u32 %v3972_v39, %v3517_v3  ;;  %v3646_v48 = vor.u32 %v4004_v43, %v3645_v40  ;;  %v3501_v40 = vld [vmem:[#allocation7 + $0x88] sm:$0xf]  ;;  %v3968_v43 = vld [vmem:[#allocation7 + $0x94] sm:$0xf0] }
  0xca   : > { %v5033_v32 = vpack.c.bf16 %v5023_v19, %v5020_v0  ;;  %v5037_v2 = vpack.c.bf16 %v5029_v49, %v5026_v47  ;;  %v736_v28 = vmul.f32 %v720_v27, %v4815_v35  ;;  %v5063_v9 = vadd.f32 %v5015_v58, %v837_v55 }
  0xcb   : > { %v732_v14 = vrot.slane %v731_v34, 1  ;;  %1652 = vmatpush.bf16.msrb.mxu3 %v3650_v62  ;;  %1505 = vmatpush.bf16.msrb.mxu0 %v3518_v63  ;;  %v5066_v21 = vadd.f32 %v5015_v58, %v839_v16  ;;  %v5069_v61 = vadd.f32 %v5017_v8, %v838_v53  ;;  %v5072_v26 = vadd.f32 %v5017_v8, %v840_v51  ;;  %v3998_v16 = vld [vmem:[#allocation7 + $0x18c] sm:$0xf]  ;;  %v3631_v63 = vld [vmem:[#allocation7 + $0x198] sm:$0xf0] }
  0xcc   : > { %1315 = vmatmul.bf16.vlgmr.msra.gmra.mxu0 %v5033_v32  ;;  %1364 = vmatmul.bf16.vlgmr.msra.gmra.mxu1 %v5037_v2  ;;  %v744_v54 = vsub.f32 %v736_v28, %v740_v45  ;;  %v3503_v45 = vld [vmem:[#allocation7 + $0x98] sm:$0xf0]  ;;  %v841_v51 = vmul.f32 %v4992_v59, %v4748_v4  ;;  %v3629_v28 = vld [vmem:[#allocation7 + $0x188] sm:$0xf] }
  0xcd   : > { %1413 = vmatmul.bf16.vlgmr.msra.gmra.mxu2 %v5033_v32  ;;  %1462 = vmatmul.bf16.vlgmr.msra.gmra.mxu3 %v5037_v2  ;;  %v733_v20 = vadd.f32 %v732_v14, %v731_v34  ;;  %6151 = vst [vmem:[#allocation27_spill] sm:$0xff] %v5072_v26  ;;  %v5077_v3 = vpack.c.bf16 %v5066_v21, %v5063_v9  ;;  %v3966_v34 = vld [vmem:[#allocation7 + $0x8c] sm:$0xf] }
  0xce   : > { %1554 = vmatpush.bf16.msrb.mxu1 %v3646_v48  ;;  %v748_v50 = vmax.f32 %v744_v54, 0.0  ;;  %v5081_v55 = vpack.c.bf16 %v5072_v26, %v5069_v61  ;;  %v3506_v62 = vor.u32 %v3966_v34, %v3503_v45  ;;  %v3634_v48 = vor.u32 %v3998_v16, %v3631_v63 }
  0xcf   : > { %v737_v37 = vmul.f32 %v733_v20, %v4815_v35  ;;  %v3502_v14 = vor.u32 %v3968_v43, %v3501_v40  ;;  %v4000_v20 = vld [vmem:[#allocation7 + $0x194] sm:$0xf0]  ;;  %v843_v54 = vmul.f32 %v4992_v59, %v4758_v12  ;;  %v5100_v16 = vadd.f32 %v5015_v58, %v841_v51 }
  0xd0   : > { %v752_v38 = vadd.f32 1e-05, %v748_v50  ;;  %v844_v50 = vmul.f32 %v4994_v6, %v4760_v13  ;;  %1604 = vmatpush.bf16.msrb.mxu2 %v3506_v62  ;;  %1653 = vmatpush.bf16.msrb.mxu3 %v3634_v48 }
  0xd1   : > { %v745_v46 = vsub.f32 %v737_v37, %v741_v60  ;;  %v842_v37 = vmul.f32 %v4994_v6, %v4750_v5  ;;  %1506 = vmatpush.bf16.msrb.mxu0 %v3502_v14  ;;  %v5103_v12 = vadd.f32 %v5015_v58, %v843_v54  ;;  %v3487_v54 = vld [vmem:[#allocation7 + $0x78] sm:$0xf0]  ;;  %v3964_v14 = vld [vmem:[#allocation7 + $0x74] sm:$0xf0] }
  0xd2   : > { %4184 = vrsqrt.f32 %v752_v38  ;;  %v5109_v13 = vadd.f32 %v5017_v8, %v844_v50  ;;  %vm780_vm8 = vweird.f32 %v752_v38 }
  0xd3   : > { %v749_v39 = vmax.f32 %v745_v46, 0.0  ;;  %v3630_v46 = vor.u32 %v4000_v20, %v3629_v28  ;;  %v5106_v5 = vadd.f32 %v5017_v8, %v842_v37  ;;  %v5114_v43 = vpack.c.bf16 %v5103_v12, %v5100_v16  ;;  %v3994_v37 = vld [vmem:[#allocation7 + $0x16c] sm:$0xf] }
  0xd4   : > { %6153 = vst [vmem:[#allocation29_spill] sm:$0xff] %v5109_v13 }
  0xd5   : > { %v753_v27 = vadd.f32 1e-05, %v749_v39  ;;  %1555 = vmatpush.bf16.msrb.mxu1 %v3630_v46  ;;  %6152 = vst [vmem:[#allocation28_spill] sm:$0xff] %v5106_v5  ;;  %v5118_v51 = vpack.c.bf16 %v5109_v13, %v5106_v5 }
  0xd7   : > { %4186 = vrsqrt.f32 %v753_v27  ;;  %vm790_vm10 = vweird.f32 %v753_v27 }
  0xd8   : > { %v5087_v53 = vpop.eup %4184 }
  0xd9   : > { %v775_v60 = vmul.f32 %v5087_v53, %v752_v38  ;;  %vm781_vm9 = vweird.f32 %v5087_v53 }
  0xda   : > { %vm5121_vm12 = vmor %vm780_vm8, %vm781_vm9 }
  0xdb   : > { %v776_v4 = vmul.f32 %v5087_v53, %v775_v60  ;;  %v3962_v60 = vld [vmem:[#allocation7 + $0x6c] sm:$0xf] }
  0xdc   : > { %1320 = vmatmul.bf16.gmra.mxu0 %v5077_v3  ;;  %1369 = vmatmul.bf16.gmra.mxu1 %v5081_v55  ;;  %v3490_v46 = vor.u32 %v3962_v60, %v3487_v54 }
  0xdd   : > { %1418 = vmatmul.bf16.gmra.mxu2 %v5077_v3  ;;  %1467 = vmatmul.bf16.gmra.mxu3 %v5081_v55  ;;  %v4187_v39 = vpop.eup %4186  ;;  %v777_v34 = vmul.f32 0.5, %v776_v4  ;;  %v3615_v4 = vld [vmem:[#allocation7 + $0x178] sm:$0xf0] }
  0xde   : > { %v785_v45 = vmul.f32 %v4187_v39, %v753_v27  ;;  %vm791_vm11 = vweird.f32 %v4187_v39  ;;  %1605 = vmatpush.bf16.msrb.mxu2 %v3490_v46 }
  0xdf   : > { %v778_v62 = vsub.f32 1.5, %v777_v34  ;;  %vm792_vm13 = vmor %vm790_vm10, %vm791_vm11  ;;  %v3485_v34 = vld [vmem:[#allocation7 + $0x68] sm:$0xf] }
  0xe0   : > { %v786_v63 = vmul.f32 %v4187_v39, %v785_v45  ;;  %v845_v45 = vmul.f32 %v4992_v59, %v4775_v23 }
  0xe1   : > { %v779_v48 = vmul.f32 %v5087_v53, %v778_v62  ;;  %v847_v62 = vmul.f32 %v4992_v59, %v4785_v30 }
  0xe2   : > { %v787_v40 = vmul.f32 0.5, %v786_v63  ;;  %v846_v63 = vmul.f32 %v4994_v6, %v4777_v24  ;;  %v5147_v59 = vadd.f32 %v5015_v58, %v845_v45 }
  0xe3   : > { %v783_v27 = vsel %vm5121_vm12, %v5087_v53, %v779_v48  ;;  %v3613_v53 = vld [vmem:[#allocation7 + $0x168] sm:$0xf]  ;;  %v848_v48 = vmul.f32 %v4994_v6, %v4787_v31  ;;  %v5150_v60 = vadd.f32 %v5015_v58, %v847_v62  ;;  %v6158_v62 = vld [vmem:[#allocation25_spill] sm:$0xff] }
  0xe4   : > { %v788_v38 = vsub.f32 1.5, %v787_v40  ;;  %v3618_v40 = vor.u32 %v3994_v37, %v3615_v4  ;;  %v5153_v31 = vadd.f32 %v5017_v8, %v846_v63  ;;  %v6159_v63 = vld [vmem:[#allocation26_spill] sm:$0xff] }
  0xe5   : > { %v5156_v6 = vadd.f32 %v5017_v8, %v848_v48  ;;  %v5164_v37 = vpack.c.bf16 %v5150_v60, %v5147_v59 }
  0xe6   : > { %v789_v28 = vmul.f32 %v4187_v39, %v788_v38  ;;  %1654 = vmatpush.bf16.msrb.mxu3 %v3618_v40  ;;  %6156 = vst [vmem:[#allocation30_spill] sm:$0xff] %v5153_v31 }
  0xe7   : > { %6157 = vst [vmem:[#allocation31_spill] sm:$0xff] %v5156_v6  ;;  %v5168_v58 = vpack.c.bf16 %v5156_v6, %v5153_v31  ;;  %v4031_v31 = vld [vmem:[#allocation10 + $0x94] sm:$0xf] }
  0xe8   : > { %v793_v20 = vsel %vm792_vm13, %v4187_v39, %v789_v28  ;;  %v3996_v39 = vld [vmem:[#allocation7 + $0x174] sm:$0xf0]  ;;  %v3486_v28 = vor.u32 %v3964_v14, %v3485_v34 }
  0xe9   : > { %v799_v50 = vrot.slane %v793_v20, 7  ;;  %v3614_v20 = vor.u32 %v3996_v39, %v3613_v53 }
  0xea   : > { %1507 = vmatpush.bf16.msrb.mxu0 %v3486_v28  ;;  %v3469_v28 = vld [vmem:[#allocation7 + $0x48] sm:$0xf] }
  0xeb   : > { %v802_v38 = vsel %vm800_vm7, %v783_v27, %v799_v50  ;;  %1556 = vmatpush.bf16.msrb.mxu1 %v3614_v20  ;;  %v3960_v20 = vld [vmem:[#allocation7 + $0x54] sm:$0xf0] }
  0xec   : > { %1325 = vmatmul.bf16.gmra.mxu0 %v5114_v43  ;;  %1374 = vmatmul.bf16.gmra.mxu1 %v5118_v51  ;;  %v806_v23 = vmul.f32 %v802_v38, %v4984_v15  ;;  %v3599_v38 = vld [vmem:[#allocation7 + $0x158] sm:$0xf0] }
  0xed   : > { %1423 = vmatmul.bf16.gmra.mxu2 %v5114_v43  ;;  %1472 = vmatmul.bf16.gmra.mxu3 %v5118_v51 }
  0xee   : > { %v5142_v30 = vperm.slane %v806_v23, 0  ;;  %v5144_v24 = vperm.slane %v806_v23, 1 }
  0xf0   : > { %v819_v15 = vmul.f32 %v5142_v30, %v5040_v57  ;;  %v820_v27 = vmul.f32 %v5144_v24, %v5049_v33  ;;  %v849_v8 = vmul.f32 %v5142_v30, %v4849_v17  ;;  %v851_v57 = vmul.f32 %v5142_v30, %v4851_v18 }
  0xf1   : > { %v850_v33 = vmul.f32 %v5144_v24, %v4833_v1  ;;  %v852_v4 = vmul.f32 %v5144_v24, %v4838_v7  ;;  %v853_v34 = vmul.f32 %v5142_v30, %v4858_v22  ;;  %v855_v45 = vmul.f32 %v5142_v30, %v4871_v36  ;;  %v3958_v7 = vld [vmem:[#allocation7 + $0x4c] sm:$0xf]  ;;  %v3471_v22 = vld [vmem:[#allocation7 + $0x58] sm:$0xf0] }
  0xf2   : > { %v826_v54 = vrot.slane %v820_v27, 7  ;;  %v854_v17 = vmul.f32 %v5144_v24, %v4864_v29  ;;  %v3990_v36 = vld [vmem:[#allocation7 + $0x14c] sm:$0xf]  ;;  %v857_v29 = vmul.f32 %v5142_v30, %v6159_v63  ;;  %v859_v40 = vmul.f32 %v5142_v30, %v4905_v10 }
  0xf3   : > { %v861_v63 = vmul.f32 %v5142_v30, %v4924_v41  ;;  %v862_v41 = vmul.f32 %v5144_v24, %v4926_v42  ;;  %v3950_v42 = vld [vmem:[#allocation7 + $0xc] sm:$0xf] }
  0xf4   : > { %v828_v50 = vsel %vm800_vm7, %v819_v15, %v826_v54  ;;  %v3597_v54 = vld [vmem:[#allocation7 + $0x148] sm:$0xf] }
  0xf5   : > { %v832_v46 = vsub.f32 %v5003_v25, %v828_v50  ;;  %v856_v25 = vmul.f32 %v5144_v24, %v6158_v62  ;;  %v3992_v50 = vld [vmem:[#allocation7 + $0x154] sm:$0xf0] }
  0xf7   : > { %v869_v1 = vperm.slane %v832_v46, 0  ;;  %v5190_v18 = vperm.slane %v832_v46, 1  ;;  %v3602_v46 = vor.u32 %v3990_v36, %v3599_v38  ;;  %v3986_v36 = vld [vmem:[#allocation7 + $0x12c] sm:$0xf]  ;;  %v3583_v38 = vld [vmem:[#allocation7 + $0x138] sm:$0xf0] }
  0xf9   : > { %v5198_v14 = vadd.f32 %v869_v1, %v849_v8  ;;  %v5200_v53 = vadd.f32 %v869_v1, %v851_v57  ;;  %v5203_v39 = vadd.f32 %v5190_v18, %v850_v33  ;;  %v5206_v48 = vadd.f32 %v5190_v18, %v852_v4  ;;  %1655 = vmatpush.bf16.msrb.mxu3 %v3602_v46  ;;  %v3988_v46 = vld [vmem:[#allocation7 + $0x134] sm:$0xf0] }
  0xfa   : > { %v5208_v23 = vadd.f32 %v869_v1, %v853_v34  ;;  %v5210_v15 = vadd.f32 %v869_v1, %v855_v45  ;;  %v5213_v27 = vadd.f32 %v5190_v18, %v854_v17  ;;  %v5216_v10 = vadd.f32 %v5190_v18, %v856_v25 }
  0xfb   : > { %6160 = vst [vmem:[#allocation25_spill] sm:$0xff] %v5198_v14  ;;  %v3474_v8 = vor.u32 %v3958_v7, %v3471_v22  ;;  %v3470_v57 = vor.u32 %v3960_v20, %v3469_v28  ;;  %v3598_v33 = vor.u32 %v3992_v50, %v3597_v54  ;;  %v5218_v4 = vadd.f32 %v869_v1, %v857_v29  ;;  %v3453_v28 = vld [vmem:[#allocation7 + $0x28] sm:$0xf]  ;;  %v3956_v20 = vld [vmem:[#allocation7 + $0x34] sm:$0xf0] }
  0xfc   : > { %1330 = vmatmul.bf16.gmra.mxu0 %v5164_v37  ;;  %1379 = vmatmul.bf16.gmra.mxu1 %v5168_v58  ;;  %6161 = vst [vmem:[#allocation26_spill] sm:$0xff] %v5200_v53  ;;  %v5220_v34 = vadd.f32 %v869_v1, %v859_v40  ;;  %v858_v45 = vmul.f32 %v5144_v24, %v4892_v56  ;;  %v3954_v56 = vld [vmem:[#allocation7 + $0x2c] sm:$0xf] }
  0xfd   : > { %1428 = vmatmul.bf16.gmra.mxu2 %v5164_v37  ;;  %1477 = vmatmul.bf16.gmra.mxu3 %v5168_v58  ;;  %6162 = vst [vmem:[#allocation32_spill] sm:$0xff] %v5203_v39  ;;  %v860_v17 = vmul.f32 %v5144_v24, %v4907_v11  ;;  %v5228_v62 = vpack.c.bf16 %v5200_v53, %v5198_v14  ;;  %v3455_v11 = vld [vmem:[#allocation7 + $0x38] sm:$0xf0] }
  0xfe   : > { %6163 = vst [vmem:[#allocation33_spill] sm:$0xff] %v5206_v48  ;;  %1606 = vmatpush.bf16.msrb.mxu2 %v3474_v8  ;;  %1508 = vmatpush.bf16.msrb.mxu0 %v3470_v57  ;;  %v5232_v25 = vpack.c.bf16 %v5206_v48, %v5203_v39  ;;  %v5235_v7 = vadd.f32 %v5190_v18, %v858_v45  ;;  %v3581_v8 = vld [vmem:[#allocation7 + $0x128] sm:$0xf]  ;;  %v3925_v39 = vld [vmem:[#allocation10 + $0x1e0] sm:$0xf] }
  0xff   : > { %6164 = vst [vmem:[#allocation34_spill] sm:$0xff] %v5208_v23  ;;  %1557 = vmatpush.bf16.msrb.mxu1 %v3598_v33  ;;  %v5238_v22 = vadd.f32 %v5190_v18, %v860_v17  ;;  %v863_v29 = vmul.f32 %v5142_v30, %v4940_v52  ;;  %v3458_v40 = vor.u32 %v3954_v56, %v3455_v11  ;;  %v4074_v48 = vld [vmem:[#allocation10 + $0x1e4] sm:$0xf0] }
 0x100   : > { %6165 = vst [vmem:[#allocation35_spill] sm:$0xff] %v5210_v15  ;;  %v3586_v54 = vor.u32 %v3986_v36, %v3583_v38  ;;  %v3454_v50 = vor.u32 %v3956_v20, %v3453_v28  ;;  %v5248_v57 = vadd.f32 %v869_v1, %v861_v63  ;;  %v3582_v45 = vor.u32 %v3988_v46, %v3581_v8  ;;  %v3567_v36 = vld [vmem:[#allocation7 + $0x118] sm:$0xf0]  ;;  %v3437_v63 = vld [vmem:[#allocation7 + $0x8] sm:$0xf] }
 0x101   : > { %6166 = vst [vmem:[#allocation36_spill] sm:$0xff] %v5213_v27  ;;  %v5250_v33 = vadd.f32 %v869_v1, %v863_v29  ;;  %v864_v52 = vmul.f32 %v5144_v24, %v4943_v44  ;;  %v5258_v30 = vpack.c.bf16 %v5210_v15, %v5208_v23  ;;  %v5262_v17 = vpack.c.bf16 %v5216_v10, %v5213_v27  ;;  %v3439_v44 = vld [vmem:[#allocation7 + $0x18] sm:$0xf0]  ;;  %v3982_v24 = vld [vmem:[#allocation7 + $0x10c] sm:$0xf] }
 0x102   : > { %6167 = vst [vmem:[#allocation37_spill] sm:$0xff] %v5216_v10  ;;  %1607 = vmatpush.bf16.msrb.mxu2 %v3458_v40  ;;  %1656 = vmatpush.bf16.msrb.mxu3 %v3586_v54  ;;  %v5265_v1 = vadd.f32 %v5190_v18, %v862_v41  ;;  %v3442_v11 = vor.u32 %v3950_v42, %v3439_v44  ;;  %v3952_v29 = vld [vmem:[#allocation7 + $0x14] sm:$0xf0]  ;;  %v3565_v28 = vld [vmem:[#allocation7 + $0x108] sm:$0xf] }
 0x103   : > { %6168 = vst [vmem:[#allocation38_spill] sm:$0xff] %v5218_v4  ;;  %1509 = vmatpush.bf16.msrb.mxu0 %v3454_v50  ;;  %1558 = vmatpush.bf16.msrb.mxu1 %v3582_v45  ;;  %v5268_v56 = vadd.f32 %v5190_v18, %v864_v52  ;;  %v3570_v40 = vor.u32 %v3982_v24, %v3567_v36  ;;  %v3984_v18 = vld [vmem:[#allocation7 + $0x114] sm:$0xf0]  ;;  %v5298_v45 = vld [vmem:[#allocation8] sm:$0xf] }
 0x104   : > { %6169 = vst [vmem:[#allocation39_spill] sm:$0xff] %v5220_v34  ;;  %v3438_v38 = vor.u32 %v3952_v29, %v3437_v63  ;;  %v3566_v20 = vor.u32 %v3984_v18, %v3565_v28  ;;  %v5276_v54 = vpack.c.bf16 %v5220_v34, %v5218_v4  ;;  %v5280_v50 = vpack.c.bf16 %v5238_v22, %v5235_v7  ;;  %v3869_v44 = vld [vmem:[#allocation10 + $0x170] sm:$0xf]  ;;  %v4060_v24 = vld [vmem:[#allocation10 + $0x174] sm:$0xf0] }
 0x105   : > { %6170 = vst [vmem:[#allocation40_spill] sm:$0xff] %v5235_v7  ;;  %v5288_v8 = vpack.c.bf16 %v5250_v33, %v5248_v57  ;;  %v5292_v46 = vpack.c.bf16 %v5268_v56, %v5265_v1  ;;  %v1733_v41 = vperm.slane %v5298_v45, 0  ;;  %v1734_v52 = vperm.slane %v5298_v45, 1  ;;  %v4028_v63 = vld [vmem:[#allocation10 + $0x74] sm:$0xf0] }
 0x106   : > { %6171 = vst [vmem:[#allocation41_spill] sm:$0xff] %v5238_v22  ;;  %1608 = vmatpush.bf16.msrb.mxu2 %v3442_v11  ;;  %1657 = vmatpush.bf16.msrb.mxu3 %v3570_v40  ;;  %v3741_v11 = vld [vmem:[#allocation10 + $0x70] sm:$0xf]  ;;  %v3870_v36 = vor.u32 %v4060_v24, %v3869_v44  ;;  %v4076_v40 = vld [vmem:[#allocation10 + $0x1f4] sm:$0xf0] }
 0x107   : > { %6172 = vst [vmem:[#allocation42_spill] sm:$0xff] %v5248_v57  ;;  %1510 = vmatpush.bf16.msrb.mxu0 %v3438_v38  ;;  %1559 = vmatpush.bf16.msrb.mxu1 %v3566_v20  ;;  %v1741_v42 = vpack.c.bf16 %v1734_v52, %v1733_v41  ;;  %v3933_v29 = vld [vmem:[#allocation10 + $0x1f0] sm:$0xf]  ;;  %v3742_v38 = vor.u32 %v4028_v63, %v3741_v11  ;;  %v4044_v24 = vld [vmem:[#allocation10 + $0xf4] sm:$0xf0] }
 0x108   : > { %6173 = vst [vmem:[#allocation43_spill] sm:$0xff] %v5250_v33  ;;  %v3934_v28 = vor.u32 %v4076_v40, %v3933_v29  ;;  %v3805_v44 = vld [vmem:[#allocation10 + $0xf0] sm:$0xf]  ;;  %v4058_v10 = vld [vmem:[#allocation10 + $0x164] sm:$0xf0] }
 0x109   : > { %6174 = vst [vmem:[#allocation44_spill] sm:$0xff] %v5265_v1  ;;  %v1745_v18 = vunpack.c.l.b16 %v1741_v42  ;;  %v1746_v20 = vunpack.c.h.b16 %v1741_v42  ;;  %v3806_v11 = vor.u32 %v4044_v24, %v3805_v44  ;;  %v3926_v24 = vor.u32 %v4074_v48, %v3925_v39 }
 0x10a   : > { %6175 = vst [vmem:[#allocation45_spill] sm:$0xff] %v5268_v56  ;;  %2581 = vmatpush.bf16.msra.mxu2 %v3870_v36  ;;  %2630 = vmatpush.bf16.msra.mxu3 %v3934_v28 }
 0x10b   : > { %2483 = vmatpush.bf16.msra.mxu0 %v3742_v38  ;;  %v1749_v41 = vpack.c.b16 %v1745_v18, %v1745_v18  ;;  %v1750_v52 = vpack.c.b16 %v1746_v20, %v1746_v20  ;;  %2532 = vmatpush.bf16.msra.mxu1 %v3806_v11  ;;  %v3861_v20 = vld [vmem:[#allocation10 + $0x160] sm:$0xf] }
 0x10c   : > { %1335 = vmatmul.bf16.gmra.mxu0 %v5228_v62  ;;  %1384 = vmatmul.bf16.gmra.mxu1 %v5232_v25  ;;  %v3862_v27 = vor.u32 %v4058_v10, %v3861_v20 }
 0x10d   : > { %1433 = vmatmul.bf16.gmra.mxu2 %v5228_v62  ;;  %1482 = vmatmul.bf16.gmra.mxu3 %v5232_v25  ;;  %v1754_v63 = vpack.i.b16 %v1749_v41, %v1749_v41  ;;  %v1758_v29 = vpack.i.b16 %v1750_v52, %v1750_v52 }
 0x10e   : > { %2582 = vmatpush.bf16.msra.mxu2 %v3862_v27  ;;  %2631 = vmatpush.bf16.msra.mxu3 %v3926_v24 }
 0x10f   : > { %v1756_v7 = vperm.slane %v1754_v63, 0  ;;  %v1760_v18 = vperm.slane %v1758_v29, 0 }
 0x111   : > { %v5306_v41 = vunpack.c.l.bf16 %v1756_v7  ;;  %v3797_v7 = vld [vmem:[#allocation10 + $0xe0] sm:$0xf] }
 0x11c   : > { %1340 = vmatmul.bf16.gmra.mxu0 %v5258_v30  ;;  %1389 = vmatmul.bf16.gmra.mxu1 %v5262_v17 }
 0x11d   : > { %1438 = vmatmul.bf16.gmra.mxu2 %v5258_v30  ;;  %1487 = vmatmul.bf16.gmra.mxu3 %v5262_v17 }
 0x12c   : > { %1345 = vmatmul.bf16.gmra.mxu0 %v5276_v54  ;;  %1394 = vmatmul.bf16.gmra.mxu1 %v5280_v50 }
 0x12d   : > { %1443 = vmatmul.bf16.gmra.mxu2 %v5276_v54  ;;  %1492 = vmatmul.bf16.gmra.mxu3 %v5280_v50 }
 0x13c   : > { %1350 = vmatmul.bf16.gmra.mxu0 %v5288_v8  ;;  %1399 = vmatmul.bf16.gmra.mxu1 %v5292_v46 }
 0x13d   : > { %1448 = vmatmul.bf16.gmra.mxu2 %v5288_v8  ;;  %1497 = vmatmul.bf16.gmra.mxu3 %v5292_v46 }
 0x149   : > { %v1316_v56 = vpop.f32.mrf.mxu0  ;;  %v1365_v1 = vpop.f32.mrf.mxu1 }
 0x14a   : > { %v1366_v22 = vadd.f32 %v1365_v1, %v1316_v56 }
 0x14c   : > { %1511 = vmatmul.bf16.vlgmr.msrb.gmra.mxu0 %v5033_v32  ;;  %1560 = vmatmul.bf16.vlgmr.msrb.gmra.mxu1 %v5037_v2 }
 0x14d   : > { %1609 = vmatmul.bf16.vlgmr.msrb.gmra.mxu2 %v5033_v32  ;;  %1658 = vmatmul.bf16.vlgmr.msrb.gmra.mxu3 %v5037_v2  ;;  %v3733_v32 = vld [vmem:[#allocation10 + $0x60] sm:$0xf]  ;;  %v4026_v2 = vld [vmem:[#allocation10 + $0x64] sm:$0xf0] }
 0x14e   : > { %v3734_v44 = vor.u32 %v4026_v2, %v3733_v32 }
 0x150   : > { %v1414_v42 = vpop.f32.mrf.mxu2  ;;  %v1463_v36 = vpop.f32.mrf.mxu3  ;;  %2484 = vmatpush.bf16.msra.mxu0 %v3734_v44 }
 0x151   : > { %v1464_v40 = vadd.f32 %v1463_v36, %v1414_v42  ;;  %v1318_v1 = vpop.f32.mrf.mxu0  ;;  %v1367_v56 = vpop.f32.mrf.mxu1  ;;  %v5308_v36 = vunpack.c.l.bf16 %v1760_v18 }
 0x152   : > { %v1368_v38 = vadd.f32 %v1367_v56, %v1318_v1  ;;  %v4042_v56 = vld [vmem:[#allocation10 + $0xe4] sm:$0xf0] }
 0x153   : > { %v1699_v28 = vpack.c.bf16 %v1464_v40, %v1366_v22 }
 0x155   : > { %v1769_v33 = vunpack.c.l.bf16 %v1699_v28  ;;  %v1770_v42 = vunpack.c.h.bf16 %v1699_v28  ;;  %v3798_v28 = vor.u32 %v4042_v56, %v3797_v7  ;;  %v3917_v7 = vld [vmem:[#allocation10 + $0x1d0] sm:$0xf]  ;;  %v4072_v56 = vld [vmem:[#allocation10 + $0x1d4] sm:$0xf0] }
 0x157   : > { %v1837_v1 = vadd.f32 %v5306_v41, %v1769_v33  ;;  %v1838_v39 = vadd.f32 %v5308_v36, %v1770_v42  ;;  %2533 = vmatpush.bf16.msra.mxu1 %v3798_v28 }
 0x158   : > { %v1416_v52 = vpop.f32.mrf.mxu2  ;;  %v1465_v11 = vpop.f32.mrf.mxu3 }
 0x159   : > { %v1466_v22 = vadd.f32 %v1465_v11, %v1416_v52  ;;  %v1321_v63 = vpop.f32.mrf.mxu0  ;;  %v1370_v29 = vpop.f32.mrf.mxu1  ;;  %v1997_v33 = vmax.f32 %v1837_v1, 0.0  ;;  %v1998_v2 = vmax.f32 %v1838_v39, 0.0  ;;  %v4024_v1 = vld [vmem:[#allocation10 + $0x54] sm:$0xf0]  ;;  %v3918_v39 = vor.u32 %v4072_v56, %v3917_v7 }
 0x15a   : > { %v1371_v10 = vadd.f32 %v1370_v29, %v1321_v63  ;;  %v3853_v29 = vld [vmem:[#allocation10 + $0x150] sm:$0xf] }
 0x15b   : > { %v1701_v40 = vpack.c.bf16 %v1466_v22, %v1368_v38  ;;  %2632 = vmatpush.bf16.msra.mxu3 %v3918_v39 }
 0x15c   : > { %1516 = vmatmul.bf16.gmra.mxu0 %v5077_v3  ;;  %1565 = vmatmul.bf16.gmra.mxu1 %v5081_v55 }
 0x15d   : > { %v1773_v48 = vunpack.c.l.bf16 %v1701_v40  ;;  %v1774_v27 = vunpack.c.h.bf16 %v1701_v40  ;;  %1614 = vmatmul.bf16.gmra.mxu2 %v5077_v3  ;;  %1663 = vmatmul.bf16.gmra.mxu3 %v5081_v55  ;;  %v4056_v40 = vld [vmem:[#allocation10 + $0x154] sm:$0xf0] }
 0x15f   : > { %v1841_v18 = vadd.f32 %v5306_v41, %v1773_v48  ;;  %v1842_v38 = vadd.f32 %v5308_v36, %v1774_v27  ;;  %v3725_v48 = vld [vmem:[#allocation10 + $0x50] sm:$0xf]  ;;  %v3854_v27 = vor.u32 %v4056_v40, %v3853_v29  ;;  %v4040_v29 = vld [vmem:[#allocation10 + $0xd4] sm:$0xf0] }
 0x160   : > { %v1419_v20 = vpop.f32.mrf.mxu2  ;;  %v1468_v32 = vpop.f32.mrf.mxu3  ;;  %v3726_v28 = vor.u32 %v4024_v1, %v3725_v48 }
 0x161   : > { %v2001_v44 = vmax.f32 %v1841_v18, 0.0  ;;  %v2002_v24 = vmax.f32 %v1842_v38, 0.0  ;;  %v1469_v52 = vadd.f32 %v1468_v32, %v1419_v20  ;;  %v1323_v11 = vpop.f32.mrf.mxu0  ;;  %v1372_v42 = vpop.f32.mrf.mxu1  ;;  %2583 = vmatpush.bf16.msra.mxu2 %v3854_v27 }
 0x162   : > { %v1373_v3 = vadd.f32 %v1372_v42, %v1323_v11  ;;  %2485 = vmatpush.bf16.msra.mxu0 %v3726_v28 }
 0x163   : > { %v5318_v22 = vpack.c.bf16 %v2001_v44, %v1997_v33  ;;  %v5320_v55 = vpack.c.bf16 %v2002_v24, %v1998_v2  ;;  %v1703_v63 = vpack.c.bf16 %v1469_v52, %v1371_v10 }
 0x165   : > { %v1777_v18 = vunpack.c.l.bf16 %v1703_v63  ;;  %v1778_v32 = vunpack.c.h.bf16 %v1703_v63  ;;  %v3789_v63 = vld [vmem:[#allocation10 + $0xd0] sm:$0xf] }
 0x166   : > { %v3790_v48 = vor.u32 %v4040_v29, %v3789_v63  ;;  %v4022_v63 = vld [vmem:[#allocation10 + $0x44] sm:$0xf0]  ;;  %v3909_v29 = vld [vmem:[#allocation10 + $0x1c0] sm:$0xf] }
 0x167   : > { %v1845_v24 = vadd.f32 %v5306_v41, %v1777_v18  ;;  %v1846_v40 = vadd.f32 %v5308_v36, %v1778_v32 }
 0x168   : > { %v1421_v38 = vpop.f32.mrf.mxu2  ;;  %v1470_v20 = vpop.f32.mrf.mxu3  ;;  %2534 = vmatpush.bf16.msra.mxu1 %v3790_v48  ;;  %v4070_v48 = vld [vmem:[#allocation10 + $0x1c4] sm:$0xf0] }
 0x169   : > { %v1471_v11 = vadd.f32 %v1470_v20, %v1421_v38  ;;  %v1326_v33 = vpop.f32.mrf.mxu0  ;;  %v1375_v44 = vpop.f32.mrf.mxu1  ;;  %v2005_v56 = vmax.f32 %v1845_v24, 0.0 }
 0x16a   : > { %v1376_v10 = vadd.f32 %v1375_v44, %v1326_v33  ;;  %v3845_v44 = vld [vmem:[#allocation10 + $0x140] sm:$0xf] }
 0x16b   : > { %v1705_v2 = vpack.c.bf16 %v1471_v11, %v1373_v3 }
 0x16c   : > { %1521 = vmatmul.bf16.gmra.mxu0 %v5114_v43  ;;  %1570 = vmatmul.bf16.gmra.mxu1 %v5118_v51 }
 0x16d   : > { %v1781_v52 = vunpack.c.l.bf16 %v1705_v2  ;;  %v1782_v42 = vunpack.c.h.bf16 %v1705_v2  ;;  %1619 = vmatmul.bf16.gmra.mxu2 %v5114_v43  ;;  %1668 = vmatmul.bf16.gmra.mxu3 %v5118_v51  ;;  %v2006_v43 = vmax.f32 %v1846_v40, 0.0  ;;  %v4054_v2 = vld [vmem:[#allocation10 + $0x144] sm:$0xf0] }
 0x16f   : > { %v1849_v27 = vadd.f32 %v5306_v41, %v1781_v52  ;;  %v1850_v3 = vadd.f32 %v5308_v36, %v1782_v42  ;;  %v3717_v52 = vld [vmem:[#allocation10 + $0x40] sm:$0xf]  ;;  %v3846_v42 = vor.u32 %v4054_v2, %v3845_v44 }
 0x170   : > { %v1424_v1 = vpop.f32.mrf.mxu2  ;;  %v1473_v7 = vpop.f32.mrf.mxu3  ;;  %v3718_v24 = vor.u32 %v4022_v63, %v3717_v52 }
 0x171   : > { %v1474_v28 = vadd.f32 %v1473_v7, %v1424_v1  ;;  %v1328_v39 = vpop.f32.mrf.mxu0  ;;  %v1377_v18 = vpop.f32.mrf.mxu1  ;;  %v2009_v38 = vmax.f32 %v1849_v27, 0.0  ;;  %v2010_v20 = vmax.f32 %v1850_v3, 0.0  ;;  %v3910_v1 = vor.u32 %v4070_v48, %v3909_v29  ;;  %2584 = vmatpush.bf16.msra.mxu2 %v3846_v42 }
 0x172   : > { %v1378_v51 = vadd.f32 %v1377_v18, %v1328_v39  ;;  %2486 = vmatpush.bf16.msra.mxu0 %v3718_v24 }
 0x173   : > { %v1707_v11 = vpack.c.bf16 %v1474_v28, %v1376_v10  ;;  %v5330_v33 = vpack.c.bf16 %v2009_v38, %v2005_v56  ;;  %v5332_v32 = vpack.c.bf16 %v2010_v20, %v2006_v43  ;;  %2633 = vmatpush.bf16.msra.mxu3 %v3910_v1  ;;  %v3781_v20 = vld [vmem:[#allocation10 + $0xc0] sm:$0xf] }
 0x175   : > { %v1785_v7 = vunpack.c.l.bf16 %v1707_v11  ;;  %v1786_v40 = vunpack.c.h.bf16 %v1707_v11 }
 0x177   : > { %v1853_v18 = vadd.f32 %v5306_v41, %v1785_v7  ;;  %v1854_v11 = vadd.f32 %v5308_v36, %v1786_v40 }
 0x178   : > { %v1426_v57 = vpop.f32.mrf.mxu2  ;;  %v1475_v27 = vpop.f32.mrf.mxu3 }
 0x179   : > { %v1476_v3 = vadd.f32 %v1475_v27, %v1426_v57  ;;  %v1331_v10 = vpop.f32.mrf.mxu0  ;;  %v1380_v56 = vpop.f32.mrf.mxu1  ;;  %v4038_v57 = vld [vmem:[#allocation10 + $0xc4] sm:$0xf0]  ;;  %v2013_v63 = vmax.f32 %v1853_v18, 0.0 }
 0x17a   : > { %v1381_v28 = vadd.f32 %v1380_v56, %v1331_v10  ;;  %v3782_v44 = vor.u32 %v4038_v57, %v3781_v20  ;;  %v3837_v10 = vld [vmem:[#allocation10 + $0x130] sm:$0xf]  ;;  %v4052_v56 = vld [vmem:[#allocation10 + $0x134] sm:$0xf0] }
 0x17b   : > { %v1709_v39 = vpack.c.bf16 %v1476_v3, %v1378_v51  ;;  %v3901_v20 = vld [vmem:[#allocation10 + $0x1b0] sm:$0xf]  ;;  %v4068_v57 = vld [vmem:[#allocation10 + $0x1b4] sm:$0xf0] }
 0x17c   : > { %1526 = vmatmul.bf16.gmra.mxu0 %v5164_v37  ;;  %1575 = vmatmul.bf16.gmra.mxu1 %v5168_v58 }
 0x17d   : > { %v1789_v38 = vunpack.c.l.bf16 %v1709_v39  ;;  %v1790_v43 = vunpack.c.h.bf16 %v1709_v39  ;;  %1624 = vmatmul.bf16.gmra.mxu2 %v5164_v37  ;;  %1673 = vmatmul.bf16.gmra.mxu3 %v5168_v58  ;;  %v2014_v37 = vmax.f32 %v1854_v11, 0.0  ;;  %v3709_v39 = vld [vmem:[#allocation10 + $0x30] sm:$0xf] }
 0x17e   : > { %2535 = vmatpush.bf16.msra.mxu1 %v3782_v44  ;;  %v3902_v44 = vor.u32 %v4068_v57, %v3901_v20 }
 0x17f   : > { %v1857_v2 = vadd.f32 %v5306_v41, %v1789_v38  ;;  %v1858_v51 = vadd.f32 %v5308_v36, %v1790_v43  ;;  %v3838_v38 = vor.u32 %v4052_v56, %v3837_v10  ;;  %v4020_v43 = vld [vmem:[#allocation10 + $0x34] sm:$0xf0] }
 0x180   : > { %v1429_v52 = vpop.f32.mrf.mxu2  ;;  %v1478_v42 = vpop.f32.mrf.mxu3  ;;  %v3710_v18 = vor.u32 %v4020_v43, %v3709_v39  ;;  %2634 = vmatpush.bf16.msra.mxu3 %v3902_v44 }
 0x181   : > { %v1479_v29 = vadd.f32 %v1478_v42, %v1429_v52  ;;  %v1333_v48 = vpop.f32.mrf.mxu0  ;;  %v1382_v24 = vpop.f32.mrf.mxu1  ;;  %v2017_v1 = vmax.f32 %v1857_v2, 0.0  ;;  %v2018_v7 = vmax.f32 %v1858_v51, 0.0  ;;  %2585 = vmatpush.bf16.msra.mxu2 %v3838_v38 }
 0x182   : > { %v1383_v58 = vadd.f32 %v1382_v24, %v1333_v48  ;;  %2487 = vmatpush.bf16.msra.mxu0 %v3710_v18 }
 0x183   : > { %v1711_v27 = vpack.c.bf16 %v1479_v29, %v1381_v28  ;;  %v5342_v3 = vpack.c.bf16 %v2017_v1, %v2013_v63  ;;  %v5344_v40 = vpack.c.bf16 %v2018_v7, %v2014_v37  ;;  %v3773_v7 = vld [vmem:[#allocation10 + $0xb0] sm:$0xf] }
 0x185   : > { %v1793_v52 = vunpack.c.l.bf16 %v1711_v27  ;;  %v1794_v11 = vunpack.c.h.bf16 %v1711_v27  ;;  %v4036_v27 = vld [vmem:[#allocation10 + $0xb4] sm:$0xf0] }
 0x186   : > { %v3774_v56 = vor.u32 %v4036_v27, %v3773_v7  ;;  %v3893_v7 = vld [vmem:[#allocation10 + $0x1a0] sm:$0xf]  ;;  %v4066_v27 = vld [vmem:[#allocation10 + $0x1a4] sm:$0xf0] }
 0x187   : > { %v1861_v24 = vadd.f32 %v5306_v41, %v1793_v52  ;;  %v1862_v10 = vadd.f32 %v5308_v36, %v1794_v11 }
 0x188   : > { %v1431_v42 = vpop.f32.mrf.mxu2  ;;  %v1480_v2 = vpop.f32.mrf.mxu3  ;;  %2536 = vmatpush.bf16.msra.mxu1 %v3774_v56  ;;  %v3894_v56 = vor.u32 %v4066_v27, %v3893_v7 }
 0x189   : > { %v1481_v51 = vadd.f32 %v1480_v2, %v1431_v42  ;;  %v1336_v28 = vpop.f32.mrf.mxu0  ;;  %v1385_v63 = vpop.f32.mrf.mxu1  ;;  %v2021_v20 = vmax.f32 %v1861_v24, 0.0 }
 0x18a   : > { %v1386_v29 = vadd.f32 %v1385_v63, %v1336_v28  ;;  %v3829_v28 = vld [vmem:[#allocation10 + $0x120] sm:$0xf]  ;;  %v4050_v63 = vld [vmem:[#allocation10 + $0x124] sm:$0xf0]  ;;  %2635 = vmatpush.bf16.msra.mxu3 %v3894_v56 }
 0x18b   : > { %v1713_v48 = vpack.c.bf16 %v1481_v51, %v1383_v58 }
 0x18c   : > { %1531 = vmatmul.bf16.gmra.mxu0 %v5228_v62  ;;  %1580 = vmatmul.bf16.gmra.mxu1 %v5232_v25 }
 0x18d   : > { %v1797_v1 = vunpack.c.l.bf16 %v1713_v48  ;;  %v1798_v37 = vunpack.c.h.bf16 %v1713_v48  ;;  %1629 = vmatmul.bf16.gmra.mxu2 %v5228_v62  ;;  %1678 = vmatmul.bf16.gmra.mxu3 %v5232_v25  ;;  %v2022_v62 = vmax.f32 %v1862_v10, 0.0  ;;  %v3701_v48 = vld [vmem:[#allocation10 + $0x20] sm:$0xf] }
 0x18f   : > { %v1865_v39 = vadd.f32 %v5306_v41, %v1797_v1  ;;  %v1866_v58 = vadd.f32 %v5308_v36, %v1798_v37  ;;  %v3830_v1 = vor.u32 %v4050_v63, %v3829_v28  ;;  %v4018_v37 = vld [vmem:[#allocation10 + $0x24] sm:$0xf0] }
 0x190   : > { %v1434_v38 = vpop.f32.mrf.mxu2  ;;  %v1483_v43 = vpop.f32.mrf.mxu3  ;;  %v3702_v24 = vor.u32 %v4018_v37, %v3701_v48 }
 0x191   : > { %v1484_v57 = vadd.f32 %v1483_v43, %v1434_v38  ;;  %v1338_v18 = vpop.f32.mrf.mxu0  ;;  %v1387_v44 = vpop.f32.mrf.mxu1  ;;  %v2025_v52 = vmax.f32 %v1865_v39, 0.0  ;;  %v2026_v42 = vmax.f32 %v1866_v58, 0.0  ;;  %2586 = vmatpush.bf16.msra.mxu2 %v3830_v1 }
 0x192   : > { %v1388_v25 = vadd.f32 %v1387_v44, %v1338_v18  ;;  %2488 = vmatpush.bf16.msra.mxu0 %v3702_v24 }
 0x193   : > { %v1715_v2 = vpack.c.bf16 %v1484_v57, %v1386_v29  ;;  %v5354_v51 = vpack.c.bf16 %v2025_v52, %v2021_v20  ;;  %v5356_v11 = vpack.c.bf16 %v2026_v42, %v2022_v62  ;;  %v3765_v42 = vld [vmem:[#allocation10 + $0xa0] sm:$0xf] }
 0x195   : > { %v1801_v38 = vunpack.c.l.bf16 %v1715_v2  ;;  %v1802_v10 = vunpack.c.h.bf16 %v1715_v2  ;;  %v4034_v2 = vld [vmem:[#allocation10 + $0xa4] sm:$0xf0] }
 0x196   : > { %v3766_v63 = vor.u32 %v4034_v2, %v3765_v42  ;;  %v3821_v42 = vld [vmem:[#allocation10 + $0x110] sm:$0xf]  ;;  %v4048_v2 = vld [vmem:[#allocation10 + $0x114] sm:$0xf0] }
 0x197   : > { %v1869_v44 = vadd.f32 %v5306_v41, %v1801_v38  ;;  %v1870_v28 = vadd.f32 %v5308_v36, %v1802_v10  ;;  %v3757_v10 = vld [vmem:[#allocation10 + $0x90] sm:$0xf] }
 0x198   : > { %v1436_v43 = vpop.f32.mrf.mxu2  ;;  %v1485_v39 = vpop.f32.mrf.mxu3  ;;  %2537 = vmatpush.bf16.msra.mxu1 %v3766_v63  ;;  %v3885_v63 = vld [vmem:[#allocation10 + $0x190] sm:$0xf] }
 0x199   : > { %v1486_v58 = vadd.f32 %v1485_v39, %v1436_v43  ;;  %v1341_v29 = vpop.f32.mrf.mxu0  ;;  %v1390_v20 = vpop.f32.mrf.mxu1  ;;  %v2029_v7 = vmax.f32 %v1869_v44, 0.0 }
 0x19a   : > { %v1391_v57 = vadd.f32 %v1390_v20, %v1341_v29  ;;  %v4016_v29 = vld [vmem:[#allocation10 + $0x14] sm:$0xf0] }
 0x19b   : > { %v1717_v18 = vpack.c.bf16 %v1486_v58, %v1388_v25  ;;  %v3693_v58 = vld [vmem:[#allocation10 + $0x10] sm:$0xf] }
 0x19c   : > { %1536 = vmatmul.bf16.gmra.mxu0 %v5258_v30  ;;  %1585 = vmatmul.bf16.gmra.mxu1 %v5262_v17 }
 0x19d   : > { %v1805_v52 = vunpack.c.l.bf16 %v1717_v18  ;;  %v1806_v62 = vunpack.c.h.bf16 %v1717_v18  ;;  %1634 = vmatmul.bf16.gmra.mxu2 %v5258_v30  ;;  %1683 = vmatmul.bf16.gmra.mxu3 %v5262_v17  ;;  %v2030_v30 = vmax.f32 %v1870_v28, 0.0 }
 0x19f   : > { %v1873_v48 = vadd.f32 %v5306_v41, %v1805_v52  ;;  %v1874_v25 = vadd.f32 %v5308_v36, %v1806_v62  ;;  %v3694_v52 = vor.u32 %v4016_v29, %v3693_v58  ;;  %v4032_v62 = vld [vmem:[#allocation10 + $0x94] sm:$0xf0] }
 0x1a0   : > { %v1439_v1 = vpop.f32.mrf.mxu2  ;;  %v1488_v37 = vpop.f32.mrf.mxu3  ;;  %v3758_v44 = vor.u32 %v4032_v62, %v3757_v10 }
 0x1a1   : > { %v1489_v27 = vadd.f32 %v1488_v37, %v1439_v1  ;;  %v1343_v24 = vpop.f32.mrf.mxu0  ;;  %v1392_v56 = vpop.f32.mrf.mxu1  ;;  %v2033_v38 = vmax.f32 %v1873_v48, 0.0  ;;  %v2034_v43 = vmax.f32 %v1874_v25, 0.0  ;;  %v3822_v1 = vor.u32 %v4048_v2, %v3821_v42  ;;  %2489 = vmatpush.bf16.msra.mxu0 %v3694_v52  ;;  %v4064_v48 = vld [vmem:[#allocation10 + $0x194] sm:$0xf0]  ;;  %v3685_v25 = vld [vmem:[#allocation10] sm:$0xf] }
 0x1a2   : > { %v1393_v17 = vadd.f32 %v1392_v56, %v1343_v24  ;;  %2538 = vmatpush.bf16.msra.mxu1 %v3758_v44  ;;  %v3886_v28 = vor.u32 %v4064_v48, %v3885_v63  ;;  %v3749_v37 = vld [vmem:[#allocation10 + $0x80] sm:$0xf]  ;;  %v4030_v56 = vld [vmem:[#allocation10 + $0x84] sm:$0xf0] }
 0x1a3   : > { %v1719_v39 = vpack.c.bf16 %v1489_v27, %v1391_v57  ;;  %v5366_v20 = vpack.c.bf16 %v2033_v38, %v2029_v7  ;;  %v5368_v18 = vpack.c.bf16 %v2034_v43, %v2030_v30  ;;  %v4014_v57 = vld [vmem:[#allocation10 + $0x4] sm:$0xf0]  ;;  %2587 = vmatpush.bf16.msra.mxu2 %v3822_v1  ;;  %v3750_v29 = vor.u32 %v4030_v56, %v3749_v37 }
 0x1a4   : > { %v3686_v7 = vor.u32 %v4014_v57, %v3685_v25  ;;  %2636 = vmatpush.bf16.msra.mxu3 %v3886_v28 }
 0x1a5   : > { %v1809_v38 = vunpack.c.l.bf16 %v1719_v39  ;;  %v1810_v10 = vunpack.c.h.bf16 %v1719_v39 }
 0x1a6   : > { %2490 = vmatpush.bf16.msra.mxu0 %v3686_v7  ;;  %2539 = vmatpush.bf16.msra.mxu1 %v3750_v29 }
 0x1a7   : > { %v1877_v44 = vadd.f32 %v5306_v41, %v1809_v38  ;;  %v1878_v63 = vadd.f32 %v5308_v36, %v1810_v10 }
 0x1a8   : > { %v1441_v27 = vpop.f32.mrf.mxu2  ;;  %v1490_v24 = vpop.f32.mrf.mxu3 }
 0x1a9   : > { %v1491_v30 = vadd.f32 %v1490_v24, %v1441_v27  ;;  %v1346_v43 = vpop.f32.mrf.mxu0  ;;  %v1395_v58 = vpop.f32.mrf.mxu1  ;;  %v2037_v37 = vmax.f32 %v1877_v44, 0.0  ;;  %v2038_v7 = vmax.f32 %v1878_v63, 0.0 }
 0x1aa   : > { %v1396_v62 = vadd.f32 %v1395_v58, %v1346_v43 }
 0x1ab   : > { %v1721_v52 = vpack.c.bf16 %v1491_v30, %v1393_v17 }
 0x1ac   : > { %1541 = vmatmul.bf16.gmra.mxu0 %v5276_v54  ;;  %1590 = vmatmul.bf16.gmra.mxu1 %v5280_v50 }
 0x1ad   : > { %v1813_v42 = vunpack.c.l.bf16 %v1721_v52  ;;  %v1814_v2 = vunpack.c.h.bf16 %v1721_v52  ;;  %1639 = vmatmul.bf16.gmra.mxu2 %v5276_v54  ;;  %1688 = vmatmul.bf16.gmra.mxu3 %v5280_v50 }
 0x1af   : > { %v1881_v39 = vadd.f32 %v5306_v41, %v1813_v42  ;;  %v1882_v1 = vadd.f32 %v5308_v36, %v1814_v2  ;;  %v3813_v2 = vld [vmem:[#allocation10 + $0x100] sm:$0xf] }
 0x1b0   : > { %v1444_v17 = vpop.f32.mrf.mxu2  ;;  %v1493_v48 = vpop.f32.mrf.mxu3 }
 0x1b1   : > { %v1494_v28 = vadd.f32 %v1493_v48, %v1444_v17  ;;  %v1348_v25 = vpop.f32.mrf.mxu0  ;;  %v1397_v57 = vpop.f32.mrf.mxu1  ;;  %v2041_v27 = vmax.f32 %v1881_v39, 0.0  ;;  %v2042_v54 = vmax.f32 %v1882_v1, 0.0  ;;  %v4046_v17 = vld [vmem:[#allocation10 + $0x104] sm:$0xf0]  ;;  %v3877_v48 = vld [vmem:[#allocation10 + $0x180] sm:$0xf] }
 0x1b2   : > { %v1398_v24 = vadd.f32 %v1397_v57, %v1348_v25  ;;  %v3814_v39 = vor.u32 %v4046_v17, %v3813_v2  ;;  %v4062_v25 = vld [vmem:[#allocation10 + $0x184] sm:$0xf0] }
 0x1b3   : > { %v1723_v56 = vpack.c.bf16 %v1494_v28, %v1396_v62  ;;  %v5378_v50 = vpack.c.bf16 %v2041_v27, %v2037_v37  ;;  %v5380_v38 = vpack.c.bf16 %v2042_v54, %v2038_v7  ;;  %v3878_v1 = vor.u32 %v4062_v25, %v3877_v48  ;;  %v4059_v25 = vld [vmem:[#allocation10 + $0x174] sm:$0xf] }
 0x1b4   : > { %2588 = vmatpush.bf16.msra.mxu2 %v3814_v39 }
 0x1b5   : > { %v1817_v30 = vunpack.c.l.bf16 %v1723_v56  ;;  %v1818_v29 = vunpack.c.h.bf16 %v1723_v56  ;;  %2637 = vmatpush.bf16.msra.mxu3 %v3878_v1  ;;  %v1735_v56 = vperm.slane %v5298_v45, 2  ;;  %v4027_v1 = vld [vmem:[#allocation10 + $0x74] sm:$0xf] }
 0x1b7   : > { %v1885_v62 = vadd.f32 %v5306_v41, %v1817_v30  ;;  %v1886_v37 = vadd.f32 %v5308_v36, %v1818_v29  ;;  %v1736_v30 = vperm.slane %v5298_v45, 3  ;;  %v4075_v45 = vld [vmem:[#allocation10 + $0x1f4] sm:$0xf] }
 0x1b8   : > { %v1446_v43 = vpop.f32.mrf.mxu2  ;;  %v1495_v58 = vpop.f32.mrf.mxu3 }
 0x1b9   : > { %v1496_v10 = vadd.f32 %v1495_v58, %v1446_v43  ;;  %v1351_v52 = vpop.f32.mrf.mxu0  ;;  %v1400_v42 = vpop.f32.mrf.mxu1  ;;  %v2045_v43 = vmax.f32 %v1885_v62, 0.0  ;;  %v1742_v39 = vpack.c.bf16 %v1736_v30, %v1735_v56  ;;  %v3935_v62 = vld [vmem:[#allocation10 + $0x1f8] sm:$0xf0] }
 0x1ba   : > { %v1401_v44 = vadd.f32 %v1400_v42, %v1351_v52 }
 0x1bb   : > { %v1725_v63 = vpack.c.bf16 %v1496_v10, %v1398_v24 }
 0x1bc   : > { %1546 = vmatmul.bf16.gmra.mxu0 %v5288_v8  ;;  %1595 = vmatmul.bf16.gmra.mxu1 %v5292_v46 }
 0x1bd   : > { %v1821_v28 = vunpack.c.l.bf16 %v1725_v63  ;;  %v1822_v57 = vunpack.c.h.bf16 %v1725_v63  ;;  %1644 = vmatmul.bf16.gmra.mxu2 %v5288_v8  ;;  %1693 = vmatmul.bf16.gmra.mxu3 %v5292_v46  ;;  %v2046_v46 = vmax.f32 %v1886_v37, 0.0  ;;  %v3871_v63 = vld [vmem:[#allocation10 + $0x178] sm:$0xf0] }
 0x1bf   : > { %v1889_v27 = vadd.f32 %v5306_v41, %v1821_v28  ;;  %v1890_v24 = vadd.f32 %v5308_v36, %v1822_v57  ;;  %v3874_v28 = vor.u32 %v4059_v25, %v3871_v63  ;;  %v3743_v57 = vld [vmem:[#allocation10 + $0x78] sm:$0xf0]  ;;  %v4043_v63 = vld [vmem:[#allocation10 + $0xf4] sm:$0xf] }
 0x1c0   : > { %v1449_v7 = vpop.f32.mrf.mxu2  ;;  %v1498_v54 = vpop.f32.mrf.mxu3 }
 0x1c1   : > { %v1499_v58 = vadd.f32 %v1498_v54, %v1449_v7  ;;  %v1353_v10 = vpop.f32.mrf.mxu0  ;;  %v1402_v8 = vpop.f32.mrf.mxu1  ;;  %v2049_v52 = vmax.f32 %v1889_v27, 0.0  ;;  %v2050_v42 = vmax.f32 %v1890_v24, 0.0  ;;  %v3746_v7 = vor.u32 %v4027_v1, %v3743_v57  ;;  %2777 = vmatpush.bf16.msrb.mxu2 %v3874_v28 }
 0x1c2   : > { %v1403_v29 = vadd.f32 %v1402_v8, %v1353_v10  ;;  %v3938_v54 = vor.u32 %v4075_v45, %v3935_v62  ;;  %v1747_v24 = vunpack.c.l.b16 %v1742_v39  ;;  %v1748_v10 = vunpack.c.h.b16 %v1742_v39  ;;  %v3807_v39 = vld [vmem:[#allocation10 + $0xf8] sm:$0xf0] }
 0x1c3   : > { %v1727_v2 = vpack.c.bf16 %v1499_v58, %v1401_v44  ;;  %v5392_v17 = vpack.c.bf16 %v2049_v52, %v2045_v43  ;;  %v5394_v48 = vpack.c.bf16 %v2050_v42, %v2046_v46  ;;  %2679 = vmatpush.bf16.msrb.mxu0 %v3746_v7  ;;  %v3810_v1 = vor.u32 %v4043_v63, %v3807_v39  ;;  %v4073_v63 = vld [vmem:[#allocation10 + $0x1e4] sm:$0xf] }
 0x1c4   : > { %2826 = vmatpush.bf16.msrb.mxu3 %v3938_v54  ;;  %v1751_v30 = vpack.c.b16 %v1747_v24, %v1747_v24  ;;  %v1752_v52 = vpack.c.b16 %v1748_v10, %v1748_v10 }
 0x1c5   : > { %v1825_v34 = vunpack.c.l.bf16 %v1727_v2  ;;  %v1826_v44 = vunpack.c.h.bf16 %v1727_v2  ;;  %2728 = vmatpush.bf16.msrb.mxu1 %v3810_v1 }
 0x1c6   : > { %v1762_v7 = vpack.i.b16 %v1751_v30, %v1751_v30  ;;  %v1766_v54 = vpack.i.b16 %v1752_v52, %v1752_v52  ;;  %v3735_v52 = vld [vmem:[#allocation10 + $0x68] sm:$0xf0] }
 0x1c7   : > { %v1893_v46 = vadd.f32 %v5306_v41, %v1825_v34  ;;  %v1894_v2 = vadd.f32 %v5308_v36, %v1826_v44 }
 0x1c8   : > { %v1451_v27 = vpop.f32.mrf.mxu2  ;;  %v1500_v37 = vpop.f32.mrf.mxu3 }
 0x1c9   : > { %v1501_v43 = vadd.f32 %v1500_v37, %v1451_v27  ;;  %v1512_v58 = vpop.f32.mrf.mxu0  ;;  %v1561_v8 = vpop.f32.mrf.mxu1  ;;  %v2053_v27 = vmax.f32 %v1893_v46, 0.0  ;;  %v3927_v46 = vld [vmem:[#allocation10 + $0x1e8] sm:$0xf0] }
 0x1ca   : > { %v3930_v1 = vor.u32 %v4073_v63, %v3927_v46 }
 0x1cb   : > { %v1729_v56 = vpack.c.bf16 %v1501_v43, %v1403_v29  ;;  %v1562_v29 = vadd.f32 %v1561_v8, %v1512_v58  ;;  %v2054_v43 = vmax.f32 %v1894_v2, 0.0  ;;  %v4057_v58 = vld [vmem:[#allocation10 + $0x164] sm:$0xf]  ;;  %v3863_v8 = vld [vmem:[#allocation10 + $0x168] sm:$0xf0] }
 0x1cc   : > { %2491 = vmatmul.bf16.vlgmr.msra.gmra.mxu0 %v5318_v22  ;;  %2540 = vmatmul.bf16.vlgmr.msra.gmra.mxu1 %v5320_v55  ;;  %v3866_v30 = vor.u32 %v4057_v58, %v3863_v8 }
 0x1cd   : > { %v1829_v42 = vunpack.c.l.bf16 %v1729_v56  ;;  %v1830_v25 = vunpack.c.h.bf16 %v1729_v56  ;;  %2827 = vmatpush.bf16.msrb.mxu3 %v3930_v1 }
 0x1ce   : > { %2778 = vmatpush.bf16.msrb.mxu2 %v3866_v30 }
 0x1cf   : > { %v1897_v28 = vadd.f32 %v5306_v41, %v1829_v42  ;;  %v1898_v57 = vadd.f32 %v5308_v36, %v1830_v25  ;;  %v1764_v42 = vperm.slane %v1762_v7, 0  ;;  %v1768_v36 = vperm.slane %v1766_v54, 0  ;;  %v4025_v25 = vld [vmem:[#allocation10 + $0x64] sm:$0xf] }
 0x1d0   : > { %v1610_v45 = vpop.f32.mrf.mxu2  ;;  %v1659_v62 = vpop.f32.mrf.mxu3  ;;  %v3738_v39 = vor.u32 %v4025_v25, %v3735_v52 }
 0x1d1   : > { %v1660_v37 = vadd.f32 %v1659_v62, %v1610_v45  ;;  %v1514_v34 = vpop.f32.mrf.mxu0  ;;  %v1563_v24 = vpop.f32.mrf.mxu1  ;;  %v2057_v10 = vmax.f32 %v1897_v28, 0.0  ;;  %v2058_v56 = vmax.f32 %v1898_v57, 0.0  ;;  %v5406_v28 = vunpack.c.l.bf16 %v1764_v42 }
 0x1d2   : > { %2680 = vmatpush.bf16.msrb.mxu0 %v3738_v39 }
 0x1d3   : > { %v5402_v4 = vpack.c.bf16 %v2057_v10, %v2053_v27  ;;  %v5404_v44 = vpack.c.bf16 %v2058_v56, %v2054_v43  ;;  %v1700_v41 = vpack.c.bf16 %v1660_v37, %v1562_v29  ;;  %v5408_v27 = vunpack.c.l.bf16 %v1768_v36  ;;  %v3799_v36 = vld [vmem:[#allocation10 + $0xe8] sm:$0xf0] }
 0x1d4   : > { %v1564_v29 = vadd.f32 %v1563_v24, %v1514_v34 }
 0x1d5   : > { %v1771_v45 = vunpack.c.l.bf16 %v1700_v41  ;;  %v1772_v62 = vunpack.c.h.bf16 %v1700_v41  ;;  %v4041_v41 = vld [vmem:[#allocation10 + $0xe4] sm:$0xf] }
 0x1d6   : > { %v3802_v8 = vor.u32 %v4041_v41, %v3799_v36 }
 0x1d7   : > { %v1839_v43 = vadd.f32 %v5406_v28, %v1771_v45  ;;  %v1840_v56 = vadd.f32 %v5408_v27, %v1772_v62 }
 0x1d8   : > { %v1612_v2 = vpop.f32.mrf.mxu2  ;;  %v1661_v57 = vpop.f32.mrf.mxu3  ;;  %2729 = vmatpush.bf16.msrb.mxu1 %v3802_v8 }
 0x1d9   : > { %v1662_v7 = vadd.f32 %v1661_v57, %v1612_v2  ;;  %v1517_v54 = vpop.f32.mrf.mxu0  ;;  %v1566_v37 = vpop.f32.mrf.mxu1  ;;  %v1999_v25 = vmax.f32 %v1839_v43, 0.0  ;;  %v2000_v46 = vmax.f32 %v1840_v56, 0.0  ;;  %v4071_v56 = vld [vmem:[#allocation10 + $0x1d4] sm:$0xf] }
 0x1da   : > { %v1567_v30 = vadd.f32 %v1566_v37, %v1517_v54  ;;  %v3855_v54 = vld [vmem:[#allocation10 + $0x158] sm:$0xf0]  ;;  %v4023_v37 = vld [vmem:[#allocation10 + $0x54] sm:$0xf] }
 0x1db   : > { %v1702_v10 = vpack.c.bf16 %v1662_v7, %v1564_v29 }
 0x1dc   : > { %2496 = vmatmul.bf16.gmra.mxu0 %v5330_v33  ;;  %2545 = vmatmul.bf16.gmra.mxu1 %v5332_v32 }
 0x1dd   : > { %v1775_v42 = vunpack.c.l.bf16 %v1702_v10  ;;  %v1776_v58 = vunpack.c.h.bf16 %v1702_v10  ;;  %v4055_v10 = vld [vmem:[#allocation10 + $0x154] sm:$0xf] }
 0x1de   : > { %v3858_v43 = vor.u32 %v4055_v10, %v3855_v54 }
 0x1df   : > { %v1843_v34 = vadd.f32 %v5406_v28, %v1775_v42  ;;  %v1844_v24 = vadd.f32 %v5408_v27, %v1776_v58  ;;  %v3727_v42 = vld [vmem:[#allocation10 + $0x58] sm:$0xf0] }
 0x1e0   : > { %v1615_v52 = vpop.f32.mrf.mxu2  ;;  %v1664_v63 = vpop.f32.mrf.mxu3  ;;  %v3919_v58 = vld [vmem:[#allocation10 + $0x1d8] sm:$0xf0]  ;;  %v3730_v41 = vor.u32 %v4023_v37, %v3727_v42  ;;  %2779 = vmatpush.bf16.msrb.mxu2 %v3858_v43  ;;  %v4039_v37 = vld [vmem:[#allocation10 + $0xd4] sm:$0xf] }
 0x1e1   : > { %v2003_v39 = vmax.f32 %v1843_v34, 0.0  ;;  %v2004_v1 = vmax.f32 %v1844_v24, 0.0  ;;  %v1665_v45 = vadd.f32 %v1664_v63, %v1615_v52  ;;  %v1519_v2 = vpop.f32.mrf.mxu0  ;;  %v1568_v57 = vpop.f32.mrf.mxu1  ;;  %v3922_v36 = vor.u32 %v4071_v56, %v3919_v58  ;;  %v3791_v43 = vld [vmem:[#allocation10 + $0xd8] sm:$0xf0] }
 0x1e2   : > { %v1569_v52 = vadd.f32 %v1568_v57, %v1519_v2  ;;  %2681 = vmatpush.bf16.msrb.mxu0 %v3730_v41 }
 0x1e3   : > { %v5416_v62 = vpack.c.bf16 %v2003_v39, %v1999_v25  ;;  %v5418_v29 = vpack.c.bf16 %v2004_v1, %v2000_v46  ;;  %v1704_v7 = vpack.c.bf16 %v1665_v45, %v1567_v30  ;;  %2828 = vmatpush.bf16.msrb.mxu3 %v3922_v36 }
 0x1e5   : > { %2589 = vmatmul.bf16.vlgmr.msra.gmra.mxu2 %v5416_v62  ;;  %2638 = vmatmul.bf16.vlgmr.msra.gmra.mxu3 %v5418_v29  ;;  %v1779_v8 = vunpack.c.l.bf16 %v1704_v7  ;;  %v1780_v25 = vunpack.c.h.bf16 %v1704_v7  ;;  %v3794_v7 = vor.u32 %v4039_v37, %v3791_v43  ;;  %v4069_v43 = vld [vmem:[#allocation10 + $0x1c4] sm:$0xf] }
 0x1e7   : > { %v1847_v1 = vadd.f32 %v5406_v28, %v1779_v8  ;;  %v1848_v54 = vadd.f32 %v5408_v27, %v1780_v25  ;;  %2730 = vmatpush.bf16.msrb.mxu1 %v3794_v7  ;;  %v3911_v7 = vld [vmem:[#allocation10 + $0x1c8] sm:$0xf0] }
 0x1e8   : > { %v1617_v34 = vpop.f32.mrf.mxu2  ;;  %v1666_v24 = vpop.f32.mrf.mxu3 }
 0x1e9   : > { %v1667_v30 = vadd.f32 %v1666_v24, %v1617_v34  ;;  %v1522_v63 = vpop.f32.mrf.mxu0  ;;  %v1571_v46 = vpop.f32.mrf.mxu1  ;;  %v2007_v41 = vmax.f32 %v1847_v1, 0.0 }
 0x1ea   : > { %v1572_v42 = vadd.f32 %v1571_v46, %v1522_v63  ;;  %v4053_v63 = vld [vmem:[#allocation10 + $0x144] sm:$0xf]  ;;  %v3847_v46 = vld [vmem:[#allocation10 + $0x148] sm:$0xf0] }
 0x1eb   : > { %v1706_v39 = vpack.c.bf16 %v1667_v30, %v1569_v52  ;;  %v2008_v52 = vmax.f32 %v1848_v54, 0.0  ;;  %v3850_v1 = vor.u32 %v4053_v63, %v3847_v46 }
 0x1ec   : > { %2501 = vmatmul.bf16.gmra.mxu0 %v5342_v3  ;;  %2550 = vmatmul.bf16.gmra.mxu1 %v5344_v40 }
 0x1ed   : > { %v1783_v45 = vunpack.c.l.bf16 %v1706_v39  ;;  %v1784_v10 = vunpack.c.h.bf16 %v1706_v39  ;;  %2780 = vmatpush.bf16.msrb.mxu2 %v3850_v1  ;;  %v3783_v1 = vld [vmem:[#allocation10 + $0xc8] sm:$0xf0] }
 0x1ef   : > { %v1851_v2 = vadd.f32 %v5406_v28, %v1783_v45  ;;  %v1852_v57 = vadd.f32 %v5408_v27, %v1784_v10  ;;  %v4021_v45 = vld [vmem:[#allocation10 + $0x44] sm:$0xf]  ;;  %v3719_v10 = vld [vmem:[#allocation10 + $0x48] sm:$0xf0] }
 0x1f0   : > { %v1620_v56 = vpop.f32.mrf.mxu2  ;;  %v1669_v58 = vpop.f32.mrf.mxu3 }
 0x1f1   : > { %v1670_v36 = vadd.f32 %v1669_v58, %v1620_v56  ;;  %v1524_v34 = vpop.f32.mrf.mxu0  ;;  %v1573_v24 = vpop.f32.mrf.mxu1  ;;  %v2011_v8 = vmax.f32 %v1851_v2, 0.0  ;;  %v2012_v30 = vmax.f32 %v1852_v57, 0.0  ;;  %v3722_v56 = vor.u32 %v4021_v45, %v3719_v10 }
 0x1f2   : > { %v3914_v2 = vor.u32 %v4069_v43, %v3911_v7  ;;  %v4037_v43 = vld [vmem:[#allocation10 + $0xc4] sm:$0xf] }
 0x1f3   : > { %v5428_v39 = vpack.c.bf16 %v2011_v8, %v2007_v41  ;;  %v5430_v25 = vpack.c.bf16 %v2012_v30, %v2008_v52  ;;  %v1708_v37 = vpack.c.bf16 %v1670_v36, %v1572_v42  ;;  %v1574_v8 = vadd.f32 %v1573_v24, %v1524_v34  ;;  %2682 = vmatpush.bf16.msrb.mxu0 %v3722_v56 }
 0x1f4   : > { %2829 = vmatpush.bf16.msrb.mxu3 %v3914_v2 }
 0x1f5   : > { %2594 = vmatmul.bf16.gmra.mxu2 %v5428_v39  ;;  %2643 = vmatmul.bf16.gmra.mxu3 %v5430_v25  ;;  %v1787_v54 = vunpack.c.l.bf16 %v1708_v37  ;;  %v1788_v41 = vunpack.c.h.bf16 %v1708_v37  ;;  %v3786_v37 = vor.u32 %v4037_v43, %v3783_v1  ;;  %v4067_v1 = vld [vmem:[#allocation10 + $0x1b4] sm:$0xf] }
 0x1f7   : > { %v1855_v63 = vadd.f32 %v5406_v28, %v1787_v54  ;;  %v1856_v10 = vadd.f32 %v5408_v27, %v1788_v41  ;;  %2731 = vmatpush.bf16.msrb.mxu1 %v3786_v37  ;;  %v3903_v37 = vld [vmem:[#allocation10 + $0x1b8] sm:$0xf0] }
 0x1f8   : > { %v1622_v57 = vpop.f32.mrf.mxu2  ;;  %v1671_v58 = vpop.f32.mrf.mxu3 }
 0x1f9   : > { %v1672_v42 = vadd.f32 %v1671_v58, %v1622_v57  ;;  %v1527_v36 = vpop.f32.mrf.mxu0  ;;  %v1576_v52 = vpop.f32.mrf.mxu1  ;;  %v2015_v57 = vmax.f32 %v1855_v63, 0.0  ;;  %v2016_v15 = vmax.f32 %v1856_v10, 0.0 }
 0x1fa   : > { %v1577_v7 = vadd.f32 %v1576_v52, %v1527_v36  ;;  %v4051_v36 = vld [vmem:[#allocation10 + $0x134] sm:$0xf]  ;;  %v3839_v52 = vld [vmem:[#allocation10 + $0x138] sm:$0xf0] }
 0x1fb   : > { %v1710_v30 = vpack.c.bf16 %v1672_v42, %v1574_v8  ;;  %v3842_v63 = vor.u32 %v4051_v36, %v3839_v52 }
 0x1fc   : > { %2506 = vmatmul.bf16.gmra.mxu0 %v5354_v51  ;;  %2555 = vmatmul.bf16.gmra.mxu1 %v5356_v11 }
 0x1fd   : > { %v1791_v46 = vunpack.c.l.bf16 %v1710_v30  ;;  %v1792_v45 = vunpack.c.h.bf16 %v1710_v30  ;;  %2781 = vmatpush.bf16.msrb.mxu2 %v3842_v63  ;;  %v3775_v63 = vld [vmem:[#allocation10 + $0xb8] sm:$0xf0] }
 0x1ff   : > { %v1859_v34 = vadd.f32 %v5406_v28, %v1791_v46  ;;  %v1860_v24 = vadd.f32 %v5408_v27, %v1792_v45  ;;  %v4019_v46 = vld [vmem:[#allocation10 + $0x34] sm:$0xf]  ;;  %v3711_v45 = vld [vmem:[#allocation10 + $0x38] sm:$0xf0] }
 0x200   : > { %v1625_v56 = vpop.f32.mrf.mxu2  ;;  %v1674_v2 = vpop.f32.mrf.mxu3 }
 0x201   : > { %v1675_v58 = vadd.f32 %v1674_v2, %v1625_v56  ;;  %v1529_v8 = vpop.f32.mrf.mxu0  ;;  %v1578_v42 = vpop.f32.mrf.mxu1  ;;  %v2019_v54 = vmax.f32 %v1859_v34, 0.0  ;;  %v2020_v30 = vmax.f32 %v1860_v24, 0.0  ;;  %v3714_v56 = vor.u32 %v4019_v46, %v3711_v45 }
 0x202   : > { %v3906_v34 = vor.u32 %v4067_v1, %v3903_v37  ;;  %v4035_v1 = vld [vmem:[#allocation10 + $0xb4] sm:$0xf] }
 0x203   : > { %v5440_v23 = vpack.c.bf16 %v2019_v54, %v2015_v57  ;;  %v5442_v41 = vpack.c.bf16 %v2020_v30, %v2016_v15  ;;  %v1712_v43 = vpack.c.bf16 %v1675_v58, %v1577_v7  ;;  %v1579_v57 = vadd.f32 %v1578_v42, %v1529_v8  ;;  %2683 = vmatpush.bf16.msrb.mxu0 %v3714_v56 }
 0x204   : > { %2830 = vmatpush.bf16.msrb.mxu3 %v3906_v34 }
 0x205   : > { %2599 = vmatmul.bf16.gmra.mxu2 %v5440_v23  ;;  %2648 = vmatmul.bf16.gmra.mxu3 %v5442_v41  ;;  %v1795_v10 = vunpack.c.l.bf16 %v1712_v43  ;;  %v1796_v15 = vunpack.c.h.bf16 %v1712_v43  ;;  %v3778_v43 = vor.u32 %v4035_v1, %v3775_v63  ;;  %v4065_v63 = vld [vmem:[#allocation10 + $0x1a4] sm:$0xf] }
 0x207   : > { %v1863_v36 = vadd.f32 %v5406_v28, %v1795_v10  ;;  %v1864_v45 = vadd.f32 %v5408_v27, %v1796_v15  ;;  %2732 = vmatpush.bf16.msrb.mxu1 %v3778_v43  ;;  %v3895_v43 = vld [vmem:[#allocation10 + $0x1a8] sm:$0xf0] }
 0x208   : > { %v1627_v24 = vpop.f32.mrf.mxu2  ;;  %v1676_v2 = vpop.f32.mrf.mxu3 }
 0x209   : > { %v1677_v7 = vadd.f32 %v1676_v2, %v1627_v24  ;;  %v1532_v58 = vpop.f32.mrf.mxu0  ;;  %v1581_v54 = vpop.f32.mrf.mxu1  ;;  %v2023_v24 = vmax.f32 %v1863_v36, 0.0  ;;  %v2024_v14 = vmax.f32 %v1864_v45, 0.0 }
 0x20a   : > { %v1582_v37 = vadd.f32 %v1581_v54, %v1532_v58  ;;  %v4049_v58 = vld [vmem:[#allocation10 + $0x124] sm:$0xf]  ;;  %v3831_v54 = vld [vmem:[#allocation10 + $0x128] sm:$0xf0] }
 0x20b   : > { %v1714_v30 = vpack.c.bf16 %v1677_v7, %v1579_v57  ;;  %v3834_v36 = vor.u32 %v4049_v58, %v3831_v54 }
 0x20c   : > { %2511 = vmatmul.bf16.gmra.mxu0 %v5366_v20  ;;  %2560 = vmatmul.bf16.gmra.mxu1 %v5368_v18 }
 0x20d   : > { %v1799_v52 = vunpack.c.l.bf16 %v1714_v30  ;;  %v1800_v46 = vunpack.c.h.bf16 %v1714_v30  ;;  %2782 = vmatpush.bf16.msrb.mxu2 %v3834_v36  ;;  %v3767_v36 = vld [vmem:[#allocation10 + $0xa8] sm:$0xf0] }
 0x20f   : > { %v1867_v8 = vadd.f32 %v5406_v28, %v1799_v52  ;;  %v1868_v42 = vadd.f32 %v5408_v27, %v1800_v46  ;;  %v4017_v52 = vld [vmem:[#allocation10 + $0x24] sm:$0xf]  ;;  %v3703_v46 = vld [vmem:[#allocation10 + $0x28] sm:$0xf0] }
 0x210   : > { %v1630_v56 = vpop.f32.mrf.mxu2  ;;  %v1679_v34 = vpop.f32.mrf.mxu3 }
 0x211   : > { %v1680_v2 = vadd.f32 %v1679_v34, %v1630_v56  ;;  %v1534_v57 = vpop.f32.mrf.mxu0  ;;  %v1583_v7 = vpop.f32.mrf.mxu1  ;;  %v2027_v10 = vmax.f32 %v1867_v8, 0.0  ;;  %v2028_v30 = vmax.f32 %v1868_v42, 0.0  ;;  %v3706_v56 = vor.u32 %v4017_v52, %v3703_v46 }
 0x212   : > { %v3898_v8 = vor.u32 %v4065_v63, %v3895_v43  ;;  %v4033_v63 = vld [vmem:[#allocation10 + $0xa4] sm:$0xf] }
 0x213   : > { %v5452_v53 = vpack.c.bf16 %v2027_v10, %v2023_v24  ;;  %v5454_v15 = vpack.c.bf16 %v2028_v30, %v2024_v14  ;;  %v1716_v1 = vpack.c.bf16 %v1680_v2, %v1582_v37  ;;  %v1584_v24 = vadd.f32 %v1583_v7, %v1534_v57  ;;  %2684 = vmatpush.bf16.msrb.mxu0 %v3706_v56 }
 0x214   : > { %2831 = vmatpush.bf16.msrb.mxu3 %v3898_v8 }
 0x215   : > { %2604 = vmatmul.bf16.gmra.mxu2 %v5452_v53  ;;  %2653 = vmatmul.bf16.gmra.mxu3 %v5454_v15  ;;  %v1803_v45 = vunpack.c.l.bf16 %v1716_v1  ;;  %v1804_v14 = vunpack.c.h.bf16 %v1716_v1  ;;  %v3770_v1 = vor.u32 %v4033_v63, %v3767_v36  ;;  %v4015_v36 = vld [vmem:[#allocation10 + $0x14] sm:$0xf] }
 0x217   : > { %v1871_v58 = vadd.f32 %v5406_v28, %v1803_v45  ;;  %v1872_v46 = vadd.f32 %v5408_v27, %v1804_v14  ;;  %2733 = vmatpush.bf16.msrb.mxu1 %v3770_v1 }
 0x218   : > { %v1632_v42 = vpop.f32.mrf.mxu2  ;;  %v1681_v34 = vpop.f32.mrf.mxu3 }
 0x219   : > { %v1682_v37 = vadd.f32 %v1681_v34, %v1632_v42  ;;  %v1537_v2 = vpop.f32.mrf.mxu0  ;;  %v1586_v10 = vpop.f32.mrf.mxu1  ;;  %v2031_v42 = vmax.f32 %v1871_v58, 0.0  ;;  %v2032_v6 = vmax.f32 %v1872_v46, 0.0  ;;  %v4063_v46 = vld [vmem:[#allocation10 + $0x194] sm:$0xf] }
 0x21a   : > { %v1587_v43 = vadd.f32 %v1586_v10, %v1537_v2  ;;  %v4047_v2 = vld [vmem:[#allocation10 + $0x114] sm:$0xf]  ;;  %v3823_v10 = vld [vmem:[#allocation10 + $0x118] sm:$0xf0] }
 0x21b   : > { %v1718_v30 = vpack.c.bf16 %v1682_v37, %v1584_v24  ;;  %v3826_v1 = vor.u32 %v4047_v2, %v3823_v10 }
 0x21c   : > { %2516 = vmatmul.bf16.gmra.mxu0 %v5378_v50  ;;  %2565 = vmatmul.bf16.gmra.mxu1 %v5380_v38 }
 0x21d   : > { %v1807_v54 = vunpack.c.l.bf16 %v1718_v30  ;;  %v1808_v52 = vunpack.c.h.bf16 %v1718_v30  ;;  %2783 = vmatpush.bf16.msrb.mxu2 %v3826_v1 }
 0x21f   : > { %v1875_v57 = vadd.f32 %v5406_v28, %v1807_v54  ;;  %v1876_v7 = vadd.f32 %v5408_v27, %v1808_v52  ;;  %v3695_v54 = vld [vmem:[#allocation10 + $0x18] sm:$0xf0] }
 0x220   : > { %v1635_v56 = vpop.f32.mrf.mxu2  ;;  %v1684_v8 = vpop.f32.mrf.mxu3  ;;  %v3698_v58 = vor.u32 %v4015_v36, %v3695_v54  ;;  %v3759_v52 = vld [vmem:[#allocation10 + $0x98] sm:$0xf0] }
 0x221   : > { %v1685_v34 = vadd.f32 %v1684_v8, %v1635_v56  ;;  %v1539_v24 = vpop.f32.mrf.mxu0  ;;  %v1588_v37 = vpop.f32.mrf.mxu1  ;;  %v2035_v45 = vmax.f32 %v1875_v57, 0.0  ;;  %v2036_v30 = vmax.f32 %v1876_v7, 0.0  ;;  %v3762_v57 = vor.u32 %v4031_v31, %v3759_v52  ;;  %v3887_v7 = vld [vmem:[#allocation10 + $0x198] sm:$0xf0]  ;;  %v3751_v31 = vld [vmem:[#allocation10 + $0x88] sm:$0xf0] }
 0x222   : > { %2685 = vmatpush.bf16.msrb.mxu0 %v3698_v58  ;;  %v3890_v56 = vor.u32 %v4063_v46, %v3887_v7  ;;  %v1589_v13 = vadd.f32 %v1588_v37, %v1539_v24 }
 0x223   : > { %v5464_v35 = vpack.c.bf16 %v2035_v45, %v2031_v42  ;;  %v5466_v14 = vpack.c.bf16 %v2036_v30, %v2032_v6  ;;  %v1720_v63 = vpack.c.bf16 %v1685_v34, %v1587_v43  ;;  %2734 = vmatpush.bf16.msrb.mxu1 %v3762_v57  ;;  %v4013_v42 = vld [vmem:[#allocation10 + $0x4] sm:$0xf]  ;;  %v3687_v34 = vld [vmem:[#allocation10 + $0x8] sm:$0xf0] }
 0x224   : > { %v4029_v45 = vld [vmem:[#allocation10 + $0x84] sm:$0xf]  ;;  %2832 = vmatpush.bf16.msrb.mxu3 %v3890_v56  ;;  %v3690_v54 = vor.u32 %v4013_v42, %v3687_v34 }
 0x225   : > { %2609 = vmatmul.bf16.gmra.mxu2 %v5464_v35  ;;  %2658 = vmatmul.bf16.gmra.mxu3 %v5466_v14  ;;  %v1811_v6 = vunpack.c.l.bf16 %v1720_v63  ;;  %v1812_v30 = vunpack.c.h.bf16 %v1720_v63  ;;  %v3754_v2 = vor.u32 %v4029_v45, %v3751_v31 }
 0x226   : > { %2686 = vmatpush.bf16.msrb.mxu0 %v3690_v54  ;;  %v4045_v54 = vld [vmem:[#allocation10 + $0x104] sm:$0xf] }
 0x227   : > { %v1879_v58 = vadd.f32 %v5406_v28, %v1811_v6  ;;  %v1880_v63 = vadd.f32 %v5408_v27, %v1812_v30  ;;  %2735 = vmatpush.bf16.msrb.mxu1 %v3754_v2  ;;  %v3879_v2 = vld [vmem:[#allocation10 + $0x188] sm:$0xf0] }
 0x228   : > { %v1637_v8 = vpop.f32.mrf.mxu2  ;;  %v1686_v43 = vpop.f32.mrf.mxu3 }
 0x229   : > { %v1687_v5 = vadd.f32 %v1686_v43, %v1637_v8  ;;  %v1542_v26 = vpop.f32.mrf.mxu0  ;;  %v1591_v36 = vpop.f32.mrf.mxu1  ;;  %v2040_v42 = vmax.f32 %v1880_v63, 0.0 }
 0x22a   : > { %v1592_v57 = vadd.f32 %v1591_v36, %v1542_v26  ;;  %v3815_v26 = vld [vmem:[#allocation10 + $0x108] sm:$0xf0]  ;;  %v4061_v36 = vld [vmem:[#allocation10 + $0x184] sm:$0xf] }
 0x22b   : > { %v1722_v10 = vpack.c.bf16 %v1687_v5, %v1589_v13  ;;  %v2039_v5 = vmax.f32 %v1879_v58, 0.0  ;;  %v3818_v31 = vor.u32 %v4045_v54, %v3815_v26 }
 0x22c   : > { %2521 = vmatmul.bf16.gmra.mxu0 %v5392_v17  ;;  %2570 = vmatmul.bf16.gmra.mxu1 %v5394_v48 }
 0x22d   : > { %v1815_v52 = vunpack.c.l.bf16 %v1722_v10  ;;  %v1816_v1 = vunpack.c.h.bf16 %v1722_v10  ;;  %v3882_v10 = vor.u32 %v4061_v36, %v3879_v2  ;;  %2784 = vmatpush.bf16.msrb.mxu2 %v3818_v31 }
 0x22f   : > { %v1883_v24 = vadd.f32 %v5406_v28, %v1815_v52  ;;  %v1884_v37 = vadd.f32 %v5408_v27, %v1816_v1  ;;  %2833 = vmatpush.bf16.msrb.mxu3 %v3882_v10 }
 0x230   : > { %v1640_v46 = vpop.f32.mrf.mxu2  ;;  %v1689_v7 = vpop.f32.mrf.mxu3 }
 0x231   : > { %v1690_v13 = vadd.f32 %v1689_v7, %v1640_v46  ;;  %v1544_v56 = vpop.f32.mrf.mxu0  ;;  %v1593_v8 = vpop.f32.mrf.mxu1  ;;  %v2043_v43 = vmax.f32 %v1883_v24, 0.0  ;;  %v2044_v34 = vmax.f32 %v1884_v37, 0.0 }
 0x232   : > { %v1594_v24 = vadd.f32 %v1593_v8, %v1544_v56 }
 0x233   : > { %v5476_v6 = vpack.c.bf16 %v2043_v43, %v2039_v5  ;;  %v5478_v45 = vpack.c.bf16 %v2044_v34, %v2040_v42  ;;  %v1724_v30 = vpack.c.bf16 %v1690_v13, %v1592_v57 }
 0x235   : > { %2614 = vmatmul.bf16.gmra.mxu2 %v5476_v6  ;;  %2663 = vmatmul.bf16.gmra.mxu3 %v5478_v45  ;;  %v1819_v58 = vunpack.c.l.bf16 %v1724_v30  ;;  %v1820_v52 = vunpack.c.h.bf16 %v1724_v30 }
 0x237   : > { %v1887_v5 = vadd.f32 %v5406_v28, %v1819_v58  ;;  %v1888_v13 = vadd.f32 %v5408_v27, %v1820_v52  ;;  %v5495_v52 = vld [vmem:[%s6078_s5] sm:$0x3] }
 0x238   : > { %v1642_v1 = vpop.f32.mrf.mxu2  ;;  %v1691_v63 = vpop.f32.mrf.mxu3 }
 0x239   : > { %v1692_v37 = vadd.f32 %v1691_v63, %v1642_v1  ;;  %v1547_v46 = vpop.f32.mrf.mxu0  ;;  %v1596_v7 = vpop.f32.mrf.mxu1  ;;  %v2047_v54 = vmax.f32 %v1887_v5, 0.0  ;;  %v2048_v26 = vmax.f32 %v1888_v13, 0.0 }
 0x23a   : > { %v1597_v36 = vadd.f32 %v1596_v7, %v1547_v46  ;;  %v5500_v46 = vperm.slane %v5495_v52, 0 }
 0x23b   : > { %v1726_v57 = vpack.c.bf16 %v1692_v37, %v1594_v24 }
 0x23c   : > { %2526 = vmatmul.bf16.gmra.mxu0 %v5402_v4  ;;  %2575 = vmatmul.bf16.gmra.mxu1 %v5404_v44 }
 0x23d   : > { %v1823_v43 = vunpack.c.l.bf16 %v1726_v57  ;;  %v1824_v42 = vunpack.c.h.bf16 %v1726_v57 }
 0x23f   : > { %v1891_v34 = vadd.f32 %v5406_v28, %v1823_v43  ;;  %v1892_v30 = vadd.f32 %v5408_v27, %v1824_v42 }
 0x240   : > { %v1645_v56 = vpop.f32.mrf.mxu2  ;;  %v1694_v8 = vpop.f32.mrf.mxu3 }
 0x241   : > { %v1695_v31 = vadd.f32 %v1694_v8, %v1645_v56  ;;  %v1549_v2 = vpop.f32.mrf.mxu0  ;;  %v1598_v10 = vpop.f32.mrf.mxu1  ;;  %v2051_v1 = vmax.f32 %v1891_v34, 0.0  ;;  %v2052_v63 = vmax.f32 %v1892_v30, 0.0 }
 0x242   : > { %v1599_v43 = vadd.f32 %v1598_v10, %v1549_v2 }
 0x243   : > { %v5488_v24 = vpack.c.bf16 %v2051_v1, %v2047_v54  ;;  %v5490_v58 = vpack.c.bf16 %v2052_v63, %v2048_v26  ;;  %v1728_v37 = vpack.c.bf16 %v1695_v31, %v1597_v36 }
 0x245   : > { %2619 = vmatmul.bf16.gmra.mxu2 %v5488_v24  ;;  %2668 = vmatmul.bf16.gmra.mxu3 %v5490_v58  ;;  %v1827_v5 = vunpack.c.l.bf16 %v1728_v37  ;;  %v1828_v13 = vunpack.c.h.bf16 %v1728_v37 }
 0x247   : > { %v1895_v31 = vadd.f32 %v5406_v28, %v1827_v5  ;;  %v1896_v1 = vadd.f32 %v5408_v27, %v1828_v13 }
 0x248   : > { %v1647_v7 = vpop.f32.mrf.mxu2  ;;  %v1696_v57 = vpop.f32.mrf.mxu3 }
 0x249   : > { %v1697_v42 = vadd.f32 %v1696_v57, %v1647_v7  ;;  %v2492_v34 = vpop.f32.mrf.mxu0  ;;  %v2541_v30 = vpop.f32.mrf.mxu1  ;;  %v2055_v7 = vmax.f32 %v1895_v31, 0.0 }
 0x24a   : > { %v2493_v56 = vadd.f32 %v2492_v34, %v5500_v46 }
 0x24b   : > { %v1730_v8 = vpack.c.bf16 %v1697_v42, %v1599_v43  ;;  %v2056_v43 = vmax.f32 %v1896_v1, 0.0 }
 0x24c   : > { %v2542_v54 = vadd.f32 %v2541_v30, %v2493_v56  ;;  %2687 = vmatmul.bf16.vlgmr.msrb.gmra.mxu0 %v5318_v22  ;;  %2736 = vmatmul.bf16.vlgmr.msrb.gmra.mxu1 %v5320_v55 }
 0x24d   : > { %v1831_v26 = vunpack.c.l.bf16 %v1730_v8  ;;  %v1832_v36 = vunpack.c.h.bf16 %v1730_v8 }
 0x24f   : > { %v1899_v63 = vadd.f32 %v5406_v28, %v1831_v26  ;;  %v1900_v2 = vadd.f32 %v5408_v27, %v1832_v36 }
 0x251   : > { %v2494_v10 = vpop.f32.mrf.mxu0  ;;  %v2543_v37 = vpop.f32.mrf.mxu1  ;;  %v2059_v57 = vmax.f32 %v1899_v63, 0.0  ;;  %v2060_v42 = vmax.f32 %v1900_v2, 0.0 }
 0x252   : > { %v2495_v22 = vadd.f32 %v2494_v10, %v5500_v46 }
 0x253   : > { %v5510_v34 = vpack.c.bf16 %v2059_v57, %v2055_v7  ;;  %v5512_v55 = vpack.c.bf16 %v2060_v42, %v2056_v43 }
 0x254   : > { %v2544_v30 = vadd.f32 %v2543_v37, %v2495_v22 }
 0x255   : > { %2624 = vmatmul.bf16.gmra.mxu2 %v5510_v34  ;;  %2673 = vmatmul.bf16.gmra.mxu3 %v5512_v55 }
 0x259   : > { %v2497_v28 = vpop.f32.mrf.mxu0  ;;  %v2546_v5 = vpop.f32.mrf.mxu1 }
 0x25a   : > { %v2498_v27 = vadd.f32 %v2497_v28, %v5500_v46 }
 0x25c   : > { %v2547_v13 = vadd.f32 %v2546_v5, %v2498_v27  ;;  %2692 = vmatmul.bf16.gmra.mxu0 %v5330_v33  ;;  %2741 = vmatmul.bf16.gmra.mxu1 %v5332_v32 }
 0x261   : > { %v2499_v56 = vpop.f32.mrf.mxu0  ;;  %v2548_v8 = vpop.f32.mrf.mxu1 }
 0x262   : > { %v2500_v26 = vadd.f32 %v2499_v56, %v5500_v46 }
 0x264   : > { %v2549_v36 = vadd.f32 %v2548_v8, %v2500_v26 }
 0x265   : > { %2785 = vmatmul.bf16.vlgmr.msrb.gmra.mxu2 %v5416_v62  ;;  %2834 = vmatmul.bf16.vlgmr.msrb.gmra.mxu3 %v5418_v29 }
 0x268   : > { %v2590_v31 = vpop.f32.mrf.mxu2  ;;  %v2639_v1 = vpop.f32.mrf.mxu3 }
 0x269   : > { %v2591_v63 = vadd.f32 %v2590_v31, %v2542_v54  ;;  %v2502_v2 = vpop.f32.mrf.mxu0  ;;  %v2551_v10 = vpop.f32.mrf.mxu1 }
 0x26a   : > { %v2503_v37 = vadd.f32 %v2502_v2, %v5500_v46 }
 0x26b   : > { %v5523_v7 = vadd.f32 %v2639_v1, %v2591_v63 }
 0x26c   : > { %v2552_v33 = vadd.f32 %v2551_v10, %v2503_v37  ;;  %2697 = vmatmul.bf16.gmra.mxu0 %v5342_v3  ;;  %2746 = vmatmul.bf16.gmra.mxu1 %v5344_v40 }
 0x270   : > { %v2592_v32 = vpop.f32.mrf.mxu2  ;;  %v2641_v57 = vpop.f32.mrf.mxu3 }
 0x271   : > { %v2593_v43 = vadd.f32 %v2592_v32, %v2544_v30  ;;  %v2504_v62 = vpop.f32.mrf.mxu0  ;;  %v2553_v42 = vpop.f32.mrf.mxu1 }
 0x272   : > { %v2505_v29 = vadd.f32 %v2504_v62, %v5500_v46 }
 0x273   : > { %v5528_v22 = vadd.f32 %v2641_v57, %v2593_v43 }
 0x274   : > { %v2554_v54 = vadd.f32 %v2553_v42, %v2505_v29 }
 0x275   : > { %2790 = vmatmul.bf16.gmra.mxu2 %v5428_v39  ;;  %2839 = vmatmul.bf16.gmra.mxu3 %v5430_v25 }
 0x278   : > { %v2595_v28 = vpop.f32.mrf.mxu2  ;;  %v2644_v5 = vpop.f32.mrf.mxu3 }
 0x279   : > { %v2596_v27 = vadd.f32 %v2595_v28, %v2547_v13  ;;  %v2507_v3 = vpop.f32.mrf.mxu0  ;;  %v2556_v56 = vpop.f32.mrf.mxu1 }
 0x27a   : > { %v2508_v40 = vadd.f32 %v2507_v3, %v5500_v46 }
 0x27b   : > { %v5533_v8 = vadd.f32 %v2644_v5, %v2596_v27 }
 0x27c   : > { %v2557_v30 = vadd.f32 %v2556_v56, %v2508_v40  ;;  %2702 = vmatmul.bf16.gmra.mxu0 %v5354_v51  ;;  %2751 = vmatmul.bf16.gmra.mxu1 %v5356_v11 }
 0x280   : > { %v2597_v26 = vpop.f32.mrf.mxu2  ;;  %v2646_v31 = vpop.f32.mrf.mxu3 }
 0x281   : > { %v2598_v1 = vadd.f32 %v2597_v26, %v2549_v36  ;;  %v2509_v39 = vpop.f32.mrf.mxu0  ;;  %v2558_v63 = vpop.f32.mrf.mxu1 }
 0x282   : > { %v2510_v25 = vadd.f32 %v2509_v39, %v5500_v46 }
 0x283   : > { %v5538_v2 = vadd.f32 %v2646_v31, %v2598_v1 }
 0x284   : > { %v2559_v13 = vadd.f32 %v2558_v63, %v2510_v25 }
 0x285   : > { %2795 = vmatmul.bf16.gmra.mxu2 %v5440_v23  ;;  %2844 = vmatmul.bf16.gmra.mxu3 %v5442_v41 }
 0x288   : > { %v2600_v10 = vpop.f32.mrf.mxu2  ;;  %v2649_v37 = vpop.f32.mrf.mxu3 }
 0x289   : > { %v2601_v32 = vadd.f32 %v2600_v10, %v2552_v33  ;;  %v2512_v51 = vpop.f32.mrf.mxu0  ;;  %v2561_v57 = vpop.f32.mrf.mxu1 }
 0x28a   : > { %v2513_v11 = vadd.f32 %v2512_v51, %v5500_v46 }
 0x28b   : > { %v5543_v43 = vadd.f32 %v2649_v37, %v2601_v32 }
 0x28c   : > { %v2562_v36 = vadd.f32 %v2561_v57, %v2513_v11  ;;  %2707 = vmatmul.bf16.gmra.mxu0 %v5366_v20  ;;  %2756 = vmatmul.bf16.gmra.mxu1 %v5368_v18 }
 0x290   : > { %v2602_v62 = vpop.f32.mrf.mxu2  ;;  %v2651_v42 = vpop.f32.mrf.mxu3 }
 0x291   : > { %v2603_v29 = vadd.f32 %v2602_v62, %v2554_v54  ;;  %v2514_v23 = vpop.f32.mrf.mxu0  ;;  %v2563_v28 = vpop.f32.mrf.mxu1 }
 0x292   : > { %v2515_v41 = vadd.f32 %v2514_v23, %v5500_v46 }
 0x293   : > { %v5548_v5 = vadd.f32 %v2651_v42, %v2603_v29 }
 0x294   : > { %v2564_v33 = vadd.f32 %v2563_v28, %v2515_v41 }
 0x295   : > { %2800 = vmatmul.bf16.gmra.mxu2 %v5452_v53  ;;  %2849 = vmatmul.bf16.gmra.mxu3 %v5454_v15 }
 0x298   : > { %v2605_v27 = vpop.f32.mrf.mxu2  ;;  %v2654_v3 = vpop.f32.mrf.mxu3 }
 0x299   : > { %v2606_v56 = vadd.f32 %v2605_v27, %v2557_v30  ;;  %v2517_v20 = vpop.f32.mrf.mxu0  ;;  %v2566_v40 = vpop.f32.mrf.mxu1 }
 0x29a   : > { %v2518_v18 = vadd.f32 %v2517_v20, %v5500_v46 }
 0x29b   : > { %v5553_v26 = vadd.f32 %v2654_v3, %v2606_v56 }
 0x29c   : > { %v2567_v54 = vadd.f32 %v2566_v40, %v2518_v18  ;;  %2712 = vmatmul.bf16.gmra.mxu0 %v5378_v50  ;;  %2761 = vmatmul.bf16.gmra.mxu1 %v5380_v38 }
 0x2a0   : > { %v2607_v31 = vpop.f32.mrf.mxu2  ;;  %v2656_v1 = vpop.f32.mrf.mxu3 }
 0x2a1   : > { %v2608_v39 = vadd.f32 %v2607_v31, %v2559_v13  ;;  %v2519_v53 = vpop.f32.mrf.mxu0  ;;  %v2568_v63 = vpop.f32.mrf.mxu1 }
 0x2a2   : > { %v2520_v15 = vadd.f32 %v2519_v53, %v5500_v46 }
 0x2a3   : > { %v5558_v25 = vadd.f32 %v2656_v1, %v2608_v39 }
 0x2a4   : > { %v2569_v30 = vadd.f32 %v2568_v63, %v2520_v15 }
 0x2a5   : > { %2805 = vmatmul.bf16.gmra.mxu2 %v5464_v35  ;;  %2854 = vmatmul.bf16.gmra.mxu3 %v5466_v14 }
 0x2a8   : > { %v2610_v10 = vpop.f32.mrf.mxu2  ;;  %v2659_v37 = vpop.f32.mrf.mxu3 }
 0x2a9   : > { %v2611_v32 = vadd.f32 %v2610_v10, %v2562_v36  ;;  %v2522_v50 = vpop.f32.mrf.mxu0  ;;  %v2571_v51 = vpop.f32.mrf.mxu1 }
 0x2aa   : > { %v2523_v38 = vadd.f32 %v2522_v50, %v5500_v46 }
 0x2ab   : > { %v5563_v57 = vadd.f32 %v2659_v37, %v2611_v32 }
 0x2ac   : > { %v2572_v13 = vadd.f32 %v2571_v51, %v2523_v38  ;;  %2717 = vmatmul.bf16.gmra.mxu0 %v5392_v17  ;;  %2766 = vmatmul.bf16.gmra.mxu1 %v5394_v48 }
 0x2b0   : > { %v2612_v11 = vpop.f32.mrf.mxu2  ;;  %v2661_v62 = vpop.f32.mrf.mxu3 }
 0x2b1   : > { %v2613_v42 = vadd.f32 %v2612_v11, %v2564_v33  ;;  %v2524_v35 = vpop.f32.mrf.mxu0  ;;  %v2573_v29 = vpop.f32.mrf.mxu1 }
 0x2b2   : > { %v2525_v14 = vadd.f32 %v2524_v35, %v5500_v46 }
 0x2b3   : > { %v5568_v23 = vadd.f32 %v2661_v62, %v2613_v42 }
 0x2b4   : > { %v2574_v36 = vadd.f32 %v2573_v29, %v2525_v14 }
 0x2b5   : > { %2810 = vmatmul.bf16.gmra.mxu2 %v5476_v6  ;;  %2859 = vmatmul.bf16.gmra.mxu3 %v5478_v45 }
 0x2b8   : > { %v2615_v28 = vpop.f32.mrf.mxu2  ;;  %v2664_v41 = vpop.f32.mrf.mxu3 }
 0x2b9   : > { %v2616_v27 = vadd.f32 %v2615_v28, %v2567_v54  ;;  %v2527_v17 = vpop.f32.mrf.mxu0  ;;  %v2576_v3 = vpop.f32.mrf.mxu1 }
 0x2ba   : > { %v2528_v48 = vadd.f32 %v2527_v17, %v5500_v46  ;;  %v5604_v17 = vadd.f32 %v5528_v22, %v5023_v19 }
 0x2bb   : > { %v5573_v56 = vadd.f32 %v2664_v41, %v2616_v27 }
 0x2bc   : > { %v2577_v33 = vadd.f32 %v2576_v3, %v2528_v48  ;;  %2722 = vmatmul.bf16.gmra.mxu0 %v5402_v4  ;;  %2771 = vmatmul.bf16.gmra.mxu1 %v5404_v44  ;;  %v5610_v48 = vadd.f32 %v5523_v7, %v5020_v0  ;;  %v2967_v19 = vmul.f32 %v5604_v17, %v5604_v17 }
 0x2bd   : > { %v5627_v7 = vadd.f32 %v5543_v43, %v5100_v16  ;;  %v5643_v16 = vadd.f32 %v5553_v26, %v5147_v59 }
 0x2c0   : > { %v2617_v20 = vpop.f32.mrf.mxu2  ;;  %v2666_v40 = vpop.f32.mrf.mxu3 }
 0x2c1   : > { %v2618_v18 = vadd.f32 %v2617_v20, %v2569_v30  ;;  %v2529_v6 = vpop.f32.mrf.mxu0  ;;  %v2578_v31 = vpop.f32.mrf.mxu1  ;;  %v2909_v20 = vadd.f32 %v5604_v17, %v5610_v48 }
 0x2c2   : > { %v2530_v45 = vadd.f32 %v2529_v6, %v5500_v46 }
 0x2c3   : > { %v5578_v1 = vadd.f32 %v2666_v40, %v2618_v18  ;;  %v5620_v40 = vadd.f32 %v5538_v2, %v5066_v21  ;;  %v5636_v2 = vadd.f32 %v5548_v5, %v5103_v12  ;;  %v5650_v12 = vadd.f32 %v5558_v25, %v5150_v60 }
 0x2c4   : > { %v2579_v54 = vadd.f32 %v2578_v31, %v2530_v45  ;;  %v5661_v25 = vperm.slane %v5495_v52, 1 }
 0x2c5   : > { %2815 = vmatmul.bf16.gmra.mxu2 %v5488_v24  ;;  %2864 = vmatmul.bf16.gmra.mxu3 %v5490_v58  ;;  %v2971_v45 = vmul.f32 %v5620_v40, %v5620_v40  ;;  %v2979_v60 = vmul.f32 %v5650_v12, %v5650_v12 }
 0x2c8   : > { %v2620_v39 = vpop.f32.mrf.mxu2  ;;  %v2669_v53 = vpop.f32.mrf.mxu3 }
 0x2c9   : > { %v2621_v63 = vadd.f32 %v2620_v39, %v2572_v13  ;;  %v5582_v4 = vpop.f32.mrf.mxu0  ;;  %v5586_v15 = vpop.f32.mrf.mxu1 }
 0x2cb   : > { %v5584_v44 = vadd.f32 %v2669_v53, %v2621_v63  ;;  %v2973_v53 = vmul.f32 %v5627_v7, %v5627_v7 }
 0x2d0   : > { %v2622_v30 = vpop.f32.mrf.mxu2  ;;  %v2671_v10 = vpop.f32.mrf.mxu3 }
 0x2d1   : > { %v2623_v37 = vadd.f32 %v2622_v30, %v2574_v36  ;;  %v2690_v46 = vpop.f32.mrf.mxu0  ;;  %v5590_v50 = vpop.f32.mrf.mxu1  ;;  %v2975_v30 = vmul.f32 %v5636_v2, %v5636_v2 }
 0x2d3   : > { %v5588_v32 = vadd.f32 %v2671_v10, %v2623_v37 }
 0x2d5   : > { %2820 = vmatmul.bf16.gmra.mxu2 %v5510_v34  ;;  %2869 = vmatmul.bf16.gmra.mxu3 %v5512_v55 }
 0x2d8   : > { %v2625_v24 = vpop.f32.mrf.mxu2  ;;  %v2674_v58 = vpop.f32.mrf.mxu3 }
 0x2d9   : > { %v2626_v51 = vadd.f32 %v2625_v24, %v2577_v33  ;;  %v2693_v38 = vpop.f32.mrf.mxu0  ;;  %v5596_v11 = vpop.f32.mrf.mxu1  ;;  %v5614_v33 = vadd.f32 %v5533_v8, %v5063_v9  ;;  %v2965_v9 = vmul.f32 %v5610_v48, %v5610_v48 }
 0x2db   : > { %v5594_v13 = vadd.f32 %v2674_v58, %v2626_v51  ;;  %v2910_v0 = vadd.f32 %v2909_v20, %v5614_v33  ;;  %v2969_v8 = vmul.f32 %v5614_v33, %v5614_v33  ;;  %v2997_v31 = vadd.f32 %v2967_v19, %v2965_v9 }
 0x2dc   : > { %v2977_v58 = vmul.f32 %v5643_v16, %v5643_v16  ;;  %v2689_v9 = vadd.f32 %v5582_v4, %v5661_v25 }
 0x2dd   : > { %v2911_v21 = vadd.f32 %v2910_v0, %v5620_v40  ;;  %v2998_v39 = vadd.f32 %v2997_v31, %v2969_v8  ;;  %v2694_v8 = vadd.f32 %v2693_v38, %v5661_v25 }
 0x2df   : > { %v2999_v5 = vadd.f32 %v2998_v39, %v2971_v45 }
 0x2e0   : > { %v2627_v62 = vpop.f32.mrf.mxu2  ;;  %v2676_v42 = vpop.f32.mrf.mxu3 }
 0x2e1   : > { %v2628_v35 = vadd.f32 %v2627_v62, %v2579_v54  ;;  %v2695_v14 = vpop.f32.mrf.mxu0  ;;  %v2744_v34 = vpop.f32.mrf.mxu1  ;;  %v2912_v54 = vadd.f32 %v2911_v21, %v5627_v7  ;;  %v3000_v24 = vadd.f32 %v2999_v5, %v2973_v53 }
 0x2e2   : > { %v2696_v39 = vadd.f32 %v2695_v14, %v5661_v25 }
 0x2e3   : > { %v5598_v29 = vadd.f32 %v2676_v42, %v2628_v35  ;;  %v2913_v63 = vadd.f32 %v2912_v54, %v5636_v2  ;;  %v3001_v62 = vadd.f32 %v3000_v24, %v2975_v30  ;;  %v2691_v35 = vadd.f32 %v2690_v46, %v5661_v25 }
 0x2e4   : > { %v2743_v46 = vadd.f32 %v5596_v11, %v2694_v8  ;;  %v2745_v24 = vadd.f32 %v2744_v34, %v2696_v39  ;;  %v6177_v39 = vld [vmem:[#allocation28_spill] sm:$0xff] }
 0x2e5   : > { %v2914_v59 = vadd.f32 %v2913_v63, %v5643_v16  ;;  %v3002_v42 = vadd.f32 %v3001_v62, %v2977_v58  ;;  %v2740_v45 = vadd.f32 %v5590_v50, %v2691_v35  ;;  %v2738_v63 = vadd.f32 %v5586_v15, %v2689_v9 }
 0x2e7   : > { %v2915_v51 = vadd.f32 %v2914_v59, %v5650_v12  ;;  %v3003_v0 = vadd.f32 %v3002_v42, %v2979_v60 }
 0x2e8   : > { %v2786_v36 = vpop.f32.mrf.mxu2  ;;  %v5600_v28 = vpop.f32.mrf.mxu3 }
 0x2e9   : > { %v2698_v41 = vpop.f32.mrf.mxu0  ;;  %v5606_v3 = vpop.f32.mrf.mxu1  ;;  %v2916_v20 = vrot.slane %v2915_v51, 4  ;;  %v3004_v53 = vrot.slane %v3003_v0, 4  ;;  %v2787_v59 = vadd.f32 %v2786_v36, %v2738_v63 }
 0x2ea   : > { %v2699_v30 = vadd.f32 %v2698_v41, %v5661_v25 }
 0x2eb   : > { %v2917_v54 = vadd.f32 %v2916_v20, %v2915_v51  ;;  %v3005_v62 = vadd.f32 %v3004_v53, %v3003_v0  ;;  %v2836_v15 = vadd.f32 %v5600_v28, %v2787_v59 }
 0x2ec   : > { %v2748_v14 = vadd.f32 %v5606_v3, %v2699_v30 }
 0x2ed   : > { %v2918_v58 = vrot.slane %v2917_v54, 2  ;;  %v3006_v34 = vrot.slane %v3005_v62, 2  ;;  %v5682_v3 = vadd.f32 %v2836_v15, %v5026_v47  ;;  %v6180_v15 = vld [vmem:[#allocation24_spill] sm:$0xff] }
 0x2ef   : > { %v2966_v47 = vmul.f32 %v5682_v3, %v5682_v3 }
 0x2f0   : > { %v2788_v55 = vpop.f32.mrf.mxu2  ;;  %v2837_v27 = vpop.f32.mrf.mxu3 }
 0x2f1   : > { %v2700_v18 = vpop.f32.mrf.mxu0  ;;  %v2749_v43 = vpop.f32.mrf.mxu1  ;;  %v2789_v5 = vadd.f32 %v2788_v55, %v2740_v45 }
 0x2f2   : > { %v2701_v38 = vadd.f32 %v2700_v18, %v5661_v25 }
 0x2f3   : > { %v2838_v50 = vadd.f32 %v2837_v27, %v2789_v5 }
 0x2f4   : > { %v2750_v55 = vadd.f32 %v2749_v43, %v2701_v38  ;;  %v6178_v38 = vld [vmem:[#allocation29_spill] sm:$0xff] }
 0x2f5   : > { %v5677_v18 = vadd.f32 %v2838_v50, %v5029_v49 }
 0x2f7   : > { %v2968_v9 = vmul.f32 %v5677_v18, %v5677_v18 }
 0x2f8   : > { %v2791_v22 = vpop.f32.mrf.mxu2  ;;  %v2840_v6 = vpop.f32.mrf.mxu3 }
 0x2f9   : > { %v2703_v26 = vpop.f32.mrf.mxu0  ;;  %v2752_v19 = vpop.f32.mrf.mxu1  ;;  %v2792_v4 = vadd.f32 %v2791_v22, %v2743_v46  ;;  %v2919_v22 = vadd.f32 %v2918_v58, %v2917_v54  ;;  %v3010_v59 = vadd.f32 %v2968_v9, %v2966_v47 }
 0x2fa   : > { %v2704_v41 = vadd.f32 %v2703_v26, %v5661_v25  ;;  %v3007_v26 = vadd.f32 %v3006_v34, %v3005_v62 }
 0x2fb   : > { %v2841_v11 = vadd.f32 %v2840_v6, %v2792_v4  ;;  %v2920_v43 = vrot.slane %v2919_v22, 1 }
 0x2fc   : > { %v2753_v28 = vadd.f32 %v2752_v19, %v2704_v41  ;;  %v2922_v19 = vadd.f32 %v5677_v18, %v5682_v3  ;;  %v3008_v30 = vrot.slane %v3007_v26, 1 }
 0x2fd   : > { %v2921_v5 = vadd.f32 %v2920_v43, %v2919_v22 }
 0x300   : > { %v2793_v10 = vpop.f32.mrf.mxu2  ;;  %v2842_v37 = vpop.f32.mrf.mxu3 }
 0x301   : > { %v2705_v52 = vpop.f32.mrf.mxu0  ;;  %v2794_v42 = vadd.f32 %v2793_v10, %v2745_v24  ;;  %v2754_v35 = vpop.f32.mrf.mxu1  ;;  %v5685_v10 = vadd.f32 %v2841_v11, %v5069_v61  ;;  %v5719_v11 = vmul.f32 %v2921_v5, %v6180_v15 }
 0x303   : > { %v2843_v20 = vadd.f32 %v2842_v37, %v2794_v42  ;;  %v2970_v61 = vmul.f32 %v5685_v10, %v5685_v10  ;;  %v2923_v4 = vadd.f32 %v2922_v19, %v5685_v10 }
 0x305   : > { %v3011_v62 = vadd.f32 %v3010_v59, %v2970_v61 }
 0x308   : > { %v2796_v21 = vpop.f32.mrf.mxu2  ;;  %v2845_v31 = vpop.f32.mrf.mxu3 }
 0x309   : > { %v2797_v36 = vadd.f32 %v2796_v21, %v2748_v14  ;;  %v5679_v27 = vpop.f32.mrf.mxu0  ;;  %v6176_v21 = vld [vmem:[#allocation27_spill] sm:$0xff]  ;;  %v5702_v63 = vpop.f32.mrf.mxu1  ;;  %v6179_v14 = vld [vmem:[#allocation30_spill] sm:$0xff] }
 0x30a   : > { %v5690_v37 = vadd.f32 %v2843_v20, %v6176_v21 }
 0x30b   : > { %v2846_v6 = vadd.f32 %v2845_v31, %v2797_v36  ;;  %v2706_v31 = vadd.f32 %v2705_v52, %v5661_v25 }
 0x30c   : > { %v2972_v24 = vmul.f32 %v5690_v37, %v5690_v37  ;;  %v2924_v52 = vadd.f32 %v2923_v4, %v5690_v37  ;;  %v6182_v4 = vld [vmem:[#allocation26_spill] sm:$0xff] }
 0x30d   : > { %v5700_v53 = vadd.f32 %v2846_v6, %v6177_v39  ;;  %v2755_v50 = vadd.f32 %v2754_v35, %v2706_v31 }
 0x30e   : > { %v3012_v22 = vadd.f32 %v3011_v62, %v2972_v24  ;;  %v5747_v24 = vadd.f32 %v5568_v23, %v6182_v4 }
 0x30f   : > { %v2925_v34 = vadd.f32 %v2924_v52, %v5700_v53 }
 0x310   : > { %v2798_v51 = vpop.f32.mrf.mxu2  ;;  %v2847_v60 = vpop.f32.mrf.mxu3 }
 0x311   : > { %v2799_v0 = vadd.f32 %v2798_v51, %v2750_v55  ;;  %v2974_v51 = vmul.f32 %v5700_v53, %v5700_v53  ;;  %v3009_v55 = vadd.f32 %v3008_v30, %v3007_v26  ;;  %v3053_v26 = vmul.f32 %v5719_v11, %v5719_v11 }
 0x313   : > { %v2848_v45 = vadd.f32 %v2847_v60, %v2799_v0  ;;  %v5713_v60 = vpop.f32.mrf.mxu0  ;;  %v3013_v0 = vadd.f32 %v3012_v22, %v2974_v51  ;;  %v3049_v9 = vmul.f32 %v3009_v55, %v6180_v15  ;;  %v2983_v22 = vmul.f32 %v5747_v24, %v5747_v24 }
 0x315   : > { %v5708_v58 = vadd.f32 %v2848_v45, %v6178_v38  ;;  %v6181_v45 = vld [vmem:[#allocation31_spill] sm:$0xff]  ;;  %v3057_v31 = vsub.f32 %v3049_v9, %v3053_v26  ;;  %v6187_v9 = vld [vmem:[#allocation38_spill] sm:$0xff] }
 0x317   : > { %v2976_v35 = vmul.f32 %v5708_v58, %v5708_v58  ;;  %v3061_v52 = vmax.f32 %v3057_v31, 0.0 }
 0x318   : > { %v2801_v8 = vpop.f32.mrf.mxu2  ;;  %v2850_v49 = vpop.f32.mrf.mxu3 }
 0x319   : > { %v2802_v54 = vadd.f32 %v2801_v8, %v2753_v28  ;;  %v2926_v28 = vadd.f32 %v2925_v34, %v5708_v58  ;;  %v3014_v8 = vadd.f32 %v3013_v0, %v2976_v35  ;;  %v6185_v34 = vld [vmem:[#allocation35_spill] sm:$0xff] }
 0x31a   : > { %v5761_v23 = vadd.f32 %v5578_v1, %v6185_v34  ;;  %v5777_v1 = vadd.f32 %v5584_v44, %v6187_v9 }
 0x31b   : > { %v2851_v46 = vadd.f32 %v2850_v49, %v2802_v54  ;;  %v5730_v49 = vpop.f32.mrf.mxu1  ;;  %v5743_v5 = vpop.f32.mrf.mxu0 }
 0x31c   : > { %6186 = vst [vmem:[#allocation27_spill] sm:$0xff] %v5761_v23 }
 0x31d   : > { %v5716_v42 = vadd.f32 %v2851_v46, %v6179_v14  ;;  %v6184_v14 = vld [vmem:[#allocation34_spill] sm:$0xff]  ;;  %6188 = vst [vmem:[#allocation28_spill] sm:$0xff] %v5777_v1 }
 0x31e   : > { %v5755_v55 = vadd.f32 %v5573_v56, %v6184_v14 }
 0x31f   : > { %v2978_v6 = vmul.f32 %v5716_v42, %v5716_v42  ;;  %v2927_v21 = vadd.f32 %v2926_v28, %v5716_v42  ;;  %v5765_v28 = vadd.f32 1e-05, %v3061_v52 }
 0x320   : > { %v2803_v41 = vpop.f32.mrf.mxu2  ;;  %v2852_v36 = vpop.f32.mrf.mxu3  ;;  %v2985_v56 = vmul.f32 %v5755_v55, %v5755_v55 }
 0x321   : > { %v2804_v20 = vadd.f32 %v2803_v41, %v2755_v50  ;;  %v3015_v47 = vadd.f32 %v3014_v8, %v2978_v6  ;;  %v6183_v50 = vld [vmem:[#allocation25_spill] sm:$0xff]  ;;  %4188 = vrsqrt.f32 %v5765_v28  ;;  %vm3075_vm1 = vweird.f32 %v5765_v28 }
 0x322   : > { %v5751_v51 = vadd.f32 %v5563_v57, %v6183_v50 }
 0x323   : > { %v2853_v43 = vadd.f32 %v2852_v36, %v2804_v20  ;;  %v5763_v35 = vpop.f32.mrf.mxu1 }
 0x324   : > { %v2981_v57 = vmul.f32 %v5751_v51, %v5751_v51 }
 0x325   : > { %v5734_v54 = vadd.f32 %v2853_v43, %v6181_v45 }
 0x326   : > { %v3023_v45 = vadd.f32 %v2983_v22, %v2981_v57  ;;  %v6193_v22 = vld [vmem:[#allocation43_spill] sm:$0xff] }
 0x327   : > { %v2928_v61 = vadd.f32 %v2927_v21, %v5734_v54  ;;  %v2980_v19 = vmul.f32 %v5734_v54, %v5734_v54  ;;  %v2935_v21 = vadd.f32 %v5747_v24, %v5751_v51  ;;  %v5803_v34 = vadd.f32 %v5598_v29, %v6193_v22 }
 0x328   : > { %v5739_v39 = vpop.f32.mrf.mxu2  ;;  %v5741_v46 = vpop.f32.mrf.mxu3  ;;  %v3024_v4 = vadd.f32 %v3023_v45, %v2985_v56 }
 0x329   : > { %v2929_v30 = vrot.slane %v2928_v61, 4  ;;  %v3016_v59 = vadd.f32 %v3015_v47, %v2980_v19  ;;  %v2987_v47 = vmul.f32 %v5761_v23, %v5761_v23  ;;  %v2936_v44 = vadd.f32 %v2935_v21, %v5755_v55  ;;  %6194 = vst [vmem:[#allocation24_spill] sm:$0xff] %v5803_v34  ;;  %v5813_v21 = vpop.eup %4188 }
 0x32a   : > { %vm3076_vm15 = vweird.f32 %v5813_v21 }
 0x32b   : > { %v2930_v38 = vadd.f32 %v2929_v30, %v2928_v61  ;;  %v3017_v62 = vrot.slane %v3016_v59, 4  ;;  %v6189_v61 = vld [vmem:[#allocation39_spill] sm:$0xff]  ;;  %v2937_v14 = vadd.f32 %v2936_v44, %v5761_v23  ;;  %v2764_v45 = vpop.f32.mrf.mxu1  ;;  %vm3077_vm3 = vmor %vm3075_vm1, %vm3076_vm15 }
 0x32c   : > { %v5785_v19 = vadd.f32 %v5588_v32, %v6189_v61  ;;  %v2995_v61 = vmul.f32 %v5803_v34, %v5803_v34 }
 0x32d   : > { %v2931_v41 = vrot.slane %v2930_v38, 2  ;;  %v3018_v36 = vadd.f32 %v3017_v62, %v3016_v59  ;;  %v2715_v59 = vpop.f32.mrf.mxu0  ;;  %v6191_v62 = vld [vmem:[#allocation42_spill] sm:$0xff]  ;;  %v2938_v56 = vadd.f32 %v2937_v14, %v5777_v1 }
 0x32e   : > { %6190 = vst [vmem:[#allocation29_spill] sm:$0xff] %v5785_v19  ;;  %v5793_v52 = vadd.f32 %v5594_v13, %v6191_v62 }
 0x32f   : > { %v2932_v20 = vadd.f32 %v2931_v41, %v2930_v38  ;;  %v3019_v0 = vrot.slane %v3018_v36, 2  ;;  %v2989_v38 = vmul.f32 %v5777_v1, %v5777_v1  ;;  %v3025_v41 = vadd.f32 %v3024_v4, %v2987_v47 }
 0x330   : > { %v5771_v6 = vpop.f32.mrf.mxu2  ;;  %v5773_v43 = vpop.f32.mrf.mxu3  ;;  %6192 = vst [vmem:[#allocation30_spill] sm:$0xff] %v5793_v52  ;;  %v2939_v29 = vadd.f32 %v2938_v56, %v5785_v19 }
 0x331   : > { %v2933_v26 = vrot.slane %v2932_v20, 1  ;;  %v3020_v8 = vadd.f32 %v3019_v0, %v3018_v36  ;;  %v2991_v36 = vmul.f32 %v5785_v19, %v5785_v19  ;;  %v3026_v9 = vadd.f32 %v3025_v41, %v2989_v38 }
 0x332   : > { %v3070_v38 = vmul.f32 %v5813_v21, %v5765_v28  ;;  %v2714_v19 = vadd.f32 %v5743_v5, %v5661_v25 }
 0x333   : > { %v2934_v31 = vadd.f32 %v2933_v26, %v2932_v20  ;;  %v3021_v30 = vrot.slane %v3020_v8, 1  ;;  %v2993_v26 = vmul.f32 %v5793_v52, %v5793_v52  ;;  %v3027_v47 = vadd.f32 %v3026_v9, %v2991_v36  ;;  %v2767_v56 = vpop.f32.mrf.mxu1 }
 0x334   : > { %v3071_v36 = vmul.f32 %v5813_v21, %v3070_v38 }
 0x335   : > { %v5796_v50 = vmul.f32 %v2934_v31, %v6180_v15  ;;  %v3022_v32 = vadd.f32 %v3021_v30, %v3020_v8  ;;  %v2940_v30 = vadd.f32 %v2939_v29, %v5793_v52  ;;  %v3028_v44 = vadd.f32 %v3027_v47, %v2993_v26  ;;  %v2718_v62 = vpop.f32.mrf.mxu0 }
 0x337   : > { %v3050_v20 = vmul.f32 %v3022_v32, %v6180_v15  ;;  %v3054_v13 = vmul.f32 %v5796_v50, %v5796_v50  ;;  %v2941_v32 = vadd.f32 %v2940_v30, %v5803_v34  ;;  %v3029_v14 = vadd.f32 %v3028_v44, %v2995_v61 }
 0x338   : > { %v2811_v0 = vpop.f32.mrf.mxu2  ;;  %v5808_v57 = vpop.f32.mrf.mxu3  ;;  %v2709_v34 = vadd.f32 %v5679_v27, %v5661_v25 }
 0x339   : > { %v3058_v8 = vsub.f32 %v3050_v20, %v3054_v13  ;;  %v2942_v20 = vrot.slane %v2941_v32, 4  ;;  %v3030_v13 = vrot.slane %v3029_v14, 4 }
 0x33b   : > { %v3062_v31 = vmax.f32 %v3058_v8, 0.0  ;;  %v3072_v8 = vmul.f32 0.5, %v3071_v36  ;;  %v2943_v29 = vadd.f32 %v2942_v20, %v2941_v32  ;;  %v3031_v47 = vadd.f32 %v3030_v13, %v3029_v14 }
 0x33c   : > { %v2758_v20 = vadd.f32 %v5702_v63, %v2709_v34  ;;  %v2719_v63 = vadd.f32 %v2718_v62, %v5661_v25 }
 0x33d   : > { %v3066_v4 = vadd.f32 1e-05, %v3062_v31  ;;  %v2711_v31 = vadd.f32 %v5713_v60, %v5661_v25  ;;  %v2720_v52 = vpop.f32.mrf.mxu0  ;;  %v3073_v38 = vsub.f32 1.5, %v3072_v8  ;;  %v2944_v36 = vrot.slane %v2943_v29, 2 }
 0x33e   : > { %v3032_v23 = vrot.slane %v3031_v47, 2  ;;  %v2716_v60 = vadd.f32 %v2715_v59, %v5661_v25  ;;  %v2763_v8 = vadd.f32 %v5763_v35, %v2714_v19  ;;  %v2807_v59 = vadd.f32 %v5739_v39, %v2758_v20  ;;  %v5845_v35 = vld [vmem:[#allocation11] sm:$0x3] }
 0x33f   : > { %4190 = vrsqrt.f32 %v3066_v4  ;;  %v2760_v32 = vadd.f32 %v5730_v49, %v2711_v31  ;;  %v3074_v27 = vmul.f32 %v5813_v21, %v3073_v38  ;;  %vm3085_vm0 = vweird.f32 %v3066_v4 }
 0x340   : > { %v2813_v41 = vpop.f32.mrf.mxu2  ;;  %v5822_v22 = vpop.f32.mrf.mxu3  ;;  %v2945_v49 = vadd.f32 %v2944_v36, %v2943_v29  ;;  %v2812_v34 = vadd.f32 %v2811_v0, %v2763_v8  ;;  %v2721_v28 = vadd.f32 %v2720_v52, %v5661_v25  ;;  %v2856_v0 = vadd.f32 %v5741_v46, %v2807_v59 }
 0x341   : > { %v2809_v13 = vadd.f32 %v5771_v6, %v2760_v32  ;;  %v3078_v29 = vsel %vm3077_vm3, %v5813_v21, %v3074_v27  ;;  %v2768_v36 = vadd.f32 %v2767_v56, %v2719_v63  ;;  %v6196_v27 = vld [vmem:[#allocation32_spill] sm:$0xff]  ;;  %v6198_v63 = vld [vmem:[#allocation37_spill] sm:$0xff] }
 0x342   : > { %v2861_v32 = vadd.f32 %v5808_v57, %v2812_v34  ;;  %v5863_v46 = vadd.f32 %v2856_v0, %v6196_v27 }
 0x345   : > { %v4191_v9 = vpop.eup %4190 }
 0x346   : > { %v3080_v26 = vmul.f32 %v4191_v9, %v3066_v4  ;;  %vm3086_vm14 = vweird.f32 %v4191_v9  ;;  %v2858_v4 = vadd.f32 %v5773_v43, %v2809_v13 }
 0x347   : > { %vm3087_vm2 = vmor %vm3085_vm0, %vm3086_vm14 }
 0x348   : > { %v3081_v30 = vmul.f32 %v4191_v9, %v3080_v26  ;;  %v2816_v61 = vpop.f32.mrf.mxu2  ;;  %v5827_v44 = vpop.f32.mrf.mxu3 }
 0x349   : > { %v2769_v26 = vpop.f32.mrf.mxu1  ;;  %v2817_v20 = vadd.f32 %v2816_v61, %v2768_v36  ;;  %v5876_v61 = vld [vmem:[%s6082_s9] sm:$0x3] }
 0x34a   : > { %v3082_v1 = vmul.f32 0.5, %v3081_v30  ;;  %v2765_v30 = vadd.f32 %v2764_v45, %v2716_v60  ;;  %v2946_v45 = vrot.slane %v2945_v49, 1  ;;  %v2770_v52 = vadd.f32 %v2769_v26, %v2721_v28 }
 0x34b   : > { %v2866_v34 = vadd.f32 %v5827_v44, %v2817_v20 }
 0x34c   : > { %v3083_v14 = vsub.f32 1.5, %v3082_v1  ;;  %v3033_v1 = vadd.f32 %v3032_v23, %v3031_v47  ;;  %v2723_v23 = vpop.f32.mrf.mxu0  ;;  %v2814_v39 = vadd.f32 %v2813_v41, %v2765_v30  ;;  %v2947_v13 = vadd.f32 %v2946_v45, %v2945_v49 }
 0x34d   : > { %v2724_v8 = vadd.f32 %v2723_v23, %v5661_v25 }
 0x34e   : > { %v3084_v5 = vmul.f32 %v4191_v9, %v3083_v14  ;;  %v3034_v47 = vrot.slane %v3033_v1, 1  ;;  %v6195_v14 = vld [vmem:[#allocation33_spill] sm:$0xff]  ;;  %v2863_v41 = vadd.f32 %v5822_v22, %v2814_v39 }
 0x34f   : > { %v5855_v43 = vadd.f32 %v2858_v4, %v6195_v14 }
 0x350   : > { %v3088_v31 = vsel %vm3087_vm2, %v4191_v9, %v3084_v5  ;;  %v2818_v6 = vpop.f32.mrf.mxu2  ;;  %v2867_v9 = vpop.f32.mrf.mxu3  ;;  %v3035_v56 = vadd.f32 %v3034_v47, %v3033_v1  ;;  %v6197_v5 = vld [vmem:[#allocation36_spill] sm:$0xff] }
 0x351   : > { %v3113_v19 = vrot.slane %v3088_v31, 7  ;;  %v5869_v59 = vadd.f32 %v2861_v32, %v6197_v5  ;;  %v2772_v26 = vpop.f32.mrf.mxu1  ;;  %v2819_v31 = vadd.f32 %v2818_v6, %v2770_v52  ;;  %v2984_v22 = vmul.f32 %v5855_v43, %v5855_v43  ;;  %v6199_v52 = vld [vmem:[#allocation40_spill] sm:$0xff] }
 0x352   : > { %v5885_v6 = vmul.f32 %v2947_v13, %v6180_v15  ;;  %v2948_v4 = vadd.f32 %v5855_v43, %v5863_v46  ;;  %v2773_v28 = vadd.f32 %v2772_v26, %v2724_v8 }
 0x353   : > { %v3115_v62 = vsel %vm800_vm7, %v3078_v29, %v3113_v19  ;;  %v2982_v19 = vmul.f32 %v5863_v46, %v5863_v46  ;;  %v5892_v29 = vmul.f32 %v3035_v56, %v6180_v15  ;;  %v2986_v39 = vmul.f32 %v5869_v59, %v5869_v59  ;;  %v6200_v56 = vld [vmem:[#allocation41_spill] sm:$0xff] }
 0x354   : > { %v3119_v38 = vmul.f32 %v3115_v62, %v5845_v35  ;;  %v2725_v23 = vpop.f32.mrf.mxu0  ;;  %v2868_v44 = vadd.f32 %v2867_v9, %v2819_v31  ;;  %v2949_v47 = vadd.f32 %v2948_v4, %v5869_v59 }
 0x355   : > { %v3036_v0 = vadd.f32 %v2984_v22, %v2982_v19  ;;  %v2726_v14 = vadd.f32 %v2725_v23, %v5661_v25 }
 0x356   : > { %v5857_v60 = vperm.slane %v3119_v38, 0  ;;  %v5859_v21 = vperm.slane %v3119_v38, 1 }
 0x357   : > { %v3037_v8 = vadd.f32 %v3036_v0, %v2986_v39  ;;  %v6201_v39 = vld [vmem:[#allocation44_spill] sm:$0xff] }
 0x358   : > { %v3132_v57 = vmul.f32 %v5859_v21, %v5796_v50  ;;  %v2821_v30 = vpop.f32.mrf.mxu2  ;;  %v3131_v49 = vmul.f32 %v5857_v60, %v5719_v11  ;;  %v5881_v50 = vadd.f32 %v2863_v41, %v6198_v63  ;;  %v2870_v45 = vpop.f32.mrf.mxu3  ;;  %v3147_v36 = vmul.f32 %v5857_v60, %v5610_v48 }
 0x359   : > { %v2822_v38 = vadd.f32 %v2821_v30, %v2773_v28  ;;  %v5905_v41 = vadd.f32 %v2866_v34, %v6199_v52  ;;  %v3148_v9 = vmul.f32 %v5859_v21, %v5682_v3  ;;  %v3149_v20 = vmul.f32 %v5857_v60, %v5604_v17  ;;  %v2774_v22 = vpop.f32.mrf.mxu1 }
 0x35a   : > { %v3139_v1 = vrot.slane %v3132_v57, 7  ;;  %v2988_v32 = vmul.f32 %v5881_v50, %v5881_v50  ;;  %v3150_v48 = vmul.f32 %v5859_v21, %v5677_v18  ;;  %v3151_v25 = vmul.f32 %v5857_v60, %v5614_v33 }
 0x35b   : > { %v5920_v57 = vadd.f32 %v2868_v44, %v6200_v56  ;;  %v2871_v26 = vadd.f32 %v2870_v45, %v2822_v38  ;;  %v3152_v31 = vmul.f32 %v5859_v21, %v5685_v10  ;;  %v2950_v30 = vadd.f32 %v2949_v47, %v5881_v50 }
 0x35c   : > { %v3141_v11 = vsel %vm800_vm7, %v3131_v49, %v3139_v1  ;;  %v2990_v33 = vmul.f32 %v5905_v41, %v5905_v41  ;;  %v3153_v1 = vmul.f32 %v5857_v60, %v5620_v40  ;;  %v3038_v10 = vadd.f32 %v3037_v8, %v2988_v32  ;;  %v6202_v8 = vld [vmem:[#allocation45_spill] sm:$0xff] }
 0x35d   : > { %v3145_v62 = vsub.f32 %v5876_v61, %v3141_v11  ;;  %v2775_v34 = vadd.f32 %v2774_v22, %v2726_v14  ;;  %v3154_v19 = vmul.f32 %v5859_v21, %v5690_v37  ;;  %v2951_v40 = vadd.f32 %v2950_v30, %v5905_v41 }
 0x35e   : > { %v2992_v28 = vmul.f32 %v5920_v57, %v5920_v57  ;;  %v3155_v23 = vmul.f32 %v5857_v60, %v5627_v7  ;;  %v5950_v44 = vadd.f32 %v2871_v26, %v6201_v39  ;;  %v3156_v37 = vmul.f32 %v5859_v21, %v5700_v53 }
 0x35f   : > { %v5911_v13 = vperm.slane %v3145_v62, 0  ;;  %v5913_v27 = vperm.slane %v3145_v62, 1  ;;  %v3039_v0 = vadd.f32 %v3038_v10, %v2990_v33  ;;  %v2952_v47 = vadd.f32 %v2951_v40, %v5920_v57 }
 0x360   : > { %v2823_v49 = vpop.f32.mrf.mxu2  ;;  %v2872_v38 = vpop.f32.mrf.mxu3  ;;  %v3157_v7 = vmul.f32 %v5857_v60, %v5636_v2  ;;  %v2994_v32 = vmul.f32 %v5950_v44, %v5950_v44  ;;  %v3055_v53 = vmul.f32 %v5885_v6, %v5885_v6  ;;  %v3158_v52 = vmul.f32 %v5859_v21, %v5708_v58 }
 0x361   : > { %v3189_v3 = vadd.f32 %v5911_v13, %v3147_v36  ;;  %v3190_v5 = vadd.f32 %v5913_v27, %v3148_v9  ;;  %v3191_v17 = vadd.f32 %v5911_v13, %v3149_v20  ;;  %v3192_v18 = vadd.f32 %v5913_v27, %v3150_v48 }
 0x362   : > { %v3193_v63 = vadd.f32 %v5911_v13, %v3151_v25  ;;  %v3194_v4 = vadd.f32 %v5913_v27, %v3152_v31  ;;  %v3195_v11 = vadd.f32 %v5911_v13, %v3153_v1  ;;  %v2824_v45 = vadd.f32 %v2823_v49, %v2775_v34 }
 0x363   : > { %3221 = vst [vmem:[%s5935_s28] sm:$0xff] %v3189_v3  ;;  %v3196_v62 = vadd.f32 %v5913_v27, %v3154_v19  ;;  %v3197_v36 = vadd.f32 %v5911_v13, %v3155_v23  ;;  %v3159_v9 = vmul.f32 %v5857_v60, %v5643_v16  ;;  %v3198_v2 = vadd.f32 %v5913_v27, %v3156_v37 }
 0x364   : > { %3222 = vst [vmem:[%s5935_s28 + $0x8] sm:$0xff] %v3190_v5  ;;  %v2873_v14 = vadd.f32 %v2872_v38, %v2824_v45  ;;  %v3199_v20 = vadd.f32 %v5911_v13, %v3157_v7  ;;  %v3040_v48 = vadd.f32 %v3039_v0, %v2992_v28  ;;  %v2953_v25 = vadd.f32 %v2952_v47, %v5950_v44 }
 0x365   : > { %3223 = vst [vmem:[%s5935_s28 + $0x10] sm:$0xff] %v3191_v17  ;;  %v3160_v58 = vmul.f32 %v5859_v21, %v5716_v42  ;;  %v3161_v16 = vmul.f32 %v5857_v60, %v5650_v12  ;;  %v3200_v3 = vadd.f32 %v5913_v27, %v3158_v52  ;;  %v3201_v5 = vadd.f32 %v5911_v13, %v3159_v9 }
 0x366   : > { %3224 = vst [vmem:[%s5935_s28 + $0x18] sm:$0xff] %v3192_v18  ;;  %v5975_v56 = vadd.f32 %v2873_v14, %v6202_v8  ;;  %v3041_v17 = vadd.f32 %v3040_v48, %v2994_v32  ;;  %v3162_v42 = vmul.f32 %v5859_v21, %v5734_v54  ;;  %v3059_v60 = vsub.f32 %v5892_v29, %v3055_v53 }
 0x367   : > { %3225 = vst [vmem:[%s5935_s28 + $0x20] sm:$0xff] %v3193_v63  ;;  %v3202_v12 = vadd.f32 %v5913_v27, %v3160_v58  ;;  %v3203_v18 = vadd.f32 %v5911_v13, %v3161_v16 }
 0x368   : > { %3226 = vst [vmem:[%s5935_s28 + $0x28] sm:$0xff] %v3194_v4  ;;  %v2954_v26 = vadd.f32 %v2953_v25, %v5975_v56  ;;  %v2996_v31 = vmul.f32 %v5975_v56, %v5975_v56  ;;  %v3204_v33 = vadd.f32 %v5913_v27, %v3162_v42  ;;  %v3063_v63 = vmax.f32 %v3059_v60, 0.0 }
 0x369   : > { %3227 = vst [vmem:[%s5935_s28 + $0x30] sm:$0xff] %v3195_v11 }
 0x36a   : > { %3228 = vst [vmem:[%s5935_s28 + $0x38] sm:$0xff] %v3196_v62  ;;  %v2955_v30 = vrot.slane %v2954_v26, 4  ;;  %v3042_v22 = vadd.f32 %v3041_v17, %v2996_v31  ;;  %v3067_v29 = vadd.f32 1e-05, %v3063_v63 }
 0x36b   : > { %3229 = vst [vmem:[%s5935_s28 + $0x40] sm:$0xff] %v3197_v36 }
 0x36c   : > { %3230 = vst [vmem:[%s5935_s28 + $0x48] sm:$0xff] %v3198_v2  ;;  %v2956_v49 = vadd.f32 %v2955_v30, %v2954_v26  ;;  %v3043_v1 = vrot.slane %v3042_v22, 4  ;;  %4192 = vrsqrt.f32 %v3067_v29  ;;  %vm3095_vm9 = vweird.f32 %v3067_v29 }
 0x36d   : > { %3231 = vst [vmem:[%s5935_s28 + $0x50] sm:$0xff] %v3199_v20 }
 0x36e   : > { %3232 = vst [vmem:[%s5935_s28 + $0x58] sm:$0xff] %v3200_v3  ;;  %v2957_v54 = vrot.slane %v2956_v49, 2  ;;  %v3044_v21 = vadd.f32 %v3043_v1, %v3042_v22  ;;  %v6203_v1 = vld [vmem:[#allocation27_spill] sm:$0xff] }
 0x36f   : > { %3233 = vst [vmem:[%s5935_s28 + $0x60] sm:$0xff] %v3201_v5 }
 0x370   : > { %3234 = vst [vmem:[%s5935_s28 + $0x68] sm:$0xff] %v3202_v12  ;;  %v2958_v10 = vadd.f32 %v2957_v54, %v2956_v49  ;;  %v3045_v34 = vrot.slane %v3044_v21, 2 }
 0x371   : > { %3235 = vst [vmem:[%s5935_s28 + $0x70] sm:$0xff] %v3203_v18 }
 0x372   : > { %3236 = vst [vmem:[%s5935_s28 + $0x78] sm:$0xff] %v3204_v33  ;;  %v2959_v19 = vrot.slane %v2958_v10, 1  ;;  %v3046_v13 = vadd.f32 %v3045_v34, %v3044_v21  ;;  %v4193_v45 = vpop.eup %4192  ;;  %v6205_v34 = vld [vmem:[#allocation29_spill] sm:$0xff] }
 0x373   : > { %v3090_v0 = vmul.f32 %v4193_v45, %v3067_v29  ;;  %vm3096_vm5 = vweird.f32 %v4193_v45 }
 0x374   : > { %v2960_v4 = vadd.f32 %v2959_v19, %v2958_v10  ;;  %v3047_v40 = vrot.slane %v3046_v13, 1  ;;  %vm3097_vm10 = vmor %vm3095_vm9, %vm3096_vm5 }
 0x375   : > { %v3091_v47 = vmul.f32 %v4193_v45, %v3090_v0 }
 0x376   : > { %v2964_v27 = vmul.f32 %v2960_v4, %v6180_v15  ;;  %v3048_v28 = vadd.f32 %v3047_v40, %v3046_v13  ;;  %v6206_v4 = vld [vmem:[#allocation30_spill] sm:$0xff] }
 0x377   : > { %v3092_v7 = vmul.f32 0.5, %v3091_v47 }
 0x378   : > { %v3052_v23 = vmul.f32 %v3048_v28, %v6180_v15  ;;  %v3056_v11 = vmul.f32 %v2964_v27, %v2964_v27 }
 0x379   : > { %v3093_v14 = vsub.f32 1.5, %v3092_v7 }
 0x37a   : > { %v3060_v39 = vsub.f32 %v3052_v23, %v3056_v11  ;;  %v6207_v23 = vld [vmem:[#allocation24_spill] sm:$0xff] }
 0x37b   : > { %v3094_v9 = vmul.f32 %v4193_v45, %v3093_v14 }
 0x37c   : > { %v3064_v37 = vmax.f32 %v3060_v39, 0.0 }
 0x37d   : > { %v3098_v48 = vsel %vm3097_vm10, %v4193_v45, %v3094_v9 }
 0x37e   : > { %v3068_v62 = vadd.f32 1e-05, %v3064_v37 }
 0x380   : > { %4194 = vrsqrt.f32 %v3068_v62  ;;  %vm3105_vm6 = vweird.f32 %v3068_v62 }
 0x386   : > { %v4195_v38 = vpop.eup %4194 }
 0x387   : > { %v3100_v36 = vmul.f32 %v4195_v38, %v3068_v62  ;;  %vm3106_vm4 = vweird.f32 %v4195_v38 }
 0x388   : > { %vm3107_vm8 = vmor %vm3105_vm6, %vm3106_vm4 }
 0x389   : > { %v3101_v32 = vmul.f32 %v4195_v38, %v3100_v36 }
 0x38b   : > { %v3102_v53 = vmul.f32 0.5, %v3101_v32 }
 0x38d   : > { %v3103_v52 = vsub.f32 1.5, %v3102_v53 }
 0x38f   : > { %v3104_v2 = vmul.f32 %v4195_v38, %v3103_v52 }
 0x391   : > { %v3108_v15 = vsel %vm3107_vm8, %v4195_v38, %v3104_v2 }
 0x392   : > { %v3114_v20 = vrot.slane %v3108_v15, 7 }
 0x394   : > { %v3116_v25 = vsel %vm800_vm7, %v3098_v48, %v3114_v20 }
 0x395   : > { %v3120_v8 = vmul.f32 %v3116_v25, %v5845_v35 }
 0x397   : > { %v3125_v58 = vperm.slane %v3120_v8, 0  ;;  %v3126_v16 = vperm.slane %v3120_v8, 1 }
 0x399   : > { %v3134_v3 = vmul.f32 %v3126_v16, %v2964_v27  ;;  %v3133_v5 = vmul.f32 %v3125_v58, %v5885_v6  ;;  %v3163_v42 = vmul.f32 %v3125_v58, %v5751_v51  ;;  %v3164_v12 = vmul.f32 %v3126_v16, %v5863_v46 }
 0x39a   : > { %v3165_v60 = vmul.f32 %v3125_v58, %v5747_v24  ;;  %v3166_v30 = vmul.f32 %v3126_v16, %v5855_v43  ;;  %v3167_v6 = vmul.f32 %v3125_v58, %v5755_v55  ;;  %v3169_v46 = vmul.f32 %v3125_v58, %v6203_v1  ;;  %v6204_v43 = vld [vmem:[#allocation28_spill] sm:$0xff] }
 0x39b   : > { %v3140_v17 = vrot.slane %v3134_v3, 7  ;;  %v3170_v24 = vmul.f32 %v3126_v16, %v5881_v50  ;;  %v3171_v55 = vmul.f32 %v3125_v58, %v6204_v43  ;;  %v3172_v10 = vmul.f32 %v3126_v16, %v5905_v41 }
 0x39c   : > { %v3173_v29 = vmul.f32 %v3125_v58, %v6205_v34  ;;  %v3174_v50 = vmul.f32 %v3126_v16, %v5920_v57  ;;  %v3175_v40 = vmul.f32 %v3125_v58, %v6206_v4  ;;  %v3176_v41 = vmul.f32 %v3126_v16, %v5950_v44 }
 0x39d   : > { %v3142_v26 = vsel %vm800_vm7, %v3133_v5, %v3140_v17  ;;  %v3177_v57 = vmul.f32 %v3125_v58, %v6207_v23  ;;  %v3178_v39 = vmul.f32 %v3126_v16, %v5975_v56 }
 0x39e   : > { %v3146_v31 = vsub.f32 %v5876_v61, %v3142_v26  ;;  %v3168_v61 = vmul.f32 %v3126_v16, %v5869_v59 }
 0x3a0   : > { %v3183_v18 = vperm.slane %v3146_v31, 0  ;;  %v3184_v35 = vperm.slane %v3146_v31, 1 }
 0x3a2   : > { %v3205_v22 = vadd.f32 %v3183_v18, %v3163_v42  ;;  %v3206_v33 = vadd.f32 %v3184_v35, %v3164_v12  ;;  %v3207_v49 = vadd.f32 %v3183_v18, %v3165_v60  ;;  %v3208_v51 = vadd.f32 %v3184_v35, %v3166_v30 }
 0x3a3   : > { %v3209_v63 = vadd.f32 %v3183_v18, %v3167_v6  ;;  %v3210_v54 = vadd.f32 %v3184_v35, %v3168_v61  ;;  %v3211_v21 = vadd.f32 %v3183_v18, %v3169_v46  ;;  %v3212_v59 = vadd.f32 %v3184_v35, %v3170_v24 }
 0x3a4   : > { %3237 = vst [vmem:[%s5935_s28 + $0x80] sm:$0xff] %v3205_v22  ;;  %v3213_v19 = vadd.f32 %v3183_v18, %v3171_v55  ;;  %v3214_v13 = vadd.f32 %v3184_v35, %v3172_v10  ;;  %v3215_v27 = vadd.f32 %v3183_v18, %v3173_v29  ;;  %v3216_v28 = vadd.f32 %v3184_v35, %v3174_v50 }
 0x3a5   : > { %3238 = vst [vmem:[%s5935_s28 + $0x88] sm:$0xff] %v3206_v33  ;;  %v3217_v11 = vadd.f32 %v3183_v18, %v3175_v40  ;;  %v3218_v45 = vadd.f32 %v3184_v35, %v3176_v41  ;;  %v3219_v37 = vadd.f32 %v3183_v18, %v3177_v57  ;;  %v3220_v44 = vadd.f32 %v3184_v35, %v3178_v39 }
 0x3a6   : > { %3239 = vst [vmem:[%s5935_s28 + $0x90] sm:$0xff] %v3207_v49 }
 0x3a7   : > { %3240 = vst [vmem:[%s5935_s28 + $0x98] sm:$0xff] %v3208_v51 }
 0x3a8   : > { %3241 = vst [vmem:[%s5935_s28 + $0xa0] sm:$0xff] %v3209_v63 }
 0x3a9   : > { %3242 = vst [vmem:[%s5935_s28 + $0xa8] sm:$0xff] %v3210_v54 }
 0x3aa   : > { %3243 = vst [vmem:[%s5935_s28 + $0xb0] sm:$0xff] %v3211_v21 }
 0x3ab   : > { %3244 = vst [vmem:[%s5935_s28 + $0xb8] sm:$0xff] %v3212_v59 }
 0x3ac   : > { %3245 = vst [vmem:[%s5935_s28 + $0xc0] sm:$0xff] %v3213_v19 }
 0x3ad   : > { %3246 = vst [vmem:[%s5935_s28 + $0xc8] sm:$0xff] %v3214_v13 }
 0x3ae   : > { %3247 = vst [vmem:[%s5935_s28 + $0xd0] sm:$0xff] %v3215_v27 }
 0x3af   : > { %3248 = vst [vmem:[%s5935_s28 + $0xd8] sm:$0xff] %v3216_v28 }
 0x3b0   : > { %3249 = vst [vmem:[%s5935_s28 + $0xe0] sm:$0xff] %v3217_v11 }
 0x3b1   : > { %3250 = vst [vmem:[%s5935_s28 + $0xe8] sm:$0xff] %v3218_v45 }
 0x3b2   : > { %3251 = vst [vmem:[%s5935_s28 + $0xf0] sm:$0xff] %v3219_v37 }
 0x3b3   : > { %3252 = vst [vmem:[%s5935_s28 + $0xf8] sm:$0xff] %v3220_v44 }
 0x3b4   : > { %4403 = shalt.err (!%p4400_p10)
}
 0x3b5   : > { %s4469_s12 = smov 256   ;;  %s4470_s29 = smov 16  }
 0x3b6   : > { %4099 = dma.vmem_to_hbm [thread:$0]  (%p4612_p0), %s3268_s15, 4096, %s3270_s20, %s3254_s0, %s4469_s12, %s4469_s12, %s4470_s29  }
 0x3b7 PF: > { %p4134_p11 = scmp.ge.s32.totalorder %s4458_s16, 2  ;;  %s3284_s25 = sand.u32 1, %s4446_s13  }
 0x3b8   : > { %s3285_s30 = scalar_lea.sflag [#allocation4], %s3284_s25 }
 0x3b9   : > { %p4122_p12 = pnand %p4134_p11, %p4561_p6 }
 0x3bb   : > { %p4123_p13 = pneg %p4122_p12 }
 0x3bd   : > { %4441 = dma.done.wait (%p4123_p13), %s3285_s30, 4096  }
 0x3be   : > { %4443 = vsyncadd (%p4123_p13), %s3285_s30, 4294963200  ;;  %s6209_s16 = sld [smem:[#allocation22_spill]]  ;;  %s6212_s13 = smov %s4450_s14 }
 0x3bf   : > { %s6210_s4 = sld [smem:[#allocation20_spill]] }
 0x3c0   : > { %s6211_s15 = sld [smem:[#allocation23_spill]] }
 0x3c4   : > { %p28_p3 = scmp.ge.s32.totalorder %s6209_s16, 6  }
 0x3c5   : > { %s6213_s14 = smov %s6210_s4 }
 0x3c6   :  { %30 = sbr.rel (!%p28_p3) target bundleno = 15 (0xf), region = 134 }
 0x3cb   :  { %3291 = vsyncpa [#allocation3], 1 }
 0x3cc   :  { %3293 = vsyncpa [#allocation3 + $0x1], 1 }
 0x3cd   :  { %3294 = vsyncpa [#allocation6], 1 }
 0x3ce   :  { %3296 = vsyncpa [#allocation6 + $0x1], 1 }
 0x3cf   :  { %3297 = vsyncpa [#allocation9], 1 }
 0x3d0   :  { %3298 = vsyncpa [#allocation12], 1 }
 0x3d1   :  { %3299 = vsyncpa [#allocation4], 1 }
 0x3d2   :  { %3301 = vsyncpa [#allocation4 + $0x1], 1 }

// kernel: tpu_custom_call.1
= control target key start
LH: loop header
LB: loop body
LE: loop exit
PB: predicated region body
PF: predicated region fallthrough
CT: control target
= control target key end

     0   :  { %s6073_s0 = inlined_call_operand.hbm [shape: f32[8,64,256], index: 0, kind: input, shape index: {}]   ;;  %s6074_s1 = inlined_call_operand.hbm [shape: f32[8,64,256], index: 1, kind: input, shape index: {}]   ;;  %s6075_s2 = inlined_call_operand.hbm [shape: bf16[256,512], index: 2, kind: input, shape index: {}]   ;;  %s6076_s3 = inlined_call_operand.hbm [shape: f32[1,512], index: 3, kind: input, shape index: {}]   ;;  %s6077_s4 = inlined_call_operand.hbm [shape: bf16[512,256], index: 4, kind: input, shape index: {}]   ;;  %s6078_s5 = inlined_call_operand.vmem [shape: f32[1,256], index: 5, kind: input, shape index: {}]   ;;  %s6079_s6 = inlined_call_operand.vmem [shape: f32[1,1,256], index: 6, kind: input, shape index: {}]   ;;  %s6080_s7 = inlined_call_operand.vmem [shape: f32[1,1,256], index: 7, kind: input, shape index: {}]   ;;  %s6081_s8 = inlined_call_operand.hbm [shape: f32[1,1,256], index: 8, kind: input, shape index: {}]   ;;  %s6082_s9 = inlined_call_operand.vmem [shape: f32[1,1,256], index: 9, kind: input, shape index: {}]   ;;  %s6083_s10 = inlined_call_operand.hbm [shape: f32[8,64,256], index: 10, kind: output, shape index: {}]  }
   0x1   :  { %6122 = sst [smem:[#allocation46_spill]] %s6073_s0 }
   0x2   :  { %6123 = sst [smem:[#allocation47_spill]] %s6075_s2 }
   0x3   :  { %6124 = sst [smem:[#allocation48_spill]] %s6076_s3 }
   0x4   :  { %6125 = sst [smem:[#allocation49_spill]] %s6077_s4 }
   0x5   :  { %6126 = sst [smem:[#allocation50_spill]] %s6081_s8 }
   0x6   :  { %15 = vsyncpa [#allocation3], 0 }
   0x7   :  { %17 = vsyncpa [#allocation3 + $0x1], 0 }
   0x8   :  { %18 = vsyncpa [#allocation6], 0 }
   0x9   :  { %20 = vsyncpa [#allocation6 + $0x1], 0 }
   0xa   :  { %21 = vsyncpa [#allocation9], 0 }
   0xb   :  { %22 = vsyncpa [#allocation12], 0 }
   0xc   :  { %23 = vsyncpa [#allocation4], 0 }
   0xd   :  { %25 = vsyncpa [#allocation4 + $0x1], 0  ;;  %s4526_s13 = smov 0   ;;  %s4528_s14 = smov 0  }
   0xe   :  { %s4530_s15 = smov 0   ;;  %s4532_s16 = smov 0  }
   0xf LB: > { %6127 = sst [smem:[#allocation20_spill]] %s4454_s15  ;;  %s4547_s17 = sadd.s32 4294967295, %s4458_s16   ;;  %s4458_s16 = sphi %s4532_s16, %s6209_s16   ;;  %s4454_s15 = sphi %s4530_s15, %s6211_s15   ;;  %s4450_s14 = sphi %s4528_s14, %s6213_s14   ;;  %s4446_s13 = sphi %s4526_s13, %s6212_s13  }
  0x10   : > { %s3404_s18 = sadd.s32 4294967294, %s4458_s16   ;;  %p51_p0 = scmp.ne.s32.totalorder %s4450_s14, %s4446_s13 }
  0x11   : > { %p52_p1 = scmp.eq.s32.totalorder %s4547_s17, 0  ;;  %p269_p2 = scmp.eq.s32.totalorder %s4547_s17, 3 }
  0x12   : > { %p275_p3 = scmp.eq.s32.totalorder %s3404_s18, 3  ;;  %p3405_p5 = scmp.ge.s32.totalorder %s4458_s16, 1 }
  0x13   : > { %p4556_p4 = por %p52_p1, %p51_p0  ;;  %p282_p7 = scmp.lt.s32.totalorder %s4458_s16, 5 }
  0x14   : > { %p4561_p6 = por %p275_p3, %p51_p0  ;;  %s6131_s2 = sld [smem:[#allocation47_spill]] }
  0x15   : > { %p4569_p8 = pnand %p3405_p5, %p282_p7  ;;  %s4460_s25 = smov [#allocation7]  }
  0x16   : > { %s6129_s20 = scalar_select %p4561_p6, 1, 0 }
  0x17   : > { %p4101_p9 = pneg %p4569_p8  ;;  %s295_s26 = sshll.u32 %s4460_s25, 4  ;;  %s296_s26 = int_to_ptr.vmem [resolvable:$true] %s295_s26 }
  0x18   : > { %6130 = sst [smem:[#allocation21_spill]] %s6129_s20  ;;  %s6084_s11 = smov 256  }
  0x19   : > { %p4577_p10 = pnand %p4101_p9, %p52_p1  ;;  %s6134_s3 = sld [smem:[#allocation48_spill]] }
  0x1a   : > { %s293_s23 = sshll.u32 %s6131_s2, 4  ;;  %s6086_s12 = smov 16   ;;  %s294_s23 = int_to_ptr.hbm [resolvable:$true] %s293_s23 }
  0x1b   : > { %4104 = dma.hbm_to_vmem [thread:$0]  (!%p4577_p10), %s294_s23, 8192, %s296_s26, [#allocation6], %s6084_s11, %s6084_s11, %s6086_s12  }
  0x1c   : > { %s4463_s18 = smov [#allocation8]   ;;  %s6135_s4 = sld [smem:[#allocation49_spill]] }
  0x1d   : > { %s310_s21 = sshll.u32 %s4463_s18, 4  ;;  %s4464_s28 = smov [#allocation10]   ;;  %s311_s21 = int_to_ptr.vmem [resolvable:$true] %s310_s21 }
  0x1e   : > { %s321_s29 = sshll.u32 %s4464_s28, 4  ;;  %s6136_s8 = sld [smem:[#allocation50_spill]]  ;;  %s322_s29 = int_to_ptr.vmem [resolvable:$true] %s321_s29 }
  0x1f   : > { %s308_s30 = sshll.u32 %s6134_s3, 4  ;;  %s4465_s22 = smov 128   ;;  %s309_s30 = int_to_ptr.hbm [resolvable:$true] %s308_s30 }
  0x20   : > { %4107 = dma.hbm_to_vmem [thread:$0]  (!%p4577_p10), %s309_s30, 64, %s311_s21, [#allocation9]  }
  0x21   : > { %s4466_s25 = smov 8   ;;  %s4467_s30 = smov [#allocation11]  }
  0x22   : > { %s319_s2 = sshll.u32 %s6135_s4, 4  ;;  %s345_s21 = sshll.u32 %s4467_s30, 4  ;;  %s320_s2 = int_to_ptr.hbm [resolvable:$true] %s319_s2  ;;  %s346_s21 = int_to_ptr.vmem [resolvable:$true] %s345_s21 }
  0x23   : > { %4110 = dma.hbm_to_vmem [thread:$0]  (!%p4577_p10), %s320_s2, 8192, %s322_s29, [#allocation9], %s4465_s22, %s4465_s22, %s4466_s25  }
  0x24   : > { %s343_s18 = sshll.u32 %s6136_s8, 4  ;;  %s4602_s28 = sadd.s32 1, %s4458_s16   ;;  %s344_s18 = int_to_ptr.hbm [resolvable:$true] %s343_s18 }
  0x25   : > { %4113 = dma.hbm_to_vmem [thread:$0]  (!%p4577_p10), %s344_s18, 32, %s346_s21, [#allocation12]  }
  0x26   : > { %6137 = sst [smem:[#allocation22_spill]] %s4602_s28  ;;  %s38_s23 = sadd.s32 1, %s4454_s15 }
  0x27   : > { %s35_s26 = ssub.s32 %s4458_s16, %s4602_s28  ;;  %p45_p11 = scmp.ne.s32.totalorder %s4454_s15, %s4450_s14 }
  0x28   : > { %p36_p12 = scmp.eq.s32.totalorder %s35_s26, 0  ;;  %p46_p13 = scmp.eq.s32.totalorder %s4458_s16, 0 }
  0x29   : > { %p4612_p0 = por %p269_p2, %p45_p11  ;;  %p4129_p3 = scmp.lt.s32.totalorder %s4458_s16, 4 }
  0x2a   : > { %s4618_s2 = scalar_select %p36_p12, %s4454_s15, %s38_s23  }
  0x2b   : > { %p47_p5 = por %p46_p13, %p45_p11  ;;  %s359_s29 = sand.u32 1, %s4454_s15  }
  0x2c   : > { %6139 = sst [smem:[#allocation23_spill]] %s4618_s2  ;;  %s4621_s27 = sshll.u32 %s359_s29, 8 }
  0x2d   : > { %s3946_s18 = sshll.u32 %s4458_s16, 8  ;;  %s6140_s0 = sld [smem:[#allocation46_spill]] }
  0x2e   : > { %s363_s21 = scalar_lea.vmem [#allocation2], %s4621_s27  ;;  %p4628_p2 = pnand %p4129_p3, %p47_p5 }
  0x2f   : > { %s372_s26 = sshll.u32 %s363_s21, 4  ;;  %s392_s8 = scalar_lea.hbm %s6074_s1, %s3946_s18  ;;  %s373_s26 = int_to_ptr.vmem [resolvable:$true] %s372_s26 }
  0x30   : > { %s393_s2 = sshll.u32 %s392_s8, 4  ;;  %s360_s15 = scalar_lea.sflag [#allocation3], %s359_s29  ;;  %s394_s2 = int_to_ptr.hbm [resolvable:$true] %s393_s2 }
  0x31   : > { %p4320_p9 = pneg %p4628_p2 }
  0x33   : > { %s369_s30 = scalar_lea.hbm %s6140_s0, %s3946_s18  ;;  %s4323_s21 = scalar_lea.hbm %s6140_s0, 1024 }
  0x34   : > { %s370_s12 = sshll.u32 %s369_s30, 4  ;;  %s371_s12 = int_to_ptr.hbm [resolvable:$true] %s370_s12 }
  0x35   : > { %s4316_s28 = sshra.s32 %s371_s12, 4  ;;  %s4317_s28 = int_to_ptr.hbm [resolvable:$true] %s4316_s28 }
  0x36   : > { %s4318_s22 = scalar_lea.hbm %s4317_s28, 256  ;;  %p4324_p12 = scmp.lt.s32.totalorder %s4317_s28, %s6140_s0 }
  0x37   : > { %p4319_p7 = scmp.ne.s32.totalorder %s4317_s28, %s4318_s22  ;;  %p4325_p13 = scmp.lt.s32.totalorder %s4323_s21, %s4318_s22 }
  0x39   : > { %p4321_p10 = pnand %p4320_p9, %p4319_p7  ;;  %p4326_p3 = por %p4325_p13, %p4324_p12 }
  0x3b   : > { %p4322_p11 = pneg %p4321_p10 }
  0x3d   : > { %p4327_p5 = pnand %p4326_p3, %p4322_p11 }
  0x3f   : > { %4330 = shalt.err (!%p4327_p5)
}
  0x40   : > { %s6142_s8 = smov 16   ;;  %s6143_s29 = smov 256  }
  0x41   : > { %4117 = dma.hbm_to_vmem [thread:$0]  (!%p4628_p2), %s371_s12, 4096, %s373_s26, %s360_s15, %s6143_s29, %s6143_s29, %s6142_s8  }
  0x42   : > { %s386_s18 = scalar_lea.vmem [#allocation5], %s4621_s27  ;;  %s382_s30 = sand.u32 1, %s4458_s16  }
  0x43   : > { %s395_s25 = sshll.u32 %s386_s18, 4  ;;  %s383_s4 = scalar_lea.sflag [#allocation6], %s382_s30  ;;  %s396_s25 = int_to_ptr.vmem [resolvable:$true] %s395_s25 }
  0x44   : > { %s4346_s28 = sshra.s32 %s394_s2, 4  ;;  %s4353_s0 = scalar_lea.hbm %s6074_s1, 1024  ;;  %s4347_s28 = int_to_ptr.hbm [resolvable:$true] %s4346_s28 }
  0x45   : > { %s4348_s22 = scalar_lea.hbm %s4347_s28, 256  ;;  %p4354_p12 = scmp.lt.s32.totalorder %s4347_s28, %s6074_s1 }
  0x46   : > { %p4349_p7 = scmp.ne.s32.totalorder %s4347_s28, %s4348_s22  ;;  %p4355_p13 = scmp.lt.s32.totalorder %s4353_s0, %s4348_s22 }
  0x48   : > { %p4351_p10 = pnand %p4349_p7, %p4320_p9  ;;  %p4356_p3 = por %p4355_p13, %p4354_p12 }
  0x4a   : > { %p4352_p11 = pneg %p4351_p10 }
  0x4c   : > { %p4357_p5 = pnand %p4356_p3, %p4352_p11 }
  0x4e   : > { %4360 = shalt.err (!%p4357_p5)
}
  0x4f   : > { %4120 = dma.hbm_to_vmem [thread:$0]  (!%p4628_p2), %s394_s2, 4096, %s396_s25, %s383_s4, %s6143_s29, %s6143_s29, %s6142_s8  }
  0x50   : > { %407 = sbr.rel (%p4569_p8) target bundleno = 951 (0x3b7), region = 60 }
  0x55   : > { %s4670_s12 = sand.u32 1, %s4450_s14  }
  0x56   : > { %s4673_s20 = sshll.u32 %s4670_s12, 8  ;;  %s410_s0 = scalar_lea.sflag [#allocation3], %s4670_s12 }
  0x57   : > { %s4677_s27 = scalar_lea.vmem [#allocation2], %s4673_s20 }
  0x58   : > { %4421 = dma.done.wait (%p4556_p4), %s410_s0, 4096  }
  0x59   : > { %4423 = vsyncadd (%p4556_p4), %s410_s0, 4294963200  ;;  %s419_s3 = sand.u32 1, %s4547_s17   ;;  %s4685_s2 = scalar_lea.vmem [#allocation5], %s4673_s20 }
  0x5a   : > { %s420_s24 = scalar_lea.sflag [#allocation6], %s419_s3 }
  0x5b   : > { %4425 = dma.done.wait (%p4556_p4), %s420_s24, 4096  }
  0x5c   : > { %4427 = vsyncadd (%p4556_p4), %s420_s24, 4294963200 }
  0x5d   : > { %4429 = dma.done.wait (%p52_p1), [#allocation6], 8192  }
  0x5e   : > { %4431 = vsyncadd (%p52_p1), [#allocation6], 4294959104 }
  0x5f   : > { %4433 = dma.done.wait (%p52_p1), [#allocation9], 8256  }
  0x60   : > { %4435 = vsyncadd (%p52_p1), [#allocation9], 4294959040 }
  0x61   : > { %4437 = dma.done.wait (%p52_p1), [#allocation12], 32  }
  0x62   : > { %4439 = vsyncadd (%p52_p1), [#allocation12], 4294967264  ;;  %v3541_v0 = vld [vmem:[#allocation7 + $0xe0] sm:$0xf]  ;;  %v3979_v1 = vld [vmem:[#allocation7 + $0xec] sm:$0xf0] }
  0x63   : > { %v3669_v2 = vld [vmem:[#allocation7 + $0x1e0] sm:$0xf]  ;;  %v3542_v3 = vor.u32 %v3979_v1, %v3541_v0  ;;  %v4011_v4 = vld [vmem:[#allocation7 + $0x1ec] sm:$0xf0]  ;;  %v3977_v5 = vld [vmem:[#allocation7 + $0xe4] sm:$0xf] }
  0x64   : > { %v3543_v6 = vld [vmem:[#allocation7 + $0xf0] sm:$0xf0]  ;;  %v3670_v7 = vor.u32 %v4011_v4, %v3669_v2  ;;  %v4009_v9 = vld [vmem:[#allocation7 + $0x1e4] sm:$0xf]  ;;  %v3525_v11 = vld [vmem:[#allocation7 + $0xc0] sm:$0xf] }
  0x65   : > { %v3546_v8 = vor.u32 %v3977_v5, %v3543_v6  ;;  %v3671_v10 = vld [vmem:[#allocation7 + $0x1f0] sm:$0xf0]  ;;  %1307 = vmatpush.bf16.msra.mxu0 %v3542_v3  ;;  %v3975_v13 = vld [vmem:[#allocation7 + $0xcc] sm:$0xf0]  ;;  %v3653_v14 = vld [vmem:[#allocation7 + $0x1c0] sm:$0xf] }
  0x66   : > { %v3674_v12 = vor.u32 %v4009_v9, %v3671_v10  ;;  %v4007_v15 = vld [vmem:[#allocation7 + $0x1cc] sm:$0xf0]  ;;  %1356 = vmatpush.bf16.msra.mxu1 %v3670_v7  ;;  %v3526_v16 = vor.u32 %v3975_v13, %v3525_v11  ;;  %v3973_v18 = vld [vmem:[#allocation7 + $0xc4] sm:$0xf]  ;;  %v3527_v19 = vld [vmem:[#allocation7 + $0xd0] sm:$0xf0] }
  0x67   : > { %1405 = vmatpush.bf16.msra.mxu2 %v3546_v8  ;;  %v3654_v17 = vor.u32 %v4007_v15, %v3653_v14  ;;  %v4005_v20 = vld [vmem:[#allocation7 + $0x1c4] sm:$0xf]  ;;  %v3530_v21 = vor.u32 %v3973_v18, %v3527_v19  ;;  %v3655_v22 = vld [vmem:[#allocation7 + $0x1d0] sm:$0xf0]  ;;  %v3509_v23 = vld [vmem:[#allocation7 + $0xa0] sm:$0xf] }
  0x68   : > { %1454 = vmatpush.bf16.msra.mxu3 %v3674_v12  ;;  %v3971_v24 = vld [vmem:[#allocation7 + $0xac] sm:$0xf0]  ;;  %v3658_v25 = vor.u32 %v4005_v20, %v3655_v22  ;;  %v3637_v26 = vld [vmem:[#allocation7 + $0x1a0] sm:$0xf]  ;;  %v3969_v28 = vld [vmem:[#allocation7 + $0xa4] sm:$0xf] }
  0x69   : > { %v4003_v27 = vld [vmem:[#allocation7 + $0x1ac] sm:$0xf0]  ;;  %1308 = vmatpush.bf16.msra.mxu0 %v3526_v16  ;;  %v3510_v29 = vor.u32 %v3971_v24, %v3509_v23  ;;  %v3511_v30 = vld [vmem:[#allocation7 + $0xb0] sm:$0xf0]  ;;  %v4001_v31 = vld [vmem:[#allocation7 + $0x1a4] sm:$0xf] }
  0x6a   : > { %v3639_v32 = vld [vmem:[#allocation7 + $0x1b0] sm:$0xf0]  ;;  %1357 = vmatpush.bf16.msra.mxu1 %v3654_v17  ;;  %v3638_v33 = vor.u32 %v4003_v27, %v3637_v26  ;;  %v3514_v34 = vor.u32 %v3969_v28, %v3511_v30  ;;  %v3493_v35 = vld [vmem:[#allocation7 + $0x80] sm:$0xf]  ;;  %v3967_v36 = vld [vmem:[#allocation7 + $0x8c] sm:$0xf0] }
  0x6b   : > { %1406 = vmatpush.bf16.msra.mxu2 %v3530_v21  ;;  %v3621_v37 = vld [vmem:[#allocation7 + $0x180] sm:$0xf]  ;;  %v3642_v38 = vor.u32 %v4001_v31, %v3639_v32  ;;  %v3999_v39 = vld [vmem:[#allocation7 + $0x18c] sm:$0xf0]  ;;  %v3965_v40 = vld [vmem:[#allocation7 + $0x84] sm:$0xf]  ;;  %v3494_v44 = vor.u32 %v3967_v36, %v3493_v35 }
  0x6c   : > { %1455 = vmatpush.bf16.msra.mxu3 %v3658_v25  ;;  %v3495_v41 = vld [vmem:[#allocation7 + $0x90] sm:$0xf0]  ;;  %v3997_v42 = vld [vmem:[#allocation7 + $0x184] sm:$0xf]  ;;  %v3622_v45 = vor.u32 %v3999_v39, %v3621_v37  ;;  %v3477_v47 = vld [vmem:[#allocation7 + $0x60] sm:$0xf] }
  0x6d   : > { %v3623_v43 = vld [vmem:[#allocation7 + $0x190] sm:$0xf0]  ;;  %1309 = vmatpush.bf16.msra.mxu0 %v3510_v29  ;;  %v3498_v46 = vor.u32 %v3965_v40, %v3495_v41  ;;  %v3963_v48 = vld [vmem:[#allocation7 + $0x6c] sm:$0xf0]  ;;  %v3605_v49 = vld [vmem:[#allocation7 + $0x160] sm:$0xf] }
  0x6e   : > { %1358 = vmatpush.bf16.msra.mxu1 %v3638_v33  ;;  %v3626_v50 = vor.u32 %v3997_v42, %v3623_v43  ;;  %v3995_v51 = vld [vmem:[#allocation7 + $0x16c] sm:$0xf0]  ;;  %v3961_v52 = vld [vmem:[#allocation7 + $0x64] sm:$0xf]  ;;  %v3479_v53 = vld [vmem:[#allocation7 + $0x70] sm:$0xf0]  ;;  %v3478_v56 = vor.u32 %v3963_v48, %v3477_v47 }
  0x6f   : > { %1407 = vmatpush.bf16.msra.mxu2 %v3514_v34  ;;  %v3993_v54 = vld [vmem:[#allocation7 + $0x164] sm:$0xf]  ;;  %v3607_v55 = vld [vmem:[#allocation7 + $0x170] sm:$0xf0]  ;;  %v3606_v57 = vor.u32 %v3995_v51, %v3605_v49  ;;  %v3482_v58 = vor.u32 %v3961_v52, %v3479_v53  ;;  %v3461_v59 = vld [vmem:[#allocation7 + $0x40] sm:$0xf] }
  0x70   : > { %1456 = vmatpush.bf16.msra.mxu3 %v3642_v38  ;;  %v3959_v60 = vld [vmem:[#allocation7 + $0x4c] sm:$0xf0]  ;;  %v3589_v61 = vld [vmem:[#allocation7 + $0x140] sm:$0xf]  ;;  %v3610_v62 = vor.u32 %v3993_v54, %v3607_v55  ;;  %v3957_v0 = vld [vmem:[#allocation7 + $0x44] sm:$0xf] }
  0x71   : > { %1310 = vmatpush.bf16.msra.mxu0 %v3494_v44  ;;  %v3991_v63 = vld [vmem:[#allocation7 + $0x14c] sm:$0xf0]  ;;  %v3463_v1 = vld [vmem:[#allocation7 + $0x50] sm:$0xf0]  ;;  %v3989_v2 = vld [vmem:[#allocation7 + $0x144] sm:$0xf]  ;;  %v3462_v4 = vor.u32 %v3959_v60, %v3461_v59 }
  0x72   : > { %1359 = vmatpush.bf16.msra.mxu1 %v3622_v45  ;;  %v3591_v3 = vld [vmem:[#allocation7 + $0x150] sm:$0xf0]  ;;  %v3445_v5 = vld [vmem:[#allocation7 + $0x20] sm:$0xf]  ;;  %v3955_v6 = vld [vmem:[#allocation7 + $0x2c] sm:$0xf0]  ;;  %v3590_v7 = vor.u32 %v3991_v63, %v3589_v61  ;;  %v3466_v8 = vor.u32 %v3957_v0, %v3463_v1 }
  0x73   : > { %1408 = vmatpush.bf16.msra.mxu2 %v3498_v46  ;;  %v3573_v9 = vld [vmem:[#allocation7 + $0x120] sm:$0xf]  ;;  %v3987_v10 = vld [vmem:[#allocation7 + $0x12c] sm:$0xf0]  ;;  %v3953_v11 = vld [vmem:[#allocation7 + $0x24] sm:$0xf]  ;;  %v3594_v12 = vor.u32 %v3989_v2, %v3591_v3  ;;  %v3446_v19 = vor.u32 %v3955_v6, %v3445_v5 }
  0x74   : > { %1457 = vmatpush.bf16.msra.mxu3 %v3626_v50  ;;  %v3447_v13 = vld [vmem:[#allocation7 + $0x30] sm:$0xf0]  ;;  %v3985_v14 = vld [vmem:[#allocation7 + $0x124] sm:$0xf]  ;;  %v3429_v16 = vld [vmem:[#allocation7] sm:$0xf]  ;;  %v3574_v23 = vor.u32 %v3987_v10, %v3573_v9 }
  0x75   : > { %1311 = vmatpush.bf16.msra.mxu0 %v3478_v56  ;;  %v3575_v15 = vld [vmem:[#allocation7 + $0x130] sm:$0xf0]  ;;  %v3951_v17 = vld [vmem:[#allocation7 + $0xc] sm:$0xf0]  ;;  %v3557_v18 = vld [vmem:[#allocation7 + $0x100] sm:$0xf]  ;;  %v3450_v24 = vor.u32 %v3953_v11, %v3447_v13 }
  0x76   : > { %1360 = vmatpush.bf16.msra.mxu1 %v3606_v57  ;;  %v3983_v20 = vld [vmem:[#allocation7 + $0x10c] sm:$0xf0]  ;;  %v3949_v21 = vld [vmem:[#allocation7 + $0x4] sm:$0xf]  ;;  %v3431_v22 = vld [vmem:[#allocation7 + $0x10] sm:$0xf0]  ;;  %v3578_v30 = vor.u32 %v3985_v14, %v3575_v15  ;;  %v3430_v37 = vor.u32 %v3951_v17, %v3429_v16 }
  0x77   : > { %1409 = vmatpush.bf16.msra.mxu2 %v3482_v58  ;;  %v3981_v25 = vld [vmem:[#allocation7 + $0x104] sm:$0xf]  ;;  %v3559_v26 = vld [vmem:[#allocation7 + $0x110] sm:$0xf0]  ;;  %v490_v28 = vld [vmem:[%s4677_s27 + $0x8] sm:$0xff]  ;;  %v3558_v38 = vor.u32 %v3983_v20, %v3557_v18  ;;  %v3434_v39 = vor.u32 %v3949_v21, %v3431_v22  ;;  %v4468_v2 = vmov 64.0  }
  0x78   : > { %1458 = vmatpush.bf16.msra.mxu3 %v3610_v62  ;;  %v489_v27 = vld [vmem:[%s4677_s27] sm:$0xff]  ;;  %v491_v29 = vld [vmem:[%s4677_s27 + $0x10] sm:$0xff]  ;;  %v492_v31 = vld [vmem:[%s4677_s27 + $0x18] sm:$0xff]  ;;  %v3562_v50 = vor.u32 %v3981_v25, %v3559_v26  ;;  %4178 = vrcp.f32 %v4468_v2  ;;  %vm800_vm7 = vcmask 1040384   ;;  %s5935_s28 = scalar_lea.vmem [#allocation13], %s4673_s20  ;;  %s4078_s22 = sshll.u32 %s4547_s17, 8 }
  0x79   : > { %1312 = vmatpush.bf16.msra.mxu0 %v3462_v4  ;;  %v493_v32 = vld [vmem:[%s4677_s27 + $0x20] sm:$0xff]  ;;  %v494_v33 = vld [vmem:[%s4677_s27 + $0x28] sm:$0xff]  ;;  %v495_v34 = vld [vmem:[%s4677_s27 + $0x30] sm:$0xff]  ;;  %s3266_s17 = scalar_lea.hbm %s6083_s10, %s4078_s22  ;;  %s3267_s15 = sshll.u32 %s5935_s28, 4  ;;  %s3268_s15 = int_to_ptr.vmem [resolvable:$true] %s3267_s15 }
  0x7a   : > { %1361 = vmatpush.bf16.msra.mxu1 %v3590_v7  ;;  %v496_v35 = vld [vmem:[%s4677_s27 + $0x38] sm:$0xff]  ;;  %v521_v36 = vld [vmem:[%s4685_s2] sm:$0xff]  ;;  %v522_v40 = vld [vmem:[%s4685_s2 + $0x8] sm:$0xff]  ;;  %s3269_s20 = sshll.u32 %s3266_s17, 4  ;;  %s3254_s0 = scalar_lea.sflag [#allocation4], %s4670_s12  ;;  %s3270_s20 = int_to_ptr.hbm [resolvable:$true] %s3269_s20 }
  0x7b   : > { %1410 = vmatpush.bf16.msra.mxu2 %v3466_v8  ;;  %v523_v41 = vld [vmem:[%s4685_s2 + $0x10] sm:$0xff]  ;;  %v524_v42 = vld [vmem:[%s4685_s2 + $0x18] sm:$0xff]  ;;  %v4715_v43 = vadd.f32 %v521_v36, %v489_v27  ;;  %v525_v44 = vld [vmem:[%s4685_s2 + $0x20] sm:$0xff]  ;;  %v4720_v47 = vadd.f32 %v522_v40, %v490_v28  ;;  %s4396_s19 = scalar_lea.hbm %s6083_s10, 1024 }
  0x7c   : > { %1459 = vmatpush.bf16.msra.mxu3 %v3594_v12  ;;  %v526_v45 = vld [vmem:[%s4685_s2 + $0x28] sm:$0xff]  ;;  %v527_v46 = vld [vmem:[%s4685_s2 + $0x30] sm:$0xff]  ;;  %v4722_v48 = vadd.f32 %v523_v41, %v491_v29  ;;  %v4724_v49 = vadd.f32 %v524_v42, %v492_v31  ;;  %v497_v51 = vld [vmem:[%s4677_s27 + $0x40] sm:$0xff]  ;;  %v4728_v53 = vadd.f32 %v525_v44, %v493_v32 }
  0x7d   : > { %1313 = vmatpush.bf16.msra.mxu0 %v3446_v19  ;;  %v528_v52 = vld [vmem:[%s4685_s2 + $0x38] sm:$0xff]  ;;  %v4730_v54 = vadd.f32 %v526_v45, %v494_v33  ;;  %v498_v55 = vld [vmem:[%s4677_s27 + $0x48] sm:$0xff]  ;;  %v529_v56 = vld [vmem:[%s4685_s2 + $0x40] sm:$0xff]  ;;  %v4738_v60 = vadd.f32 %v527_v46, %v495_v34  ;;  %v650_v19 = vmul.f32 %v4715_v43, %v4715_v43  ;;  %v651_v20 = vmul.f32 %v4720_v47, %v4720_v47 }
  0x7e   : > { %1362 = vmatpush.bf16.msra.mxu1 %v3574_v23  ;;  %v530_v57 = vld [vmem:[%s4685_s2 + $0x48] sm:$0xff]  ;;  %v587_v58 = vadd.f32 %v4722_v48, %v4715_v43  ;;  %v499_v59 = vld [vmem:[%s4677_s27 + $0x50] sm:$0xff]  ;;  %v4740_v61 = vadd.f32 %v528_v52, %v496_v35  ;;  %v600_v62 = vadd.f32 %v4724_v49, %v4720_v47  ;;  %v500_v63 = vld [vmem:[%s4677_s27 + $0x58] sm:$0xff]  ;;  %v4748_v4 = vadd.f32 %v529_v56, %v497_v51  ;;  %v4179_v27 = vpop.eup %4178 }
  0x7f   : > { %1411 = vmatpush.bf16.msra.mxu2 %v3450_v24  ;;  %v531_v0 = vld [vmem:[%s4685_s2 + $0x50] sm:$0xff]  ;;  %v532_v1 = vld [vmem:[%s4685_s2 + $0x58] sm:$0xff]  ;;  %v501_v3 = vld [vmem:[%s4677_s27 + $0x60] sm:$0xff]  ;;  %v4750_v5 = vadd.f32 %v530_v57, %v498_v55  ;;  %v652_v21 = vmul.f32 %v4722_v48, %v4722_v48  ;;  %v653_v22 = vmul.f32 %v4724_v49, %v4724_v49  ;;  %v654_v28 = vmul.f32 %v4728_v53, %v4728_v53 }
  0x80   : > { %1460 = vmatpush.bf16.msra.mxu3 %v3578_v30  ;;  %v588_v6 = vadd.f32 %v587_v58, %v4728_v53  ;;  %v601_v7 = vadd.f32 %v600_v62, %v4730_v54  ;;  %v502_v8 = vld [vmem:[%s4677_s27 + $0x68] sm:$0xff]  ;;  %v533_v9 = vld [vmem:[%s4685_s2 + $0x60] sm:$0xff]  ;;  %v503_v11 = vld [vmem:[%s4677_s27 + $0x70] sm:$0xff]  ;;  %v4758_v12 = vadd.f32 %v531_v0, %v499_v59  ;;  %v4760_v13 = vadd.f32 %v532_v1, %v500_v63 }
  0x81   : > { %1314 = vmatpush.bf16.msra.mxu0 %v3430_v37  ;;  %v534_v10 = vld [vmem:[%s4685_s2 + $0x68] sm:$0xff]  ;;  %v504_v16 = vld [vmem:[%s4677_s27 + $0x78] sm:$0xff]  ;;  %v535_v17 = vld [vmem:[%s4685_s2 + $0x70] sm:$0xff]  ;;  %v4775_v23 = vadd.f32 %v533_v9, %v501_v3  ;;  %v655_v29 = vmul.f32 %v4730_v54, %v4730_v54  ;;  %v656_v34 = vmul.f32 %v4738_v60, %v4738_v60  ;;  %v657_v35 = vmul.f32 %v4740_v61, %v4740_v61 }
  0x82   : > { %1363 = vmatpush.bf16.msra.mxu1 %v3558_v38  ;;  %v589_v14 = vadd.f32 %v588_v6, %v4738_v60  ;;  %v602_v15 = vadd.f32 %v601_v7, %v4740_v61  ;;  %v536_v18 = vld [vmem:[%s4685_s2 + $0x78] sm:$0xff]  ;;  %v4777_v24 = vadd.f32 %v534_v10, %v502_v8  ;;  %v4785_v30 = vadd.f32 %v535_v17, %v503_v11 }
  0x83   : > { %1412 = vmatpush.bf16.msra.mxu2 %v3434_v39  ;;  %v4787_v31 = vadd.f32 %v536_v18, %v504_v16  ;;  %v682_v36 = vadd.f32 %v652_v21, %v650_v19  ;;  %v695_v37 = vadd.f32 %v653_v22, %v651_v20  ;;  %v640_v40 = vmul.f32 64.0, %v4179_v27 }
  0x84   : > { %1461 = vmatpush.bf16.msra.mxu3 %v3562_v50  ;;  %v590_v25 = vadd.f32 %v589_v14, %v4748_v4  ;;  %v603_v26 = vadd.f32 %v602_v15, %v4750_v5  ;;  %v658_v41 = vmul.f32 %v4748_v4, %v4748_v4  ;;  %v659_v42 = vmul.f32 %v4750_v5, %v4750_v5 }
  0x85   : > { %v683_v44 = vadd.f32 %v682_v36, %v654_v28  ;;  %v696_v45 = vadd.f32 %v695_v37, %v655_v29  ;;  %v660_v51 = vmul.f32 %v4758_v12, %v4758_v12  ;;  %v661_v52 = vmul.f32 %v4760_v13, %v4760_v13 }
  0x86   : > { %v591_v32 = vadd.f32 %v590_v25, %v4758_v12  ;;  %v604_v33 = vadd.f32 %v603_v26, %v4760_v13  ;;  %v641_v59 = vsub.f32 1.0, %v640_v40  ;;  %v662_v62 = vmul.f32 %v4775_v23, %v4775_v23 }
  0x87   : > { %v684_v55 = vadd.f32 %v683_v44, %v656_v34  ;;  %v697_v56 = vadd.f32 %v696_v45, %v657_v35  ;;  %v663_v63 = vmul.f32 %v4777_v24, %v4777_v24  ;;  %v664_v6 = vmul.f32 %v4785_v30, %v4785_v30 }
  0x88   : > { %v592_v38 = vadd.f32 %v591_v32, %v4775_v23  ;;  %v605_v39 = vadd.f32 %v604_v33, %v4777_v24  ;;  %v665_v7 = vmul.f32 %v4787_v31, %v4787_v31  ;;  %v642_v14 = vmul.f32 %v4179_v27, %v641_v59  ;;  %v538_v59 = vld [vmem:[%s4685_s2 + $0x88] sm:$0xff] }
  0x89   : > { %v685_v0 = vadd.f32 %v684_v55, %v658_v41  ;;  %v698_v1 = vadd.f32 %v697_v56, %v659_v42  ;;  %vm644_vm0 = vweird.f32 %v4179_v27 }
  0x8a   : > { %v593_v46 = vadd.f32 %v592_v38, %v4785_v30  ;;  %v606_v50 = vadd.f32 %v605_v39, %v4787_v31  ;;  %v643_v25 = vadd.f32 %v4179_v27, %v642_v14  ;;  %v509_v14 = vld [vmem:[%s4677_s27 + $0xa0] sm:$0xff] }
  0x8b   : > { %v686_v8 = vadd.f32 %v685_v0, %v660_v51  ;;  %v699_v9 = vadd.f32 %v698_v1, %v661_v52  ;;  %v540_v0 = vld [vmem:[%s4685_s2 + $0x98] sm:$0xff] }
  0x8c   : > { %v594_v57 = vrot.slane %v593_v46, 4  ;;  %v607_v58 = vrot.slane %v606_v50, 4  ;;  %v4815_v35 = vsel %vm644_vm0, %v4179_v27, %v643_v25  ;;  %v511_v25 = vld [vmem:[%s4677_s27 + $0xb0] sm:$0xff] }
  0x8d   : > { %v687_v15 = vadd.f32 %v686_v8, %v662_v62  ;;  %v700_v16 = vadd.f32 %v699_v9, %v663_v63  ;;  %6144 = vst [vmem:[#allocation24_spill] sm:$0xff] %v4815_v35 }
  0x8e   : > { %v595_v2 = vadd.f32 %v594_v57, %v593_v46  ;;  %v608_v3 = vadd.f32 %v607_v58, %v606_v50  ;;  %v506_v57 = vld [vmem:[%s4677_s27 + $0x88] sm:$0xff]  ;;  %v508_v58 = vld [vmem:[%s4677_s27 + $0x98] sm:$0xff] }
  0x8f   : > { %v688_v19 = vadd.f32 %v687_v15, %v664_v6  ;;  %v701_v20 = vadd.f32 %v700_v16, %v665_v7  ;;  %v4833_v1 = vadd.f32 %v538_v59, %v506_v57  ;;  %v510_v6 = vld [vmem:[%s4677_s27 + $0xa8] sm:$0xff]  ;;  %v4838_v7 = vadd.f32 %v540_v0, %v508_v58  ;;  %v512_v15 = vld [vmem:[%s4677_s27 + $0xb8] sm:$0xff]  ;;  %v541_v16 = vld [vmem:[%s4685_s2 + $0xa0] sm:$0xff] }
  0x90   : > { %v596_v10 = vrot.slane %v595_v2, 2  ;;  %v609_v11 = vrot.slane %v608_v3, 2  ;;  %v515_v58 = vld [vmem:[%s4677_s27 + $0xd0] sm:$0xff]  ;;  %v518_v59 = vld [vmem:[%s4677_s27 + $0xe8] sm:$0xff] }
  0x91   : > { %v689_v26 = vrot.slane %v688_v19, 4  ;;  %v702_v28 = vrot.slane %v701_v20, 4 }
  0x92   : > { %v597_v17 = vadd.f32 %v596_v10, %v595_v2  ;;  %v610_v18 = vadd.f32 %v609_v11, %v608_v3  ;;  %v505_v2 = vld [vmem:[%s4677_s27 + $0x80] sm:$0xff]  ;;  %v507_v3 = vld [vmem:[%s4677_s27 + $0x90] sm:$0xff] }
  0x93   : > { %v690_v33 = vadd.f32 %v689_v26, %v688_v19  ;;  %v703_v34 = vadd.f32 %v702_v28, %v701_v20  ;;  %v537_v10 = vld [vmem:[%s4685_s2 + $0x80] sm:$0xff]  ;;  %v539_v11 = vld [vmem:[%s4685_s2 + $0x90] sm:$0xff]  ;;  %v626_v19 = vadd.f32 %v4838_v7, %v4833_v1  ;;  %v542_v20 = vld [vmem:[%s4685_s2 + $0xa8] sm:$0xff] }
  0x94   : > { %v598_v21 = vrot.slane %v597_v17, 1  ;;  %v611_v22 = vrot.slane %v610_v18, 1  ;;  %v514_v26 = vld [vmem:[%s4677_s27 + $0xc8] sm:$0xff]  ;;  %v543_v28 = vld [vmem:[%s4685_s2 + $0xb0] sm:$0xff] }
  0x95   : > { %v691_v36 = vrot.slane %v690_v33, 2  ;;  %v704_v37 = vrot.slane %v703_v34, 2 }
  0x96   : > { %v599_v29 = vadd.f32 %v598_v21, %v597_v17  ;;  %v612_v32 = vadd.f32 %v611_v22, %v610_v18  ;;  %v4849_v17 = vadd.f32 %v537_v10, %v505_v2  ;;  %v4851_v18 = vadd.f32 %v539_v11, %v507_v3  ;;  %v544_v21 = vld [vmem:[%s4685_s2 + $0xb8] sm:$0xff] }
  0x97   : > { %v692_v40 = vadd.f32 %v691_v36, %v690_v33  ;;  %v705_v41 = vadd.f32 %v704_v37, %v703_v34  ;;  %v4858_v22 = vadd.f32 %v541_v16, %v509_v14  ;;  %v546_v34 = vld [vmem:[%s4685_s2 + $0xc8] sm:$0xff]  ;;  %v4871_v36 = vadd.f32 %v543_v28, %v511_v25 }
  0x98   : > { %v4818_v38 = vmul.f32 %v4815_v35, %v599_v29  ;;  %v4821_v39 = vmul.f32 %v4815_v35, %v612_v32  ;;  %v4864_v29 = vadd.f32 %v542_v20, %v510_v6  ;;  %v4866_v32 = vadd.f32 %v544_v21, %v512_v15  ;;  %v550_v6 = vld [vmem:[%s4685_s2 + $0xe8] sm:$0xff]  ;;  %v517_v20 = vld [vmem:[%s4677_s27 + $0xe0] sm:$0xff] }
  0x99   : > { %v693_v42 = vrot.slane %v692_v40, 1  ;;  %v706_v44 = vrot.slane %v705_v41, 1  ;;  %v613_v33 = vadd.f32 %v4851_v18, %v4849_v17  ;;  %v666_v37 = vmul.f32 %v4849_v17, %v4849_v17  ;;  %v549_v21 = vld [vmem:[%s4685_s2 + $0xe0] sm:$0xff] }
  0x9a   : > { %v738_v46 = vmul.f32 %v4818_v38, %v4818_v38  ;;  %v739_v50 = vmul.f32 %v4821_v39, %v4821_v39  ;;  %6145 = vst [vmem:[#allocation25_spill] sm:$0xff] %v4866_v32  ;;  %v671_v2 = vmul.f32 %v4864_v29, %v4864_v29  ;;  %v672_v14 = vmul.f32 %v4871_v36, %v4871_v36 }
  0x9b   : > { %v694_v45 = vadd.f32 %v693_v42, %v692_v40  ;;  %v707_v27 = vadd.f32 %v706_v44, %v705_v41  ;;  %v667_v40 = vmul.f32 %v4833_v1, %v4833_v1  ;;  %v668_v41 = vmul.f32 %v4851_v18, %v4851_v18  ;;  %v513_v42 = vld [vmem:[%s4677_s27 + $0xc0] sm:$0xff]  ;;  %v516_v44 = vld [vmem:[%s4677_s27 + $0xd8] sm:$0xff] }
  0x9c   : > { %v673_v15 = vmul.f32 %v4866_v32, %v4866_v32 }
  0x9d   : > { %v734_v51 = vmul.f32 %v694_v45, %v4815_v35  ;;  %v735_v52 = vmul.f32 %v707_v27, %v4815_v35  ;;  %v545_v45 = vld [vmem:[%s4685_s2 + $0xc0] sm:$0xff]  ;;  %v614_v27 = vadd.f32 %v613_v33, %v4858_v22  ;;  %v708_v57 = vadd.f32 %v668_v41, %v666_v37  ;;  %v3551_v37 = vld [vmem:[#allocation7 + $0xf8] sm:$0xf0] }
  0x9e   : > { %v4924_v41 = vadd.f32 %v549_v21, %v517_v20 }
  0x9f   : > { %v742_v55 = vsub.f32 %v734_v51, %v738_v46  ;;  %v743_v56 = vsub.f32 %v735_v52, %v739_v50  ;;  %v627_v46 = vadd.f32 %v626_v19, %v4864_v29  ;;  %v669_v50 = vmul.f32 %v4838_v7, %v4838_v7  ;;  %v548_v52 = vld [vmem:[%s4685_s2 + $0xd8] sm:$0xff] }
  0xa0   : > { %v670_v51 = vmul.f32 %v4858_v22, %v4858_v22  ;;  %v4907_v11 = vadd.f32 %v548_v52, %v516_v44  ;;  %v3679_v52 = vld [vmem:[#allocation7 + $0x1f8] sm:$0xf0] }
  0xa1   : > { %v746_v62 = vmax.f32 %v742_v55, 0.0  ;;  %v747_v63 = vmax.f32 %v743_v56, 0.0  ;;  %v4890_v55 = vadd.f32 %v545_v45, %v513_v42  ;;  %v4892_v56 = vadd.f32 %v546_v34, %v514_v26  ;;  %v3978_v34 = vld [vmem:[#allocation7 + $0xec] sm:$0xf] }
  0xa2   : > { %v628_v0 = vadd.f32 %v627_v46, %v4866_v32  ;;  %v709_v28 = vadd.f32 %v708_v57, %v670_v51  ;;  %v4926_v42 = vadd.f32 %v550_v6, %v518_v59  ;;  %v4010_v46 = vld [vmem:[#allocation7 + $0x1ec] sm:$0xf]  ;;  %v721_v57 = vadd.f32 %v669_v50, %v667_v40  ;;  %v3549_v59 = vld [vmem:[#allocation7 + $0xe8] sm:$0xf]  ;;  %v3980_v6 = vld [vmem:[#allocation7 + $0xf4] sm:$0xf0] }
  0xa3   : > { %v4840_v8 = vadd.f32 1e-05, %v746_v62  ;;  %v4842_v9 = vadd.f32 1e-05, %v747_v63  ;;  %6146 = vst [vmem:[#allocation26_spill] sm:$0xff] %v4890_v55  ;;  %v547_v62 = vld [vmem:[%s4685_s2 + $0xd0] sm:$0xff]  ;;  %v615_v63 = vadd.f32 %v614_v27, %v4871_v36  ;;  %v674_v26 = vmul.f32 %v4890_v55, %v4890_v55 }
  0xa4   : > { %v4905_v10 = vadd.f32 %v547_v62, %v515_v58  ;;  %v629_v44 = vadd.f32 %v628_v0, %v4892_v56  ;;  %v3554_v27 = vor.u32 %v3978_v34, %v3551_v37  ;;  %v520_v58 = vld [vmem:[%s4677_s27 + $0xf8] sm:$0xff]  ;;  %v3677_v0 = vld [vmem:[#allocation7 + $0x1e8] sm:$0xf]  ;;  %v3550_v21 = vor.u32 %v3980_v6, %v3549_v59  ;;  %v519_v37 = vld [vmem:[%s4677_s27 + $0xf0] sm:$0xff]  ;;  %s4390_s27 = sshra.s32 %s3270_s20, 4  ;;  %s4391_s27 = int_to_ptr.hbm [resolvable:$true] %s4390_s27 }
  0xa5   : > { %4180 = vrsqrt.f32 %v4840_v8  ;;  %vm760_vm1 = vweird.f32 %v4840_v8  ;;  %vm770_vm2 = vweird.f32 %v4842_v9  ;;  %v616_v25 = vadd.f32 %v615_v63, %v4890_v55  ;;  %v4012_v34 = vld [vmem:[#allocation7 + $0x1f4] sm:$0xf0]  ;;  %s4392_s3 = scalar_lea.hbm %s4391_s27, 256  ;;  %p4397_p2 = scmp.lt.s32.totalorder %s4391_s27, %s6083_s10 }
  0xa6   : > { %4182 = vrsqrt.f32 %v4842_v9  ;;  %v3682_v63 = vor.u32 %v4010_v46, %v3679_v52  ;;  %1601 = vmatpush.bf16.msrb.mxu2 %v3554_v27  ;;  %v552_v46 = vld [vmem:[%s4685_s2 + $0xf8] sm:$0xff]  ;;  %1503 = vmatpush.bf16.msrb.mxu0 %v3550_v21  ;;  %v710_v27 = vadd.f32 %v709_v28, %v672_v14  ;;  %v722_v59 = vadd.f32 %v721_v57, %v671_v2  ;;  %p4393_p1 = scmp.ne.s32.totalorder %s4391_s27, %s4392_s3  ;;  %p4398_p9 = scmp.lt.s32.totalorder %s4396_s19, %s4392_s3 }
  0xa7   : > { %v617_v51 = vadd.f32 %v616_v25, %v4905_v10  ;;  %v551_v25 = vld [vmem:[%s4685_s2 + $0xf0] sm:$0xff]  ;;  %v678_v28 = vmul.f32 %v4924_v41, %v4924_v41 }
  0xa8   : > { %1650 = vmatpush.bf16.msrb.mxu3 %v3682_v63  ;;  %v4940_v52 = vadd.f32 %v551_v25, %v519_v37  ;;  %v723_v2 = vadd.f32 %v722_v59, %v673_v15  ;;  %v4984_v15 = vld [vmem:[%s6079_s6] sm:$0x3]  ;;  %p4394_p4 = pnand %p4393_p1, %p4612_p0  ;;  %p4399_p7 = por %p4398_p9, %p4397_p2 }
  0xa9   : > { %v618_v40 = vadd.f32 %v617_v51, %v4924_v41 }
  0xaa   : > { %p4395_p8 = pneg %p4394_p4 }
  0xab   : > { %v4902_v3 = vpop.eup %4180  ;;  %v619_v63 = vadd.f32 %v618_v40, %v4940_v52 }
  0xac   : > { %v4913_v16 = vpop.eup %4182  ;;  %v755_v19 = vmul.f32 %v4902_v3, %v4840_v8  ;;  %vm761_vm3 = vweird.f32 %v4902_v3  ;;  %v3974_v8 = vld [vmem:[#allocation7 + $0xcc] sm:$0xf]  ;;  %p4400_p10 = pnand %p4399_p7, %p4395_p8 }
  0xad   : > { %v765_v33 = vmul.f32 %v4913_v16, %v4842_v9  ;;  %vm771_vm4 = vweird.f32 %v4913_v16  ;;  %vm4951_vm5 = vmor %vm760_vm1, %vm761_vm3  ;;  %v680_v9 = vmul.f32 %v4940_v52, %v4940_v52 }
  0xae   : > { %v756_v45 = vmul.f32 %v4902_v3, %v755_v19  ;;  %v630_v19 = vadd.f32 %v629_v44, %v4907_v11  ;;  %v4943_v44 = vadd.f32 %v552_v46, %v520_v58  ;;  %v675_v58 = vmul.f32 %v4892_v56, %v4892_v56  ;;  %vm4963_vm6 = vmor %vm770_vm2, %vm771_vm4 }
  0xaf   : > { %v766_v62 = vmul.f32 %v4913_v16, %v765_v33  ;;  %v3678_v33 = vor.u32 %v4012_v34, %v3677_v0  ;;  %v711_v0 = vadd.f32 %v710_v27, %v674_v26 }
  0xb0   : > { %v757_v20 = vmul.f32 0.5, %v756_v45  ;;  %v631_v55 = vadd.f32 %v630_v19, %v4926_v42  ;;  %v676_v45 = vmul.f32 %v4905_v10, %v4905_v10  ;;  %v724_v37 = vadd.f32 %v723_v2, %v675_v58 }
  0xb1   : > { %v767_v50 = vmul.f32 0.5, %v766_v62  ;;  %1552 = vmatpush.bf16.msrb.mxu1 %v3678_v33 }
  0xb2   : > { %v758_v32 = vsub.f32 1.5, %v757_v20  ;;  %v632_v14 = vadd.f32 %v631_v55, %v4943_v44  ;;  %v620_v20 = vrot.slane %v619_v63, 4  ;;  %v712_v21 = vadd.f32 %v711_v0, %v676_v45  ;;  %v4006_v0 = vld [vmem:[#allocation7 + $0x1cc] sm:$0xf] }
  0xb3   : > { %v768_v62 = vsub.f32 1.5, %v767_v50  ;;  %v679_v50 = vmul.f32 %v4926_v42, %v4926_v42 }
  0xb4   : > { %v759_v6 = vmul.f32 %v4902_v3, %v758_v32  ;;  %v677_v32 = vmul.f32 %v4907_v11, %v4907_v11  ;;  %v633_v57 = vrot.slane %v632_v14, 4  ;;  %v621_v34 = vadd.f32 %v620_v20, %v619_v63  ;;  %v3533_v20 = vld [vmem:[#allocation7 + $0xc8] sm:$0xf] }
  0xb5   : > { %v769_v19 = vmul.f32 %v4913_v16, %v768_v62  ;;  %v713_v33 = vadd.f32 %v712_v21, %v678_v28  ;;  %v681_v62 = vmul.f32 %v4943_v44, %v4943_v44  ;;  %v4008_v21 = vld [vmem:[#allocation7 + $0x1d4] sm:$0xf0] }
  0xb6   : > { %v763_v55 = vsel %vm4951_vm5, %v4902_v3, %v759_v6  ;;  %v634_v40 = vadd.f32 %v633_v57, %v632_v14  ;;  %v725_v46 = vadd.f32 %v724_v37, %v677_v32  ;;  %v3535_v14 = vld [vmem:[#allocation7 + $0xd8] sm:$0xf0]  ;;  %v3976_v57 = vld [vmem:[#allocation7 + $0xd4] sm:$0xf0] }
  0xb7   : > { %v773_v26 = vsel %vm4963_vm6, %v4913_v16, %v769_v19  ;;  %v714_v45 = vadd.f32 %v713_v33, %v680_v9  ;;  %v622_v16 = vrot.slane %v621_v34, 2  ;;  %v3538_v28 = vor.u32 %v3974_v8, %v3535_v14  ;;  %v3663_v19 = vld [vmem:[#allocation7 + $0x1d8] sm:$0xf0]  ;;  %v3661_v9 = vld [vmem:[#allocation7 + $0x1c8] sm:$0xf] }
  0xb8   : > { %v798_v25 = vrot.slane %v773_v26, 7  ;;  %v635_v51 = vrot.slane %v634_v40, 2  ;;  %v726_v58 = vadd.f32 %v725_v46, %v679_v50  ;;  %v3666_v33 = vor.u32 %v4006_v0, %v3663_v19 }
  0xb9   : > { %v715_v63 = vrot.slane %v714_v45, 4  ;;  %1602 = vmatpush.bf16.msrb.mxu2 %v3538_v28 }
  0xba   : > { %v801_v3 = vsel %vm800_vm7, %v763_v55, %v798_v25  ;;  %v623_v55 = vadd.f32 %v622_v16, %v621_v34  ;;  %v727_v37 = vadd.f32 %v726_v58, %v681_v62  ;;  %v5003_v25 = vld [vmem:[%s6080_s7] sm:$0x3]  ;;  %v636_v46 = vadd.f32 %v635_v51, %v634_v40  ;;  %1651 = vmatpush.bf16.msrb.mxu3 %v3666_v33 }
  0xbb   : > { %v805_v27 = vmul.f32 %v801_v3, %v4984_v15  ;;  %v716_v26 = vadd.f32 %v715_v63, %v714_v45  ;;  %v3534_v3 = vor.u32 %v3976_v57, %v3533_v20 }
  0xbc   : > { %v624_v45 = vrot.slane %v623_v55, 1  ;;  %v637_v51 = vrot.slane %v636_v46, 1 }
  0xbd   : > { %v4992_v59 = vperm.slane %v805_v27, 0  ;;  %v4994_v6 = vperm.slane %v805_v27, 1  ;;  %v717_v16 = vrot.slane %v716_v26, 2  ;;  %1504 = vmatpush.bf16.msrb.mxu0 %v3534_v3  ;;  %v3517_v3 = vld [vmem:[#allocation7 + $0xa8] sm:$0xf] }
  0xbe   : > { %v638_v20 = vadd.f32 %v637_v51, %v636_v46 }
  0xbf   : > { %v817_v32 = vmul.f32 %v4992_v59, %v4818_v38  ;;  %v818_v2 = vmul.f32 %v4994_v6, %v4821_v39  ;;  %v833_v38 = vmul.f32 %v4992_v59, %v4715_v43  ;;  %v3662_v39 = vor.u32 %v4008_v21, %v3661_v9 }
  0xc0   : > { %v835_v34 = vmul.f32 %v4992_v59, %v4722_v48  ;;  %v834_v63 = vmul.f32 %v4994_v6, %v4720_v47  ;;  %v836_v40 = vmul.f32 %v4994_v6, %v4724_v49  ;;  %v728_v43 = vrot.slane %v727_v37, 4 }
  0xc1   : > { %v825_v50 = vrot.slane %v818_v2, 7  ;;  %1553 = vmatpush.bf16.msrb.mxu1 %v3662_v39  ;;  %v625_v48 = vadd.f32 %v624_v45, %v623_v55  ;;  %v718_v14 = vadd.f32 %v717_v16, %v716_v26  ;;  %v837_v55 = vmul.f32 %v4992_v59, %v4728_v53  ;;  %v3970_v26 = vld [vmem:[#allocation7 + $0xac] sm:$0xf]  ;;  %v3972_v39 = vld [vmem:[#allocation7 + $0xb4] sm:$0xf0] }
  0xc2   : > { %v729_v28 = vadd.f32 %v728_v43, %v727_v37  ;;  %v3519_v37 = vld [vmem:[#allocation7 + $0xb8] sm:$0xf0]  ;;  %v5049_v33 = vmul.f32 %v4815_v35, %v638_v20  ;;  %v839_v16 = vmul.f32 %v4992_v59, %v4738_v60  ;;  %v838_v53 = vmul.f32 %v4994_v6, %v4730_v54  ;;  %v4004_v43 = vld [vmem:[#allocation7 + $0x1b4] sm:$0xf0] }
  0xc3   : > { %v827_v27 = vsel %vm800_vm7, %v817_v32, %v825_v50  ;;  %v5040_v57 = vmul.f32 %v4815_v35, %v625_v48  ;;  %v719_v9 = vrot.slane %v718_v14, 1  ;;  %v4002_v50 = vld [vmem:[#allocation7 + $0x1ac] sm:$0xf]  ;;  %v3522_v46 = vor.u32 %v3970_v26, %v3519_v37 }
  0xc4   : > { %v831_v62 = vsub.f32 %v5003_v25, %v827_v27  ;;  %v730_v21 = vrot.slane %v729_v28, 2  ;;  %v840_v51 = vmul.f32 %v4994_v6, %v4740_v61  ;;  %v741_v60 = vmul.f32 %v5049_v33, %v5049_v33 }
  0xc5   : > { %v720_v27 = vadd.f32 %v719_v9, %v718_v14  ;;  %v740_v45 = vmul.f32 %v5040_v57, %v5040_v57  ;;  %1603 = vmatpush.bf16.msrb.mxu2 %v3522_v46 }
  0xc6   : > { %v5015_v58 = vperm.slane %v831_v62, 0  ;;  %v5017_v8 = vperm.slane %v831_v62, 1 }
  0xc8   : > { %v5020_v0 = vadd.f32 %v5015_v58, %v833_v38  ;;  %v5023_v19 = vadd.f32 %v5015_v58, %v835_v34  ;;  %v5026_v47 = vadd.f32 %v5017_v8, %v834_v63  ;;  %v5029_v49 = vadd.f32 %v5017_v8, %v836_v40  ;;  %v3647_v38 = vld [vmem:[#allocation7 + $0x1b8] sm:$0xf0]  ;;  %v3645_v40 = vld [vmem:[#allocation7 + $0x1a8] sm:$0xf] }
  0xc9   : > { %v731_v34 = vadd.f32 %v730_v21, %v729_v28  ;;  %v3650_v62 = vor.u32 %v4002_v50, %v3647_v38  ;;  %v3518_v63 = vor.u32 %v3972_v39, %v3517_v3  ;;  %v3646_v48 = vor.u32 %v4004_v43, %v3645_v40  ;;  %v3501_v40 = vld [vmem:[#allocation7 + $0x88] sm:$0xf]  ;;  %v3968_v43 = vld [vmem:[#allocation7 + $0x94] sm:$0xf0] }
  0xca   : > { %v5033_v32 = vpack.c.bf16 %v5023_v19, %v5020_v0  ;;  %v5037_v2 = vpack.c.bf16 %v5029_v49, %v5026_v47  ;;  %v736_v28 = vmul.f32 %v720_v27, %v4815_v35  ;;  %v5063_v9 = vadd.f32 %v5015_v58, %v837_v55 }
  0xcb   : > { %v732_v14 = vrot.slane %v731_v34, 1  ;;  %1652 = vmatpush.bf16.msrb.mxu3 %v3650_v62  ;;  %1505 = vmatpush.bf16.msrb.mxu0 %v3518_v63  ;;  %v5066_v21 = vadd.f32 %v5015_v58, %v839_v16  ;;  %v5069_v61 = vadd.f32 %v5017_v8, %v838_v53  ;;  %v5072_v26 = vadd.f32 %v5017_v8, %v840_v51  ;;  %v3998_v16 = vld [vmem:[#allocation7 + $0x18c] sm:$0xf]  ;;  %v3631_v63 = vld [vmem:[#allocation7 + $0x198] sm:$0xf0] }
  0xcc   : > { %1315 = vmatmul.bf16.vlgmr.msra.gmra.mxu0 %v5033_v32  ;;  %1364 = vmatmul.bf16.vlgmr.msra.gmra.mxu1 %v5037_v2  ;;  %v744_v54 = vsub.f32 %v736_v28, %v740_v45  ;;  %v3503_v45 = vld [vmem:[#allocation7 + $0x98] sm:$0xf0]  ;;  %v841_v51 = vmul.f32 %v4992_v59, %v4748_v4  ;;  %v3629_v28 = vld [vmem:[#allocation7 + $0x188] sm:$0xf] }
  0xcd   : > { %1413 = vmatmul.bf16.vlgmr.msra.gmra.mxu2 %v5033_v32  ;;  %1462 = vmatmul.bf16.vlgmr.msra.gmra.mxu3 %v5037_v2  ;;  %v733_v20 = vadd.f32 %v732_v14, %v731_v34  ;;  %6151 = vst [vmem:[#allocation27_spill] sm:$0xff] %v5072_v26  ;;  %v5077_v3 = vpack.c.bf16 %v5066_v21, %v5063_v9  ;;  %v3966_v34 = vld [vmem:[#allocation7 + $0x8c] sm:$0xf] }
  0xce   : > { %1554 = vmatpush.bf16.msrb.mxu1 %v3646_v48  ;;  %v748_v50 = vmax.f32 %v744_v54, 0.0  ;;  %v5081_v55 = vpack.c.bf16 %v5072_v26, %v5069_v61  ;;  %v3506_v62 = vor.u32 %v3966_v34, %v3503_v45  ;;  %v3634_v48 = vor.u32 %v3998_v16, %v3631_v63 }
  0xcf   : > { %v737_v37 = vmul.f32 %v733_v20, %v4815_v35  ;;  %v3502_v14 = vor.u32 %v3968_v43, %v3501_v40  ;;  %v4000_v20 = vld [vmem:[#allocation7 + $0x194] sm:$0xf0]  ;;  %v843_v54 = vmul.f32 %v4992_v59, %v4758_v12  ;;  %v5100_v16 = vadd.f32 %v5015_v58, %v841_v51 }
  0xd0   : > { %v752_v38 = vadd.f32 1e-05, %v748_v50  ;;  %v844_v50 = vmul.f32 %v4994_v6, %v4760_v13  ;;  %1604 = vmatpush.bf16.msrb.mxu2 %v3506_v62  ;;  %1653 = vmatpush.bf16.msrb.mxu3 %v3634_v48 }
  0xd1   : > { %v745_v46 = vsub.f32 %v737_v37, %v741_v60  ;;  %v842_v37 = vmul.f32 %v4994_v6, %v4750_v5  ;;  %1506 = vmatpush.bf16.msrb.mxu0 %v3502_v14  ;;  %v5103_v12 = vadd.f32 %v5015_v58, %v843_v54  ;;  %v3487_v54 = vld [vmem:[#allocation7 + $0x78] sm:$0xf0]  ;;  %v3964_v14 = vld [vmem:[#allocation7 + $0x74] sm:$0xf0] }
  0xd2   : > { %4184 = vrsqrt.f32 %v752_v38  ;;  %v5109_v13 = vadd.f32 %v5017_v8, %v844_v50  ;;  %vm780_vm8 = vweird.f32 %v752_v38 }
  0xd3   : > { %v749_v39 = vmax.f32 %v745_v46, 0.0  ;;  %v3630_v46 = vor.u32 %v4000_v20, %v3629_v28  ;;  %v5106_v5 = vadd.f32 %v5017_v8, %v842_v37  ;;  %v5114_v43 = vpack.c.bf16 %v5103_v12, %v5100_v16  ;;  %v3994_v37 = vld [vmem:[#allocation7 + $0x16c] sm:$0xf] }
  0xd4   : > { %6153 = vst [vmem:[#allocation29_spill] sm:$0xff] %v5109_v13 }
  0xd5   : > { %v753_v27 = vadd.f32 1e-05, %v749_v39  ;;  %1555 = vmatpush.bf16.msrb.mxu1 %v3630_v46  ;;  %6152 = vst [vmem:[#allocation28_spill] sm:$0xff] %v5106_v5  ;;  %v5118_v51 = vpack.c.bf16 %v5109_v13, %v5106_v5 }
  0xd7   : > { %4186 = vrsqrt.f32 %v753_v27  ;;  %vm790_vm10 = vweird.f32 %v753_v27 }
  0xd8   : > { %v5087_v53 = vpop.eup %4184 }
  0xd9   : > { %v775_v60 = vmul.f32 %v5087_v53, %v752_v38  ;;  %vm781_vm9 = vweird.f32 %v5087_v53 }
  0xda   : > { %vm5121_vm12 = vmor %vm780_vm8, %vm781_vm9 }
  0xdb   : > { %v776_v4 = vmul.f32 %v5087_v53, %v775_v60  ;;  %v3962_v60 = vld [vmem:[#allocation7 + $0x6c] sm:$0xf] }
  0xdc   : > { %1320 = vmatmul.bf16.gmra.mxu0 %v5077_v3  ;;  %1369 = vmatmul.bf16.gmra.mxu1 %v5081_v55  ;;  %v3490_v46 = vor.u32 %v3962_v60, %v3487_v54 }
  0xdd   : > { %1418 = vmatmul.bf16.gmra.mxu2 %v5077_v3  ;;  %1467 = vmatmul.bf16.gmra.mxu3 %v5081_v55  ;;  %v4187_v39 = vpop.eup %4186  ;;  %v777_v34 = vmul.f32 0.5, %v776_v4  ;;  %v3615_v4 = vld [vmem:[#allocation7 + $0x178] sm:$0xf0] }
  0xde   : > { %v785_v45 = vmul.f32 %v4187_v39, %v753_v27  ;;  %vm791_vm11 = vweird.f32 %v4187_v39  ;;  %1605 = vmatpush.bf16.msrb.mxu2 %v3490_v46 }
  0xdf   : > { %v778_v62 = vsub.f32 1.5, %v777_v34  ;;  %vm792_vm13 = vmor %vm790_vm10, %vm791_vm11  ;;  %v3485_v34 = vld [vmem:[#allocation7 + $0x68] sm:$0xf] }
  0xe0   : > { %v786_v63 = vmul.f32 %v4187_v39, %v785_v45  ;;  %v845_v45 = vmul.f32 %v4992_v59, %v4775_v23 }
  0xe1   : > { %v779_v48 = vmul.f32 %v5087_v53, %v778_v62  ;;  %v847_v62 = vmul.f32 %v4992_v59, %v4785_v30 }
  0xe2   : > { %v787_v40 = vmul.f32 0.5, %v786_v63  ;;  %v846_v63 = vmul.f32 %v4994_v6, %v4777_v24  ;;  %v5147_v59 = vadd.f32 %v5015_v58, %v845_v45 }
  0xe3   : > { %v783_v27 = vsel %vm5121_vm12, %v5087_v53, %v779_v48  ;;  %v3613_v53 = vld [vmem:[#allocation7 + $0x168] sm:$0xf]  ;;  %v848_v48 = vmul.f32 %v4994_v6, %v4787_v31  ;;  %v5150_v60 = vadd.f32 %v5015_v58, %v847_v62  ;;  %v6158_v62 = vld [vmem:[#allocation25_spill] sm:$0xff] }
  0xe4   : > { %v788_v38 = vsub.f32 1.5, %v787_v40  ;;  %v3618_v40 = vor.u32 %v3994_v37, %v3615_v4  ;;  %v5153_v31 = vadd.f32 %v5017_v8, %v846_v63  ;;  %v6159_v63 = vld [vmem:[#allocation26_spill] sm:$0xff] }
  0xe5   : > { %v5156_v6 = vadd.f32 %v5017_v8, %v848_v48  ;;  %v5164_v37 = vpack.c.bf16 %v5150_v60, %v5147_v59 }
  0xe6   : > { %v789_v28 = vmul.f32 %v4187_v39, %v788_v38  ;;  %1654 = vmatpush.bf16.msrb.mxu3 %v3618_v40  ;;  %6156 = vst [vmem:[#allocation30_spill] sm:$0xff] %v5153_v31 }
  0xe7   : > { %6157 = vst [vmem:[#allocation31_spill] sm:$0xff] %v5156_v6  ;;  %v5168_v58 = vpack.c.bf16 %v5156_v6, %v5153_v31  ;;  %v4031_v31 = vld [vmem:[#allocation10 + $0x94] sm:$0xf] }
  0xe8   : > { %v793_v20 = vsel %vm792_vm13, %v4187_v39, %v789_v28  ;;  %v3996_v39 = vld [vmem:[#allocation7 + $0x174] sm:$0xf0]  ;;  %v3486_v28 = vor.u32 %v3964_v14, %v3485_v34 }
  0xe9   : > { %v799_v50 = vrot.slane %v793_v20, 7  ;;  %v3614_v20 = vor.u32 %v3996_v39, %v3613_v53 }
  0xea   : > { %1507 = vmatpush.bf16.msrb.mxu0 %v3486_v28  ;;  %v3469_v28 = vld [vmem:[#allocation7 + $0x48] sm:$0xf] }
  0xeb   : > { %v802_v38 = vsel %vm800_vm7, %v783_v27, %v799_v50  ;;  %1556 = vmatpush.bf16.msrb.mxu1 %v3614_v20  ;;  %v3960_v20 = vld [vmem:[#allocation7 + $0x54] sm:$0xf0] }
  0xec   : > { %1325 = vmatmul.bf16.gmra.mxu0 %v5114_v43  ;;  %1374 = vmatmul.bf16.gmra.mxu1 %v5118_v51  ;;  %v806_v23 = vmul.f32 %v802_v38, %v4984_v15  ;;  %v3599_v38 = vld [vmem:[#allocation7 + $0x158] sm:$0xf0] }
  0xed   : > { %1423 = vmatmul.bf16.gmra.mxu2 %v5114_v43  ;;  %1472 = vmatmul.bf16.gmra.mxu3 %v5118_v51 }
  0xee   : > { %v5142_v30 = vperm.slane %v806_v23, 0  ;;  %v5144_v24 = vperm.slane %v806_v23, 1 }
  0xf0   : > { %v819_v15 = vmul.f32 %v5142_v30, %v5040_v57  ;;  %v820_v27 = vmul.f32 %v5144_v24, %v5049_v33  ;;  %v849_v8 = vmul.f32 %v5142_v30, %v4849_v17  ;;  %v851_v57 = vmul.f32 %v5142_v30, %v4851_v18 }
  0xf1   : > { %v850_v33 = vmul.f32 %v5144_v24, %v4833_v1  ;;  %v852_v4 = vmul.f32 %v5144_v24, %v4838_v7  ;;  %v853_v34 = vmul.f32 %v5142_v30, %v4858_v22  ;;  %v855_v45 = vmul.f32 %v5142_v30, %v4871_v36  ;;  %v3958_v7 = vld [vmem:[#allocation7 + $0x4c] sm:$0xf]  ;;  %v3471_v22 = vld [vmem:[#allocation7 + $0x58] sm:$0xf0] }
  0xf2   : > { %v826_v54 = vrot.slane %v820_v27, 7  ;;  %v854_v17 = vmul.f32 %v5144_v24, %v4864_v29  ;;  %v3990_v36 = vld [vmem:[#allocation7 + $0x14c] sm:$0xf]  ;;  %v857_v29 = vmul.f32 %v5142_v30, %v6159_v63  ;;  %v859_v40 = vmul.f32 %v5142_v30, %v4905_v10 }
  0xf3   : > { %v861_v63 = vmul.f32 %v5142_v30, %v4924_v41  ;;  %v862_v41 = vmul.f32 %v5144_v24, %v4926_v42  ;;  %v3950_v42 = vld [vmem:[#allocation7 + $0xc] sm:$0xf] }
  0xf4   : > { %v828_v50 = vsel %vm800_vm7, %v819_v15, %v826_v54  ;;  %v3597_v54 = vld [vmem:[#allocation7 + $0x148] sm:$0xf] }
  0xf5   : > { %v832_v46 = vsub.f32 %v5003_v25, %v828_v50  ;;  %v856_v25 = vmul.f32 %v5144_v24, %v6158_v62  ;;  %v3992_v50 = vld [vmem:[#allocation7 + $0x154] sm:$0xf0] }
  0xf7   : > { %v869_v1 = vperm.slane %v832_v46, 0  ;;  %v5190_v18 = vperm.slane %v832_v46, 1  ;;  %v3602_v46 = vor.u32 %v3990_v36, %v3599_v38  ;;  %v3986_v36 = vld [vmem:[#allocation7 + $0x12c] sm:$0xf]  ;;  %v3583_v38 = vld [vmem:[#allocation7 + $0x138] sm:$0xf0] }
  0xf9   : > { %v5198_v14 = vadd.f32 %v869_v1, %v849_v8  ;;  %v5200_v53 = vadd.f32 %v869_v1, %v851_v57  ;;  %v5203_v39 = vadd.f32 %v5190_v18, %v850_v33  ;;  %v5206_v48 = vadd.f32 %v5190_v18, %v852_v4  ;;  %1655 = vmatpush.bf16.msrb.mxu3 %v3602_v46  ;;  %v3988_v46 = vld [vmem:[#allocation7 + $0x134] sm:$0xf0] }
  0xfa   : > { %v5208_v23 = vadd.f32 %v869_v1, %v853_v34  ;;  %v5210_v15 = vadd.f32 %v869_v1, %v855_v45  ;;  %v5213_v27 = vadd.f32 %v5190_v18, %v854_v17  ;;  %v5216_v10 = vadd.f32 %v5190_v18, %v856_v25 }
  0xfb   : > { %6160 = vst [vmem:[#allocation25_spill] sm:$0xff] %v5198_v14  ;;  %v3474_v8 = vor.u32 %v3958_v7, %v3471_v22  ;;  %v3470_v57 = vor.u32 %v3960_v20, %v3469_v28  ;;  %v3598_v33 = vor.u32 %v3992_v50, %v3597_v54  ;;  %v5218_v4 = vadd.f32 %v869_v1, %v857_v29  ;;  %v3453_v28 = vld [vmem:[#allocation7 + $0x28] sm:$0xf]  ;;  %v3956_v20 = vld [vmem:[#allocation7 + $0x34] sm:$0xf0] }
  0xfc   : > { %1330 = vmatmul.bf16.gmra.mxu0 %v5164_v37  ;;  %1379 = vmatmul.bf16.gmra.mxu1 %v5168_v58  ;;  %6161 = vst [vmem:[#allocation26_spill] sm:$0xff] %v5200_v53  ;;  %v5220_v34 = vadd.f32 %v869_v1, %v859_v40  ;;  %v858_v45 = vmul.f32 %v5144_v24, %v4892_v56  ;;  %v3954_v56 = vld [vmem:[#allocation7 + $0x2c] sm:$0xf] }
  0xfd   : > { %1428 = vmatmul.bf16.gmra.mxu2 %v5164_v37  ;;  %1477 = vmatmul.bf16.gmra.mxu3 %v5168_v58  ;;  %6162 = vst [vmem:[#allocation32_spill] sm:$0xff] %v5203_v39  ;;  %v860_v17 = vmul.f32 %v5144_v24, %v4907_v11  ;;  %v5228_v62 = vpack.c.bf16 %v5200_v53, %v5198_v14  ;;  %v3455_v11 = vld [vmem:[#allocation7 + $0x38] sm:$0xf0] }
  0xfe   : > { %6163 = vst [vmem:[#allocation33_spill] sm:$0xff] %v5206_v48  ;;  %1606 = vmatpush.bf16.msrb.mxu2 %v3474_v8  ;;  %1508 = vmatpush.bf16.msrb.mxu0 %v3470_v57  ;;  %v5232_v25 = vpack.c.bf16 %v5206_v48, %v5203_v39  ;;  %v5235_v7 = vadd.f32 %v5190_v18, %v858_v45  ;;  %v3581_v8 = vld [vmem:[#allocation7 + $0x128] sm:$0xf]  ;;  %v3925_v39 = vld [vmem:[#allocation10 + $0x1e0] sm:$0xf] }
  0xff   : > { %6164 = vst [vmem:[#allocation34_spill] sm:$0xff] %v5208_v23  ;;  %1557 = vmatpush.bf16.msrb.mxu1 %v3598_v33  ;;  %v5238_v22 = vadd.f32 %v5190_v18, %v860_v17  ;;  %v863_v29 = vmul.f32 %v5142_v30, %v4940_v52  ;;  %v3458_v40 = vor.u32 %v3954_v56, %v3455_v11  ;;  %v4074_v48 = vld [vmem:[#allocation10 + $0x1e4] sm:$0xf0] }
 0x100   : > { %6165 = vst [vmem:[#allocation35_spill] sm:$0xff] %v5210_v15  ;;  %v3586_v54 = vor.u32 %v3986_v36, %v3583_v38  ;;  %v3454_v50 = vor.u32 %v3956_v20, %v3453_v28  ;;  %v5248_v57 = vadd.f32 %v869_v1, %v861_v63  ;;  %v3582_v45 = vor.u32 %v3988_v46, %v3581_v8  ;;  %v3567_v36 = vld [vmem:[#allocation7 + $0x118] sm:$0xf0]  ;;  %v3437_v63 = vld [vmem:[#allocation7 + $0x8] sm:$0xf] }
 0x101   : > { %6166 = vst [vmem:[#allocation36_spill] sm:$0xff] %v5213_v27  ;;  %v5250_v33 = vadd.f32 %v869_v1, %v863_v29  ;;  %v864_v52 = vmul.f32 %v5144_v24, %v4943_v44  ;;  %v5258_v30 = vpack.c.bf16 %v5210_v15, %v5208_v23  ;;  %v5262_v17 = vpack.c.bf16 %v5216_v10, %v5213_v27  ;;  %v3439_v44 = vld [vmem:[#allocation7 + $0x18] sm:$0xf0]  ;;  %v3982_v24 = vld [vmem:[#allocation7 + $0x10c] sm:$0xf] }
 0x102   : > { %6167 = vst [vmem:[#allocation37_spill] sm:$0xff] %v5216_v10  ;;  %1607 = vmatpush.bf16.msrb.mxu2 %v3458_v40  ;;  %1656 = vmatpush.bf16.msrb.mxu3 %v3586_v54  ;;  %v5265_v1 = vadd.f32 %v5190_v18, %v862_v41  ;;  %v3442_v11 = vor.u32 %v3950_v42, %v3439_v44  ;;  %v3952_v29 = vld [vmem:[#allocation7 + $0x14] sm:$0xf0]  ;;  %v3565_v28 = vld [vmem:[#allocation7 + $0x108] sm:$0xf] }
 0x103   : > { %6168 = vst [vmem:[#allocation38_spill] sm:$0xff] %v5218_v4  ;;  %1509 = vmatpush.bf16.msrb.mxu0 %v3454_v50  ;;  %1558 = vmatpush.bf16.msrb.mxu1 %v3582_v45  ;;  %v5268_v56 = vadd.f32 %v5190_v18, %v864_v52  ;;  %v3570_v40 = vor.u32 %v3982_v24, %v3567_v36  ;;  %v3984_v18 = vld [vmem:[#allocation7 + $0x114] sm:$0xf0]  ;;  %v5298_v45 = vld [vmem:[#allocation8] sm:$0xf] }
 0x104   : > { %6169 = vst [vmem:[#allocation39_spill] sm:$0xff] %v5220_v34  ;;  %v3438_v38 = vor.u32 %v3952_v29, %v3437_v63  ;;  %v3566_v20 = vor.u32 %v3984_v18, %v3565_v28  ;;  %v5276_v54 = vpack.c.bf16 %v5220_v34, %v5218_v4  ;;  %v5280_v50 = vpack.c.bf16 %v5238_v22, %v5235_v7  ;;  %v3869_v44 = vld [vmem:[#allocation10 + $0x170] sm:$0xf]  ;;  %v4060_v24 = vld [vmem:[#allocation10 + $0x174] sm:$0xf0] }
 0x105   : > { %6170 = vst [vmem:[#allocation40_spill] sm:$0xff] %v5235_v7  ;;  %v5288_v8 = vpack.c.bf16 %v5250_v33, %v5248_v57  ;;  %v5292_v46 = vpack.c.bf16 %v5268_v56, %v5265_v1  ;;  %v1733_v41 = vperm.slane %v5298_v45, 0  ;;  %v1734_v52 = vperm.slane %v5298_v45, 1  ;;  %v4028_v63 = vld [vmem:[#allocation10 + $0x74] sm:$0xf0] }
 0x106   : > { %6171 = vst [vmem:[#allocation41_spill] sm:$0xff] %v5238_v22  ;;  %1608 = vmatpush.bf16.msrb.mxu2 %v3442_v11  ;;  %1657 = vmatpush.bf16.msrb.mxu3 %v3570_v40  ;;  %v3741_v11 = vld [vmem:[#allocation10 + $0x70] sm:$0xf]  ;;  %v3870_v36 = vor.u32 %v4060_v24, %v3869_v44  ;;  %v4076_v40 = vld [vmem:[#allocation10 + $0x1f4] sm:$0xf0] }
 0x107   : > { %6172 = vst [vmem:[#allocation42_spill] sm:$0xff] %v5248_v57  ;;  %1510 = vmatpush.bf16.msrb.mxu0 %v3438_v38  ;;  %1559 = vmatpush.bf16.msrb.mxu1 %v3566_v20  ;;  %v1741_v42 = vpack.c.bf16 %v1734_v52, %v1733_v41  ;;  %v3933_v29 = vld [vmem:[#allocation10 + $0x1f0] sm:$0xf]  ;;  %v3742_v38 = vor.u32 %v4028_v63, %v3741_v11  ;;  %v4044_v24 = vld [vmem:[#allocation10 + $0xf4] sm:$0xf0] }
 0x108   : > { %6173 = vst [vmem:[#allocation43_spill] sm:$0xff] %v5250_v33  ;;  %v3934_v28 = vor.u32 %v4076_v40, %v3933_v29  ;;  %v3805_v44 = vld [vmem:[#allocation10 + $0xf0] sm:$0xf]  ;;  %v4058_v10 = vld [vmem:[#allocation10 + $0x164] sm:$0xf0] }
 0x109   : > { %6174 = vst [vmem:[#allocation44_spill] sm:$0xff] %v5265_v1  ;;  %v1745_v18 = vunpack.c.l.b16 %v1741_v42  ;;  %v1746_v20 = vunpack.c.h.b16 %v1741_v42  ;;  %v3806_v11 = vor.u32 %v4044_v24, %v3805_v44  ;;  %v3926_v24 = vor.u32 %v4074_v48, %v3925_v39 }
 0x10a   : > { %6175 = vst [vmem:[#allocation45_spill] sm:$0xff] %v5268_v56  ;;  %2581 = vmatpush.bf16.msra.mxu2 %v3870_v36  ;;  %2630 = vmatpush.bf16.msra.mxu3 %v3934_v28 }
 0x10b   : > { %2483 = vmatpush.bf16.msra.mxu0 %v3742_v38  ;;  %v1749_v41 = vpack.c.b16 %v1745_v18, %v1745_v18  ;;  %v1750_v52 = vpack.c.b16 %v1746_v20, %v1746_v20  ;;  %2532 = vmatpush.bf16.msra.mxu1 %v3806_v11  ;;  %v3861_v20 = vld [vmem:[#allocation10 + $0x160] sm:$0xf] }
 0x10c   : > { %1335 = vmatmul.bf16.gmra.mxu0 %v5228_v62  ;;  %1384 = vmatmul.bf16.gmra.mxu1 %v5232_v25  ;;  %v3862_v27 = vor.u32 %v4058_v10, %v3861_v20 }
 0x10d   : > { %1433 = vmatmul.bf16.gmra.mxu2 %v5228_v62  ;;  %1482 = vmatmul.bf16.gmra.mxu3 %v5232_v25  ;;  %v1754_v63 = vpack.i.b16 %v1749_v41, %v1749_v41  ;;  %v1758_v29 = vpack.i.b16 %v1750_v52, %v1750_v52 }
 0x10e   : > { %2582 = vmatpush.bf16.msra.mxu2 %v3862_v27  ;;  %2631 = vmatpush.bf16.msra.mxu3 %v3926_v24 }
 0x10f   : > { %v1756_v7 = vperm.slane %v1754_v63, 0  ;;  %v1760_v18 = vperm.slane %v1758_v29, 0 }
 0x111   : > { %v5306_v41 = vunpack.c.l.bf16 %v1756_v7  ;;  %v3797_v7 = vld [vmem:[#allocation10 + $0xe0] sm:$0xf] }
 0x11c   : > { %1340 = vmatmul.bf16.gmra.mxu0 %v5258_v30  ;;  %1389 = vmatmul.bf16.gmra.mxu1 %v5262_v17 }
 0x11d   : > { %1438 = vmatmul.bf16.gmra.mxu2 %v5258_v30  ;;  %1487 = vmatmul.bf16.gmra.mxu3 %v5262_v17 }
 0x12c   : > { %1345 = vmatmul.bf16.gmra.mxu0 %v5276_v54  ;;  %1394 = vmatmul.bf16.gmra.mxu1 %v5280_v50 }
 0x12d   : > { %1443 = vmatmul.bf16.gmra.mxu2 %v5276_v54  ;;  %1492 = vmatmul.bf16.gmra.mxu3 %v5280_v50 }
 0x13c   : > { %1350 = vmatmul.bf16.gmra.mxu0 %v5288_v8  ;;  %1399 = vmatmul.bf16.gmra.mxu1 %v5292_v46 }
 0x13d   : > { %1448 = vmatmul.bf16.gmra.mxu2 %v5288_v8  ;;  %1497 = vmatmul.bf16.gmra.mxu3 %v5292_v46 }
 0x149   : > { %v1316_v56 = vpop.f32.mrf.mxu0  ;;  %v1365_v1 = vpop.f32.mrf.mxu1 }
 0x14a   : > { %v1366_v22 = vadd.f32 %v1365_v1, %v1316_v56 }
 0x14c   : > { %1511 = vmatmul.bf16.vlgmr.msrb.gmra.mxu0 %v5033_v32  ;;  %1560 = vmatmul.bf16.vlgmr.msrb.gmra.mxu1 %v5037_v2 }
 0x14d   : > { %1609 = vmatmul.bf16.vlgmr.msrb.gmra.mxu2 %v5033_v32  ;;  %1658 = vmatmul.bf16.vlgmr.msrb.gmra.mxu3 %v5037_v2  ;;  %v3733_v32 = vld [vmem:[#allocation10 + $0x60] sm:$0xf]  ;;  %v4026_v2 = vld [vmem:[#allocation10 + $0x64] sm:$0xf0] }
 0x14e   : > { %v3734_v44 = vor.u32 %v4026_v2, %v3733_v32 }
 0x150   : > { %v1414_v42 = vpop.f32.mrf.mxu2  ;;  %v1463_v36 = vpop.f32.mrf.mxu3  ;;  %2484 = vmatpush.bf16.msra.mxu0 %v3734_v44 }
 0x151   : > { %v1464_v40 = vadd.f32 %v1463_v36, %v1414_v42  ;;  %v1318_v1 = vpop.f32.mrf.mxu0  ;;  %v1367_v56 = vpop.f32.mrf.mxu1  ;;  %v5308_v36 = vunpack.c.l.bf16 %v1760_v18 }
 0x152   : > { %v1368_v38 = vadd.f32 %v1367_v56, %v1318_v1  ;;  %v4042_v56 = vld [vmem:[#allocation10 + $0xe4] sm:$0xf0] }
 0x153   : > { %v1699_v28 = vpack.c.bf16 %v1464_v40, %v1366_v22 }
 0x155   : > { %v1769_v33 = vunpack.c.l.bf16 %v1699_v28  ;;  %v1770_v42 = vunpack.c.h.bf16 %v1699_v28  ;;  %v3798_v28 = vor.u32 %v4042_v56, %v3797_v7  ;;  %v3917_v7 = vld [vmem:[#allocation10 + $0x1d0] sm:$0xf]  ;;  %v4072_v56 = vld [vmem:[#allocation10 + $0x1d4] sm:$0xf0] }
 0x157   : > { %v1837_v1 = vadd.f32 %v5306_v41, %v1769_v33  ;;  %v1838_v39 = vadd.f32 %v5308_v36, %v1770_v42  ;;  %2533 = vmatpush.bf16.msra.mxu1 %v3798_v28 }
 0x158   : > { %v1416_v52 = vpop.f32.mrf.mxu2  ;;  %v1465_v11 = vpop.f32.mrf.mxu3 }
 0x159   : > { %v1466_v22 = vadd.f32 %v1465_v11, %v1416_v52  ;;  %v1321_v63 = vpop.f32.mrf.mxu0  ;;  %v1370_v29 = vpop.f32.mrf.mxu1  ;;  %v1997_v33 = vmax.f32 %v1837_v1, 0.0  ;;  %v1998_v2 = vmax.f32 %v1838_v39, 0.0  ;;  %v4024_v1 = vld [vmem:[#allocation10 + $0x54] sm:$0xf0]  ;;  %v3918_v39 = vor.u32 %v4072_v56, %v3917_v7 }
 0x15a   : > { %v1371_v10 = vadd.f32 %v1370_v29, %v1321_v63  ;;  %v3853_v29 = vld [vmem:[#allocation10 + $0x150] sm:$0xf] }
 0x15b   : > { %v1701_v40 = vpack.c.bf16 %v1466_v22, %v1368_v38  ;;  %2632 = vmatpush.bf16.msra.mxu3 %v3918_v39 }
 0x15c   : > { %1516 = vmatmul.bf16.gmra.mxu0 %v5077_v3  ;;  %1565 = vmatmul.bf16.gmra.mxu1 %v5081_v55 }
 0x15d   : > { %v1773_v48 = vunpack.c.l.bf16 %v1701_v40  ;;  %v1774_v27 = vunpack.c.h.bf16 %v1701_v40  ;;  %1614 = vmatmul.bf16.gmra.mxu2 %v5077_v3  ;;  %1663 = vmatmul.bf16.gmra.mxu3 %v5081_v55  ;;  %v4056_v40 = vld [vmem:[#allocation10 + $0x154] sm:$0xf0] }
 0x15f   : > { %v1841_v18 = vadd.f32 %v5306_v41, %v1773_v48  ;;  %v1842_v38 = vadd.f32 %v5308_v36, %v1774_v27  ;;  %v3725_v48 = vld [vmem:[#allocation10 + $0x50] sm:$0xf]  ;;  %v3854_v27 = vor.u32 %v4056_v40, %v3853_v29  ;;  %v4040_v29 = vld [vmem:[#allocation10 + $0xd4] sm:$0xf0] }
 0x160   : > { %v1419_v20 = vpop.f32.mrf.mxu2  ;;  %v1468_v32 = vpop.f32.mrf.mxu3  ;;  %v3726_v28 = vor.u32 %v4024_v1, %v3725_v48 }
 0x161   : > { %v2001_v44 = vmax.f32 %v1841_v18, 0.0  ;;  %v2002_v24 = vmax.f32 %v1842_v38, 0.0  ;;  %v1469_v52 = vadd.f32 %v1468_v32, %v1419_v20  ;;  %v1323_v11 = vpop.f32.mrf.mxu0  ;;  %v1372_v42 = vpop.f32.mrf.mxu1  ;;  %2583 = vmatpush.bf16.msra.mxu2 %v3854_v27 }
 0x162   : > { %v1373_v3 = vadd.f32 %v1372_v42, %v1323_v11  ;;  %2485 = vmatpush.bf16.msra.mxu0 %v3726_v28 }
 0x163   : > { %v5318_v22 = vpack.c.bf16 %v2001_v44, %v1997_v33  ;;  %v5320_v55 = vpack.c.bf16 %v2002_v24, %v1998_v2  ;;  %v1703_v63 = vpack.c.bf16 %v1469_v52, %v1371_v10 }
 0x165   : > { %v1777_v18 = vunpack.c.l.bf16 %v1703_v63  ;;  %v1778_v32 = vunpack.c.h.bf16 %v1703_v63  ;;  %v3789_v63 = vld [vmem:[#allocation10 + $0xd0] sm:$0xf] }
 0x166   : > { %v3790_v48 = vor.u32 %v4040_v29, %v3789_v63  ;;  %v4022_v63 = vld [vmem:[#allocation10 + $0x44] sm:$0xf0]  ;;  %v3909_v29 = vld [vmem:[#allocation10 + $0x1c0] sm:$0xf] }
 0x167   : > { %v1845_v24 = vadd.f32 %v5306_v41, %v1777_v18  ;;  %v1846_v40 = vadd.f32 %v5308_v36, %v1778_v32 }
 0x168   : > { %v1421_v38 = vpop.f32.mrf.mxu2  ;;  %v1470_v20 = vpop.f32.mrf.mxu3  ;;  %2534 = vmatpush.bf16.msra.mxu1 %v3790_v48  ;;  %v4070_v48 = vld [vmem:[#allocation10 + $0x1c4] sm:$0xf0] }
 0x169   : > { %v1471_v11 = vadd.f32 %v1470_v20, %v1421_v38  ;;  %v1326_v33 = vpop.f32.mrf.mxu0  ;;  %v1375_v44 = vpop.f32.mrf.mxu1  ;;  %v2005_v56 = vmax.f32 %v1845_v24, 0.0 }
 0x16a   : > { %v1376_v10 = vadd.f32 %v1375_v44, %v1326_v33  ;;  %v3845_v44 = vld [vmem:[#allocation10 + $0x140] sm:$0xf] }
 0x16b   : > { %v1705_v2 = vpack.c.bf16 %v1471_v11, %v1373_v3 }
 0x16c   : > { %1521 = vmatmul.bf16.gmra.mxu0 %v5114_v43  ;;  %1570 = vmatmul.bf16.gmra.mxu1 %v5118_v51 }
 0x16d   : > { %v1781_v52 = vunpack.c.l.bf16 %v1705_v2  ;;  %v1782_v42 = vunpack.c.h.bf16 %v1705_v2  ;;  %1619 = vmatmul.bf16.gmra.mxu2 %v5114_v43  ;;  %1668 = vmatmul.bf16.gmra.mxu3 %v5118_v51  ;;  %v2006_v43 = vmax.f32 %v1846_v40, 0.0  ;;  %v4054_v2 = vld [vmem:[#allocation10 + $0x144] sm:$0xf0] }
 0x16f   : > { %v1849_v27 = vadd.f32 %v5306_v41, %v1781_v52  ;;  %v1850_v3 = vadd.f32 %v5308_v36, %v1782_v42  ;;  %v3717_v52 = vld [vmem:[#allocation10 + $0x40] sm:$0xf]  ;;  %v3846_v42 = vor.u32 %v4054_v2, %v3845_v44 }
 0x170   : > { %v1424_v1 = vpop.f32.mrf.mxu2  ;;  %v1473_v7 = vpop.f32.mrf.mxu3  ;;  %v3718_v24 = vor.u32 %v4022_v63, %v3717_v52 }
 0x171   : > { %v1474_v28 = vadd.f32 %v1473_v7, %v1424_v1  ;;  %v1328_v39 = vpop.f32.mrf.mxu0  ;;  %v1377_v18 = vpop.f32.mrf.mxu1  ;;  %v2009_v38 = vmax.f32 %v1849_v27, 0.0  ;;  %v2010_v20 = vmax.f32 %v1850_v3, 0.0  ;;  %v3910_v1 = vor.u32 %v4070_v48, %v3909_v29  ;;  %2584 = vmatpush.bf16.msra.mxu2 %v3846_v42 }
 0x172   : > { %v1378_v51 = vadd.f32 %v1377_v18, %v1328_v39  ;;  %2486 = vmatpush.bf16.msra.mxu0 %v3718_v24 }
 0x173   : > { %v1707_v11 = vpack.c.bf16 %v1474_v28, %v1376_v10  ;;  %v5330_v33 = vpack.c.bf16 %v2009_v38, %v2005_v56  ;;  %v5332_v32 = vpack.c.bf16 %v2010_v20, %v2006_v43  ;;  %2633 = vmatpush.bf16.msra.mxu3 %v3910_v1  ;;  %v3781_v20 = vld [vmem:[#allocation10 + $0xc0] sm:$0xf] }
 0x175   : > { %v1785_v7 = vunpack.c.l.bf16 %v1707_v11  ;;  %v1786_v40 = vunpack.c.h.bf16 %v1707_v11 }
 0x177   : > { %v1853_v18 = vadd.f32 %v5306_v41, %v1785_v7  ;;  %v1854_v11 = vadd.f32 %v5308_v36, %v1786_v40 }
 0x178   : > { %v1426_v57 = vpop.f32.mrf.mxu2  ;;  %v1475_v27 = vpop.f32.mrf.mxu3 }
 0x179   : > { %v1476_v3 = vadd.f32 %v1475_v27, %v1426_v57  ;;  %v1331_v10 = vpop.f32.mrf.mxu0  ;;  %v1380_v56 = vpop.f32.mrf.mxu1  ;;  %v4038_v57 = vld [vmem:[#allocation10 + $0xc4] sm:$0xf0]  ;;  %v2013_v63 = vmax.f32 %v1853_v18, 0.0 }
 0x17a   : > { %v1381_v28 = vadd.f32 %v1380_v56, %v1331_v10  ;;  %v3782_v44 = vor.u32 %v4038_v57, %v3781_v20  ;;  %v3837_v10 = vld [vmem:[#allocation10 + $0x130] sm:$0xf]  ;;  %v4052_v56 = vld [vmem:[#allocation10 + $0x134] sm:$0xf0] }
 0x17b   : > { %v1709_v39 = vpack.c.bf16 %v1476_v3, %v1378_v51  ;;  %v3901_v20 = vld [vmem:[#allocation10 + $0x1b0] sm:$0xf]  ;;  %v4068_v57 = vld [vmem:[#allocation10 + $0x1b4] sm:$0xf0] }
 0x17c   : > { %1526 = vmatmul.bf16.gmra.mxu0 %v5164_v37  ;;  %1575 = vmatmul.bf16.gmra.mxu1 %v5168_v58 }
 0x17d   : > { %v1789_v38 = vunpack.c.l.bf16 %v1709_v39  ;;  %v1790_v43 = vunpack.c.h.bf16 %v1709_v39  ;;  %1624 = vmatmul.bf16.gmra.mxu2 %v5164_v37  ;;  %1673 = vmatmul.bf16.gmra.mxu3 %v5168_v58  ;;  %v2014_v37 = vmax.f32 %v1854_v11, 0.0  ;;  %v3709_v39 = vld [vmem:[#allocation10 + $0x30] sm:$0xf] }
 0x17e   : > { %2535 = vmatpush.bf16.msra.mxu1 %v3782_v44  ;;  %v3902_v44 = vor.u32 %v4068_v57, %v3901_v20 }
 0x17f   : > { %v1857_v2 = vadd.f32 %v5306_v41, %v1789_v38  ;;  %v1858_v51 = vadd.f32 %v5308_v36, %v1790_v43  ;;  %v3838_v38 = vor.u32 %v4052_v56, %v3837_v10  ;;  %v4020_v43 = vld [vmem:[#allocation10 + $0x34] sm:$0xf0] }
 0x180   : > { %v1429_v52 = vpop.f32.mrf.mxu2  ;;  %v1478_v42 = vpop.f32.mrf.mxu3  ;;  %v3710_v18 = vor.u32 %v4020_v43, %v3709_v39  ;;  %2634 = vmatpush.bf16.msra.mxu3 %v3902_v44 }
 0x181   : > { %v1479_v29 = vadd.f32 %v1478_v42, %v1429_v52  ;;  %v1333_v48 = vpop.f32.mrf.mxu0  ;;  %v1382_v24 = vpop.f32.mrf.mxu1  ;;  %v2017_v1 = vmax.f32 %v1857_v2, 0.0  ;;  %v2018_v7 = vmax.f32 %v1858_v51, 0.0  ;;  %2585 = vmatpush.bf16.msra.mxu2 %v3838_v38 }
 0x182   : > { %v1383_v58 = vadd.f32 %v1382_v24, %v1333_v48  ;;  %2487 = vmatpush.bf16.msra.mxu0 %v3710_v18 }
 0x183   : > { %v1711_v27 = vpack.c.bf16 %v1479_v29, %v1381_v28  ;;  %v5342_v3 = vpack.c.bf16 %v2017_v1, %v2013_v63  ;;  %v5344_v40 = vpack.c.bf16 %v2018_v7, %v2014_v37  ;;  %v3773_v7 = vld [vmem:[#allocation10 + $0xb0] sm:$0xf] }
 0x185   : > { %v1793_v52 = vunpack.c.l.bf16 %v1711_v27  ;;  %v1794_v11 = vunpack.c.h.bf16 %v1711_v27  ;;  %v4036_v27 = vld [vmem:[#allocation10 + $0xb4] sm:$0xf0] }
 0x186   : > { %v3774_v56 = vor.u32 %v4036_v27, %v3773_v7  ;;  %v3893_v7 = vld [vmem:[#allocation10 + $0x1a0] sm:$0xf]  ;;  %v4066_v27 = vld [vmem:[#allocation10 + $0x1a4] sm:$0xf0] }
 0x187   : > { %v1861_v24 = vadd.f32 %v5306_v41, %v1793_v52  ;;  %v1862_v10 = vadd.f32 %v5308_v36, %v1794_v11 }
 0x188   : > { %v1431_v42 = vpop.f32.mrf.mxu2  ;;  %v1480_v2 = vpop.f32.mrf.mxu3  ;;  %2536 = vmatpush.bf16.msra.mxu1 %v3774_v56  ;;  %v3894_v56 = vor.u32 %v4066_v27, %v3893_v7 }
 0x189   : > { %v1481_v51 = vadd.f32 %v1480_v2, %v1431_v42  ;;  %v1336_v28 = vpop.f32.mrf.mxu0  ;;  %v1385_v63 = vpop.f32.mrf.mxu1  ;;  %v2021_v20 = vmax.f32 %v1861_v24, 0.0 }
 0x18a   : > { %v1386_v29 = vadd.f32 %v1385_v63, %v1336_v28  ;;  %v3829_v28 = vld [vmem:[#allocation10 + $0x120] sm:$0xf]  ;;  %v4050_v63 = vld [vmem:[#allocation10 + $0x124] sm:$0xf0]  ;;  %2635 = vmatpush.bf16.msra.mxu3 %v3894_v56 }
 0x18b   : > { %v1713_v48 = vpack.c.bf16 %v1481_v51, %v1383_v58 }
 0x18c   : > { %1531 = vmatmul.bf16.gmra.mxu0 %v5228_v62  ;;  %1580 = vmatmul.bf16.gmra.mxu1 %v5232_v25 }
 0x18d   : > { %v1797_v1 = vunpack.c.l.bf16 %v1713_v48  ;;  %v1798_v37 = vunpack.c.h.bf16 %v1713_v48  ;;  %1629 = vmatmul.bf16.gmra.mxu2 %v5228_v62  ;;  %1678 = vmatmul.bf16.gmra.mxu3 %v5232_v25  ;;  %v2022_v62 = vmax.f32 %v1862_v10, 0.0  ;;  %v3701_v48 = vld [vmem:[#allocation10 + $0x20] sm:$0xf] }
 0x18f   : > { %v1865_v39 = vadd.f32 %v5306_v41, %v1797_v1  ;;  %v1866_v58 = vadd.f32 %v5308_v36, %v1798_v37  ;;  %v3830_v1 = vor.u32 %v4050_v63, %v3829_v28  ;;  %v4018_v37 = vld [vmem:[#allocation10 + $0x24] sm:$0xf0] }
 0x190   : > { %v1434_v38 = vpop.f32.mrf.mxu2  ;;  %v1483_v43 = vpop.f32.mrf.mxu3  ;;  %v3702_v24 = vor.u32 %v4018_v37, %v3701_v48 }
 0x191   : > { %v1484_v57 = vadd.f32 %v1483_v43, %v1434_v38  ;;  %v1338_v18 = vpop.f32.mrf.mxu0  ;;  %v1387_v44 = vpop.f32.mrf.mxu1  ;;  %v2025_v52 = vmax.f32 %v1865_v39, 0.0  ;;  %v2026_v42 = vmax.f32 %v1866_v58, 0.0  ;;  %2586 = vmatpush.bf16.msra.mxu2 %v3830_v1 }
 0x192   : > { %v1388_v25 = vadd.f32 %v1387_v44, %v1338_v18  ;;  %2488 = vmatpush.bf16.msra.mxu0 %v3702_v24 }
 0x193   : > { %v1715_v2 = vpack.c.bf16 %v1484_v57, %v1386_v29  ;;  %v5354_v51 = vpack.c.bf16 %v2025_v52, %v2021_v20  ;;  %v5356_v11 = vpack.c.bf16 %v2026_v42, %v2022_v62  ;;  %v3765_v42 = vld [vmem:[#allocation10 + $0xa0] sm:$0xf] }
 0x195   : > { %v1801_v38 = vunpack.c.l.bf16 %v1715_v2  ;;  %v1802_v10 = vunpack.c.h.bf16 %v1715_v2  ;;  %v4034_v2 = vld [vmem:[#allocation10 + $0xa4] sm:$0xf0] }
 0x196   : > { %v3766_v63 = vor.u32 %v4034_v2, %v3765_v42  ;;  %v3821_v42 = vld [vmem:[#allocation10 + $0x110] sm:$0xf]  ;;  %v4048_v2 = vld [vmem:[#allocation10 + $0x114] sm:$0xf0] }
 0x197   : > { %v1869_v44 = vadd.f32 %v5306_v41, %v1801_v38  ;;  %v1870_v28 = vadd.f32 %v5308_v36, %v1802_v10  ;;  %v3757_v10 = vld [vmem:[#allocation10 + $0x90] sm:$0xf] }
 0x198   : > { %v1436_v43 = vpop.f32.mrf.mxu2  ;;  %v1485_v39 = vpop.f32.mrf.mxu3  ;;  %2537 = vmatpush.bf16.msra.mxu1 %v3766_v63  ;;  %v3885_v63 = vld [vmem:[#allocation10 + $0x190] sm:$0xf] }
 0x199   : > { %v1486_v58 = vadd.f32 %v1485_v39, %v1436_v43  ;;  %v1341_v29 = vpop.f32.mrf.mxu0  ;;  %v1390_v20 = vpop.f32.mrf.mxu1  ;;  %v2029_v7 = vmax.f32 %v1869_v44, 0.0 }
 0x19a   : > { %v1391_v57 = vadd.f32 %v1390_v20, %v1341_v29  ;;  %v4016_v29 = vld [vmem:[#allocation10 + $0x14] sm:$0xf0] }
 0x19b   : > { %v1717_v18 = vpack.c.bf16 %v1486_v58, %v1388_v25  ;;  %v3693_v58 = vld [vmem:[#allocation10 + $0x10] sm:$0xf] }
 0x19c   : > { %1536 = vmatmul.bf16.gmra.mxu0 %v5258_v30  ;;  %1585 = vmatmul.bf16.gmra.mxu1 %v5262_v17 }
 0x19d   : > { %v1805_v52 = vunpack.c.l.bf16 %v1717_v18  ;;  %v1806_v62 = vunpack.c.h.bf16 %v1717_v18  ;;  %1634 = vmatmul.bf16.gmra.mxu2 %v5258_v30  ;;  %1683 = vmatmul.bf16.gmra.mxu3 %v5262_v17  ;;  %v2030_v30 = vmax.f32 %v1870_v28, 0.0 }
 0x19f   : > { %v1873_v48 = vadd.f32 %v5306_v41, %v1805_v52  ;;  %v1874_v25 = vadd.f32 %v5308_v36, %v1806_v62  ;;  %v3694_v52 = vor.u32 %v4016_v29, %v3693_v58  ;;  %v4032_v62 = vld [vmem:[#allocation10 + $0x94] sm:$0xf0] }
 0x1a0   : > { %v1439_v1 = vpop.f32.mrf.mxu2  ;;  %v1488_v37 = vpop.f32.mrf.mxu3  ;;  %v3758_v44 = vor.u32 %v4032_v62, %v3757_v10 }
 0x1a1   : > { %v1489_v27 = vadd.f32 %v1488_v37, %v1439_v1  ;;  %v1343_v24 = vpop.f32.mrf.mxu0  ;;  %v1392_v56 = vpop.f32.mrf.mxu1  ;;  %v2033_v38 = vmax.f32 %v1873_v48, 0.0  ;;  %v2034_v43 = vmax.f32 %v1874_v25, 0.0  ;;  %v3822_v1 = vor.u32 %v4048_v2, %v3821_v42  ;;  %2489 = vmatpush.bf16.msra.mxu0 %v3694_v52  ;;  %v4064_v48 = vld [vmem:[#allocation10 + $0x194] sm:$0xf0]  ;;  %v3685_v25 = vld [vmem:[#allocation10] sm:$0xf] }
 0x1a2   : > { %v1393_v17 = vadd.f32 %v1392_v56, %v1343_v24  ;;  %2538 = vmatpush.bf16.msra.mxu1 %v3758_v44  ;;  %v3886_v28 = vor.u32 %v4064_v48, %v3885_v63  ;;  %v3749_v37 = vld [vmem:[#allocation10 + $0x80] sm:$0xf]  ;;  %v4030_v56 = vld [vmem:[#allocation10 + $0x84] sm:$0xf0] }
 0x1a3   : > { %v1719_v39 = vpack.c.bf16 %v1489_v27, %v1391_v57  ;;  %v5366_v20 = vpack.c.bf16 %v2033_v38, %v2029_v7  ;;  %v5368_v18 = vpack.c.bf16 %v2034_v43, %v2030_v30  ;;  %v4014_v57 = vld [vmem:[#allocation10 + $0x4] sm:$0xf0]  ;;  %2587 = vmatpush.bf16.msra.mxu2 %v3822_v1  ;;  %v3750_v29 = vor.u32 %v4030_v56, %v3749_v37 }
 0x1a4   : > { %v3686_v7 = vor.u32 %v4014_v57, %v3685_v25  ;;  %2636 = vmatpush.bf16.msra.mxu3 %v3886_v28 }
 0x1a5   : > { %v1809_v38 = vunpack.c.l.bf16 %v1719_v39  ;;  %v1810_v10 = vunpack.c.h.bf16 %v1719_v39 }
 0x1a6   : > { %2490 = vmatpush.bf16.msra.mxu0 %v3686_v7  ;;  %2539 = vmatpush.bf16.msra.mxu1 %v3750_v29 }
 0x1a7   : > { %v1877_v44 = vadd.f32 %v5306_v41, %v1809_v38  ;;  %v1878_v63 = vadd.f32 %v5308_v36, %v1810_v10 }
 0x1a8   : > { %v1441_v27 = vpop.f32.mrf.mxu2  ;;  %v1490_v24 = vpop.f32.mrf.mxu3 }
 0x1a9   : > { %v1491_v30 = vadd.f32 %v1490_v24, %v1441_v27  ;;  %v1346_v43 = vpop.f32.mrf.mxu0  ;;  %v1395_v58 = vpop.f32.mrf.mxu1  ;;  %v2037_v37 = vmax.f32 %v1877_v44, 0.0  ;;  %v2038_v7 = vmax.f32 %v1878_v63, 0.0 }
 0x1aa   : > { %v1396_v62 = vadd.f32 %v1395_v58, %v1346_v43 }
 0x1ab   : > { %v1721_v52 = vpack.c.bf16 %v1491_v30, %v1393_v17 }
 0x1ac   : > { %1541 = vmatmul.bf16.gmra.mxu0 %v5276_v54  ;;  %1590 = vmatmul.bf16.gmra.mxu1 %v5280_v50 }
 0x1ad   : > { %v1813_v42 = vunpack.c.l.bf16 %v1721_v52  ;;  %v1814_v2 = vunpack.c.h.bf16 %v1721_v52  ;;  %1639 = vmatmul.bf16.gmra.mxu2 %v5276_v54  ;;  %1688 = vmatmul.bf16.gmra.mxu3 %v5280_v50 }
 0x1af   : > { %v1881_v39 = vadd.f32 %v5306_v41, %v1813_v42  ;;  %v1882_v1 = vadd.f32 %v5308_v36, %v1814_v2  ;;  %v3813_v2 = vld [vmem:[#allocation10 + $0x100] sm:$0xf] }
 0x1b0   : > { %v1444_v17 = vpop.f32.mrf.mxu2  ;;  %v1493_v48 = vpop.f32.mrf.mxu3 }
 0x1b1   : > { %v1494_v28 = vadd.f32 %v1493_v48, %v1444_v17  ;;  %v1348_v25 = vpop.f32.mrf.mxu0  ;;  %v1397_v57 = vpop.f32.mrf.mxu1  ;;  %v2041_v27 = vmax.f32 %v1881_v39, 0.0  ;;  %v2042_v54 = vmax.f32 %v1882_v1, 0.0  ;;  %v4046_v17 = vld [vmem:[#allocation10 + $0x104] sm:$0xf0]  ;;  %v3877_v48 = vld [vmem:[#allocation10 + $0x180] sm:$0xf] }
 0x1b2   : > { %v1398_v24 = vadd.f32 %v1397_v57, %v1348_v25  ;;  %v3814_v39 = vor.u32 %v4046_v17, %v3813_v2  ;;  %v4062_v25 = vld [vmem:[#allocation10 + $0x184] sm:$0xf0] }
 0x1b3   : > { %v1723_v56 = vpack.c.bf16 %v1494_v28, %v1396_v62  ;;  %v5378_v50 = vpack.c.bf16 %v2041_v27, %v2037_v37  ;;  %v5380_v38 = vpack.c.bf16 %v2042_v54, %v2038_v7  ;;  %v3878_v1 = vor.u32 %v4062_v25, %v3877_v48  ;;  %v4059_v25 = vld [vmem:[#allocation10 + $0x174] sm:$0xf] }
 0x1b4   : > { %2588 = vmatpush.bf16.msra.mxu2 %v3814_v39 }
 0x1b5   : > { %v1817_v30 = vunpack.c.l.bf16 %v1723_v56  ;;  %v1818_v29 = vunpack.c.h.bf16 %v1723_v56  ;;  %2637 = vmatpush.bf16.msra.mxu3 %v3878_v1  ;;  %v1735_v56 = vperm.slane %v5298_v45, 2  ;;  %v4027_v1 = vld [vmem:[#allocation10 + $0x74] sm:$0xf] }
 0x1b7   : > { %v1885_v62 = vadd.f32 %v5306_v41, %v1817_v30  ;;  %v1886_v37 = vadd.f32 %v5308_v36, %v1818_v29  ;;  %v1736_v30 = vperm.slane %v5298_v45, 3  ;;  %v4075_v45 = vld [vmem:[#allocation10 + $0x1f4] sm:$0xf] }
 0x1b8   : > { %v1446_v43 = vpop.f32.mrf.mxu2  ;;  %v1495_v58 = vpop.f32.mrf.mxu3 }
 0x1b9   : > { %v1496_v10 = vadd.f32 %v1495_v58, %v1446_v43  ;;  %v1351_v52 = vpop.f32.mrf.mxu0  ;;  %v1400_v42 = vpop.f32.mrf.mxu1  ;;  %v2045_v43 = vmax.f32 %v1885_v62, 0.0  ;;  %v1742_v39 = vpack.c.bf16 %v1736_v30, %v1735_v56  ;;  %v3935_v62 = vld [vmem:[#allocation10 + $0x1f8] sm:$0xf0] }
 0x1ba   : > { %v1401_v44 = vadd.f32 %v1400_v42, %v1351_v52 }
 0x1bb   : > { %v1725_v63 = vpack.c.bf16 %v1496_v10, %v1398_v24 }
 0x1bc   : > { %1546 = vmatmul.bf16.gmra.mxu0 %v5288_v8  ;;  %1595 = vmatmul.bf16.gmra.mxu1 %v5292_v46 }
 0x1bd   : > { %v1821_v28 = vunpack.c.l.bf16 %v1725_v63  ;;  %v1822_v57 = vunpack.c.h.bf16 %v1725_v63  ;;  %1644 = vmatmul.bf16.gmra.mxu2 %v5288_v8  ;;  %1693 = vmatmul.bf16.gmra.mxu3 %v5292_v46  ;;  %v2046_v46 = vmax.f32 %v1886_v37, 0.0  ;;  %v3871_v63 = vld [vmem:[#allocation10 + $0x178] sm:$0xf0] }
 0x1bf   : > { %v1889_v27 = vadd.f32 %v5306_v41, %v1821_v28  ;;  %v1890_v24 = vadd.f32 %v5308_v36, %v1822_v57  ;;  %v3874_v28 = vor.u32 %v4059_v25, %v3871_v63  ;;  %v3743_v57 = vld [vmem:[#allocation10 + $0x78] sm:$0xf0]  ;;  %v4043_v63 = vld [vmem:[#allocation10 + $0xf4] sm:$0xf] }
 0x1c0   : > { %v1449_v7 = vpop.f32.mrf.mxu2  ;;  %v1498_v54 = vpop.f32.mrf.mxu3 }
 0x1c1   : > { %v1499_v58 = vadd.f32 %v1498_v54, %v1449_v7  ;;  %v1353_v10 = vpop.f32.mrf.mxu0  ;;  %v1402_v8 = vpop.f32.mrf.mxu1  ;;  %v2049_v52 = vmax.f32 %v1889_v27, 0.0  ;;  %v2050_v42 = vmax.f32 %v1890_v24, 0.0  ;;  %v3746_v7 = vor.u32 %v4027_v1, %v3743_v57  ;;  %2777 = vmatpush.bf16.msrb.mxu2 %v3874_v28 }
 0x1c2   : > { %v1403_v29 = vadd.f32 %v1402_v8, %v1353_v10  ;;  %v3938_v54 = vor.u32 %v4075_v45, %v3935_v62  ;;  %v1747_v24 = vunpack.c.l.b16 %v1742_v39  ;;  %v1748_v10 = vunpack.c.h.b16 %v1742_v39  ;;  %v3807_v39 = vld [vmem:[#allocation10 + $0xf8] sm:$0xf0] }
 0x1c3   : > { %v1727_v2 = vpack.c.bf16 %v1499_v58, %v1401_v44  ;;  %v5392_v17 = vpack.c.bf16 %v2049_v52, %v2045_v43  ;;  %v5394_v48 = vpack.c.bf16 %v2050_v42, %v2046_v46  ;;  %2679 = vmatpush.bf16.msrb.mxu0 %v3746_v7  ;;  %v3810_v1 = vor.u32 %v4043_v63, %v3807_v39  ;;  %v4073_v63 = vld [vmem:[#allocation10 + $0x1e4] sm:$0xf] }
 0x1c4   : > { %2826 = vmatpush.bf16.msrb.mxu3 %v3938_v54  ;;  %v1751_v30 = vpack.c.b16 %v1747_v24, %v1747_v24  ;;  %v1752_v52 = vpack.c.b16 %v1748_v10, %v1748_v10 }
 0x1c5   : > { %v1825_v34 = vunpack.c.l.bf16 %v1727_v2  ;;  %v1826_v44 = vunpack.c.h.bf16 %v1727_v2  ;;  %2728 = vmatpush.bf16.msrb.mxu1 %v3810_v1 }
 0x1c6   : > { %v1762_v7 = vpack.i.b16 %v1751_v30, %v1751_v30  ;;  %v1766_v54 = vpack.i.b16 %v1752_v52, %v1752_v52  ;;  %v3735_v52 = vld [vmem:[#allocation10 + $0x68] sm:$0xf0] }
 0x1c7   : > { %v1893_v46 = vadd.f32 %v5306_v41, %v1825_v34  ;;  %v1894_v2 = vadd.f32 %v5308_v36, %v1826_v44 }
 0x1c8   : > { %v1451_v27 = vpop.f32.mrf.mxu2  ;;  %v1500_v37 = vpop.f32.mrf.mxu3 }
 0x1c9   : > { %v1501_v43 = vadd.f32 %v1500_v37, %v1451_v27  ;;  %v1512_v58 = vpop.f32.mrf.mxu0  ;;  %v1561_v8 = vpop.f32.mrf.mxu1  ;;  %v2053_v27 = vmax.f32 %v1893_v46, 0.0  ;;  %v3927_v46 = vld [vmem:[#allocation10 + $0x1e8] sm:$0xf0] }
 0x1ca   : > { %v3930_v1 = vor.u32 %v4073_v63, %v3927_v46 }
 0x1cb   : > { %v1729_v56 = vpack.c.bf16 %v1501_v43, %v1403_v29  ;;  %v1562_v29 = vadd.f32 %v1561_v8, %v1512_v58  ;;  %v2054_v43 = vmax.f32 %v1894_v2, 0.0  ;;  %v4057_v58 = vld [vmem:[#allocation10 + $0x164] sm:$0xf]  ;;  %v3863_v8 = vld [vmem:[#allocation10 + $0x168] sm:$0xf0] }
 0x1cc   : > { %2491 = vmatmul.bf16.vlgmr.msra.gmra.mxu0 %v5318_v22  ;;  %2540 = vmatmul.bf16.vlgmr.msra.gmra.mxu1 %v5320_v55  ;;  %v3866_v30 = vor.u32 %v4057_v58, %v3863_v8 }
 0x1cd   : > { %v1829_v42 = vunpack.c.l.bf16 %v1729_v56  ;;  %v1830_v25 = vunpack.c.h.bf16 %v1729_v56  ;;  %2827 = vmatpush.bf16.msrb.mxu3 %v3930_v1 }
 0x1ce   : > { %2778 = vmatpush.bf16.msrb.mxu2 %v3866_v30 }
 0x1cf   : > { %v1897_v28 = vadd.f32 %v5306_v41, %v1829_v42  ;;  %v1898_v57 = vadd.f32 %v5308_v36, %v1830_v25  ;;  %v1764_v42 = vperm.slane %v1762_v7, 0  ;;  %v1768_v36 = vperm.slane %v1766_v54, 0  ;;  %v4025_v25 = vld [vmem:[#allocation10 + $0x64] sm:$0xf] }
 0x1d0   : > { %v1610_v45 = vpop.f32.mrf.mxu2  ;;  %v1659_v62 = vpop.f32.mrf.mxu3  ;;  %v3738_v39 = vor.u32 %v4025_v25, %v3735_v52 }
 0x1d1   : > { %v1660_v37 = vadd.f32 %v1659_v62, %v1610_v45  ;;  %v1514_v34 = vpop.f32.mrf.mxu0  ;;  %v1563_v24 = vpop.f32.mrf.mxu1  ;;  %v2057_v10 = vmax.f32 %v1897_v28, 0.0  ;;  %v2058_v56 = vmax.f32 %v1898_v57, 0.0  ;;  %v5406_v28 = vunpack.c.l.bf16 %v1764_v42 }
 0x1d2   : > { %2680 = vmatpush.bf16.msrb.mxu0 %v3738_v39 }
 0x1d3   : > { %v5402_v4 = vpack.c.bf16 %v2057_v10, %v2053_v27  ;;  %v5404_v44 = vpack.c.bf16 %v2058_v56, %v2054_v43  ;;  %v1700_v41 = vpack.c.bf16 %v1660_v37, %v1562_v29  ;;  %v5408_v27 = vunpack.c.l.bf16 %v1768_v36  ;;  %v3799_v36 = vld [vmem:[#allocation10 + $0xe8] sm:$0xf0] }
 0x1d4   : > { %v1564_v29 = vadd.f32 %v1563_v24, %v1514_v34 }
 0x1d5   : > { %v1771_v45 = vunpack.c.l.bf16 %v1700_v41  ;;  %v1772_v62 = vunpack.c.h.bf16 %v1700_v41  ;;  %v4041_v41 = vld [vmem:[#allocation10 + $0xe4] sm:$0xf] }
 0x1d6   : > { %v3802_v8 = vor.u32 %v4041_v41, %v3799_v36 }
 0x1d7   : > { %v1839_v43 = vadd.f32 %v5406_v28, %v1771_v45  ;;  %v1840_v56 = vadd.f32 %v5408_v27, %v1772_v62 }
 0x1d8   : > { %v1612_v2 = vpop.f32.mrf.mxu2  ;;  %v1661_v57 = vpop.f32.mrf.mxu3  ;;  %2729 = vmatpush.bf16.msrb.mxu1 %v3802_v8 }
 0x1d9   : > { %v1662_v7 = vadd.f32 %v1661_v57, %v1612_v2  ;;  %v1517_v54 = vpop.f32.mrf.mxu0  ;;  %v1566_v37 = vpop.f32.mrf.mxu1  ;;  %v1999_v25 = vmax.f32 %v1839_v43, 0.0  ;;  %v2000_v46 = vmax.f32 %v1840_v56, 0.0  ;;  %v4071_v56 = vld [vmem:[#allocation10 + $0x1d4] sm:$0xf] }
 0x1da   : > { %v1567_v30 = vadd.f32 %v1566_v37, %v1517_v54  ;;  %v3855_v54 = vld [vmem:[#allocation10 + $0x158] sm:$0xf0]  ;;  %v4023_v37 = vld [vmem:[#allocation10 + $0x54] sm:$0xf] }
 0x1db   : > { %v1702_v10 = vpack.c.bf16 %v1662_v7, %v1564_v29 }
 0x1dc   : > { %2496 = vmatmul.bf16.gmra.mxu0 %v5330_v33  ;;  %2545 = vmatmul.bf16.gmra.mxu1 %v5332_v32 }
 0x1dd   : > { %v1775_v42 = vunpack.c.l.bf16 %v1702_v10  ;;  %v1776_v58 = vunpack.c.h.bf16 %v1702_v10  ;;  %v4055_v10 = vld [vmem:[#allocation10 + $0x154] sm:$0xf] }
 0x1de   : > { %v3858_v43 = vor.u32 %v4055_v10, %v3855_v54 }
 0x1df   : > { %v1843_v34 = vadd.f32 %v5406_v28, %v1775_v42  ;;  %v1844_v24 = vadd.f32 %v5408_v27, %v1776_v58  ;;  %v3727_v42 = vld [vmem:[#allocation10 + $0x58] sm:$0xf0] }
 0x1e0   : > { %v1615_v52 = vpop.f32.mrf.mxu2  ;;  %v1664_v63 = vpop.f32.mrf.mxu3  ;;  %v3919_v58 = vld [vmem:[#allocation10 + $0x1d8] sm:$0xf0]  ;;  %v3730_v41 = vor.u32 %v4023_v37, %v3727_v42  ;;  %2779 = vmatpush.bf16.msrb.mxu2 %v3858_v43  ;;  %v4039_v37 = vld [vmem:[#allocation10 + $0xd4] sm:$0xf] }
 0x1e1   : > { %v2003_v39 = vmax.f32 %v1843_v34, 0.0  ;;  %v2004_v1 = vmax.f32 %v1844_v24, 0.0  ;;  %v1665_v45 = vadd.f32 %v1664_v63, %v1615_v52  ;;  %v1519_v2 = vpop.f32.mrf.mxu0  ;;  %v1568_v57 = vpop.f32.mrf.mxu1  ;;  %v3922_v36 = vor.u32 %v4071_v56, %v3919_v58  ;;  %v3791_v43 = vld [vmem:[#allocation10 + $0xd8] sm:$0xf0] }
 0x1e2   : > { %v1569_v52 = vadd.f32 %v1568_v57, %v1519_v2  ;;  %2681 = vmatpush.bf16.msrb.mxu0 %v3730_v41 }
 0x1e3   : > { %v5416_v62 = vpack.c.bf16 %v2003_v39, %v1999_v25  ;;  %v5418_v29 = vpack.c.bf16 %v2004_v1, %v2000_v46  ;;  %v1704_v7 = vpack.c.bf16 %v1665_v45, %v1567_v30  ;;  %2828 = vmatpush.bf16.msrb.mxu3 %v3922_v36 }
 0x1e5   : > { %2589 = vmatmul.bf16.vlgmr.msra.gmra.mxu2 %v5416_v62  ;;  %2638 = vmatmul.bf16.vlgmr.msra.gmra.mxu3 %v5418_v29  ;;  %v1779_v8 = vunpack.c.l.bf16 %v1704_v7  ;;  %v1780_v25 = vunpack.c.h.bf16 %v1704_v7  ;;  %v3794_v7 = vor.u32 %v4039_v37, %v3791_v43  ;;  %v4069_v43 = vld [vmem:[#allocation10 + $0x1c4] sm:$0xf] }
 0x1e7   : > { %v1847_v1 = vadd.f32 %v5406_v28, %v1779_v8  ;;  %v1848_v54 = vadd.f32 %v5408_v27, %v1780_v25  ;;  %2730 = vmatpush.bf16.msrb.mxu1 %v3794_v7  ;;  %v3911_v7 = vld [vmem:[#allocation10 + $0x1c8] sm:$0xf0] }
 0x1e8   : > { %v1617_v34 = vpop.f32.mrf.mxu2  ;;  %v1666_v24 = vpop.f32.mrf.mxu3 }
 0x1e9   : > { %v1667_v30 = vadd.f32 %v1666_v24, %v1617_v34  ;;  %v1522_v63 = vpop.f32.mrf.mxu0  ;;  %v1571_v46 = vpop.f32.mrf.mxu1  ;;  %v2007_v41 = vmax.f32 %v1847_v1, 0.0 }
 0x1ea   : > { %v1572_v42 = vadd.f32 %v1571_v46, %v1522_v63  ;;  %v4053_v63 = vld [vmem:[#allocation10 + $0x144] sm:$0xf]  ;;  %v3847_v46 = vld [vmem:[#allocation10 + $0x148] sm:$0xf0] }
 0x1eb   : > { %v1706_v39 = vpack.c.bf16 %v1667_v30, %v1569_v52  ;;  %v2008_v52 = vmax.f32 %v1848_v54, 0.0  ;;  %v3850_v1 = vor.u32 %v4053_v63, %v3847_v46 }
 0x1ec   : > { %2501 = vmatmul.bf16.gmra.mxu0 %v5342_v3  ;;  %2550 = vmatmul.bf16.gmra.mxu1 %v5344_v40 }
 0x1ed   : > { %v1783_v45 = vunpack.c.l.bf16 %v1706_v39  ;;  %v1784_v10 = vunpack.c.h.bf16 %v1706_v39  ;;  %2780 = vmatpush.bf16.msrb.mxu2 %v3850_v1  ;;  %v3783_v1 = vld [vmem:[#allocation10 + $0xc8] sm:$0xf0] }
 0x1ef   : > { %v1851_v2 = vadd.f32 %v5406_v28, %v1783_v45  ;;  %v1852_v57 = vadd.f32 %v5408_v27, %v1784_v10  ;;  %v4021_v45 = vld [vmem:[#allocation10 + $0x44] sm:$0xf]  ;;  %v3719_v10 = vld [vmem:[#allocation10 + $0x48] sm:$0xf0] }
 0x1f0   : > { %v1620_v56 = vpop.f32.mrf.mxu2  ;;  %v1669_v58 = vpop.f32.mrf.mxu3 }
 0x1f1   : > { %v1670_v36 = vadd.f32 %v1669_v58, %v1620_v56  ;;  %v1524_v34 = vpop.f32.mrf.mxu0  ;;  %v1573_v24 = vpop.f32.mrf.mxu1  ;;  %v2011_v8 = vmax.f32 %v1851_v2, 0.0  ;;  %v2012_v30 = vmax.f32 %v1852_v57, 0.0  ;;  %v3722_v56 = vor.u32 %v4021_v45, %v3719_v10 }
 0x1f2   : > { %v3914_v2 = vor.u32 %v4069_v43, %v3911_v7  ;;  %v4037_v43 = vld [vmem:[#allocation10 + $0xc4] sm:$0xf] }
 0x1f3   : > { %v5428_v39 = vpack.c.bf16 %v2011_v8, %v2007_v41  ;;  %v5430_v25 = vpack.c.bf16 %v2012_v30, %v2008_v52  ;;  %v1708_v37 = vpack.c.bf16 %v1670_v36, %v1572_v42  ;;  %v1574_v8 = vadd.f32 %v1573_v24, %v1524_v34  ;;  %2682 = vmatpush.bf16.msrb.mxu0 %v3722_v56 }
 0x1f4   : > { %2829 = vmatpush.bf16.msrb.mxu3 %v3914_v2 }
 0x1f5   : > { %2594 = vmatmul.bf16.gmra.mxu2 %v5428_v39  ;;  %2643 = vmatmul.bf16.gmra.mxu3 %v5430_v25  ;;  %v1787_v54 = vunpack.c.l.bf16 %v1708_v37  ;;  %v1788_v41 = vunpack.c.h.bf16 %v1708_v37  ;;  %v3786_v37 = vor.u32 %v4037_v43, %v3783_v1  ;;  %v4067_v1 = vld [vmem:[#allocation10 + $0x1b4] sm:$0xf] }
 0x1f7   : > { %v1855_v63 = vadd.f32 %v5406_v28, %v1787_v54  ;;  %v1856_v10 = vadd.f32 %v5408_v27, %v1788_v41  ;;  %2731 = vmatpush.bf16.msrb.mxu1 %v3786_v37  ;;  %v3903_v37 = vld [vmem:[#allocation10 + $0x1b8] sm:$0xf0] }
 0x1f8   : > { %v1622_v57 = vpop.f32.mrf.mxu2  ;;  %v1671_v58 = vpop.f32.mrf.mxu3 }
 0x1f9   : > { %v1672_v42 = vadd.f32 %v1671_v58, %v1622_v57  ;;  %v1527_v36 = vpop.f32.mrf.mxu0  ;;  %v1576_v52 = vpop.f32.mrf.mxu1  ;;  %v2015_v57 = vmax.f32 %v1855_v63, 0.0  ;;  %v2016_v15 = vmax.f32 %v1856_v10, 0.0 }
 0x1fa   : > { %v1577_v7 = vadd.f32 %v1576_v52, %v1527_v36  ;;  %v4051_v36 = vld [vmem:[#allocation10 + $0x134] sm:$0xf]  ;;  %v3839_v52 = vld [vmem:[#allocation10 + $0x138] sm:$0xf0] }
 0x1fb   : > { %v1710_v30 = vpack.c.bf16 %v1672_v42, %v1574_v8  ;;  %v3842_v63 = vor.u32 %v4051_v36, %v3839_v52 }
 0x1fc   : > { %2506 = vmatmul.bf16.gmra.mxu0 %v5354_v51  ;;  %2555 = vmatmul.bf16.gmra.mxu1 %v5356_v11 }
 0x1fd   : > { %v1791_v46 = vunpack.c.l.bf16 %v1710_v30  ;;  %v1792_v45 = vunpack.c.h.bf16 %v1710_v30  ;;  %2781 = vmatpush.bf16.msrb.mxu2 %v3842_v63  ;;  %v3775_v63 = vld [vmem:[#allocation10 + $0xb8] sm:$0xf0] }
 0x1ff   : > { %v1859_v34 = vadd.f32 %v5406_v28, %v1791_v46  ;;  %v1860_v24 = vadd.f32 %v5408_v27, %v1792_v45  ;;  %v4019_v46 = vld [vmem:[#allocation10 + $0x34] sm:$0xf]  ;;  %v3711_v45 = vld [vmem:[#allocation10 + $0x38] sm:$0xf0] }
 0x200   : > { %v1625_v56 = vpop.f32.mrf.mxu2  ;;  %v1674_v2 = vpop.f32.mrf.mxu3 }
 0x201   : > { %v1675_v58 = vadd.f32 %v1674_v2, %v1625_v56  ;;  %v1529_v8 = vpop.f32.mrf.mxu0  ;;  %v1578_v42 = vpop.f32.mrf.mxu1  ;;  %v2019_v54 = vmax.f32 %v1859_v34, 0.0  ;;  %v2020_v30 = vmax.f32 %v1860_v24, 0.0  ;;  %v3714_v56 = vor.u32 %v4019_v46, %v3711_v45 }
 0x202   : > { %v3906_v34 = vor.u32 %v4067_v1, %v3903_v37  ;;  %v4035_v1 = vld [vmem:[#allocation10 + $0xb4] sm:$0xf] }
 0x203   : > { %v5440_v23 = vpack.c.bf16 %v2019_v54, %v2015_v57  ;;  %v5442_v41 = vpack.c.bf16 %v2020_v30, %v2016_v15  ;;  %v1712_v43 = vpack.c.bf16 %v1675_v58, %v1577_v7  ;;  %v1579_v57 = vadd.f32 %v1578_v42, %v1529_v8  ;;  %2683 = vmatpush.bf16.msrb.mxu0 %v3714_v56 }
 0x204   : > { %2830 = vmatpush.bf16.msrb.mxu3 %v3906_v34 }
 0x205   : > { %2599 = vmatmul.bf16.gmra.mxu2 %v5440_v23  ;;  %2648 = vmatmul.bf16.gmra.mxu3 %v5442_v41  ;;  %v1795_v10 = vunpack.c.l.bf16 %v1712_v43  ;;  %v1796_v15 = vunpack.c.h.bf16 %v1712_v43  ;;  %v3778_v43 = vor.u32 %v4035_v1, %v3775_v63  ;;  %v4065_v63 = vld [vmem:[#allocation10 + $0x1a4] sm:$0xf] }
 0x207   : > { %v1863_v36 = vadd.f32 %v5406_v28, %v1795_v10  ;;  %v1864_v45 = vadd.f32 %v5408_v27, %v1796_v15  ;;  %2732 = vmatpush.bf16.msrb.mxu1 %v3778_v43  ;;  %v3895_v43 = vld [vmem:[#allocation10 + $0x1a8] sm:$0xf0] }
 0x208   : > { %v1627_v24 = vpop.f32.mrf.mxu2  ;;  %v1676_v2 = vpop.f32.mrf.mxu3 }
 0x209   : > { %v1677_v7 = vadd.f32 %v1676_v2, %v1627_v24  ;;  %v1532_v58 = vpop.f32.mrf.mxu0  ;;  %v1581_v54 = vpop.f32.mrf.mxu1  ;;  %v2023_v24 = vmax.f32 %v1863_v36, 0.0  ;;  %v2024_v14 = vmax.f32 %v1864_v45, 0.0 }
 0x20a   : > { %v1582_v37 = vadd.f32 %v1581_v54, %v1532_v58  ;;  %v4049_v58 = vld [vmem:[#allocation10 + $0x124] sm:$0xf]  ;;  %v3831_v54 = vld [vmem:[#allocation10 + $0x128] sm:$0xf0] }
 0x20b   : > { %v1714_v30 = vpack.c.bf16 %v1677_v7, %v1579_v57  ;;  %v3834_v36 = vor.u32 %v4049_v58, %v3831_v54 }
 0x20c   : > { %2511 = vmatmul.bf16.gmra.mxu0 %v5366_v20  ;;  %2560 = vmatmul.bf16.gmra.mxu1 %v5368_v18 }
 0x20d   : > { %v1799_v52 = vunpack.c.l.bf16 %v1714_v30  ;;  %v1800_v46 = vunpack.c.h.bf16 %v1714_v30  ;;  %2782 = vmatpush.bf16.msrb.mxu2 %v3834_v36  ;;  %v3767_v36 = vld [vmem:[#allocation10 + $0xa8] sm:$0xf0] }
 0x20f   : > { %v1867_v8 = vadd.f32 %v5406_v28, %v1799_v52  ;;  %v1868_v42 = vadd.f32 %v5408_v27, %v1800_v46  ;;  %v4017_v52 = vld [vmem:[#allocation10 + $0x24] sm:$0xf]  ;;  %v3703_v46 = vld [vmem:[#allocation10 + $0x28] sm:$0xf0] }
 0x210   : > { %v1630_v56 = vpop.f32.mrf.mxu2  ;;  %v1679_v34 = vpop.f32.mrf.mxu3 }
 0x211   : > { %v1680_v2 = vadd.f32 %v1679_v34, %v1630_v56  ;;  %v1534_v57 = vpop.f32.mrf.mxu0  ;;  %v1583_v7 = vpop.f32.mrf.mxu1  ;;  %v2027_v10 = vmax.f32 %v1867_v8, 0.0  ;;  %v2028_v30 = vmax.f32 %v1868_v42, 0.0  ;;  %v3706_v56 = vor.u32 %v4017_v52, %v3703_v46 }
 0x212   : > { %v3898_v8 = vor.u32 %v4065_v63, %v3895_v43  ;;  %v4033_v63 = vld [vmem:[#allocation10 + $0xa4] sm:$0xf] }
 0x213   : > { %v5452_v53 = vpack.c.bf16 %v2027_v10, %v2023_v24  ;;  %v5454_v15 = vpack.c.bf16 %v2028_v30, %v2024_v14  ;;  %v1716_v1 = vpack.c.bf16 %v1680_v2, %v1582_v37  ;;  %v1584_v24 = vadd.f32 %v1583_v7, %v1534_v57  ;;  %2684 = vmatpush.bf16.msrb.mxu0 %v3706_v56 }
 0x214   : > { %2831 = vmatpush.bf16.msrb.mxu3 %v3898_v8 }
 0x215   : > { %2604 = vmatmul.bf16.gmra.mxu2 %v5452_v53  ;;  %2653 = vmatmul.bf16.gmra.mxu3 %v5454_v15  ;;  %v1803_v45 = vunpack.c.l.bf16 %v1716_v1  ;;  %v1804_v14 = vunpack.c.h.bf16 %v1716_v1  ;;  %v3770_v1 = vor.u32 %v4033_v63, %v3767_v36  ;;  %v4015_v36 = vld [vmem:[#allocation10 + $0x14] sm:$0xf] }
 0x217   : > { %v1871_v58 = vadd.f32 %v5406_v28, %v1803_v45  ;;  %v1872_v46 = vadd.f32 %v5408_v27, %v1804_v14  ;;  %2733 = vmatpush.bf16.msrb.mxu1 %v3770_v1 }
 0x218   : > { %v1632_v42 = vpop.f32.mrf.mxu2  ;;  %v1681_v34 = vpop.f32.mrf.mxu3 }
 0x219   : > { %v1682_v37 = vadd.f32 %v1681_v34, %v1632_v42  ;;  %v1537_v2 = vpop.f32.mrf.mxu0  ;;  %v1586_v10 = vpop.f32.mrf.mxu1  ;;  %v2031_v42 = vmax.f32 %v1871_v58, 0.0  ;;  %v2032_v6 = vmax.f32 %v1872_v46, 0.0  ;;  %v4063_v46 = vld [vmem:[#allocation10 + $0x194] sm:$0xf] }
 0x21a   : > { %v1587_v43 = vadd.f32 %v1586_v10, %v1537_v2  ;;  %v4047_v2 = vld [vmem:[#allocation10 + $0x114] sm:$0xf]  ;;  %v3823_v10 = vld [vmem:[#allocation10 + $0x118] sm:$0xf0] }
 0x21b   : > { %v1718_v30 = vpack.c.bf16 %v1682_v37, %v1584_v24  ;;  %v3826_v1 = vor.u32 %v4047_v2, %v3823_v10 }
 0x21c   : > { %2516 = vmatmul.bf16.gmra.mxu0 %v5378_v50  ;;  %2565 = vmatmul.bf16.gmra.mxu1 %v5380_v38 }
 0x21d   : > { %v1807_v54 = vunpack.c.l.bf16 %v1718_v30  ;;  %v1808_v52 = vunpack.c.h.bf16 %v1718_v30  ;;  %2783 = vmatpush.bf16.msrb.mxu2 %v3826_v1 }
 0x21f   : > { %v1875_v57 = vadd.f32 %v5406_v28, %v1807_v54  ;;  %v1876_v7 = vadd.f32 %v5408_v27, %v1808_v52  ;;  %v3695_v54 = vld [vmem:[#allocation10 + $0x18] sm:$0xf0] }
 0x220   : > { %v1635_v56 = vpop.f32.mrf.mxu2  ;;  %v1684_v8 = vpop.f32.mrf.mxu3  ;;  %v3698_v58 = vor.u32 %v4015_v36, %v3695_v54  ;;  %v3759_v52 = vld [vmem:[#allocation10 + $0x98] sm:$0xf0] }
 0x221   : > { %v1685_v34 = vadd.f32 %v1684_v8, %v1635_v56  ;;  %v1539_v24 = vpop.f32.mrf.mxu0  ;;  %v1588_v37 = vpop.f32.mrf.mxu1  ;;  %v2035_v45 = vmax.f32 %v1875_v57, 0.0  ;;  %v2036_v30 = vmax.f32 %v1876_v7, 0.0  ;;  %v3762_v57 = vor.u32 %v4031_v31, %v3759_v52  ;;  %v3887_v7 = vld [vmem:[#allocation10 + $0x198] sm:$0xf0]  ;;  %v3751_v31 = vld [vmem:[#allocation10 + $0x88] sm:$0xf0] }
 0x222   : > { %2685 = vmatpush.bf16.msrb.mxu0 %v3698_v58  ;;  %v3890_v56 = vor.u32 %v4063_v46, %v3887_v7  ;;  %v1589_v13 = vadd.f32 %v1588_v37, %v1539_v24 }
 0x223   : > { %v5464_v35 = vpack.c.bf16 %v2035_v45, %v2031_v42  ;;  %v5466_v14 = vpack.c.bf16 %v2036_v30, %v2032_v6  ;;  %v1720_v63 = vpack.c.bf16 %v1685_v34, %v1587_v43  ;;  %2734 = vmatpush.bf16.msrb.mxu1 %v3762_v57  ;;  %v4013_v42 = vld [vmem:[#allocation10 + $0x4] sm:$0xf]  ;;  %v3687_v34 = vld [vmem:[#allocation10 + $0x8] sm:$0xf0] }
 0x224   : > { %v4029_v45 = vld [vmem:[#allocation10 + $0x84] sm:$0xf]  ;;  %2832 = vmatpush.bf16.msrb.mxu3 %v3890_v56  ;;  %v3690_v54 = vor.u32 %v4013_v42, %v3687_v34 }
 0x225   : > { %2609 = vmatmul.bf16.gmra.mxu2 %v5464_v35  ;;  %2658 = vmatmul.bf16.gmra.mxu3 %v5466_v14  ;;  %v1811_v6 = vunpack.c.l.bf16 %v1720_v63  ;;  %v1812_v30 = vunpack.c.h.bf16 %v1720_v63  ;;  %v3754_v2 = vor.u32 %v4029_v45, %v3751_v31 }
 0x226   : > { %2686 = vmatpush.bf16.msrb.mxu0 %v3690_v54  ;;  %v4045_v54 = vld [vmem:[#allocation10 + $0x104] sm:$0xf] }
 0x227   : > { %v1879_v58 = vadd.f32 %v5406_v28, %v1811_v6  ;;  %v1880_v63 = vadd.f32 %v5408_v27, %v1812_v30  ;;  %2735 = vmatpush.bf16.msrb.mxu1 %v3754_v2  ;;  %v3879_v2 = vld [vmem:[#allocation10 + $0x188] sm:$0xf0] }
 0x228   : > { %v1637_v8 = vpop.f32.mrf.mxu2  ;;  %v1686_v43 = vpop.f32.mrf.mxu3 }
 0x229   : > { %v1687_v5 = vadd.f32 %v1686_v43, %v1637_v8  ;;  %v1542_v26 = vpop.f32.mrf.mxu0  ;;  %v1591_v36 = vpop.f32.mrf.mxu1  ;;  %v2040_v42 = vmax.f32 %v1880_v63, 0.0 }
 0x22a   : > { %v1592_v57 = vadd.f32 %v1591_v36, %v1542_v26  ;;  %v3815_v26 = vld [vmem:[#allocation10 + $0x108] sm:$0xf0]  ;;  %v4061_v36 = vld [vmem:[#allocation10 + $0x184] sm:$0xf] }
 0x22b   : > { %v1722_v10 = vpack.c.bf16 %v1687_v5, %v1589_v13  ;;  %v2039_v5 = vmax.f32 %v1879_v58, 0.0  ;;  %v3818_v31 = vor.u32 %v4045_v54, %v3815_v26 }
 0x22c   : > { %2521 = vmatmul.bf16.gmra.mxu0 %v5392_v17  ;;  %2570 = vmatmul.bf16.gmra.mxu1 %v5394_v48 }
 0x22d   : > { %v1815_v52 = vunpack.c.l.bf16 %v1722_v10  ;;  %v1816_v1 = vunpack.c.h.bf16 %v1722_v10  ;;  %v3882_v10 = vor.u32 %v4061_v36, %v3879_v2  ;;  %2784 = vmatpush.bf16.msrb.mxu2 %v3818_v31 }
 0x22f   : > { %v1883_v24 = vadd.f32 %v5406_v28, %v1815_v52  ;;  %v1884_v37 = vadd.f32 %v5408_v27, %v1816_v1  ;;  %2833 = vmatpush.bf16.msrb.mxu3 %v3882_v10 }
 0x230   : > { %v1640_v46 = vpop.f32.mrf.mxu2  ;;  %v1689_v7 = vpop.f32.mrf.mxu3 }
 0x231   : > { %v1690_v13 = vadd.f32 %v1689_v7, %v1640_v46  ;;  %v1544_v56 = vpop.f32.mrf.mxu0  ;;  %v1593_v8 = vpop.f32.mrf.mxu1  ;;  %v2043_v43 = vmax.f32 %v1883_v24, 0.0  ;;  %v2044_v34 = vmax.f32 %v1884_v37, 0.0 }
 0x232   : > { %v1594_v24 = vadd.f32 %v1593_v8, %v1544_v56 }
 0x233   : > { %v5476_v6 = vpack.c.bf16 %v2043_v43, %v2039_v5  ;;  %v5478_v45 = vpack.c.bf16 %v2044_v34, %v2040_v42  ;;  %v1724_v30 = vpack.c.bf16 %v1690_v13, %v1592_v57 }
 0x235   : > { %2614 = vmatmul.bf16.gmra.mxu2 %v5476_v6  ;;  %2663 = vmatmul.bf16.gmra.mxu3 %v5478_v45  ;;  %v1819_v58 = vunpack.c.l.bf16 %v1724_v30  ;;  %v1820_v52 = vunpack.c.h.bf16 %v1724_v30 }
 0x237   : > { %v1887_v5 = vadd.f32 %v5406_v28, %v1819_v58  ;;  %v1888_v13 = vadd.f32 %v5408_v27, %v1820_v52  ;;  %v5495_v52 = vld [vmem:[%s6078_s5] sm:$0x3] }
 0x238   : > { %v1642_v1 = vpop.f32.mrf.mxu2  ;;  %v1691_v63 = vpop.f32.mrf.mxu3 }
 0x239   : > { %v1692_v37 = vadd.f32 %v1691_v63, %v1642_v1  ;;  %v1547_v46 = vpop.f32.mrf.mxu0  ;;  %v1596_v7 = vpop.f32.mrf.mxu1  ;;  %v2047_v54 = vmax.f32 %v1887_v5, 0.0  ;;  %v2048_v26 = vmax.f32 %v1888_v13, 0.0 }
 0x23a   : > { %v1597_v36 = vadd.f32 %v1596_v7, %v1547_v46  ;;  %v5500_v46 = vperm.slane %v5495_v52, 0 }
 0x23b   : > { %v1726_v57 = vpack.c.bf16 %v1692_v37, %v1594_v24 }
 0x23c   : > { %2526 = vmatmul.bf16.gmra.mxu0 %v5402_v4  ;;  %2575 = vmatmul.bf16.gmra.mxu1 %v5404_v44 }
 0x23d   : > { %v1823_v43 = vunpack.c.l.bf16 %v1726_v57  ;;  %v1824_v42 = vunpack.c.h.bf16 %v1726_v57 }
 0x23f   : > { %v1891_v34 = vadd.f32 %v5406_v28, %v1823_v43  ;;  %v1892_v30 = vadd.f32 %v5408_v27, %v1824_v42 }
 0x240   : > { %v1645_v56 = vpop.f32.mrf.mxu2  ;;  %v1694_v8 = vpop.f32.mrf.mxu3 }
 0x241   : > { %v1695_v31 = vadd.f32 %v1694_v8, %v1645_v56  ;;  %v1549_v2 = vpop.f32.mrf.mxu0  ;;  %v1598_v10 = vpop.f32.mrf.mxu1  ;;  %v2051_v1 = vmax.f32 %v1891_v34, 0.0  ;;  %v2052_v63 = vmax.f32 %v1892_v30, 0.0 }
 0x242   : > { %v1599_v43 = vadd.f32 %v1598_v10, %v1549_v2 }
 0x243   : > { %v5488_v24 = vpack.c.bf16 %v2051_v1, %v2047_v54  ;;  %v5490_v58 = vpack.c.bf16 %v2052_v63, %v2048_v26  ;;  %v1728_v37 = vpack.c.bf16 %v1695_v31, %v1597_v36 }
 0x245   : > { %2619 = vmatmul.bf16.gmra.mxu2 %v5488_v24  ;;  %2668 = vmatmul.bf16.gmra.mxu3 %v5490_v58  ;;  %v1827_v5 = vunpack.c.l.bf16 %v1728_v37  ;;  %v1828_v13 = vunpack.c.h.bf16 %v1728_v37 }
 0x247   : > { %v1895_v31 = vadd.f32 %v5406_v28, %v1827_v5  ;;  %v1896_v1 = vadd.f32 %v5408_v27, %v1828_v13 }
 0x248   : > { %v1647_v7 = vpop.f32.mrf.mxu2  ;;  %v1696_v57 = vpop.f32.mrf.mxu3 }
 0x249   : > { %v1697_v42 = vadd.f32 %v1696_v57, %v1647_v7  ;;  %v2492_v34 = vpop.f32.mrf.mxu0  ;;  %v2541_v30 = vpop.f32.mrf.mxu1  ;;  %v2055_v7 = vmax.f32 %v1895_v31, 0.0 }
 0x24a   : > { %v2493_v56 = vadd.f32 %v2492_v34, %v5500_v46 }
 0x24b   : > { %v1730_v8 = vpack.c.bf16 %v1697_v42, %v1599_v43  ;;  %v2056_v43 = vmax.f32 %v1896_v1, 0.0 }
 0x24c   : > { %v2542_v54 = vadd.f32 %v2541_v30, %v2493_v56  ;;  %2687 = vmatmul.bf16.vlgmr.msrb.gmra.mxu0 %v5318_v22  ;;  %2736 = vmatmul.bf16.vlgmr.msrb.gmra.mxu1 %v5320_v55 }
 0x24d   : > { %v1831_v26 = vunpack.c.l.bf16 %v1730_v8  ;;  %v1832_v36 = vunpack.c.h.bf16 %v1730_v8 }
 0x24f   : > { %v1899_v63 = vadd.f32 %v5406_v28, %v1831_v26  ;;  %v1900_v2 = vadd.f32 %v5408_v27, %v1832_v36 }
 0x251   : > { %v2494_v10 = vpop.f32.mrf.mxu0  ;;  %v2543_v37 = vpop.f32.mrf.mxu1  ;;  %v2059_v57 = vmax.f32 %v1899_v63, 0.0  ;;  %v2060_v42 = vmax.f32 %v1900_v2, 0.0 }
 0x252   : > { %v2495_v22 = vadd.f32 %v2494_v10, %v5500_v46 }
 0x253   : > { %v5510_v34 = vpack.c.bf16 %v2059_v57, %v2055_v7  ;;  %v5512_v55 = vpack.c.bf16 %v2060_v42, %v2056_v43 }
 0x254   : > { %v2544_v30 = vadd.f32 %v2543_v37, %v2495_v22 }
 0x255   : > { %2624 = vmatmul.bf16.gmra.mxu2 %v5510_v34  ;;  %2673 = vmatmul.bf16.gmra.mxu3 %v5512_v55 }
 0x259   : > { %v2497_v28 = vpop.f32.mrf.mxu0  ;;  %v2546_v5 = vpop.f32.mrf.mxu1 }
 0x25a   : > { %v2498_v27 = vadd.f32 %v2497_v28, %v5500_v46 }
 0x25c   : > { %v2547_v13 = vadd.f32 %v2546_v5, %v2498_v27  ;;  %2692 = vmatmul.bf16.gmra.mxu0 %v5330_v33  ;;  %2741 = vmatmul.bf16.gmra.mxu1 %v5332_v32 }
 0x261   : > { %v2499_v56 = vpop.f32.mrf.mxu0  ;;  %v2548_v8 = vpop.f32.mrf.mxu1 }
 0x262   : > { %v2500_v26 = vadd.f32 %v2499_v56, %v5500_v46 }
 0x264   : > { %v2549_v36 = vadd.f32 %v2548_v8, %v2500_v26 }
 0x265   : > { %2785 = vmatmul.bf16.vlgmr.msrb.gmra.mxu2 %v5416_v62  ;;  %2834 = vmatmul.bf16.vlgmr.msrb.gmra.mxu3 %v5418_v29 }
 0x268   : > { %v2590_v31 = vpop.f32.mrf.mxu2  ;;  %v2639_v1 = vpop.f32.mrf.mxu3 }
 0x269   : > { %v2591_v63 = vadd.f32 %v2590_v31, %v2542_v54  ;;  %v2502_v2 = vpop.f32.mrf.mxu0  ;;  %v2551_v10 = vpop.f32.mrf.mxu1 }
 0x26a   : > { %v2503_v37 = vadd.f32 %v2502_v2, %v5500_v46 }
 0x26b   : > { %v5523_v7 = vadd.f32 %v2639_v1, %v2591_v63 }
 0x26c   : > { %v2552_v33 = vadd.f32 %v2551_v10, %v2503_v37  ;;  %2697 = vmatmul.bf16.gmra.mxu0 %v5342_v3  ;;  %2746 = vmatmul.bf16.gmra.mxu1 %v5344_v40 }
 0x270   : > { %v2592_v32 = vpop.f32.mrf.mxu2  ;;  %v2641_v57 = vpop.f32.mrf.mxu3 }
 0x271   : > { %v2593_v43 = vadd.f32 %v2592_v32, %v2544_v30  ;;  %v2504_v62 = vpop.f32.mrf.mxu0  ;;  %v2553_v42 = vpop.f32.mrf.mxu1 }
 0x272   : > { %v2505_v29 = vadd.f32 %v2504_v62, %v5500_v46 }
 0x273   : > { %v5528_v22 = vadd.f32 %v2641_v57, %v2593_v43 }
 0x274   : > { %v2554_v54 = vadd.f32 %v2553_v42, %v2505_v29 }
 0x275   : > { %2790 = vmatmul.bf16.gmra.mxu2 %v5428_v39  ;;  %2839 = vmatmul.bf16.gmra.mxu3 %v5430_v25 }
 0x278   : > { %v2595_v28 = vpop.f32.mrf.mxu2  ;;  %v2644_v5 = vpop.f32.mrf.mxu3 }
 0x279   : > { %v2596_v27 = vadd.f32 %v2595_v28, %v2547_v13  ;;  %v2507_v3 = vpop.f32.mrf.mxu0  ;;  %v2556_v56 = vpop.f32.mrf.mxu1 }
 0x27a   : > { %v2508_v40 = vadd.f32 %v2507_v3, %v5500_v46 }
 0x27b   : > { %v5533_v8 = vadd.f32 %v2644_v5, %v2596_v27 }
 0x27c   : > { %v2557_v30 = vadd.f32 %v2556_v56, %v2508_v40  ;;  %2702 = vmatmul.bf16.gmra.mxu0 %v5354_v51  ;;  %2751 = vmatmul.bf16.gmra.mxu1 %v5356_v11 }
 0x280   : > { %v2597_v26 = vpop.f32.mrf.mxu2  ;;  %v2646_v31 = vpop.f32.mrf.mxu3 }
 0x281   : > { %v2598_v1 = vadd.f32 %v2597_v26, %v2549_v36  ;;  %v2509_v39 = vpop.f32.mrf.mxu0  ;;  %v2558_v63 = vpop.f32.mrf.mxu1 }
 0x282   : > { %v2510_v25 = vadd.f32 %v2509_v39, %v5500_v46 }
 0x283   : > { %v5538_v2 = vadd.f32 %v2646_v31, %v2598_v1 }
 0x284   : > { %v2559_v13 = vadd.f32 %v2558_v63, %v2510_v25 }
 0x285   : > { %2795 = vmatmul.bf16.gmra.mxu2 %v5440_v23  ;;  %2844 = vmatmul.bf16.gmra.mxu3 %v5442_v41 }
 0x288   : > { %v2600_v10 = vpop.f32.mrf.mxu2  ;;  %v2649_v37 = vpop.f32.mrf.mxu3 }
 0x289   : > { %v2601_v32 = vadd.f32 %v2600_v10, %v2552_v33  ;;  %v2512_v51 = vpop.f32.mrf.mxu0  ;;  %v2561_v57 = vpop.f32.mrf.mxu1 }
 0x28a   : > { %v2513_v11 = vadd.f32 %v2512_v51, %v5500_v46 }
 0x28b   : > { %v5543_v43 = vadd.f32 %v2649_v37, %v2601_v32 }
 0x28c   : > { %v2562_v36 = vadd.f32 %v2561_v57, %v2513_v11  ;;  %2707 = vmatmul.bf16.gmra.mxu0 %v5366_v20  ;;  %2756 = vmatmul.bf16.gmra.mxu1 %v5368_v18 }
 0x290   : > { %v2602_v62 = vpop.f32.mrf.mxu2  ;;  %v2651_v42 = vpop.f32.mrf.mxu3 }
 0x291   : > { %v2603_v29 = vadd.f32 %v2602_v62, %v2554_v54  ;;  %v2514_v23 = vpop.f32.mrf.mxu0  ;;  %v2563_v28 = vpop.f32.mrf.mxu1 }
 0x292   : > { %v2515_v41 = vadd.f32 %v2514_v23, %v5500_v46 }
 0x293   : > { %v5548_v5 = vadd.f32 %v2651_v42, %v2603_v29 }
 0x294   : > { %v2564_v33 = vadd.f32 %v2563_v28, %v2515_v41 }
 0x295   : > { %2800 = vmatmul.bf16.gmra.mxu2 %v5452_v53  ;;  %2849 = vmatmul.bf16.gmra.mxu3 %v5454_v15 }
 0x298   : > { %v2605_v27 = vpop.f32.mrf.mxu2  ;;  %v2654_v3 = vpop.f32.mrf.mxu3 }
 0x299   : > { %v2606_v56 = vadd.f32 %v2605_v27, %v2557_v30  ;;  %v2517_v20 = vpop.f32.mrf.mxu0  ;;  %v2566_v40 = vpop.f32.mrf.mxu1 }
 0x29a   : > { %v2518_v18 = vadd.f32 %v2517_v20, %v5500_v46 }
 0x29b   : > { %v5553_v26 = vadd.f32 %v2654_v3, %v2606_v56 }
 0x29c   : > { %v2567_v54 = vadd.f32 %v2566_v40, %v2518_v18  ;;  %2712 = vmatmul.bf16.gmra.mxu0 %v5378_v50  ;;  %2761 = vmatmul.bf16.gmra.mxu1 %v5380_v38 }
 0x2a0   : > { %v2607_v31 = vpop.f32.mrf.mxu2  ;;  %v2656_v1 = vpop.f32.mrf.mxu3 }
 0x2a1   : > { %v2608_v39 = vadd.f32 %v2607_v31, %v2559_v13  ;;  %v2519_v53 = vpop.f32.mrf.mxu0  ;;  %v2568_v63 = vpop.f32.mrf.mxu1 }
 0x2a2   : > { %v2520_v15 = vadd.f32 %v2519_v53, %v5500_v46 }
 0x2a3   : > { %v5558_v25 = vadd.f32 %v2656_v1, %v2608_v39 }
 0x2a4   : > { %v2569_v30 = vadd.f32 %v2568_v63, %v2520_v15 }
 0x2a5   : > { %2805 = vmatmul.bf16.gmra.mxu2 %v5464_v35  ;;  %2854 = vmatmul.bf16.gmra.mxu3 %v5466_v14 }
 0x2a8   : > { %v2610_v10 = vpop.f32.mrf.mxu2  ;;  %v2659_v37 = vpop.f32.mrf.mxu3 }
 0x2a9   : > { %v2611_v32 = vadd.f32 %v2610_v10, %v2562_v36  ;;  %v2522_v50 = vpop.f32.mrf.mxu0  ;;  %v2571_v51 = vpop.f32.mrf.mxu1 }
 0x2aa   : > { %v2523_v38 = vadd.f32 %v2522_v50, %v5500_v46 }
 0x2ab   : > { %v5563_v57 = vadd.f32 %v2659_v37, %v2611_v32 }
 0x2ac   : > { %v2572_v13 = vadd.f32 %v2571_v51, %v2523_v38  ;;  %2717 = vmatmul.bf16.gmra.mxu0 %v5392_v17  ;;  %2766 = vmatmul.bf16.gmra.mxu1 %v5394_v48 }
 0x2b0   : > { %v2612_v11 = vpop.f32.mrf.mxu2  ;;  %v2661_v62 = vpop.f32.mrf.mxu3 }
 0x2b1   : > { %v2613_v42 = vadd.f32 %v2612_v11, %v2564_v33  ;;  %v2524_v35 = vpop.f32.mrf.mxu0  ;;  %v2573_v29 = vpop.f32.mrf.mxu1 }
 0x2b2   : > { %v2525_v14 = vadd.f32 %v2524_v35, %v5500_v46 }
 0x2b3   : > { %v5568_v23 = vadd.f32 %v2661_v62, %v2613_v42 }
 0x2b4   : > { %v2574_v36 = vadd.f32 %v2573_v29, %v2525_v14 }
 0x2b5   : > { %2810 = vmatmul.bf16.gmra.mxu2 %v5476_v6  ;;  %2859 = vmatmul.bf16.gmra.mxu3 %v5478_v45 }
 0x2b8   : > { %v2615_v28 = vpop.f32.mrf.mxu2  ;;  %v2664_v41 = vpop.f32.mrf.mxu3 }
 0x2b9   : > { %v2616_v27 = vadd.f32 %v2615_v28, %v2567_v54  ;;  %v2527_v17 = vpop.f32.mrf.mxu0  ;;  %v2576_v3 = vpop.f32.mrf.mxu1 }
 0x2ba   : > { %v2528_v48 = vadd.f32 %v2527_v17, %v5500_v46  ;;  %v5604_v17 = vadd.f32 %v5528_v22, %v5023_v19 }
 0x2bb   : > { %v5573_v56 = vadd.f32 %v2664_v41, %v2616_v27 }
 0x2bc   : > { %v2577_v33 = vadd.f32 %v2576_v3, %v2528_v48  ;;  %2722 = vmatmul.bf16.gmra.mxu0 %v5402_v4  ;;  %2771 = vmatmul.bf16.gmra.mxu1 %v5404_v44  ;;  %v5610_v48 = vadd.f32 %v5523_v7, %v5020_v0  ;;  %v2967_v19 = vmul.f32 %v5604_v17, %v5604_v17 }
 0x2bd   : > { %v5627_v7 = vadd.f32 %v5543_v43, %v5100_v16  ;;  %v5643_v16 = vadd.f32 %v5553_v26, %v5147_v59 }
 0x2c0   : > { %v2617_v20 = vpop.f32.mrf.mxu2  ;;  %v2666_v40 = vpop.f32.mrf.mxu3 }
 0x2c1   : > { %v2618_v18 = vadd.f32 %v2617_v20, %v2569_v30  ;;  %v2529_v6 = vpop.f32.mrf.mxu0  ;;  %v2578_v31 = vpop.f32.mrf.mxu1  ;;  %v2909_v20 = vadd.f32 %v5604_v17, %v5610_v48 }
 0x2c2   : > { %v2530_v45 = vadd.f32 %v2529_v6, %v5500_v46 }
 0x2c3   : > { %v5578_v1 = vadd.f32 %v2666_v40, %v2618_v18  ;;  %v5620_v40 = vadd.f32 %v5538_v2, %v5066_v21  ;;  %v5636_v2 = vadd.f32 %v5548_v5, %v5103_v12  ;;  %v5650_v12 = vadd.f32 %v5558_v25, %v5150_v60 }
 0x2c4   : > { %v2579_v54 = vadd.f32 %v2578_v31, %v2530_v45  ;;  %v5661_v25 = vperm.slane %v5495_v52, 1 }
 0x2c5   : > { %2815 = vmatmul.bf16.gmra.mxu2 %v5488_v24  ;;  %2864 = vmatmul.bf16.gmra.mxu3 %v5490_v58  ;;  %v2971_v45 = vmul.f32 %v5620_v40, %v5620_v40  ;;  %v2979_v60 = vmul.f32 %v5650_v12, %v5650_v12 }
 0x2c8   : > { %v2620_v39 = vpop.f32.mrf.mxu2  ;;  %v2669_v53 = vpop.f32.mrf.mxu3 }
 0x2c9   : > { %v2621_v63 = vadd.f32 %v2620_v39, %v2572_v13  ;;  %v5582_v4 = vpop.f32.mrf.mxu0  ;;  %v5586_v15 = vpop.f32.mrf.mxu1 }
 0x2cb   : > { %v5584_v44 = vadd.f32 %v2669_v53, %v2621_v63  ;;  %v2973_v53 = vmul.f32 %v5627_v7, %v5627_v7 }
 0x2d0   : > { %v2622_v30 = vpop.f32.mrf.mxu2  ;;  %v2671_v10 = vpop.f32.mrf.mxu3 }
 0x2d1   : > { %v2623_v37 = vadd.f32 %v2622_v30, %v2574_v36  ;;  %v2690_v46 = vpop.f32.mrf.mxu0  ;;  %v5590_v50 = vpop.f32.mrf.mxu1  ;;  %v2975_v30 = vmul.f32 %v5636_v2, %v5636_v2 }
 0x2d3   : > { %v5588_v32 = vadd.f32 %v2671_v10, %v2623_v37 }
 0x2d5   : > { %2820 = vmatmul.bf16.gmra.mxu2 %v5510_v34  ;;  %2869 = vmatmul.bf16.gmra.mxu3 %v5512_v55 }
 0x2d8   : > { %v2625_v24 = vpop.f32.mrf.mxu2  ;;  %v2674_v58 = vpop.f32.mrf.mxu3 }
 0x2d9   : > { %v2626_v51 = vadd.f32 %v2625_v24, %v2577_v33  ;;  %v2693_v38 = vpop.f32.mrf.mxu0  ;;  %v5596_v11 = vpop.f32.mrf.mxu1  ;;  %v5614_v33 = vadd.f32 %v5533_v8, %v5063_v9  ;;  %v2965_v9 = vmul.f32 %v5610_v48, %v5610_v48 }
 0x2db   : > { %v5594_v13 = vadd.f32 %v2674_v58, %v2626_v51  ;;  %v2910_v0 = vadd.f32 %v2909_v20, %v5614_v33  ;;  %v2969_v8 = vmul.f32 %v5614_v33, %v5614_v33  ;;  %v2997_v31 = vadd.f32 %v2967_v19, %v2965_v9 }
 0x2dc   : > { %v2977_v58 = vmul.f32 %v5643_v16, %v5643_v16  ;;  %v2689_v9 = vadd.f32 %v5582_v4, %v5661_v25 }
 0x2dd   : > { %v2911_v21 = vadd.f32 %v2910_v0, %v5620_v40  ;;  %v2998_v39 = vadd.f32 %v2997_v31, %v2969_v8  ;;  %v2694_v8 = vadd.f32 %v2693_v38, %v5661_v25 }
 0x2df   : > { %v2999_v5 = vadd.f32 %v2998_v39, %v2971_v45 }
 0x2e0   : > { %v2627_v62 = vpop.f32.mrf.mxu2  ;;  %v2676_v42 = vpop.f32.mrf.mxu3 }
 0x2e1   : > { %v2628_v35 = vadd.f32 %v2627_v62, %v2579_v54  ;;  %v2695_v14 = vpop.f32.mrf.mxu0  ;;  %v2744_v34 = vpop.f32.mrf.mxu1  ;;  %v2912_v54 = vadd.f32 %v2911_v21, %v5627_v7  ;;  %v3000_v24 = vadd.f32 %v2999_v5, %v2973_v53 }
 0x2e2   : > { %v2696_v39 = vadd.f32 %v2695_v14, %v5661_v25 }
 0x2e3   : > { %v5598_v29 = vadd.f32 %v2676_v42, %v2628_v35  ;;  %v2913_v63 = vadd.f32 %v2912_v54, %v5636_v2  ;;  %v3001_v62 = vadd.f32 %v3000_v24, %v2975_v30  ;;  %v2691_v35 = vadd.f32 %v2690_v46, %v5661_v25 }
 0x2e4   : > { %v2743_v46 = vadd.f32 %v5596_v11, %v2694_v8  ;;  %v2745_v24 = vadd.f32 %v2744_v34, %v2696_v39  ;;  %v6177_v39 = vld [vmem:[#allocation28_spill] sm:$0xff] }
 0x2e5   : > { %v2914_v59 = vadd.f32 %v2913_v63, %v5643_v16  ;;  %v3002_v42 = vadd.f32 %v3001_v62, %v2977_v58  ;;  %v2740_v45 = vadd.f32 %v5590_v50, %v2691_v35  ;;  %v2738_v63 = vadd.f32 %v5586_v15, %v2689_v9 }
 0x2e7   : > { %v2915_v51 = vadd.f32 %v2914_v59, %v5650_v12  ;;  %v3003_v0 = vadd.f32 %v3002_v42, %v2979_v60 }
 0x2e8   : > { %v2786_v36 = vpop.f32.mrf.mxu2  ;;  %v5600_v28 = vpop.f32.mrf.mxu3 }
 0x2e9   : > { %v2698_v41 = vpop.f32.mrf.mxu0  ;;  %v5606_v3 = vpop.f32.mrf.mxu1  ;;  %v2916_v20 = vrot.slane %v2915_v51, 4  ;;  %v3004_v53 = vrot.slane %v3003_v0, 4  ;;  %v2787_v59 = vadd.f32 %v2786_v36, %v2738_v63 }
 0x2ea   : > { %v2699_v30 = vadd.f32 %v2698_v41, %v5661_v25 }
 0x2eb   : > { %v2917_v54 = vadd.f32 %v2916_v20, %v2915_v51  ;;  %v3005_v62 = vadd.f32 %v3004_v53, %v3003_v0  ;;  %v2836_v15 = vadd.f32 %v5600_v28, %v2787_v59 }
 0x2ec   : > { %v2748_v14 = vadd.f32 %v5606_v3, %v2699_v30 }
 0x2ed   : > { %v2918_v58 = vrot.slane %v2917_v54, 2  ;;  %v3006_v34 = vrot.slane %v3005_v62, 2  ;;  %v5682_v3 = vadd.f32 %v2836_v15, %v5026_v47  ;;  %v6180_v15 = vld [vmem:[#allocation24_spill] sm:$0xff] }
 0x2ef   : > { %v2966_v47 = vmul.f32 %v5682_v3, %v5682_v3 }
 0x2f0   : > { %v2788_v55 = vpop.f32.mrf.mxu2  ;;  %v2837_v27 = vpop.f32.mrf.mxu3 }
 0x2f1   : > { %v2700_v18 = vpop.f32.mrf.mxu0  ;;  %v2749_v43 = vpop.f32.mrf.mxu1  ;;  %v2789_v5 = vadd.f32 %v2788_v55, %v2740_v45 }
 0x2f2   : > { %v2701_v38 = vadd.f32 %v2700_v18, %v5661_v25 }
 0x2f3   : > { %v2838_v50 = vadd.f32 %v2837_v27, %v2789_v5 }
 0x2f4   : > { %v2750_v55 = vadd.f32 %v2749_v43, %v2701_v38  ;;  %v6178_v38 = vld [vmem:[#allocation29_spill] sm:$0xff] }
 0x2f5   : > { %v5677_v18 = vadd.f32 %v2838_v50, %v5029_v49 }
 0x2f7   : > { %v2968_v9 = vmul.f32 %v5677_v18, %v5677_v18 }
 0x2f8   : > { %v2791_v22 = vpop.f32.mrf.mxu2  ;;  %v2840_v6 = vpop.f32.mrf.mxu3 }
 0x2f9   : > { %v2703_v26 = vpop.f32.mrf.mxu0  ;;  %v2752_v19 = vpop.f32.mrf.mxu1  ;;  %v2792_v4 = vadd.f32 %v2791_v22, %v2743_v46  ;;  %v2919_v22 = vadd.f32 %v2918_v58, %v2917_v54  ;;  %v3010_v59 = vadd.f32 %v2968_v9, %v2966_v47 }
 0x2fa   : > { %v2704_v41 = vadd.f32 %v2703_v26, %v5661_v25  ;;  %v3007_v26 = vadd.f32 %v3006_v34, %v3005_v62 }
 0x2fb   : > { %v2841_v11 = vadd.f32 %v2840_v6, %v2792_v4  ;;  %v2920_v43 = vrot.slane %v2919_v22, 1 }
 0x2fc   : > { %v2753_v28 = vadd.f32 %v2752_v19, %v2704_v41  ;;  %v2922_v19 = vadd.f32 %v5677_v18, %v5682_v3  ;;  %v3008_v30 = vrot.slane %v3007_v26, 1 }
 0x2fd   : > { %v2921_v5 = vadd.f32 %v2920_v43, %v2919_v22 }
 0x300   : > { %v2793_v10 = vpop.f32.mrf.mxu2  ;;  %v2842_v37 = vpop.f32.mrf.mxu3 }
 0x301   : > { %v2705_v52 = vpop.f32.mrf.mxu0  ;;  %v2794_v42 = vadd.f32 %v2793_v10, %v2745_v24  ;;  %v2754_v35 = vpop.f32.mrf.mxu1  ;;  %v5685_v10 = vadd.f32 %v2841_v11, %v5069_v61  ;;  %v5719_v11 = vmul.f32 %v2921_v5, %v6180_v15 }
 0x303   : > { %v2843_v20 = vadd.f32 %v2842_v37, %v2794_v42  ;;  %v2970_v61 = vmul.f32 %v5685_v10, %v5685_v10  ;;  %v2923_v4 = vadd.f32 %v2922_v19, %v5685_v10 }
 0x305   : > { %v3011_v62 = vadd.f32 %v3010_v59, %v2970_v61 }
 0x308   : > { %v2796_v21 = vpop.f32.mrf.mxu2  ;;  %v2845_v31 = vpop.f32.mrf.mxu3 }
 0x309   : > { %v2797_v36 = vadd.f32 %v2796_v21, %v2748_v14  ;;  %v5679_v27 = vpop.f32.mrf.mxu0  ;;  %v6176_v21 = vld [vmem:[#allocation27_spill] sm:$0xff]  ;;  %v5702_v63 = vpop.f32.mrf.mxu1  ;;  %v6179_v14 = vld [vmem:[#allocation30_spill] sm:$0xff] }
 0x30a   : > { %v5690_v37 = vadd.f32 %v2843_v20, %v6176_v21 }
 0x30b   : > { %v2846_v6 = vadd.f32 %v2845_v31, %v2797_v36  ;;  %v2706_v31 = vadd.f32 %v2705_v52, %v5661_v25 }
 0x30c   : > { %v2972_v24 = vmul.f32 %v5690_v37, %v5690_v37  ;;  %v2924_v52 = vadd.f32 %v2923_v4, %v5690_v37  ;;  %v6182_v4 = vld [vmem:[#allocation26_spill] sm:$0xff] }
 0x30d   : > { %v5700_v53 = vadd.f32 %v2846_v6, %v6177_v39  ;;  %v2755_v50 = vadd.f32 %v2754_v35, %v2706_v31 }
 0x30e   : > { %v3012_v22 = vadd.f32 %v3011_v62, %v2972_v24  ;;  %v5747_v24 = vadd.f32 %v5568_v23, %v6182_v4 }
 0x30f   : > { %v2925_v34 = vadd.f32 %v2924_v52, %v5700_v53 }
 0x310   : > { %v2798_v51 = vpop.f32.mrf.mxu2  ;;  %v2847_v60 = vpop.f32.mrf.mxu3 }
 0x311   : > { %v2799_v0 = vadd.f32 %v2798_v51, %v2750_v55  ;;  %v2974_v51 = vmul.f32 %v5700_v53, %v5700_v53  ;;  %v3009_v55 = vadd.f32 %v3008_v30, %v3007_v26  ;;  %v3053_v26 = vmul.f32 %v5719_v11, %v5719_v11 }
 0x313   : > { %v2848_v45 = vadd.f32 %v2847_v60, %v2799_v0  ;;  %v5713_v60 = vpop.f32.mrf.mxu0  ;;  %v3013_v0 = vadd.f32 %v3012_v22, %v2974_v51  ;;  %v3049_v9 = vmul.f32 %v3009_v55, %v6180_v15  ;;  %v2983_v22 = vmul.f32 %v5747_v24, %v5747_v24 }
 0x315   : > { %v5708_v58 = vadd.f32 %v2848_v45, %v6178_v38  ;;  %v6181_v45 = vld [vmem:[#allocation31_spill] sm:$0xff]  ;;  %v3057_v31 = vsub.f32 %v3049_v9, %v3053_v26  ;;  %v6187_v9 = vld [vmem:[#allocation38_spill] sm:$0xff] }
 0x317   : > { %v2976_v35 = vmul.f32 %v5708_v58, %v5708_v58  ;;  %v3061_v52 = vmax.f32 %v3057_v31, 0.0 }
 0x318   : > { %v2801_v8 = vpop.f32.mrf.mxu2  ;;  %v2850_v49 = vpop.f32.mrf.mxu3 }
 0x319   : > { %v2802_v54 = vadd.f32 %v2801_v8, %v2753_v28  ;;  %v2926_v28 = vadd.f32 %v2925_v34, %v5708_v58  ;;  %v3014_v8 = vadd.f32 %v3013_v0, %v2976_v35  ;;  %v6185_v34 = vld [vmem:[#allocation35_spill] sm:$0xff] }
 0x31a   : > { %v5761_v23 = vadd.f32 %v5578_v1, %v6185_v34  ;;  %v5777_v1 = vadd.f32 %v5584_v44, %v6187_v9 }
 0x31b   : > { %v2851_v46 = vadd.f32 %v2850_v49, %v2802_v54  ;;  %v5730_v49 = vpop.f32.mrf.mxu1  ;;  %v5743_v5 = vpop.f32.mrf.mxu0 }
 0x31c   : > { %6186 = vst [vmem:[#allocation27_spill] sm:$0xff] %v5761_v23 }
 0x31d   : > { %v5716_v42 = vadd.f32 %v2851_v46, %v6179_v14  ;;  %v6184_v14 = vld [vmem:[#allocation34_spill] sm:$0xff]  ;;  %6188 = vst [vmem:[#allocation28_spill] sm:$0xff] %v5777_v1 }
 0x31e   : > { %v5755_v55 = vadd.f32 %v5573_v56, %v6184_v14 }
 0x31f   : > { %v2978_v6 = vmul.f32 %v5716_v42, %v5716_v42  ;;  %v2927_v21 = vadd.f32 %v2926_v28, %v5716_v42  ;;  %v5765_v28 = vadd.f32 1e-05, %v3061_v52 }
 0x320   : > { %v2803_v41 = vpop.f32.mrf.mxu2  ;;  %v2852_v36 = vpop.f32.mrf.mxu3  ;;  %v2985_v56 = vmul.f32 %v5755_v55, %v5755_v55 }
 0x321   : > { %v2804_v20 = vadd.f32 %v2803_v41, %v2755_v50  ;;  %v3015_v47 = vadd.f32 %v3014_v8, %v2978_v6  ;;  %v6183_v50 = vld [vmem:[#allocation25_spill] sm:$0xff]  ;;  %4188 = vrsqrt.f32 %v5765_v28  ;;  %vm3075_vm1 = vweird.f32 %v5765_v28 }
 0x322   : > { %v5751_v51 = vadd.f32 %v5563_v57, %v6183_v50 }
 0x323   : > { %v2853_v43 = vadd.f32 %v2852_v36, %v2804_v20  ;;  %v5763_v35 = vpop.f32.mrf.mxu1 }
 0x324   : > { %v2981_v57 = vmul.f32 %v5751_v51, %v5751_v51 }
 0x325   : > { %v5734_v54 = vadd.f32 %v2853_v43, %v6181_v45 }
 0x326   : > { %v3023_v45 = vadd.f32 %v2983_v22, %v2981_v57  ;;  %v6193_v22 = vld [vmem:[#allocation43_spill] sm:$0xff] }
 0x327   : > { %v2928_v61 = vadd.f32 %v2927_v21, %v5734_v54  ;;  %v2980_v19 = vmul.f32 %v5734_v54, %v5734_v54  ;;  %v2935_v21 = vadd.f32 %v5747_v24, %v5751_v51  ;;  %v5803_v34 = vadd.f32 %v5598_v29, %v6193_v22 }
 0x328   : > { %v5739_v39 = vpop.f32.mrf.mxu2  ;;  %v5741_v46 = vpop.f32.mrf.mxu3  ;;  %v3024_v4 = vadd.f32 %v3023_v45, %v2985_v56 }
 0x329   : > { %v2929_v30 = vrot.slane %v2928_v61, 4  ;;  %v3016_v59 = vadd.f32 %v3015_v47, %v2980_v19  ;;  %v2987_v47 = vmul.f32 %v5761_v23, %v5761_v23  ;;  %v2936_v44 = vadd.f32 %v2935_v21, %v5755_v55  ;;  %6194 = vst [vmem:[#allocation24_spill] sm:$0xff] %v5803_v34  ;;  %v5813_v21 = vpop.eup %4188 }
 0x32a   : > { %vm3076_vm15 = vweird.f32 %v5813_v21 }
 0x32b   : > { %v2930_v38 = vadd.f32 %v2929_v30, %v2928_v61  ;;  %v3017_v62 = vrot.slane %v3016_v59, 4  ;;  %v6189_v61 = vld [vmem:[#allocation39_spill] sm:$0xff]  ;;  %v2937_v14 = vadd.f32 %v2936_v44, %v5761_v23  ;;  %v2764_v45 = vpop.f32.mrf.mxu1  ;;  %vm3077_vm3 = vmor %vm3075_vm1, %vm3076_vm15 }
 0x32c   : > { %v5785_v19 = vadd.f32 %v5588_v32, %v6189_v61  ;;  %v2995_v61 = vmul.f32 %v5803_v34, %v5803_v34 }
 0x32d   : > { %v2931_v41 = vrot.slane %v2930_v38, 2  ;;  %v3018_v36 = vadd.f32 %v3017_v62, %v3016_v59  ;;  %v2715_v59 = vpop.f32.mrf.mxu0  ;;  %v6191_v62 = vld [vmem:[#allocation42_spill] sm:$0xff]  ;;  %v2938_v56 = vadd.f32 %v2937_v14, %v5777_v1 }
 0x32e   : > { %6190 = vst [vmem:[#allocation29_spill] sm:$0xff] %v5785_v19  ;;  %v5793_v52 = vadd.f32 %v5594_v13, %v6191_v62 }
 0x32f   : > { %v2932_v20 = vadd.f32 %v2931_v41, %v2930_v38  ;;  %v3019_v0 = vrot.slane %v3018_v36, 2  ;;  %v2989_v38 = vmul.f32 %v5777_v1, %v5777_v1  ;;  %v3025_v41 = vadd.f32 %v3024_v4, %v2987_v47 }
 0x330   : > { %v5771_v6 = vpop.f32.mrf.mxu2  ;;  %v5773_v43 = vpop.f32.mrf.mxu3  ;;  %6192 = vst [vmem:[#allocation30_spill] sm:$0xff] %v5793_v52  ;;  %v2939_v29 = vadd.f32 %v2938_v56, %v5785_v19 }
 0x331   : > { %v2933_v26 = vrot.slane %v2932_v20, 1  ;;  %v3020_v8 = vadd.f32 %v3019_v0, %v3018_v36  ;;  %v2991_v36 = vmul.f32 %v5785_v19, %v5785_v19  ;;  %v3026_v9 = vadd.f32 %v3025_v41, %v2989_v38 }
 0x332   : > { %v3070_v38 = vmul.f32 %v5813_v21, %v5765_v28  ;;  %v2714_v19 = vadd.f32 %v5743_v5, %v5661_v25 }
 0x333   : > { %v2934_v31 = vadd.f32 %v2933_v26, %v2932_v20  ;;  %v3021_v30 = vrot.slane %v3020_v8, 1  ;;  %v2993_v26 = vmul.f32 %v5793_v52, %v5793_v52  ;;  %v3027_v47 = vadd.f32 %v3026_v9, %v2991_v36  ;;  %v2767_v56 = vpop.f32.mrf.mxu1 }
 0x334   : > { %v3071_v36 = vmul.f32 %v5813_v21, %v3070_v38 }
 0x335   : > { %v5796_v50 = vmul.f32 %v2934_v31, %v6180_v15  ;;  %v3022_v32 = vadd.f32 %v3021_v30, %v3020_v8  ;;  %v2940_v30 = vadd.f32 %v2939_v29, %v5793_v52  ;;  %v3028_v44 = vadd.f32 %v3027_v47, %v2993_v26  ;;  %v2718_v62 = vpop.f32.mrf.mxu0 }
 0x337   : > { %v3050_v20 = vmul.f32 %v3022_v32, %v6180_v15  ;;  %v3054_v13 = vmul.f32 %v5796_v50, %v5796_v50  ;;  %v2941_v32 = vadd.f32 %v2940_v30, %v5803_v34  ;;  %v3029_v14 = vadd.f32 %v3028_v44, %v2995_v61 }
 0x338   : > { %v2811_v0 = vpop.f32.mrf.mxu2  ;;  %v5808_v57 = vpop.f32.mrf.mxu3  ;;  %v2709_v34 = vadd.f32 %v5679_v27, %v5661_v25 }
 0x339   : > { %v3058_v8 = vsub.f32 %v3050_v20, %v3054_v13  ;;  %v2942_v20 = vrot.slane %v2941_v32, 4  ;;  %v3030_v13 = vrot.slane %v3029_v14, 4 }
 0x33b   : > { %v3062_v31 = vmax.f32 %v3058_v8, 0.0  ;;  %v3072_v8 = vmul.f32 0.5, %v3071_v36  ;;  %v2943_v29 = vadd.f32 %v2942_v20, %v2941_v32  ;;  %v3031_v47 = vadd.f32 %v3030_v13, %v3029_v14 }
 0x33c   : > { %v2758_v20 = vadd.f32 %v5702_v63, %v2709_v34  ;;  %v2719_v63 = vadd.f32 %v2718_v62, %v5661_v25 }
 0x33d   : > { %v3066_v4 = vadd.f32 1e-05, %v3062_v31  ;;  %v2711_v31 = vadd.f32 %v5713_v60, %v5661_v25  ;;  %v2720_v52 = vpop.f32.mrf.mxu0  ;;  %v3073_v38 = vsub.f32 1.5, %v3072_v8  ;;  %v2944_v36 = vrot.slane %v2943_v29, 2 }
 0x33e   : > { %v3032_v23 = vrot.slane %v3031_v47, 2  ;;  %v2716_v60 = vadd.f32 %v2715_v59, %v5661_v25  ;;  %v2763_v8 = vadd.f32 %v5763_v35, %v2714_v19  ;;  %v2807_v59 = vadd.f32 %v5739_v39, %v2758_v20  ;;  %v5845_v35 = vld [vmem:[#allocation11] sm:$0x3] }
 0x33f   : > { %4190 = vrsqrt.f32 %v3066_v4  ;;  %v2760_v32 = vadd.f32 %v5730_v49, %v2711_v31  ;;  %v3074_v27 = vmul.f32 %v5813_v21, %v3073_v38  ;;  %vm3085_vm0 = vweird.f32 %v3066_v4 }
 0x340   : > { %v2813_v41 = vpop.f32.mrf.mxu2  ;;  %v5822_v22 = vpop.f32.mrf.mxu3  ;;  %v2945_v49 = vadd.f32 %v2944_v36, %v2943_v29  ;;  %v2812_v34 = vadd.f32 %v2811_v0, %v2763_v8  ;;  %v2721_v28 = vadd.f32 %v2720_v52, %v5661_v25  ;;  %v2856_v0 = vadd.f32 %v5741_v46, %v2807_v59 }
 0x341   : > { %v2809_v13 = vadd.f32 %v5771_v6, %v2760_v32  ;;  %v3078_v29 = vsel %vm3077_vm3, %v5813_v21, %v3074_v27  ;;  %v2768_v36 = vadd.f32 %v2767_v56, %v2719_v63  ;;  %v6196_v27 = vld [vmem:[#allocation32_spill] sm:$0xff]  ;;  %v6198_v63 = vld [vmem:[#allocation37_spill] sm:$0xff] }
 0x342   : > { %v2861_v32 = vadd.f32 %v5808_v57, %v2812_v34  ;;  %v5863_v46 = vadd.f32 %v2856_v0, %v6196_v27 }
 0x345   : > { %v4191_v9 = vpop.eup %4190 }
 0x346   : > { %v3080_v26 = vmul.f32 %v4191_v9, %v3066_v4  ;;  %vm3086_vm14 = vweird.f32 %v4191_v9  ;;  %v2858_v4 = vadd.f32 %v5773_v43, %v2809_v13 }
 0x347   : > { %vm3087_vm2 = vmor %vm3085_vm0, %vm3086_vm14 }
 0x348   : > { %v3081_v30 = vmul.f32 %v4191_v9, %v3080_v26  ;;  %v2816_v61 = vpop.f32.mrf.mxu2  ;;  %v5827_v44 = vpop.f32.mrf.mxu3 }
 0x349   : > { %v2769_v26 = vpop.f32.mrf.mxu1  ;;  %v2817_v20 = vadd.f32 %v2816_v61, %v2768_v36  ;;  %v5876_v61 = vld [vmem:[%s6082_s9] sm:$0x3] }
 0x34a   : > { %v3082_v1 = vmul.f32 0.5, %v3081_v30  ;;  %v2765_v30 = vadd.f32 %v2764_v45, %v2716_v60  ;;  %v2946_v45 = vrot.slane %v2945_v49, 1  ;;  %v2770_v52 = vadd.f32 %v2769_v26, %v2721_v28 }
 0x34b   : > { %v2866_v34 = vadd.f32 %v5827_v44, %v2817_v20 }
 0x34c   : > { %v3083_v14 = vsub.f32 1.5, %v3082_v1  ;;  %v3033_v1 = vadd.f32 %v3032_v23, %v3031_v47  ;;  %v2723_v23 = vpop.f32.mrf.mxu0  ;;  %v2814_v39 = vadd.f32 %v2813_v41, %v2765_v30  ;;  %v2947_v13 = vadd.f32 %v2946_v45, %v2945_v49 }
 0x34d   : > { %v2724_v8 = vadd.f32 %v2723_v23, %v5661_v25 }
 0x34e   : > { %v3084_v5 = vmul.f32 %v4191_v9, %v3083_v14  ;;  %v3034_v47 = vrot.slane %v3033_v1, 1  ;;  %v6195_v14 = vld [vmem:[#allocation33_spill] sm:$0xff]  ;;  %v2863_v41 = vadd.f32 %v5822_v22, %v2814_v39 }
 0x34f   : > { %v5855_v43 = vadd.f32 %v2858_v4, %v6195_v14 }
 0x350   : > { %v3088_v31 = vsel %vm3087_vm2, %v4191_v9, %v3084_v5  ;;  %v2818_v6 = vpop.f32.mrf.mxu2  ;;  %v2867_v9 = vpop.f32.mrf.mxu3  ;;  %v3035_v56 = vadd.f32 %v3034_v47, %v3033_v1  ;;  %v6197_v5 = vld [vmem:[#allocation36_spill] sm:$0xff] }
 0x351   : > { %v3113_v19 = vrot.slane %v3088_v31, 7  ;;  %v5869_v59 = vadd.f32 %v2861_v32, %v6197_v5  ;;  %v2772_v26 = vpop.f32.mrf.mxu1  ;;  %v2819_v31 = vadd.f32 %v2818_v6, %v2770_v52  ;;  %v2984_v22 = vmul.f32 %v5855_v43, %v5855_v43  ;;  %v6199_v52 = vld [vmem:[#allocation40_spill] sm:$0xff] }
 0x352   : > { %v5885_v6 = vmul.f32 %v2947_v13, %v6180_v15  ;;  %v2948_v4 = vadd.f32 %v5855_v43, %v5863_v46  ;;  %v2773_v28 = vadd.f32 %v2772_v26, %v2724_v8 }
 0x353   : > { %v3115_v62 = vsel %vm800_vm7, %v3078_v29, %v3113_v19  ;;  %v2982_v19 = vmul.f32 %v5863_v46, %v5863_v46  ;;  %v5892_v29 = vmul.f32 %v3035_v56, %v6180_v15  ;;  %v2986_v39 = vmul.f32 %v5869_v59, %v5869_v59  ;;  %v6200_v56 = vld [vmem:[#allocation41_spill] sm:$0xff] }
 0x354   : > { %v3119_v38 = vmul.f32 %v3115_v62, %v5845_v35  ;;  %v2725_v23 = vpop.f32.mrf.mxu0  ;;  %v2868_v44 = vadd.f32 %v2867_v9, %v2819_v31  ;;  %v2949_v47 = vadd.f32 %v2948_v4, %v5869_v59 }
 0x355   : > { %v3036_v0 = vadd.f32 %v2984_v22, %v2982_v19  ;;  %v2726_v14 = vadd.f32 %v2725_v23, %v5661_v25 }
 0x356   : > { %v5857_v60 = vperm.slane %v3119_v38, 0  ;;  %v5859_v21 = vperm.slane %v3119_v38, 1 }
 0x357   : > { %v3037_v8 = vadd.f32 %v3036_v0, %v2986_v39  ;;  %v6201_v39 = vld [vmem:[#allocation44_spill] sm:$0xff] }
 0x358   : > { %v3132_v57 = vmul.f32 %v5859_v21, %v5796_v50  ;;  %v2821_v30 = vpop.f32.mrf.mxu2  ;;  %v3131_v49 = vmul.f32 %v5857_v60, %v5719_v11  ;;  %v5881_v50 = vadd.f32 %v2863_v41, %v6198_v63  ;;  %v2870_v45 = vpop.f32.mrf.mxu3  ;;  %v3147_v36 = vmul.f32 %v5857_v60, %v5610_v48 }
 0x359   : > { %v2822_v38 = vadd.f32 %v2821_v30, %v2773_v28  ;;  %v5905_v41 = vadd.f32 %v2866_v34, %v6199_v52  ;;  %v3148_v9 = vmul.f32 %v5859_v21, %v5682_v3  ;;  %v3149_v20 = vmul.f32 %v5857_v60, %v5604_v17  ;;  %v2774_v22 = vpop.f32.mrf.mxu1 }
 0x35a   : > { %v3139_v1 = vrot.slane %v3132_v57, 7  ;;  %v2988_v32 = vmul.f32 %v5881_v50, %v5881_v50  ;;  %v3150_v48 = vmul.f32 %v5859_v21, %v5677_v18  ;;  %v3151_v25 = vmul.f32 %v5857_v60, %v5614_v33 }
 0x35b   : > { %v5920_v57 = vadd.f32 %v2868_v44, %v6200_v56  ;;  %v2871_v26 = vadd.f32 %v2870_v45, %v2822_v38  ;;  %v3152_v31 = vmul.f32 %v5859_v21, %v5685_v10  ;;  %v2950_v30 = vadd.f32 %v2949_v47, %v5881_v50 }
 0x35c   : > { %v3141_v11 = vsel %vm800_vm7, %v3131_v49, %v3139_v1  ;;  %v2990_v33 = vmul.f32 %v5905_v41, %v5905_v41  ;;  %v3153_v1 = vmul.f32 %v5857_v60, %v5620_v40  ;;  %v3038_v10 = vadd.f32 %v3037_v8, %v2988_v32  ;;  %v6202_v8 = vld [vmem:[#allocation45_spill] sm:$0xff] }
 0x35d   : > { %v3145_v62 = vsub.f32 %v5876_v61, %v3141_v11  ;;  %v2775_v34 = vadd.f32 %v2774_v22, %v2726_v14  ;;  %v3154_v19 = vmul.f32 %v5859_v21, %v5690_v37  ;;  %v2951_v40 = vadd.f32 %v2950_v30, %v5905_v41 }
 0x35e   : > { %v2992_v28 = vmul.f32 %v5920_v57, %v5920_v57  ;;  %v3155_v23 = vmul.f32 %v5857_v60, %v5627_v7  ;;  %v5950_v44 = vadd.f32 %v2871_v26, %v6201_v39  ;;  %v3156_v37 = vmul.f32 %v5859_v21, %v5700_v53 }
 0x35f   : > { %v5911_v13 = vperm.slane %v3145_v62, 0  ;;  %v5913_v27 = vperm.slane %v3145_v62, 1  ;;  %v3039_v0 = vadd.f32 %v3038_v10, %v2990_v33  ;;  %v2952_v47 = vadd.f32 %v2951_v40, %v5920_v57 }
 0x360   : > { %v2823_v49 = vpop.f32.mrf.mxu2  ;;  %v2872_v38 = vpop.f32.mrf.mxu3  ;;  %v3157_v7 = vmul.f32 %v5857_v60, %v5636_v2  ;;  %v2994_v32 = vmul.f32 %v5950_v44, %v5950_v44  ;;  %v3055_v53 = vmul.f32 %v5885_v6, %v5885_v6  ;;  %v3158_v52 = vmul.f32 %v5859_v21, %v5708_v58 }
 0x361   : > { %v3189_v3 = vadd.f32 %v5911_v13, %v3147_v36  ;;  %v3190_v5 = vadd.f32 %v5913_v27, %v3148_v9  ;;  %v3191_v17 = vadd.f32 %v5911_v13, %v3149_v20  ;;  %v3192_v18 = vadd.f32 %v5913_v27, %v3150_v48 }
 0x362   : > { %v3193_v63 = vadd.f32 %v5911_v13, %v3151_v25  ;;  %v3194_v4 = vadd.f32 %v5913_v27, %v3152_v31  ;;  %v3195_v11 = vadd.f32 %v5911_v13, %v3153_v1  ;;  %v2824_v45 = vadd.f32 %v2823_v49, %v2775_v34 }
 0x363   : > { %3221 = vst [vmem:[%s5935_s28] sm:$0xff] %v3189_v3  ;;  %v3196_v62 = vadd.f32 %v5913_v27, %v3154_v19  ;;  %v3197_v36 = vadd.f32 %v5911_v13, %v3155_v23  ;;  %v3159_v9 = vmul.f32 %v5857_v60, %v5643_v16  ;;  %v3198_v2 = vadd.f32 %v5913_v27, %v3156_v37 }
 0x364   : > { %3222 = vst [vmem:[%s5935_s28 + $0x8] sm:$0xff] %v3190_v5  ;;  %v2873_v14 = vadd.f32 %v2872_v38, %v2824_v45  ;;  %v3199_v20 = vadd.f32 %v5911_v13, %v3157_v7  ;;  %v3040_v48 = vadd.f32 %v3039_v0, %v2992_v28  ;;  %v2953_v25 = vadd.f32 %v2952_v47, %v5950_v44 }
 0x365   : > { %3223 = vst [vmem:[%s5935_s28 + $0x10] sm:$0xff] %v3191_v17  ;;  %v3160_v58 = vmul.f32 %v5859_v21, %v5716_v42  ;;  %v3161_v16 = vmul.f32 %v5857_v60, %v5650_v12  ;;  %v3200_v3 = vadd.f32 %v5913_v27, %v3158_v52  ;;  %v3201_v5 = vadd.f32 %v5911_v13, %v3159_v9 }
 0x366   : > { %3224 = vst [vmem:[%s5935_s28 + $0x18] sm:$0xff] %v3192_v18  ;;  %v5975_v56 = vadd.f32 %v2873_v14, %v6202_v8  ;;  %v3041_v17 = vadd.f32 %v3040_v48, %v2994_v32  ;;  %v3162_v42 = vmul.f32 %v5859_v21, %v5734_v54  ;;  %v3059_v60 = vsub.f32 %v5892_v29, %v3055_v53 }
 0x367   : > { %3225 = vst [vmem:[%s5935_s28 + $0x20] sm:$0xff] %v3193_v63  ;;  %v3202_v12 = vadd.f32 %v5913_v27, %v3160_v58  ;;  %v3203_v18 = vadd.f32 %v5911_v13, %v3161_v16 }
 0x368   : > { %3226 = vst [vmem:[%s5935_s28 + $0x28] sm:$0xff] %v3194_v4  ;;  %v2954_v26 = vadd.f32 %v2953_v25, %v5975_v56  ;;  %v2996_v31 = vmul.f32 %v5975_v56, %v5975_v56  ;;  %v3204_v33 = vadd.f32 %v5913_v27, %v3162_v42  ;;  %v3063_v63 = vmax.f32 %v3059_v60, 0.0 }
 0x369   : > { %3227 = vst [vmem:[%s5935_s28 + $0x30] sm:$0xff] %v3195_v11 }
 0x36a   : > { %3228 = vst [vmem:[%s5935_s28 + $0x38] sm:$0xff] %v3196_v62  ;;  %v2955_v30 = vrot.slane %v2954_v26, 4  ;;  %v3042_v22 = vadd.f32 %v3041_v17, %v2996_v31  ;;  %v3067_v29 = vadd.f32 1e-05, %v3063_v63 }
 0x36b   : > { %3229 = vst [vmem:[%s5935_s28 + $0x40] sm:$0xff] %v3197_v36 }
 0x36c   : > { %3230 = vst [vmem:[%s5935_s28 + $0x48] sm:$0xff] %v3198_v2  ;;  %v2956_v49 = vadd.f32 %v2955_v30, %v2954_v26  ;;  %v3043_v1 = vrot.slane %v3042_v22, 4  ;;  %4192 = vrsqrt.f32 %v3067_v29  ;;  %vm3095_vm9 = vweird.f32 %v3067_v29 }
 0x36d   : > { %3231 = vst [vmem:[%s5935_s28 + $0x50] sm:$0xff] %v3199_v20 }
 0x36e   : > { %3232 = vst [vmem:[%s5935_s28 + $0x58] sm:$0xff] %v3200_v3  ;;  %v2957_v54 = vrot.slane %v2956_v49, 2  ;;  %v3044_v21 = vadd.f32 %v3043_v1, %v3042_v22  ;;  %v6203_v1 = vld [vmem:[#allocation27_spill] sm:$0xff] }
 0x36f   : > { %3233 = vst [vmem:[%s5935_s28 + $0x60] sm:$0xff] %v3201_v5 }
 0x370   : > { %3234 = vst [vmem:[%s5935_s28 + $0x68] sm:$0xff] %v3202_v12  ;;  %v2958_v10 = vadd.f32 %v2957_v54, %v2956_v49  ;;  %v3045_v34 = vrot.slane %v3044_v21, 2 }
 0x371   : > { %3235 = vst [vmem:[%s5935_s28 + $0x70] sm:$0xff] %v3203_v18 }
 0x372   : > { %3236 = vst [vmem:[%s5935_s28 + $0x78] sm:$0xff] %v3204_v33  ;;  %v2959_v19 = vrot.slane %v2958_v10, 1  ;;  %v3046_v13 = vadd.f32 %v3045_v34, %v3044_v21  ;;  %v4193_v45 = vpop.eup %4192  ;;  %v6205_v34 = vld [vmem:[#allocation29_spill] sm:$0xff] }
 0x373   : > { %v3090_v0 = vmul.f32 %v4193_v45, %v3067_v29  ;;  %vm3096_vm5 = vweird.f32 %v4193_v45 }
 0x374   : > { %v2960_v4 = vadd.f32 %v2959_v19, %v2958_v10  ;;  %v3047_v40 = vrot.slane %v3046_v13, 1  ;;  %vm3097_vm10 = vmor %vm3095_vm9, %vm3096_vm5 }
 0x375   : > { %v3091_v47 = vmul.f32 %v4193_v45, %v3090_v0 }
 0x376   : > { %v2964_v27 = vmul.f32 %v2960_v4, %v6180_v15  ;;  %v3048_v28 = vadd.f32 %v3047_v40, %v3046_v13  ;;  %v6206_v4 = vld [vmem:[#allocation30_spill] sm:$0xff] }
 0x377   : > { %v3092_v7 = vmul.f32 0.5, %v3091_v47 }
 0x378   : > { %v3052_v23 = vmul.f32 %v3048_v28, %v6180_v15  ;;  %v3056_v11 = vmul.f32 %v2964_v27, %v2964_v27 }
 0x379   : > { %v3093_v14 = vsub.f32 1.5, %v3092_v7 }
 0x37a   : > { %v3060_v39 = vsub.f32 %v3052_v23, %v3056_v11  ;;  %v6207_v23 = vld [vmem:[#allocation24_spill] sm:$0xff] }
 0x37b   : > { %v3094_v9 = vmul.f32 %v4193_v45, %v3093_v14 }
 0x37c   : > { %v3064_v37 = vmax.f32 %v3060_v39, 0.0 }
 0x37d   : > { %v3098_v48 = vsel %vm3097_vm10, %v4193_v45, %v3094_v9 }
 0x37e   : > { %v3068_v62 = vadd.f32 1e-05, %v3064_v37 }
 0x380   : > { %4194 = vrsqrt.f32 %v3068_v62  ;;  %vm3105_vm6 = vweird.f32 %v3068_v62 }
 0x386   : > { %v4195_v38 = vpop.eup %4194 }
 0x387   : > { %v3100_v36 = vmul.f32 %v4195_v38, %v3068_v62  ;;  %vm3106_vm4 = vweird.f32 %v4195_v38 }
 0x388   : > { %vm3107_vm8 = vmor %vm3105_vm6, %vm3106_vm4 }
 0x389   : > { %v3101_v32 = vmul.f32 %v4195_v38, %v3100_v36 }
 0x38b   : > { %v3102_v53 = vmul.f32 0.5, %v3101_v32 }
 0x38d   : > { %v3103_v52 = vsub.f32 1.5, %v3102_v53 }
 0x38f   : > { %v3104_v2 = vmul.f32 %v4195_v38, %v3103_v52 }
 0x391   : > { %v3108_v15 = vsel %vm3107_vm8, %v4195_v38, %v3104_v2 }
 0x392   : > { %v3114_v20 = vrot.slane %v3108_v15, 7 }
 0x394   : > { %v3116_v25 = vsel %vm800_vm7, %v3098_v48, %v3114_v20 }
 0x395   : > { %v3120_v8 = vmul.f32 %v3116_v25, %v5845_v35 }
 0x397   : > { %v3125_v58 = vperm.slane %v3120_v8, 0  ;;  %v3126_v16 = vperm.slane %v3120_v8, 1 }
 0x399   : > { %v3134_v3 = vmul.f32 %v3126_v16, %v2964_v27  ;;  %v3133_v5 = vmul.f32 %v3125_v58, %v5885_v6  ;;  %v3163_v42 = vmul.f32 %v3125_v58, %v5751_v51  ;;  %v3164_v12 = vmul.f32 %v3126_v16, %v5863_v46 }
 0x39a   : > { %v3165_v60 = vmul.f32 %v3125_v58, %v5747_v24  ;;  %v3166_v30 = vmul.f32 %v3126_v16, %v5855_v43  ;;  %v3167_v6 = vmul.f32 %v3125_v58, %v5755_v55  ;;  %v3169_v46 = vmul.f32 %v3125_v58, %v6203_v1  ;;  %v6204_v43 = vld [vmem:[#allocation28_spill] sm:$0xff] }
 0x39b   : > { %v3140_v17 = vrot.slane %v3134_v3, 7  ;;  %v3170_v24 = vmul.f32 %v3126_v16, %v5881_v50  ;;  %v3171_v55 = vmul.f32 %v3125_v58, %v6204_v43  ;;  %v3172_v10 = vmul.f32 %v3126_v16, %v5905_v41 }
 0x39c   : > { %v3173_v29 = vmul.f32 %v3125_v58, %v6205_v34  ;;  %v3174_v50 = vmul.f32 %v3126_v16, %v5920_v57  ;;  %v3175_v40 = vmul.f32 %v3125_v58, %v6206_v4  ;;  %v3176_v41 = vmul.f32 %v3126_v16, %v5950_v44 }
 0x39d   : > { %v3142_v26 = vsel %vm800_vm7, %v3133_v5, %v3140_v17  ;;  %v3177_v57 = vmul.f32 %v3125_v58, %v6207_v23  ;;  %v3178_v39 = vmul.f32 %v3126_v16, %v5975_v56 }
 0x39e   : > { %v3146_v31 = vsub.f32 %v5876_v61, %v3142_v26  ;;  %v3168_v61 = vmul.f32 %v3126_v16, %v5869_v59 }
 0x3a0   : > { %v3183_v18 = vperm.slane %v3146_v31, 0  ;;  %v3184_v35 = vperm.slane %v3146_v31, 1 }
 0x3a2   : > { %v3205_v22 = vadd.f32 %v3183_v18, %v3163_v42  ;;  %v3206_v33 = vadd.f32 %v3184_v35, %v3164_v12  ;;  %v3207_v49 = vadd.f32 %v3183_v18, %v3165_v60  ;;  %v3208_v51 = vadd.f32 %v3184_v35, %v3166_v30 }
 0x3a3   : > { %v3209_v63 = vadd.f32 %v3183_v18, %v3167_v6  ;;  %v3210_v54 = vadd.f32 %v3184_v35, %v3168_v61  ;;  %v3211_v21 = vadd.f32 %v3183_v18, %v3169_v46  ;;  %v3212_v59 = vadd.f32 %v3184_v35, %v3170_v24 }
 0x3a4   : > { %3237 = vst [vmem:[%s5935_s28 + $0x80] sm:$0xff] %v3205_v22  ;;  %v3213_v19 = vadd.f32 %v3183_v18, %v3171_v55  ;;  %v3214_v13 = vadd.f32 %v3184_v35, %v3172_v10  ;;  %v3215_v27 = vadd.f32 %v3183_v18, %v3173_v29  ;;  %v3216_v28 = vadd.f32 %v3184_v35, %v3174_v50 }
 0x3a5   : > { %3238 = vst [vmem:[%s5935_s28 + $0x88] sm:$0xff] %v3206_v33  ;;  %v3217_v11 = vadd.f32 %v3183_v18, %v3175_v40  ;;  %v3218_v45 = vadd.f32 %v3184_v35, %v3176_v41  ;;  %v3219_v37 = vadd.f32 %v3183_v18, %v3177_v57  ;;  %v3220_v44 = vadd.f32 %v3184_v35, %v3178_v39 }
 0x3a6   : > { %3239 = vst [vmem:[%s5935_s28 + $0x90] sm:$0xff] %v3207_v49 }
 0x3a7   : > { %3240 = vst [vmem:[%s5935_s28 + $0x98] sm:$0xff] %v3208_v51 }
 0x3a8   : > { %3241 = vst [vmem:[%s5935_s28 + $0xa0] sm:$0xff] %v3209_v63 }
 0x3a9   : > { %3242 = vst [vmem:[%s5935_s28 + $0xa8] sm:$0xff] %v3210_v54 }
 0x3aa   : > { %3243 = vst [vmem:[%s5935_s28 + $0xb0] sm:$0xff] %v3211_v21 }
 0x3ab   : > { %3244 = vst [vmem:[%s5935_s28 + $0xb8] sm:$0xff] %v3212_v59 }
 0x3ac   : > { %3245 = vst [vmem:[%s5935_s28 + $0xc0] sm:$0xff] %v3213_v19 }
 0x3ad   : > { %3246 = vst [vmem:[%s5935_s28 + $0xc8] sm:$0xff] %v3214_v13 }
 0x3ae   : > { %3247 = vst [vmem:[%s5935_s28 + $0xd0] sm:$0xff] %v3215_v27 }
 0x3af   : > { %3248 = vst [vmem:[%s5935_s28 + $0xd8] sm:$0xff] %v3216_v28 }
 0x3b0   : > { %3249 = vst [vmem:[%s5935_s28 + $0xe0] sm:$0xff] %v3217_v11 }
 0x3b1   : > { %3250 = vst [vmem:[%s5935_s28 + $0xe8] sm:$0xff] %v3218_v45 }
 0x3b2   : > { %3251 = vst [vmem:[%s5935_s28 + $0xf0] sm:$0xff] %v3219_v37 }
 0x3b3   : > { %3252 = vst [vmem:[%s5935_s28 + $0xf8] sm:$0xff] %v3220_v44 }
 0x3b4   : > { %4403 = shalt.err (!%p4400_p10)
}
 0x3b5   : > { %s4469_s12 = smov 256   ;;  %s4470_s29 = smov 16  }
 0x3b6   : > { %4099 = dma.vmem_to_hbm [thread:$0]  (%p4612_p0), %s3268_s15, 4096, %s3270_s20, %s3254_s0, %s4469_s12, %s4469_s12, %s4470_s29  }
 0x3b7 PF: > { %p4134_p11 = scmp.ge.s32.totalorder %s4458_s16, 2  ;;  %s3284_s25 = sand.u32 1, %s4446_s13  }
 0x3b8   : > { %s3285_s30 = scalar_lea.sflag [#allocation4], %s3284_s25 }
 0x3b9   : > { %p4122_p12 = pnand %p4134_p11, %p4561_p6 }
 0x3bb   : > { %p4123_p13 = pneg %p4122_p12 }
 0x3bd   : > { %4441 = dma.done.wait (%p4123_p13), %s3285_s30, 4096  }
 0x3be   : > { %4443 = vsyncadd (%p4123_p13), %s3285_s30, 4294963200  ;;  %s6209_s16 = sld [smem:[#allocation22_spill]]  ;;  %s6212_s13 = smov %s4450_s14 }
 0x3bf   : > { %s6210_s4 = sld [smem:[#allocation20_spill]] }
 0x3c0   : > { %s6211_s15 = sld [smem:[#allocation23_spill]] }
 0x3c4   : > { %p28_p3 = scmp.ge.s32.totalorder %s6209_s16, 6  }
 0x3c5   : > { %s6213_s14 = smov %s6210_s4 }
 0x3c6   :  { %30 = sbr.rel (!%p28_p3) target bundleno = 15 (0xf), region = 134 }
 0x3cb   :  { %3291 = vsyncpa [#allocation3], 1 }
 0x3cc   :  { %3293 = vsyncpa [#allocation3 + $0x1], 1 }
 0x3cd   :  { %3294 = vsyncpa [#allocation6], 1 }
 0x3ce   :  { %3296 = vsyncpa [#allocation6 + $0x1], 1 }
 0x3cf   :  { %3297 = vsyncpa [#allocation9], 1 }
 0x3d0   :  { %3298 = vsyncpa [#allocation12], 1 }
 0x3d1   :  { %3299 = vsyncpa [#allocation4], 1 }
 0x3d2   :  { %3301 = vsyncpa [#allocation4 + $0x1], 1 }

</bundles_post_ra>
